<compile_context>
chip_gen: v6e
topology: v6e:2x2x1
jax: 0.10.0
libtpu: 0.0.40
codegen_flags: <defaults>
</compile_context>

<pallas_src>
import math
import functools

import jax
import jax.numpy as jnp
from jax.experimental import pallas as pl
from jax.experimental.pallas import tpu as pltpu

LN_EPS = 1e-5  # nn.LayerNorm / nn.Transformer default layer_norm_eps


# ----------------------------- in-kernel building blocks -----------------------------
# These operate on traced values / refs INSIDE the single fused kernel body.

def _linear(x, w_ref, b_ref):
    """y = x @ W + b.  W is pre-transposed to (in, out) and possibly bf16; the MXU
    accumulates in f32.  Bias is stored as (1, out) and broadcast over rows."""
    w = w_ref[...]
    y = jnp.dot(x.astype(w.dtype), w, preferred_element_type=jnp.float32)
    return y + b_ref[...]


def _layernorm(x, g_ref, b_ref):
    mean = jnp.mean(x, axis=-1, keepdims=True)
    c = x - mean
    var = jnp.mean(c * c, axis=-1, keepdims=True)
    return c * jax.lax.rsqrt(var + LN_EPS) * g_ref[...] + b_ref[...]


def _attention_core(q, k, v, nhead):
    """softmax(Q K^T / sqrt(Dh)) V for all heads, unrolled in one kernel body
    (no per-head grid / no per-head DMAs).  q: (Sq, D), k/v: (Sk, D), f32."""
    D = q.shape[-1]
    dh = D // nhead
    scale = 1.0 / math.sqrt(dh)
    outs = []
    for h in range(nhead):
        qh = q[:, h * dh:(h + 1) * dh]
        kh = k[:, h * dh:(h + 1) * dh]
        vh = v[:, h * dh:(h + 1) * dh]
        s = jax.lax.dot_general(qh, kh, (((1,), (1,)), ((), ())),
                                preferred_element_type=jnp.float32) * scale
        s = s - jnp.max(s, axis=-1, keepdims=True)         # stable softmax (f32)
        p = jnp.exp(s)
        p = p / jnp.sum(p, axis=-1, keepdims=True)
        outs.append(jnp.dot(p, vh, preferred_element_type=jnp.float32))
    return jnp.concatenate(outs, axis=-1)                   # (Sq, D), head-major cols


def _self_attention(x, p, nhead):
    D = x.shape[-1]
    qkv = _linear(x, p["qkv_w"], p["qkv_b"])                # fused QKV: one (D,3D) matmul
    q, k, v = qkv[:, :D], qkv[:, D:2 * D], qkv[:, 2 * D:]
    o = _attention_core(q, k, v, nhead)
    return _linear(o, p["out_w"], p["out_b"])


def _cross_attention(x, mem, p, nhead):
    D = x.shape[-1]
    q = _linear(x, p["q_w"], p["q_b"])
    kv = _linear(mem, p["kv_w"], p["kv_b"])                 # fused K,V: one (D,2D) matmul
    k, v = kv[:, :D], kv[:, D:]
    o = _attention_core(q, k, v, nhead)
    return _linear(o, p["out_w"], p["out_b"])


def _ffn(x, p):
    # linear1 -> ReLU -> linear2; the (S, dim_ff) intermediate never leaves VMEM.
    h = jnp.maximum(_linear(x, p["lin1_w"], p["lin1_b"]), 0.0)
    return _linear(h, p["lin2_w"], p["lin2_b"])


def _encoder_layer(x, p, nhead):
    # nn.TransformerEncoderLayer, post-norm (norm_first=False), dropout = identity (eval)
    x = _layernorm(x + _self_attention(x, p["self_attn"], nhead),
                   p["ln1"]["g"], p["ln1"]["b"])
    x = _layernorm(x + _ffn(x, p), p["ln2"]["g"], p["ln2"]["b"])
    return x


def _decoder_layer(x, mem, p, nhead):
    x = _layernorm(x + _self_attention(x, p["self_attn"], nhead),
                   p["ln1"]["g"], p["ln1"]["b"])
    x = _layernorm(x + _cross_attention(x, mem, p["cross_attn"], nhead),
                   p["ln2"]["g"], p["ln2"]["b"])
    x = _layernorm(x + _ffn(x, p), p["ln3"]["g"], p["ln3"]["b"])
    return x


# ----------------------------- the single fused kernel -----------------------------

def _make_fused_kernel(treedef, nhead):
    def kernel(x_ref, *refs):
        o_ref = refs[-1]
        p = jax.tree_util.tree_unflatten(treedef, refs[:-1])   # tree of param refs

        # self.layers: Linear -> ReLU -> LayerNorm
        h = jnp.maximum(_linear(x_ref[...], p["in_w"], p["in_b"]), 0.0)
        h = _layernorm(h, p["in_ln"]["g"], p["in_ln"]["b"])

        # self.transformer(src=h, tgt=h): default nn.Transformer (post-norm, no masks,
        # final encoder/decoder LayerNorms).
        # TODO(synk): nn.Dropout(0.1) layers are identity in inference mode; training-mode
        # stochastic dropout is not implemented.
        mem = h
        for lp in p["enc_layers"]:
            mem = _encoder_layer(mem, lp, nhead)
        mem = _layernorm(mem, p["enc_norm"]["g"], p["enc_norm"]["b"])

        out = h
        for lp in p["dec_layers"]:
            out = _decoder_layer(out, mem, lp, nhead)
        out = _layernorm(out, p["dec_norm"]["g"], p["dec_norm"]["b"])

        # self.out_layers: LayerNorm -> Dropout(identity) -> Linear
        out = _layernorm(out, p["out_ln"]["g"], p["out_ln"]["b"])
        o_ref[...] = _linear(out, p["out_w"], p["out_b"])

    return kernel


def simple_transformer_forward(x, prepared, nhead):
    """Whole-model forward as one pallas_call.  `prepared` is the pytree produced by
    prepare_params(); every leaf is passed as its own (whole-array, VMEM) operand."""
    leaves, treedef = jax.tree_util.tree_flatten(prepared)
    S = x.shape[0]
    out_dim = prepared["out_w"].shape[1]
    kernel = _make_fused_kernel(treedef, nhead)
    vmem = pl.BlockSpec(memory_space=pltpu.MemorySpace.VMEM)
    return pl.pallas_call(
        kernel,
        out_shape=jax.ShapeDtypeStruct((S, out_dim), jnp.float32),
        in_specs=[vmem] * (1 + len(leaves)),
        out_specs=vmem,
    )(x, *leaves)


# ----------------------------- one-time parameter preparation -----------------------------

def prepare_params(params, matmul_dtype=jnp.bfloat16):
    """Call ONCE outside jax.jit.  Repacks PyTorch-convention params for the fused kernel:
      * (out, in) weights transposed to (in, out)  -> no per-forward w.T transposes,
      * QKV packed into one (D, 3D) matmul / cross-attn K,V into one (D, 2D) matmul,
      * biases / LN params reshaped to (1, N) for in-kernel broadcasting,
      * matmul weights cast to `matmul_dtype` (bf16 halves weight DMA bytes; MXU still
        accumulates in f32; LayerNorm / softmax / bias math stays f32)."""
    f32 = jnp.float32

    def mw(w):
        return jnp.asarray(w, f32).T.astype(matmul_dtype)

    def vec(v):
        return jnp.asarray(v, f32).reshape(1, -1)

    def ln(lnp):
        return {"g": vec(lnp["g"]), "b": vec(lnp["b"])}

    def self_attn(ap):
        return {"qkv_w": mw(ap["in_proj_w"]), "qkv_b": vec(ap["in_proj_b"]),
                "out_w": mw(ap["out_proj_w"]), "out_b": vec(ap["out_proj_b"])}

    d = params["in_w"].shape[0]  # hidden_size

    def cross_attn(ap):
        return {"q_w": mw(ap["in_proj_w"][:d]), "q_b": vec(ap["in_proj_b"][:d]),
                "kv_w": mw(ap["in_proj_w"][d:]), "kv_b": vec(ap["in_proj_b"][d:]),
                "out_w": mw(ap["out_proj_w"]), "out_b": vec(ap["out_proj_b"])}

    def ffn(lp):
        return {"lin1_w": mw(lp["linear1_w"]), "lin1_b": vec(lp["linear1_b"]),
                "lin2_w": mw(lp["linear2_w"]), "lin2_b": vec(lp["linear2_b"])}

    def enc_layer(lp):
        out = {"self_attn": self_attn(lp["self_attn"]),
               "ln1": ln(lp["norm1"]), "ln2": ln(lp["norm2"])}
        out.update(ffn(lp))
        return out

    def dec_layer(lp):
        out = {"self_attn": self_attn(lp["self_attn"]),
               "cross_attn": cross_attn(lp["cross_attn"]),
               "ln1": ln(lp["norm1"]), "ln2": ln(lp["norm2"]), "ln3": ln(lp["norm3"])}
        out.update(ffn(lp))
        return out

    return {
        "in_w": mw(params["in_w"]), "in_b": vec(params["in_b"]),
        "in_ln": ln(params["in_ln"]),
        "enc_layers": [enc_layer(lp) for lp in params["enc_layers"]],
        "enc_norm": ln(params["enc_norm"]),
        "dec_layers": [dec_layer(lp) for lp in params["dec_layers"]],
        "dec_norm": ln(params["dec_norm"]),
        "out_ln": ln(params["out_ln"]),
        "out_w": mw(params["out_w"]), "out_b": vec(params["out_b"]),
    }


# ----------------------------- parameter init (PyTorch-convention shapes) -----------------------------

def init_params(key, input_size, hidden_size, num_layers, dim_ff):
    keys = iter(jax.random.split(key, 256))

    def w(shape, scale=0.05):
        return jax.random.normal(next(keys), shape, jnp.float32) * scale

    def ln(d):
        return {"g": jnp.ones((d,), jnp.float32), "b": jnp.zeros((d,), jnp.float32)}

    def attn(d):
        return {
            "in_proj_w": w((3 * d, d)),
            "in_proj_b": w((3 * d,)),
            "out_proj_w": w((d, d)),
            "out_proj_b": w((d,)),
        }

    def enc_layer(d):
        return {
            "self_attn": attn(d),
            "linear1_w": w((dim_ff, d)), "linear1_b": w((dim_ff,)),
            "linear2_w": w((d, dim_ff)), "linear2_b": w((d,)),
            "norm1": ln(d), "norm2": ln(d),
        }

    def dec_layer(d):
        return {
            "self_attn": attn(d),
            "cross_attn": attn(d),
            "linear1_w": w((dim_ff, d)), "linear1_b": w((dim_ff,)),
            "linear2_w": w((d, dim_ff)), "linear2_b": w((d,)),
            "norm1": ln(d), "norm2": ln(d), "norm3": ln(d),
        }

    return {
        "in_w": w((hidden_size, input_size)), "in_b": w((hidden_size,)),
        "in_ln": ln(hidden_size),
        "enc_layers": [enc_layer(hidden_size) for _ in range(num_layers)],
        "enc_norm": ln(hidden_size),
        "dec_layers": [dec_layer(hidden_size) for _ in range(num_layers)],
        "dec_norm": ln(hidden_size),
        "out_ln": ln(hidden_size),
        "out_w": w((input_size, hidden_size)), "out_b": w((input_size,)),
    }


# ----------------------------- main -----------------------------

if __name__ == "__main__":
    INPUT_SIZE = 16
    HIDDEN_SIZE = 32
    NUM_LAYERS = 2
    NHEAD = 4            # nn.Transformer(nhead=4)
    DIM_FF = 2048        # nn.Transformer default dim_feedforward
    SEQ = 8

    key = jax.random.PRNGKey(0)
    pkey, xkey = jax.random.split(key)
    params = init_params(pkey, INPUT_SIZE, HIDDEN_SIZE, NUM_LAYERS, DIM_FF)
    x = jax.random.normal(xkey, (SEQ, INPUT_SIZE), jnp.float32)

    # One-time repacking (transpose / QKV fuse / bf16 cast) OUTSIDE jit.
    prepared = prepare_params(params, matmul_dtype=jnp.bfloat16)

    fwd = jax.jit(functools.partial(simple_transformer_forward, nhead=NHEAD))
    y = fwd(x, prepared)
    jax.block_until_ready(y)
    assert y.shape == (SEQ, INPUT_SIZE) and y.dtype == jnp.float32
    assert bool(jnp.all(jnp.isfinite(y)))
    print("KERNEL_OK")
</pallas_src>

<mosaic_0001>
module attributes {stable_mosaic.version = 11 : i64} {
  func.func @kernel(%arg0: memref<8x16xf32, #tpu.memory_space<vmem>>, %arg1: memref<1x64xf32, #tpu.memory_space<vmem>>, %arg2: memref<32x64xbf16, #tpu.memory_space<vmem>>, %arg3: memref<1x32xf32, #tpu.memory_space<vmem>>, %arg4: memref<32x32xbf16, #tpu.memory_space<vmem>>, %arg5: memref<1x32xf32, #tpu.memory_space<vmem>>, %arg6: memref<32x32xbf16, #tpu.memory_space<vmem>>, %arg7: memref<1x2048xf32, #tpu.memory_space<vmem>>, %arg8: memref<32x2048xbf16, #tpu.memory_space<vmem>>, %arg9: memref<1x32xf32, #tpu.memory_space<vmem>>, %arg10: memref<2048x32xbf16, #tpu.memory_space<vmem>>, %arg11: memref<1x32xf32, #tpu.memory_space<vmem>>, %arg12: memref<1x32xf32, #tpu.memory_space<vmem>>, %arg13: memref<1x32xf32, #tpu.memory_space<vmem>>, %arg14: memref<1x32xf32, #tpu.memory_space<vmem>>, %arg15: memref<1x32xf32, #tpu.memory_space<vmem>>, %arg16: memref<1x32xf32, #tpu.memory_space<vmem>>, %arg17: memref<1x32xf32, #tpu.memory_space<vmem>>, %arg18: memref<32x32xbf16, #tpu.memory_space<vmem>>, %arg19: memref<1x96xf32, #tpu.memory_space<vmem>>, %arg20: memref<32x96xbf16, #tpu.memory_space<vmem>>, %arg21: memref<1x64xf32, #tpu.memory_space<vmem>>, %arg22: memref<32x64xbf16, #tpu.memory_space<vmem>>, %arg23: memref<1x32xf32, #tpu.memory_space<vmem>>, %arg24: memref<32x32xbf16, #tpu.memory_space<vmem>>, %arg25: memref<1x32xf32, #tpu.memory_space<vmem>>, %arg26: memref<32x32xbf16, #tpu.memory_space<vmem>>, %arg27: memref<1x2048xf32, #tpu.memory_space<vmem>>, %arg28: memref<32x2048xbf16, #tpu.memory_space<vmem>>, %arg29: memref<1x32xf32, #tpu.memory_space<vmem>>, %arg30: memref<2048x32xbf16, #tpu.memory_space<vmem>>, %arg31: memref<1x32xf32, #tpu.memory_space<vmem>>, %arg32: memref<1x32xf32, #tpu.memory_space<vmem>>, %arg33: memref<1x32xf32, #tpu.memory_space<vmem>>, %arg34: memref<1x32xf32, #tpu.memory_space<vmem>>, %arg35: memref<1x32xf32, #tpu.memory_space<vmem>>, %arg36: memref<1x32xf32, #tpu.memory_space<vmem>>, %arg37: memref<1x32xf32, #tpu.memory_space<vmem>>, %arg38: memref<32x32xbf16, #tpu.memory_space<vmem>>, %arg39: memref<1x96xf32, #tpu.memory_space<vmem>>, %arg40: memref<32x96xbf16, #tpu.memory_space<vmem>>, %arg41: memref<1x32xf32, #tpu.memory_space<vmem>>, %arg42: memref<1x32xf32, #tpu.memory_space<vmem>>, %arg43: memref<1x2048xf32, #tpu.memory_space<vmem>>, %arg44: memref<32x2048xbf16, #tpu.memory_space<vmem>>, %arg45: memref<1x32xf32, #tpu.memory_space<vmem>>, %arg46: memref<2048x32xbf16, #tpu.memory_space<vmem>>, %arg47: memref<1x32xf32, #tpu.memory_space<vmem>>, %arg48: memref<1x32xf32, #tpu.memory_space<vmem>>, %arg49: memref<1x32xf32, #tpu.memory_space<vmem>>, %arg50: memref<1x32xf32, #tpu.memory_space<vmem>>, %arg51: memref<1x32xf32, #tpu.memory_space<vmem>>, %arg52: memref<32x32xbf16, #tpu.memory_space<vmem>>, %arg53: memref<1x96xf32, #tpu.memory_space<vmem>>, %arg54: memref<32x96xbf16, #tpu.memory_space<vmem>>, %arg55: memref<1x2048xf32, #tpu.memory_space<vmem>>, %arg56: memref<32x2048xbf16, #tpu.memory_space<vmem>>, %arg57: memref<1x32xf32, #tpu.memory_space<vmem>>, %arg58: memref<2048x32xbf16, #tpu.memory_space<vmem>>, %arg59: memref<1x32xf32, #tpu.memory_space<vmem>>, %arg60: memref<1x32xf32, #tpu.memory_space<vmem>>, %arg61: memref<1x32xf32, #tpu.memory_space<vmem>>, %arg62: memref<1x32xf32, #tpu.memory_space<vmem>>, %arg63: memref<1x32xf32, #tpu.memory_space<vmem>>, %arg64: memref<32x32xbf16, #tpu.memory_space<vmem>>, %arg65: memref<1x96xf32, #tpu.memory_space<vmem>>, %arg66: memref<32x96xbf16, #tpu.memory_space<vmem>>, %arg67: memref<1x32xf32, #tpu.memory_space<vmem>>, %arg68: memref<1x32xf32, #tpu.memory_space<vmem>>, %arg69: memref<1x32xf32, #tpu.memory_space<vmem>>, %arg70: memref<1x32xf32, #tpu.memory_space<vmem>>, %arg71: memref<1x32xf32, #tpu.memory_space<vmem>>, %arg72: memref<16x32xbf16, #tpu.memory_space<vmem>>, %arg73: memref<1x16xf32, #tpu.memory_space<vmem>>, %arg74: memref<1x32xf32, #tpu.memory_space<vmem>>, %arg75: memref<1x32xf32, #tpu.memory_space<vmem>>, %arg76: memref<32x16xbf16, #tpu.memory_space<vmem>>, %arg77: memref<8x16xf32, #tpu.memory_space<vmem>>) attributes {dimension_semantics = [], scalar_prefetch = 0 : i64, scratch_operands = 0 : i64, tpu.core_type = #tpu.core_type<tc>} {
    %c0 = arith.constant 0 : index
    %c0_0 = arith.constant 0 : index
    %0 = vector.load %arg0[%c0, %c0_0] : memref<8x16xf32, #tpu.memory_space<vmem>>, vector<8x16xf32>
    %c0_1 = arith.constant 0 : index
    %c0_2 = arith.constant 0 : index
    %1 = vector.load %arg72[%c0_1, %c0_2] : memref<16x32xbf16, #tpu.memory_space<vmem>>, vector<16x32xbf16>
    %2 = arith.truncf %0 : vector<8x16xf32> to vector<8x16xbf16>
    %cst = arith.constant dense<0.000000e+00> : vector<8x32xf32>
    %3 = tpu.matmul %2, %1, %cst {dimension_numbers = #tpu.dot_dimension_numbers<[1], [0], [0], [1], [0, 0, 1, 1], [], []>} : vector<8x16xbf16>, vector<16x32xbf16>, vector<8x32xf32> -> vector<8x32xf32>
    %c0_3 = arith.constant 0 : index
    %c0_4 = arith.constant 0 : index
    %4 = vector.load %arg69[%c0_3, %c0_4] : memref<1x32xf32, #tpu.memory_space<vmem>>, vector<1x32xf32>
    %5 = vector.broadcast %4 : vector<1x32xf32> to vector<8x32xf32>
    %6 = arith.addf %3, %5 : vector<8x32xf32>
    %cst_5 = arith.constant 0.000000e+00 : f32
    %7 = vector.broadcast %cst_5 : f32 to vector<8x32xf32>
    %8 = arith.maximumf %6, %7 : vector<8x32xf32>
    %cst_6 = arith.constant dense<0.000000e+00> : vector<8xf32>
    %9 = vector.multi_reduction <add>, %8, %cst_6 [1] : vector<8x32xf32> to vector<8xf32>
    %10 = vector.shape_cast %9 : vector<8xf32> to vector<8x1xf32>
    %cst_7 = arith.constant 3.200000e+01 : f32
    %11 = vector.broadcast %cst_7 : f32 to vector<8x1xf32>
    %12 = arith.divf %10, %11 : vector<8x1xf32>
    %13 = vector.broadcast %12 : vector<8x1xf32> to vector<8x32xf32>
    %14 = arith.subf %8, %13 : vector<8x32xf32>
    %15 = arith.mulf %14, %14 : vector<8x32xf32>
    %cst_8 = arith.constant dense<0.000000e+00> : vector<8xf32>
    %16 = vector.multi_reduction <add>, %15, %cst_8 [1] : vector<8x32xf32> to vector<8xf32>
    %17 = vector.shape_cast %16 : vector<8xf32> to vector<8x1xf32>
    %cst_9 = arith.constant 3.200000e+01 : f32
    %18 = vector.broadcast %cst_9 : f32 to vector<8x1xf32>
    %19 = arith.divf %17, %18 : vector<8x1xf32>
    %cst_10 = arith.constant 9.99999974E-6 : f32
    %20 = vector.broadcast %cst_10 : f32 to vector<8x1xf32>
    %21 = arith.addf %19, %20 : vector<8x1xf32>
    %22 = math.rsqrt %21 : vector<8x1xf32>
    %23 = vector.broadcast %22 : vector<8x1xf32> to vector<8x32xf32>
    %24 = arith.mulf %14, %23 : vector<8x32xf32>
    %c0_11 = arith.constant 0 : index
    %c0_12 = arith.constant 0 : index
    %25 = vector.load %arg71[%c0_11, %c0_12] : memref<1x32xf32, #tpu.memory_space<vmem>>, vector<1x32xf32>
    %26 = vector.broadcast %25 : vector<1x32xf32> to vector<8x32xf32>
    %27 = arith.mulf %24, %26 : vector<8x32xf32>
    %c0_13 = arith.constant 0 : index
    %c0_14 = arith.constant 0 : index
    %28 = vector.load %arg70[%c0_13, %c0_14] : memref<1x32xf32, #tpu.memory_space<vmem>>, vector<1x32xf32>
    %29 = vector.broadcast %28 : vector<1x32xf32> to vector<8x32xf32>
    %30 = arith.addf %27, %29 : vector<8x32xf32>
    %c0_15 = arith.constant 0 : index
    %c0_16 = arith.constant 0 : index
    %31 = vector.load %arg54[%c0_15, %c0_16] : memref<32x96xbf16, #tpu.memory_space<vmem>>, vector<32x96xbf16>
    %32 = arith.truncf %30 : vector<8x32xf32> to vector<8x32xbf16>
    %cst_17 = arith.constant dense<0.000000e+00> : vector<8x96xf32>
    %33 = tpu.matmul %32, %31, %cst_17 {dimension_numbers = #tpu.dot_dimension_numbers<[1], [0], [0], [1], [0, 0, 1, 1], [], []>} : vector<8x32xbf16>, vector<32x96xbf16>, vector<8x96xf32> -> vector<8x96xf32>
    %c0_18 = arith.constant 0 : index
    %c0_19 = arith.constant 0 : index
    %34 = vector.load %arg53[%c0_18, %c0_19] : memref<1x96xf32, #tpu.memory_space<vmem>>, vector<1x96xf32>
    %35 = vector.broadcast %34 : vector<1x96xf32> to vector<8x96xf32>
    %36 = arith.addf %33, %35 : vector<8x96xf32>
    %37 = vector.extract_strided_slice %36 {offsets = [0, 0], sizes = [8, 32], strides = [1, 1]} : vector<8x96xf32> to vector<8x32xf32>
    %38 = vector.extract_strided_slice %36 {offsets = [0, 32], sizes = [8, 32], strides = [1, 1]} : vector<8x96xf32> to vector<8x32xf32>
    %39 = vector.extract_strided_slice %36 {offsets = [0, 64], sizes = [8, 32], strides = [1, 1]} : vector<8x96xf32> to vector<8x32xf32>
    %40 = vector.extract_strided_slice %37 {offsets = [0, 0], sizes = [8, 8], strides = [1, 1]} : vector<8x32xf32> to vector<8x8xf32>
    %41 = vector.extract_strided_slice %38 {offsets = [0, 0], sizes = [8, 8], strides = [1, 1]} : vector<8x32xf32> to vector<8x8xf32>
    %42 = vector.extract_strided_slice %39 {offsets = [0, 0], sizes = [8, 8], strides = [1, 1]} : vector<8x32xf32> to vector<8x8xf32>
    %cst_20 = arith.constant dense<0.000000e+00> : vector<8x8xf32>
    %43 = tpu.matmul %40, %41, %cst_20 {dimension_numbers = #tpu.dot_dimension_numbers<[1], [1], [0], [0], [0, 0, 1, 0], [], []>} : vector<8x8xf32>, vector<8x8xf32>, vector<8x8xf32> -> vector<8x8xf32>
    %cst_21 = arith.constant 0.353553385 : f32
    %44 = vector.broadcast %cst_21 : f32 to vector<8x8xf32>
    %45 = arith.mulf %43, %44 : vector<8x8xf32>
    %cst_22 = arith.constant dense<0xFF800000> : vector<8xf32>
    %46 = vector.multi_reduction <maximumf>, %45, %cst_22 [1] : vector<8x8xf32> to vector<8xf32>
    %47 = vector.shape_cast %46 : vector<8xf32> to vector<8x1xf32>
    %48 = vector.broadcast %47 : vector<8x1xf32> to vector<8x8xf32>
    %49 = arith.subf %45, %48 : vector<8x8xf32>
    %50 = math.exp %49 : vector<8x8xf32>
    %cst_23 = arith.constant dense<0.000000e+00> : vector<8xf32>
    %51 = vector.multi_reduction <add>, %50, %cst_23 [1] : vector<8x8xf32> to vector<8xf32>
    %52 = vector.shape_cast %51 : vector<8xf32> to vector<8x1xf32>
    %53 = vector.broadcast %52 : vector<8x1xf32> to vector<8x8xf32>
    %54 = arith.divf %50, %53 : vector<8x8xf32>
    %cst_24 = arith.constant dense<0.000000e+00> : vector<8x8xf32>
    %55 = tpu.matmul %54, %42, %cst_24 {dimension_numbers = #tpu.dot_dimension_numbers<[1], [0], [0], [1], [0, 0, 1, 1], [], []>} : vector<8x8xf32>, vector<8x8xf32>, vector<8x8xf32> -> vector<8x8xf32>
    %56 = vector.extract_strided_slice %37 {offsets = [0, 8], sizes = [8, 8], strides = [1, 1]} : vector<8x32xf32> to vector<8x8xf32>
    %57 = vector.extract_strided_slice %38 {offsets = [0, 8], sizes = [8, 8], strides = [1, 1]} : vector<8x32xf32> to vector<8x8xf32>
    %58 = vector.extract_strided_slice %39 {offsets = [0, 8], sizes = [8, 8], strides = [1, 1]} : vector<8x32xf32> to vector<8x8xf32>
    %cst_25 = arith.constant dense<0.000000e+00> : vector<8x8xf32>
    %59 = tpu.matmul %56, %57, %cst_25 {dimension_numbers = #tpu.dot_dimension_numbers<[1], [1], [0], [0], [0, 0, 1, 0], [], []>} : vector<8x8xf32>, vector<8x8xf32>, vector<8x8xf32> -> vector<8x8xf32>
    %cst_26 = arith.constant 0.353553385 : f32
    %60 = vector.broadcast %cst_26 : f32 to vector<8x8xf32>
    %61 = arith.mulf %59, %60 : vector<8x8xf32>
    %cst_27 = arith.constant dense<0xFF800000> : vector<8xf32>
    %62 = vector.multi_reduction <maximumf>, %61, %cst_27 [1] : vector<8x8xf32> to vector<8xf32>
    %63 = vector.shape_cast %62 : vector<8xf32> to vector<8x1xf32>
    %64 = vector.broadcast %63 : vector<8x1xf32> to vector<8x8xf32>
    %65 = arith.subf %61, %64 : vector<8x8xf32>
    %66 = math.exp %65 : vector<8x8xf32>
    %cst_28 = arith.constant dense<0.000000e+00> : vector<8xf32>
    %67 = vector.multi_reduction <add>, %66, %cst_28 [1] : vector<8x8xf32> to vector<8xf32>
    %68 = vector.shape_cast %67 : vector<8xf32> to vector<8x1xf32>
    %69 = vector.broadcast %68 : vector<8x1xf32> to vector<8x8xf32>
    %70 = arith.divf %66, %69 : vector<8x8xf32>
    %cst_29 = arith.constant dense<0.000000e+00> : vector<8x8xf32>
    %71 = tpu.matmul %70, %58, %cst_29 {dimension_numbers = #tpu.dot_dimension_numbers<[1], [0], [0], [1], [0, 0, 1, 1], [], []>} : vector<8x8xf32>, vector<8x8xf32>, vector<8x8xf32> -> vector<8x8xf32>
    %72 = vector.extract_strided_slice %37 {offsets = [0, 16], sizes = [8, 8], strides = [1, 1]} : vector<8x32xf32> to vector<8x8xf32>
    %73 = vector.extract_strided_slice %38 {offsets = [0, 16], sizes = [8, 8], strides = [1, 1]} : vector<8x32xf32> to vector<8x8xf32>
    %74 = vector.extract_strided_slice %39 {offsets = [0, 16], sizes = [8, 8], strides = [1, 1]} : vector<8x32xf32> to vector<8x8xf32>
    %cst_30 = arith.constant dense<0.000000e+00> : vector<8x8xf32>
    %75 = tpu.matmul %72, %73, %cst_30 {dimension_numbers = #tpu.dot_dimension_numbers<[1], [1], [0], [0], [0, 0, 1, 0], [], []>} : vector<8x8xf32>, vector<8x8xf32>, vector<8x8xf32> -> vector<8x8xf32>
    %cst_31 = arith.constant 0.353553385 : f32
    %76 = vector.broadcast %cst_31 : f32 to vector<8x8xf32>
    %77 = arith.mulf %75, %76 : vector<8x8xf32>
    %cst_32 = arith.constant dense<0xFF800000> : vector<8xf32>
    %78 = vector.multi_reduction <maximumf>, %77, %cst_32 [1] : vector<8x8xf32> to vector<8xf32>
    %79 = vector.shape_cast %78 : vector<8xf32> to vector<8x1xf32>
    %80 = vector.broadcast %79 : vector<8x1xf32> to vector<8x8xf32>
    %81 = arith.subf %77, %80 : vector<8x8xf32>
    %82 = math.exp %81 : vector<8x8xf32>
    %cst_33 = arith.constant dense<0.000000e+00> : vector<8xf32>
    %83 = vector.multi_reduction <add>, %82, %cst_33 [1] : vector<8x8xf32> to vector<8xf32>
    %84 = vector.shape_cast %83 : vector<8xf32> to vector<8x1xf32>
    %85 = vector.broadcast %84 : vector<8x1xf32> to vector<8x8xf32>
    %86 = arith.divf %82, %85 : vector<8x8xf32>
    %cst_34 = arith.constant dense<0.000000e+00> : vector<8x8xf32>
    %87 = tpu.matmul %86, %74, %cst_34 {dimension_numbers = #tpu.dot_dimension_numbers<[1], [0], [0], [1], [0, 0, 1, 1], [], []>} : vector<8x8xf32>, vector<8x8xf32>, vector<8x8xf32> -> vector<8x8xf32>
    %88 = vector.extract_strided_slice %37 {offsets = [0, 24], sizes = [8, 8], strides = [1, 1]} : vector<8x32xf32> to vector<8x8xf32>
    %89 = vector.extract_strided_slice %38 {offsets = [0, 24], sizes = [8, 8], strides = [1, 1]} : vector<8x32xf32> to vector<8x8xf32>
    %90 = vector.extract_strided_slice %39 {offsets = [0, 24], sizes = [8, 8], strides = [1, 1]} : vector<8x32xf32> to vector<8x8xf32>
    %cst_35 = arith.constant dense<0.000000e+00> : vector<8x8xf32>
    %91 = tpu.matmul %88, %89, %cst_35 {dimension_numbers = #tpu.dot_dimension_numbers<[1], [1], [0], [0], [0, 0, 1, 0], [], []>} : vector<8x8xf32>, vector<8x8xf32>, vector<8x8xf32> -> vector<8x8xf32>
    %cst_36 = arith.constant 0.353553385 : f32
    %92 = vector.broadcast %cst_36 : f32 to vector<8x8xf32>
    %93 = arith.mulf %91, %92 : vector<8x8xf32>
    %cst_37 = arith.constant dense<0xFF800000> : vector<8xf32>
    %94 = vector.multi_reduction <maximumf>, %93, %cst_37 [1] : vector<8x8xf32> to vector<8xf32>
    %95 = vector.shape_cast %94 : vector<8xf32> to vector<8x1xf32>
    %96 = vector.broadcast %95 : vector<8x1xf32> to vector<8x8xf32>
    %97 = arith.subf %93, %96 : vector<8x8xf32>
    %98 = math.exp %97 : vector<8x8xf32>
    %cst_38 = arith.constant dense<0.000000e+00> : vector<8xf32>
    %99 = vector.multi_reduction <add>, %98, %cst_38 [1] : vector<8x8xf32> to vector<8xf32>
    %100 = vector.shape_cast %99 : vector<8xf32> to vector<8x1xf32>
    %101 = vector.broadcast %100 : vector<8x1xf32> to vector<8x8xf32>
    %102 = arith.divf %98, %101 : vector<8x8xf32>
    %cst_39 = arith.constant dense<0.000000e+00> : vector<8x8xf32>
    %103 = tpu.matmul %102, %90, %cst_39 {dimension_numbers = #tpu.dot_dimension_numbers<[1], [0], [0], [1], [0, 0, 1, 1], [], []>} : vector<8x8xf32>, vector<8x8xf32>, vector<8x8xf32> -> vector<8x8xf32>
    %104 = tpu.concatenate %55, %71, %87, %103 in 1 : vector<8x8xf32>, vector<8x8xf32>, vector<8x8xf32>, vector<8x8xf32> -> vector<8x32xf32>
    %c0_40 = arith.constant 0 : index
    %c0_41 = arith.constant 0 : index
    %105 = vector.load %arg52[%c0_40, %c0_41] : memref<32x32xbf16, #tpu.memory_space<vmem>>, vector<32x32xbf16>
    %106 = arith.truncf %104 : vector<8x32xf32> to vector<8x32xbf16>
    %cst_42 = arith.constant dense<0.000000e+00> : vector<8x32xf32>
    %107 = tpu.matmul %106, %105, %cst_42 {dimension_numbers = #tpu.dot_dimension_numbers<[1], [0], [0], [1], [0, 0, 1, 1], [], []>} : vector<8x32xbf16>, vector<32x32xbf16>, vector<8x32xf32> -> vector<8x32xf32>
    %c0_43 = arith.constant 0 : index
    %c0_44 = arith.constant 0 : index
    %108 = vector.load %arg51[%c0_43, %c0_44] : memref<1x32xf32, #tpu.memory_space<vmem>>, vector<1x32xf32>
    %109 = vector.broadcast %108 : vector<1x32xf32> to vector<8x32xf32>
    %110 = arith.addf %107, %109 : vector<8x32xf32>
    %111 = arith.addf %30, %110 : vector<8x32xf32>
    %cst_45 = arith.constant dense<0.000000e+00> : vector<8xf32>
    %112 = vector.multi_reduction <add>, %111, %cst_45 [1] : vector<8x32xf32> to vector<8xf32>
    %113 = vector.shape_cast %112 : vector<8xf32> to vector<8x1xf32>
    %cst_46 = arith.constant 3.200000e+01 : f32
    %114 = vector.broadcast %cst_46 : f32 to vector<8x1xf32>
    %115 = arith.divf %113, %114 : vector<8x1xf32>
    %116 = vector.broadcast %115 : vector<8x1xf32> to vector<8x32xf32>
    %117 = arith.subf %111, %116 : vector<8x32xf32>
    %118 = arith.mulf %117, %117 : vector<8x32xf32>
    %cst_47 = arith.constant dense<0.000000e+00> : vector<8xf32>
    %119 = vector.multi_reduction <add>, %118, %cst_47 [1] : vector<8x32xf32> to vector<8xf32>
    %120 = vector.shape_cast %119 : vector<8xf32> to vector<8x1xf32>
    %cst_48 = arith.constant 3.200000e+01 : f32
    %121 = vector.broadcast %cst_48 : f32 to vector<8x1xf32>
    %122 = arith.divf %120, %121 : vector<8x1xf32>
    %cst_49 = arith.constant 9.99999974E-6 : f32
    %123 = vector.broadcast %cst_49 : f32 to vector<8x1xf32>
    %124 = arith.addf %122, %123 : vector<8x1xf32>
    %125 = math.rsqrt %124 : vector<8x1xf32>
    %126 = vector.broadcast %125 : vector<8x1xf32> to vector<8x32xf32>
    %127 = arith.mulf %117, %126 : vector<8x32xf32>
    %c0_50 = arith.constant 0 : index
    %c0_51 = arith.constant 0 : index
    %128 = vector.load %arg48[%c0_50, %c0_51] : memref<1x32xf32, #tpu.memory_space<vmem>>, vector<1x32xf32>
    %129 = vector.broadcast %128 : vector<1x32xf32> to vector<8x32xf32>
    %130 = arith.mulf %127, %129 : vector<8x32xf32>
    %c0_52 = arith.constant 0 : index
    %c0_53 = arith.constant 0 : index
    %131 = vector.load %arg47[%c0_52, %c0_53] : memref<1x32xf32, #tpu.memory_space<vmem>>, vector<1x32xf32>
    %132 = vector.broadcast %131 : vector<1x32xf32> to vector<8x32xf32>
    %133 = arith.addf %130, %132 : vector<8x32xf32>
    %c0_54 = arith.constant 0 : index
    %c0_55 = arith.constant 0 : index
    %134 = vector.load %arg44[%c0_54, %c0_55] : memref<32x2048xbf16, #tpu.memory_space<vmem>>, vector<32x2048xbf16>
    %135 = arith.truncf %133 : vector<8x32xf32> to vector<8x32xbf16>
    %cst_56 = arith.constant dense<0.000000e+00> : vector<8x2048xf32>
    %136 = tpu.matmul %135, %134, %cst_56 {dimension_numbers = #tpu.dot_dimension_numbers<[1], [0], [0], [1], [0, 0, 1, 1], [], []>} : vector<8x32xbf16>, vector<32x2048xbf16>, vector<8x2048xf32> -> vector<8x2048xf32>
    %c0_57 = arith.constant 0 : index
    %c0_58 = arith.constant 0 : index
    %137 = vector.load %arg43[%c0_57, %c0_58] : memref<1x2048xf32, #tpu.memory_space<vmem>>, vector<1x2048xf32>
    %138 = vector.broadcast %137 : vector<1x2048xf32> to vector<8x2048xf32>
    %139 = arith.addf %136, %138 : vector<8x2048xf32>
    %cst_59 = arith.constant 0.000000e+00 : f32
    %140 = vector.broadcast %cst_59 : f32 to vector<8x2048xf32>
    %141 = arith.maximumf %139, %140 : vector<8x2048xf32>
    %c0_60 = arith.constant 0 : index
    %c0_61 = arith.constant 0 : index
    %142 = vector.load %arg46[%c0_60, %c0_61] : memref<2048x32xbf16, #tpu.memory_space<vmem>>, vector<2048x32xbf16>
    %143 = arith.truncf %141 : vector<8x2048xf32> to vector<8x2048xbf16>
    %cst_62 = arith.constant dense<0.000000e+00> : vector<8x32xf32>
    %144 = tpu.matmul %143, %142, %cst_62 {dimension_numbers = #tpu.dot_dimension_numbers<[1], [0], [0], [1], [0, 0, 1, 1], [], []>} : vector<8x2048xbf16>, vector<2048x32xbf16>, vector<8x32xf32> -> vector<8x32xf32>
    %c0_63 = arith.constant 0 : index
    %c0_64 = arith.constant 0 : index
    %145 = vector.load %arg45[%c0_63, %c0_64] : memref<1x32xf32, #tpu.memory_space<vmem>>, vector<1x32xf32>
    %146 = vector.broadcast %145 : vector<1x32xf32> to vector<8x32xf32>
    %147 = arith.addf %144, %146 : vector<8x32xf32>
    %148 = arith.addf %133, %147 : vector<8x32xf32>
    %cst_65 = arith.constant dense<0.000000e+00> : vector<8xf32>
    %149 = vector.multi_reduction <add>, %148, %cst_65 [1] : vector<8x32xf32> to vector<8xf32>
    %150 = vector.shape_cast %149 : vector<8xf32> to vector<8x1xf32>
    %cst_66 = arith.constant 3.200000e+01 : f32
    %151 = vector.broadcast %cst_66 : f32 to vector<8x1xf32>
    %152 = arith.divf %150, %151 : vector<8x1xf32>
    %153 = vector.broadcast %152 : vector<8x1xf32> to vector<8x32xf32>
    %154 = arith.subf %148, %153 : vector<8x32xf32>
    %155 = arith.mulf %154, %154 : vector<8x32xf32>
    %cst_67 = arith.constant dense<0.000000e+00> : vector<8xf32>
    %156 = vector.multi_reduction <add>, %155, %cst_67 [1] : vector<8x32xf32> to vector<8xf32>
    %157 = vector.shape_cast %156 : vector<8xf32> to vector<8x1xf32>
    %cst_68 = arith.constant 3.200000e+01 : f32
    %158 = vector.broadcast %cst_68 : f32 to vector<8x1xf32>
    %159 = arith.divf %157, %158 : vector<8x1xf32>
    %cst_69 = arith.constant 9.99999974E-6 : f32
    %160 = vector.broadcast %cst_69 : f32 to vector<8x1xf32>
    %161 = arith.addf %159, %160 : vector<8x1xf32>
    %162 = math.rsqrt %161 : vector<8x1xf32>
    %163 = vector.broadcast %162 : vector<8x1xf32> to vector<8x32xf32>
    %164 = arith.mulf %154, %163 : vector<8x32xf32>
    %c0_70 = arith.constant 0 : index
    %c0_71 = arith.constant 0 : index
    %165 = vector.load %arg50[%c0_70, %c0_71] : memref<1x32xf32, #tpu.memory_space<vmem>>, vector<1x32xf32>
    %166 = vector.broadcast %165 : vector<1x32xf32> to vector<8x32xf32>
    %167 = arith.mulf %164, %166 : vector<8x32xf32>
    %c0_72 = arith.constant 0 : index
    %c0_73 = arith.constant 0 : index
    %168 = vector.load %arg49[%c0_72, %c0_73] : memref<1x32xf32, #tpu.memory_space<vmem>>, vector<1x32xf32>
    %169 = vector.broadcast %168 : vector<1x32xf32> to vector<8x32xf32>
    %170 = arith.addf %167, %169 : vector<8x32xf32>
    %c0_74 = arith.constant 0 : index
    %c0_75 = arith.constant 0 : index
    %171 = vector.load %arg66[%c0_74, %c0_75] : memref<32x96xbf16, #tpu.memory_space<vmem>>, vector<32x96xbf16>
    %172 = arith.truncf %170 : vector<8x32xf32> to vector<8x32xbf16>
    %cst_76 = arith.constant dense<0.000000e+00> : vector<8x96xf32>
    %173 = tpu.matmul %172, %171, %cst_76 {dimension_numbers = #tpu.dot_dimension_numbers<[1], [0], [0], [1], [0, 0, 1, 1], [], []>} : vector<8x32xbf16>, vector<32x96xbf16>, vector<8x96xf32> -> vector<8x96xf32>
    %c0_77 = arith.constant 0 : index
    %c0_78 = arith.constant 0 : index
    %174 = vector.load %arg65[%c0_77, %c0_78] : memref<1x96xf32, #tpu.memory_space<vmem>>, vector<1x96xf32>
    %175 = vector.broadcast %174 : vector<1x96xf32> to vector<8x96xf32>
    %176 = arith.addf %173, %175 : vector<8x96xf32>
    %177 = vector.extract_strided_slice %176 {offsets = [0, 0], sizes = [8, 32], strides = [1, 1]} : vector<8x96xf32> to vector<8x32xf32>
    %178 = vector.extract_strided_slice %176 {offsets = [0, 32], sizes = [8, 32], strides = [1, 1]} : vector<8x96xf32> to vector<8x32xf32>
    %179 = vector.extract_strided_slice %176 {offsets = [0, 64], sizes = [8, 32], strides = [1, 1]} : vector<8x96xf32> to vector<8x32xf32>
    %180 = vector.extract_strided_slice %177 {offsets = [0, 0], sizes = [8, 8], strides = [1, 1]} : vector<8x32xf32> to vector<8x8xf32>
    %181 = vector.extract_strided_slice %178 {offsets = [0, 0], sizes = [8, 8], strides = [1, 1]} : vector<8x32xf32> to vector<8x8xf32>
    %182 = vector.extract_strided_slice %179 {offsets = [0, 0], sizes = [8, 8], strides = [1, 1]} : vector<8x32xf32> to vector<8x8xf32>
    %cst_79 = arith.constant dense<0.000000e+00> : vector<8x8xf32>
    %183 = tpu.matmul %180, %181, %cst_79 {dimension_numbers = #tpu.dot_dimension_numbers<[1], [1], [0], [0], [0, 0, 1, 0], [], []>} : vector<8x8xf32>, vector<8x8xf32>, vector<8x8xf32> -> vector<8x8xf32>
    %cst_80 = arith.constant 0.353553385 : f32
    %184 = vector.broadcast %cst_80 : f32 to vector<8x8xf32>
    %185 = arith.mulf %183, %184 : vector<8x8xf32>
    %cst_81 = arith.constant dense<0xFF800000> : vector<8xf32>
    %186 = vector.multi_reduction <maximumf>, %185, %cst_81 [1] : vector<8x8xf32> to vector<8xf32>
    %187 = vector.shape_cast %186 : vector<8xf32> to vector<8x1xf32>
    %188 = vector.broadcast %187 : vector<8x1xf32> to vector<8x8xf32>
    %189 = arith.subf %185, %188 : vector<8x8xf32>
    %190 = math.exp %189 : vector<8x8xf32>
    %cst_82 = arith.constant dense<0.000000e+00> : vector<8xf32>
    %191 = vector.multi_reduction <add>, %190, %cst_82 [1] : vector<8x8xf32> to vector<8xf32>
    %192 = vector.shape_cast %191 : vector<8xf32> to vector<8x1xf32>
    %193 = vector.broadcast %192 : vector<8x1xf32> to vector<8x8xf32>
    %194 = arith.divf %190, %193 : vector<8x8xf32>
    %cst_83 = arith.constant dense<0.000000e+00> : vector<8x8xf32>
    %195 = tpu.matmul %194, %182, %cst_83 {dimension_numbers = #tpu.dot_dimension_numbers<[1], [0], [0], [1], [0, 0, 1, 1], [], []>} : vector<8x8xf32>, vector<8x8xf32>, vector<8x8xf32> -> vector<8x8xf32>
    %196 = vector.extract_strided_slice %177 {offsets = [0, 8], sizes = [8, 8], strides = [1, 1]} : vector<8x32xf32> to vector<8x8xf32>
    %197 = vector.extract_strided_slice %178 {offsets = [0, 8], sizes = [8, 8], strides = [1, 1]} : vector<8x32xf32> to vector<8x8xf32>
    %198 = vector.extract_strided_slice %179 {offsets = [0, 8], sizes = [8, 8], strides = [1, 1]} : vector<8x32xf32> to vector<8x8xf32>
    %cst_84 = arith.constant dense<0.000000e+00> : vector<8x8xf32>
    %199 = tpu.matmul %196, %197, %cst_84 {dimension_numbers = #tpu.dot_dimension_numbers<[1], [1], [0], [0], [0, 0, 1, 0], [], []>} : vector<8x8xf32>, vector<8x8xf32>, vector<8x8xf32> -> vector<8x8xf32>
    %cst_85 = arith.constant 0.353553385 : f32
    %200 = vector.broadcast %cst_85 : f32 to vector<8x8xf32>
    %201 = arith.mulf %199, %200 : vector<8x8xf32>
    %cst_86 = arith.constant dense<0xFF800000> : vector<8xf32>
    %202 = vector.multi_reduction <maximumf>, %201, %cst_86 [1] : vector<8x8xf32> to vector<8xf32>
    %203 = vector.shape_cast %202 : vector<8xf32> to vector<8x1xf32>
    %204 = vector.broadcast %203 : vector<8x1xf32> to vector<8x8xf32>
    %205 = arith.subf %201, %204 : vector<8x8xf32>
    %206 = math.exp %205 : vector<8x8xf32>
    %cst_87 = arith.constant dense<0.000000e+00> : vector<8xf32>
    %207 = vector.multi_reduction <add>, %206, %cst_87 [1] : vector<8x8xf32> to vector<8xf32>
    %208 = vector.shape_cast %207 : vector<8xf32> to vector<8x1xf32>
    %209 = vector.broadcast %208 : vector<8x1xf32> to vector<8x8xf32>
    %210 = arith.divf %206, %209 : vector<8x8xf32>
    %cst_88 = arith.constant dense<0.000000e+00> : vector<8x8xf32>
    %211 = tpu.matmul %210, %198, %cst_88 {dimension_numbers = #tpu.dot_dimension_numbers<[1], [0], [0], [1], [0, 0, 1, 1], [], []>} : vector<8x8xf32>, vector<8x8xf32>, vector<8x8xf32> -> vector<8x8xf32>
    %212 = vector.extract_strided_slice %177 {offsets = [0, 16], sizes = [8, 8], strides = [1, 1]} : vector<8x32xf32> to vector<8x8xf32>
    %213 = vector.extract_strided_slice %178 {offsets = [0, 16], sizes = [8, 8], strides = [1, 1]} : vector<8x32xf32> to vector<8x8xf32>
    %214 = vector.extract_strided_slice %179 {offsets = [0, 16], sizes = [8, 8], strides = [1, 1]} : vector<8x32xf32> to vector<8x8xf32>
    %cst_89 = arith.constant dense<0.000000e+00> : vector<8x8xf32>
    %215 = tpu.matmul %212, %213, %cst_89 {dimension_numbers = #tpu.dot_dimension_numbers<[1], [1], [0], [0], [0, 0, 1, 0], [], []>} : vector<8x8xf32>, vector<8x8xf32>, vector<8x8xf32> -> vector<8x8xf32>
    %cst_90 = arith.constant 0.353553385 : f32
    %216 = vector.broadcast %cst_90 : f32 to vector<8x8xf32>
    %217 = arith.mulf %215, %216 : vector<8x8xf32>
    %cst_91 = arith.constant dense<0xFF800000> : vector<8xf32>
    %218 = vector.multi_reduction <maximumf>, %217, %cst_91 [1] : vector<8x8xf32> to vector<8xf32>
    %219 = vector.shape_cast %218 : vector<8xf32> to vector<8x1xf32>
    %220 = vector.broadcast %219 : vector<8x1xf32> to vector<8x8xf32>
    %221 = arith.subf %217, %220 : vector<8x8xf32>
    %222 = math.exp %221 : vector<8x8xf32>
    %cst_92 = arith.constant dense<0.000000e+00> : vector<8xf32>
    %223 = vector.multi_reduction <add>, %222, %cst_92 [1] : vector<8x8xf32> to vector<8xf32>
    %224 = vector.shape_cast %223 : vector<8xf32> to vector<8x1xf32>
    %225 = vector.broadcast %224 : vector<8x1xf32> to vector<8x8xf32>
    %226 = arith.divf %222, %225 : vector<8x8xf32>
    %cst_93 = arith.constant dense<0.000000e+00> : vector<8x8xf32>
    %227 = tpu.matmul %226, %214, %cst_93 {dimension_numbers = #tpu.dot_dimension_numbers<[1], [0], [0], [1], [0, 0, 1, 1], [], []>} : vector<8x8xf32>, vector<8x8xf32>, vector<8x8xf32> -> vector<8x8xf32>
    %228 = vector.extract_strided_slice %177 {offsets = [0, 24], sizes = [8, 8], strides = [1, 1]} : vector<8x32xf32> to vector<8x8xf32>
    %229 = vector.extract_strided_slice %178 {offsets = [0, 24], sizes = [8, 8], strides = [1, 1]} : vector<8x32xf32> to vector<8x8xf32>
    %230 = vector.extract_strided_slice %179 {offsets = [0, 24], sizes = [8, 8], strides = [1, 1]} : vector<8x32xf32> to vector<8x8xf32>
    %cst_94 = arith.constant dense<0.000000e+00> : vector<8x8xf32>
    %231 = tpu.matmul %228, %229, %cst_94 {dimension_numbers = #tpu.dot_dimension_numbers<[1], [1], [0], [0], [0, 0, 1, 0], [], []>} : vector<8x8xf32>, vector<8x8xf32>, vector<8x8xf32> -> vector<8x8xf32>
    %cst_95 = arith.constant 0.353553385 : f32
    %232 = vector.broadcast %cst_95 : f32 to vector<8x8xf32>
    %233 = arith.mulf %231, %232 : vector<8x8xf32>
    %cst_96 = arith.constant dense<0xFF800000> : vector<8xf32>
    %234 = vector.multi_reduction <maximumf>, %233, %cst_96 [1] : vector<8x8xf32> to vector<8xf32>
    %235 = vector.shape_cast %234 : vector<8xf32> to vector<8x1xf32>
    %236 = vector.broadcast %235 : vector<8x1xf32> to vector<8x8xf32>
    %237 = arith.subf %233, %236 : vector<8x8xf32>
    %238 = math.exp %237 : vector<8x8xf32>
    %cst_97 = arith.constant dense<0.000000e+00> : vector<8xf32>
    %239 = vector.multi_reduction <add>, %238, %cst_97 [1] : vector<8x8xf32> to vector<8xf32>
    %240 = vector.shape_cast %239 : vector<8xf32> to vector<8x1xf32>
    %241 = vector.broadcast %240 : vector<8x1xf32> to vector<8x8xf32>
    %242 = arith.divf %238, %241 : vector<8x8xf32>
    %cst_98 = arith.constant dense<0.000000e+00> : vector<8x8xf32>
    %243 = tpu.matmul %242, %230, %cst_98 {dimension_numbers = #tpu.dot_dimension_numbers<[1], [0], [0], [1], [0, 0, 1, 1], [], []>} : vector<8x8xf32>, vector<8x8xf32>, vector<8x8xf32> -> vector<8x8xf32>
    %244 = tpu.concatenate %195, %211, %227, %243 in 1 : vector<8x8xf32>, vector<8x8xf32>, vector<8x8xf32>, vector<8x8xf32> -> vector<8x32xf32>
    %c0_99 = arith.constant 0 : index
    %c0_100 = arith.constant 0 : index
    %245 = vector.load %arg64[%c0_99, %c0_100] : memref<32x32xbf16, #tpu.memory_space<vmem>>, vector<32x32xbf16>
    %246 = arith.truncf %244 : vector<8x32xf32> to vector<8x32xbf16>
    %cst_101 = arith.constant dense<0.000000e+00> : vector<8x32xf32>
    %247 = tpu.matmul %246, %245, %cst_101 {dimension_numbers = #tpu.dot_dimension_numbers<[1], [0], [0], [1], [0, 0, 1, 1], [], []>} : vector<8x32xbf16>, vector<32x32xbf16>, vector<8x32xf32> -> vector<8x32xf32>
    %c0_102 = arith.constant 0 : index
    %c0_103 = arith.constant 0 : index
    %248 = vector.load %arg63[%c0_102, %c0_103] : memref<1x32xf32, #tpu.memory_space<vmem>>, vector<1x32xf32>
    %249 = vector.broadcast %248 : vector<1x32xf32> to vector<8x32xf32>
    %250 = arith.addf %247, %249 : vector<8x32xf32>
    %251 = arith.addf %170, %250 : vector<8x32xf32>
    %cst_104 = arith.constant dense<0.000000e+00> : vector<8xf32>
    %252 = vector.multi_reduction <add>, %251, %cst_104 [1] : vector<8x32xf32> to vector<8xf32>
    %253 = vector.shape_cast %252 : vector<8xf32> to vector<8x1xf32>
    %cst_105 = arith.constant 3.200000e+01 : f32
    %254 = vector.broadcast %cst_105 : f32 to vector<8x1xf32>
    %255 = arith.divf %253, %254 : vector<8x1xf32>
    %256 = vector.broadcast %255 : vector<8x1xf32> to vector<8x32xf32>
    %257 = arith.subf %251, %256 : vector<8x32xf32>
    %258 = arith.mulf %257, %257 : vector<8x32xf32>
    %cst_106 = arith.constant dense<0.000000e+00> : vector<8xf32>
    %259 = vector.multi_reduction <add>, %258, %cst_106 [1] : vector<8x32xf32> to vector<8xf32>
    %260 = vector.shape_cast %259 : vector<8xf32> to vector<8x1xf32>
    %cst_107 = arith.constant 3.200000e+01 : f32
    %261 = vector.broadcast %cst_107 : f32 to vector<8x1xf32>
    %262 = arith.divf %260, %261 : vector<8x1xf32>
    %cst_108 = arith.constant 9.99999974E-6 : f32
    %263 = vector.broadcast %cst_108 : f32 to vector<8x1xf32>
    %264 = arith.addf %262, %263 : vector<8x1xf32>
    %265 = math.rsqrt %264 : vector<8x1xf32>
    %266 = vector.broadcast %265 : vector<8x1xf32> to vector<8x32xf32>
    %267 = arith.mulf %257, %266 : vector<8x32xf32>
    %c0_109 = arith.constant 0 : index
    %c0_110 = arith.constant 0 : index
    %268 = vector.load %arg60[%c0_109, %c0_110] : memref<1x32xf32, #tpu.memory_space<vmem>>, vector<1x32xf32>
    %269 = vector.broadcast %268 : vector<1x32xf32> to vector<8x32xf32>
    %270 = arith.mulf %267, %269 : vector<8x32xf32>
    %c0_111 = arith.constant 0 : index
    %c0_112 = arith.constant 0 : index
    %271 = vector.load %arg59[%c0_111, %c0_112] : memref<1x32xf32, #tpu.memory_space<vmem>>, vector<1x32xf32>
    %272 = vector.broadcast %271 : vector<1x32xf32> to vector<8x32xf32>
    %273 = arith.addf %270, %272 : vector<8x32xf32>
    %c0_113 = arith.constant 0 : index
    %c0_114 = arith.constant 0 : index
    %274 = vector.load %arg56[%c0_113, %c0_114] : memref<32x2048xbf16, #tpu.memory_space<vmem>>, vector<32x2048xbf16>
    %275 = arith.truncf %273 : vector<8x32xf32> to vector<8x32xbf16>
    %cst_115 = arith.constant dense<0.000000e+00> : vector<8x2048xf32>
    %276 = tpu.matmul %275, %274, %cst_115 {dimension_numbers = #tpu.dot_dimension_numbers<[1], [0], [0], [1], [0, 0, 1, 1], [], []>} : vector<8x32xbf16>, vector<32x2048xbf16>, vector<8x2048xf32> -> vector<8x2048xf32>
    %c0_116 = arith.constant 0 : index
    %c0_117 = arith.constant 0 : index
    %277 = vector.load %arg55[%c0_116, %c0_117] : memref<1x2048xf32, #tpu.memory_space<vmem>>, vector<1x2048xf32>
    %278 = vector.broadcast %277 : vector<1x2048xf32> to vector<8x2048xf32>
    %279 = arith.addf %276, %278 : vector<8x2048xf32>
    %cst_118 = arith.constant 0.000000e+00 : f32
    %280 = vector.broadcast %cst_118 : f32 to vector<8x2048xf32>
    %281 = arith.maximumf %279, %280 : vector<8x2048xf32>
    %c0_119 = arith.constant 0 : index
    %c0_120 = arith.constant 0 : index
    %282 = vector.load %arg58[%c0_119, %c0_120] : memref<2048x32xbf16, #tpu.memory_space<vmem>>, vector<2048x32xbf16>
    %283 = arith.truncf %281 : vector<8x2048xf32> to vector<8x2048xbf16>
    %cst_121 = arith.constant dense<0.000000e+00> : vector<8x32xf32>
    %284 = tpu.matmul %283, %282, %cst_121 {dimension_numbers = #tpu.dot_dimension_numbers<[1], [0], [0], [1], [0, 0, 1, 1], [], []>} : vector<8x2048xbf16>, vector<2048x32xbf16>, vector<8x32xf32> -> vector<8x32xf32>
    %c0_122 = arith.constant 0 : index
    %c0_123 = arith.constant 0 : index
    %285 = vector.load %arg57[%c0_122, %c0_123] : memref<1x32xf32, #tpu.memory_space<vmem>>, vector<1x32xf32>
    %286 = vector.broadcast %285 : vector<1x32xf32> to vector<8x32xf32>
    %287 = arith.addf %284, %286 : vector<8x32xf32>
    %288 = arith.addf %273, %287 : vector<8x32xf32>
    %cst_124 = arith.constant dense<0.000000e+00> : vector<8xf32>
    %289 = vector.multi_reduction <add>, %288, %cst_124 [1] : vector<8x32xf32> to vector<8xf32>
    %290 = vector.shape_cast %289 : vector<8xf32> to vector<8x1xf32>
    %cst_125 = arith.constant 3.200000e+01 : f32
    %291 = vector.broadcast %cst_125 : f32 to vector<8x1xf32>
    %292 = arith.divf %290, %291 : vector<8x1xf32>
    %293 = vector.broadcast %292 : vector<8x1xf32> to vector<8x32xf32>
    %294 = arith.subf %288, %293 : vector<8x32xf32>
    %295 = arith.mulf %294, %294 : vector<8x32xf32>
    %cst_126 = arith.constant dense<0.000000e+00> : vector<8xf32>
    %296 = vector.multi_reduction <add>, %295, %cst_126 [1] : vector<8x32xf32> to vector<8xf32>
    %297 = vector.shape_cast %296 : vector<8xf32> to vector<8x1xf32>
    %cst_127 = arith.constant 3.200000e+01 : f32
    %298 = vector.broadcast %cst_127 : f32 to vector<8x1xf32>
    %299 = arith.divf %297, %298 : vector<8x1xf32>
    %cst_128 = arith.constant 9.99999974E-6 : f32
    %300 = vector.broadcast %cst_128 : f32 to vector<8x1xf32>
    %301 = arith.addf %299, %300 : vector<8x1xf32>
    %302 = math.rsqrt %301 : vector<8x1xf32>
    %303 = vector.broadcast %302 : vector<8x1xf32> to vector<8x32xf32>
    %304 = arith.mulf %294, %303 : vector<8x32xf32>
    %c0_129 = arith.constant 0 : index
    %c0_130 = arith.constant 0 : index
    %305 = vector.load %arg62[%c0_129, %c0_130] : memref<1x32xf32, #tpu.memory_space<vmem>>, vector<1x32xf32>
    %306 = vector.broadcast %305 : vector<1x32xf32> to vector<8x32xf32>
    %307 = arith.mulf %304, %306 : vector<8x32xf32>
    %c0_131 = arith.constant 0 : index
    %c0_132 = arith.constant 0 : index
    %308 = vector.load %arg61[%c0_131, %c0_132] : memref<1x32xf32, #tpu.memory_space<vmem>>, vector<1x32xf32>
    %309 = vector.broadcast %308 : vector<1x32xf32> to vector<8x32xf32>
    %310 = arith.addf %307, %309 : vector<8x32xf32>
    %cst_133 = arith.constant dense<0.000000e+00> : vector<8xf32>
    %311 = vector.multi_reduction <add>, %310, %cst_133 [1] : vector<8x32xf32> to vector<8xf32>
    %312 = vector.shape_cast %311 : vector<8xf32> to vector<8x1xf32>
    %cst_134 = arith.constant 3.200000e+01 : f32
    %313 = vector.broadcast %cst_134 : f32 to vector<8x1xf32>
    %314 = arith.divf %312, %313 : vector<8x1xf32>
    %315 = vector.broadcast %314 : vector<8x1xf32> to vector<8x32xf32>
    %316 = arith.subf %310, %315 : vector<8x32xf32>
    %317 = arith.mulf %316, %316 : vector<8x32xf32>
    %cst_135 = arith.constant dense<0.000000e+00> : vector<8xf32>
    %318 = vector.multi_reduction <add>, %317, %cst_135 [1] : vector<8x32xf32> to vector<8xf32>
    %319 = vector.shape_cast %318 : vector<8xf32> to vector<8x1xf32>
    %cst_136 = arith.constant 3.200000e+01 : f32
    %320 = vector.broadcast %cst_136 : f32 to vector<8x1xf32>
    %321 = arith.divf %319, %320 : vector<8x1xf32>
    %cst_137 = arith.constant 9.99999974E-6 : f32
    %322 = vector.broadcast %cst_137 : f32 to vector<8x1xf32>
    %323 = arith.addf %321, %322 : vector<8x1xf32>
    %324 = math.rsqrt %323 : vector<8x1xf32>
    %325 = vector.broadcast %324 : vector<8x1xf32> to vector<8x32xf32>
    %326 = arith.mulf %316, %325 : vector<8x32xf32>
    %c0_138 = arith.constant 0 : index
    %c0_139 = arith.constant 0 : index
    %327 = vector.load %arg68[%c0_138, %c0_139] : memref<1x32xf32, #tpu.memory_space<vmem>>, vector<1x32xf32>
    %328 = vector.broadcast %327 : vector<1x32xf32> to vector<8x32xf32>
    %329 = arith.mulf %326, %328 : vector<8x32xf32>
    %c0_140 = arith.constant 0 : index
    %c0_141 = arith.constant 0 : index
    %330 = vector.load %arg67[%c0_140, %c0_141] : memref<1x32xf32, #tpu.memory_space<vmem>>, vector<1x32xf32>
    %331 = vector.broadcast %330 : vector<1x32xf32> to vector<8x32xf32>
    %332 = arith.addf %329, %331 : vector<8x32xf32>
    %c0_142 = arith.constant 0 : index
    %c0_143 = arith.constant 0 : index
    %333 = vector.load %arg20[%c0_142, %c0_143] : memref<32x96xbf16, #tpu.memory_space<vmem>>, vector<32x96xbf16>
    %334 = arith.truncf %30 : vector<8x32xf32> to vector<8x32xbf16>
    %cst_144 = arith.constant dense<0.000000e+00> : vector<8x96xf32>
    %335 = tpu.matmul %334, %333, %cst_144 {dimension_numbers = #tpu.dot_dimension_numbers<[1], [0], [0], [1], [0, 0, 1, 1], [], []>} : vector<8x32xbf16>, vector<32x96xbf16>, vector<8x96xf32> -> vector<8x96xf32>
    %c0_145 = arith.constant 0 : index
    %c0_146 = arith.constant 0 : index
    %336 = vector.load %arg19[%c0_145, %c0_146] : memref<1x96xf32, #tpu.memory_space<vmem>>, vector<1x96xf32>
    %337 = vector.broadcast %336 : vector<1x96xf32> to vector<8x96xf32>
    %338 = arith.addf %335, %337 : vector<8x96xf32>
    %339 = vector.extract_strided_slice %338 {offsets = [0, 0], sizes = [8, 32], strides = [1, 1]} : vector<8x96xf32> to vector<8x32xf32>
    %340 = vector.extract_strided_slice %338 {offsets = [0, 32], sizes = [8, 32], strides = [1, 1]} : vector<8x96xf32> to vector<8x32xf32>
    %341 = vector.extract_strided_slice %338 {offsets = [0, 64], sizes = [8, 32], strides = [1, 1]} : vector<8x96xf32> to vector<8x32xf32>
    %342 = vector.extract_strided_slice %339 {offsets = [0, 0], sizes = [8, 8], strides = [1, 1]} : vector<8x32xf32> to vector<8x8xf32>
    %343 = vector.extract_strided_slice %340 {offsets = [0, 0], sizes = [8, 8], strides = [1, 1]} : vector<8x32xf32> to vector<8x8xf32>
    %344 = vector.extract_strided_slice %341 {offsets = [0, 0], sizes = [8, 8], strides = [1, 1]} : vector<8x32xf32> to vector<8x8xf32>
    %cst_147 = arith.constant dense<0.000000e+00> : vector<8x8xf32>
    %345 = tpu.matmul %342, %343, %cst_147 {dimension_numbers = #tpu.dot_dimension_numbers<[1], [1], [0], [0], [0, 0, 1, 0], [], []>} : vector<8x8xf32>, vector<8x8xf32>, vector<8x8xf32> -> vector<8x8xf32>
    %cst_148 = arith.constant 0.353553385 : f32
    %346 = vector.broadcast %cst_148 : f32 to vector<8x8xf32>
    %347 = arith.mulf %345, %346 : vector<8x8xf32>
    %cst_149 = arith.constant dense<0xFF800000> : vector<8xf32>
    %348 = vector.multi_reduction <maximumf>, %347, %cst_149 [1] : vector<8x8xf32> to vector<8xf32>
    %349 = vector.shape_cast %348 : vector<8xf32> to vector<8x1xf32>
    %350 = vector.broadcast %349 : vector<8x1xf32> to vector<8x8xf32>
    %351 = arith.subf %347, %350 : vector<8x8xf32>
    %352 = math.exp %351 : vector<8x8xf32>
    %cst_150 = arith.constant dense<0.000000e+00> : vector<8xf32>
    %353 = vector.multi_reduction <add>, %352, %cst_150 [1] : vector<8x8xf32> to vector<8xf32>
    %354 = vector.shape_cast %353 : vector<8xf32> to vector<8x1xf32>
    %355 = vector.broadcast %354 : vector<8x1xf32> to vector<8x8xf32>
    %356 = arith.divf %352, %355 : vector<8x8xf32>
    %cst_151 = arith.constant dense<0.000000e+00> : vector<8x8xf32>
    %357 = tpu.matmul %356, %344, %cst_151 {dimension_numbers = #tpu.dot_dimension_numbers<[1], [0], [0], [1], [0, 0, 1, 1], [], []>} : vector<8x8xf32>, vector<8x8xf32>, vector<8x8xf32> -> vector<8x8xf32>
    %358 = vector.extract_strided_slice %339 {offsets = [0, 8], sizes = [8, 8], strides = [1, 1]} : vector<8x32xf32> to vector<8x8xf32>
    %359 = vector.extract_strided_slice %340 {offsets = [0, 8], sizes = [8, 8], strides = [1, 1]} : vector<8x32xf32> to vector<8x8xf32>
    %360 = vector.extract_strided_slice %341 {offsets = [0, 8], sizes = [8, 8], strides = [1, 1]} : vector<8x32xf32> to vector<8x8xf32>
    %cst_152 = arith.constant dense<0.000000e+00> : vector<8x8xf32>
    %361 = tpu.matmul %358, %359, %cst_152 {dimension_numbers = #tpu.dot_dimension_numbers<[1], [1], [0], [0], [0, 0, 1, 0], [], []>} : vector<8x8xf32>, vector<8x8xf32>, vector<8x8xf32> -> vector<8x8xf32>
    %cst_153 = arith.constant 0.353553385 : f32
    %362 = vector.broadcast %cst_153 : f32 to vector<8x8xf32>
    %363 = arith.mulf %361, %362 : vector<8x8xf32>
    %cst_154 = arith.constant dense<0xFF800000> : vector<8xf32>
    %364 = vector.multi_reduction <maximumf>, %363, %cst_154 [1] : vector<8x8xf32> to vector<8xf32>
    %365 = vector.shape_cast %364 : vector<8xf32> to vector<8x1xf32>
    %366 = vector.broadcast %365 : vector<8x1xf32> to vector<8x8xf32>
    %367 = arith.subf %363, %366 : vector<8x8xf32>
    %368 = math.exp %367 : vector<8x8xf32>
    %cst_155 = arith.constant dense<0.000000e+00> : vector<8xf32>
    %369 = vector.multi_reduction <add>, %368, %cst_155 [1] : vector<8x8xf32> to vector<8xf32>
    %370 = vector.shape_cast %369 : vector<8xf32> to vector<8x1xf32>
    %371 = vector.broadcast %370 : vector<8x1xf32> to vector<8x8xf32>
    %372 = arith.divf %368, %371 : vector<8x8xf32>
    %cst_156 = arith.constant dense<0.000000e+00> : vector<8x8xf32>
    %373 = tpu.matmul %372, %360, %cst_156 {dimension_numbers = #tpu.dot_dimension_numbers<[1], [0], [0], [1], [0, 0, 1, 1], [], []>} : vector<8x8xf32>, vector<8x8xf32>, vector<8x8xf32> -> vector<8x8xf32>
    %374 = vector.extract_strided_slice %339 {offsets = [0, 16], sizes = [8, 8], strides = [1, 1]} : vector<8x32xf32> to vector<8x8xf32>
    %375 = vector.extract_strided_slice %340 {offsets = [0, 16], sizes = [8, 8], strides = [1, 1]} : vector<8x32xf32> to vector<8x8xf32>
    %376 = vector.extract_strided_slice %341 {offsets = [0, 16], sizes = [8, 8], strides = [1, 1]} : vector<8x32xf32> to vector<8x8xf32>
    %cst_157 = arith.constant dense<0.000000e+00> : vector<8x8xf32>
    %377 = tpu.matmul %374, %375, %cst_157 {dimension_numbers = #tpu.dot_dimension_numbers<[1], [1], [0], [0], [0, 0, 1, 0], [], []>} : vector<8x8xf32>, vector<8x8xf32>, vector<8x8xf32> -> vector<8x8xf32>
    %cst_158 = arith.constant 0.353553385 : f32
    %378 = vector.broadcast %cst_158 : f32 to vector<8x8xf32>
    %379 = arith.mulf %377, %378 : vector<8x8xf32>
    %cst_159 = arith.constant dense<0xFF800000> : vector<8xf32>
    %380 = vector.multi_reduction <maximumf>, %379, %cst_159 [1] : vector<8x8xf32> to vector<8xf32>
    %381 = vector.shape_cast %380 : vector<8xf32> to vector<8x1xf32>
    %382 = vector.broadcast %381 : vector<8x1xf32> to vector<8x8xf32>
    %383 = arith.subf %379, %382 : vector<8x8xf32>
    %384 = math.exp %383 : vector<8x8xf32>
    %cst_160 = arith.constant dense<0.000000e+00> : vector<8xf32>
    %385 = vector.multi_reduction <add>, %384, %cst_160 [1] : vector<8x8xf32> to vector<8xf32>
    %386 = vector.shape_cast %385 : vector<8xf32> to vector<8x1xf32>
    %387 = vector.broadcast %386 : vector<8x1xf32> to vector<8x8xf32>
    %388 = arith.divf %384, %387 : vector<8x8xf32>
    %cst_161 = arith.constant dense<0.000000e+00> : vector<8x8xf32>
    %389 = tpu.matmul %388, %376, %cst_161 {dimension_numbers = #tpu.dot_dimension_numbers<[1], [0], [0], [1], [0, 0, 1, 1], [], []>} : vector<8x8xf32>, vector<8x8xf32>, vector<8x8xf32> -> vector<8x8xf32>
    %390 = vector.extract_strided_slice %339 {offsets = [0, 24], sizes = [8, 8], strides = [1, 1]} : vector<8x32xf32> to vector<8x8xf32>
    %391 = vector.extract_strided_slice %340 {offsets = [0, 24], sizes = [8, 8], strides = [1, 1]} : vector<8x32xf32> to vector<8x8xf32>
    %392 = vector.extract_strided_slice %341 {offsets = [0, 24], sizes = [8, 8], strides = [1, 1]} : vector<8x32xf32> to vector<8x8xf32>
    %cst_162 = arith.constant dense<0.000000e+00> : vector<8x8xf32>
    %393 = tpu.matmul %390, %391, %cst_162 {dimension_numbers = #tpu.dot_dimension_numbers<[1], [1], [0], [0], [0, 0, 1, 0], [], []>} : vector<8x8xf32>, vector<8x8xf32>, vector<8x8xf32> -> vector<8x8xf32>
    %cst_163 = arith.constant 0.353553385 : f32
    %394 = vector.broadcast %cst_163 : f32 to vector<8x8xf32>
    %395 = arith.mulf %393, %394 : vector<8x8xf32>
    %cst_164 = arith.constant dense<0xFF800000> : vector<8xf32>
    %396 = vector.multi_reduction <maximumf>, %395, %cst_164 [1] : vector<8x8xf32> to vector<8xf32>
    %397 = vector.shape_cast %396 : vector<8xf32> to vector<8x1xf32>
    %398 = vector.broadcast %397 : vector<8x1xf32> to vector<8x8xf32>
    %399 = arith.subf %395, %398 : vector<8x8xf32>
    %400 = math.exp %399 : vector<8x8xf32>
    %cst_165 = arith.constant dense<0.000000e+00> : vector<8xf32>
    %401 = vector.multi_reduction <add>, %400, %cst_165 [1] : vector<8x8xf32> to vector<8xf32>
    %402 = vector.shape_cast %401 : vector<8xf32> to vector<8x1xf32>
    %403 = vector.broadcast %402 : vector<8x1xf32> to vector<8x8xf32>
    %404 = arith.divf %400, %403 : vector<8x8xf32>
    %cst_166 = arith.constant dense<0.000000e+00> : vector<8x8xf32>
    %405 = tpu.matmul %404, %392, %cst_166 {dimension_numbers = #tpu.dot_dimension_numbers<[1], [0], [0], [1], [0, 0, 1, 1], [], []>} : vector<8x8xf32>, vector<8x8xf32>, vector<8x8xf32> -> vector<8x8xf32>
    %406 = tpu.concatenate %357, %373, %389, %405 in 1 : vector<8x8xf32>, vector<8x8xf32>, vector<8x8xf32>, vector<8x8xf32> -> vector<8x32xf32>
    %c0_167 = arith.constant 0 : index
    %c0_168 = arith.constant 0 : index
    %407 = vector.load %arg18[%c0_167, %c0_168] : memref<32x32xbf16, #tpu.memory_space<vmem>>, vector<32x32xbf16>
    %408 = arith.truncf %406 : vector<8x32xf32> to vector<8x32xbf16>
    %cst_169 = arith.constant dense<0.000000e+00> : vector<8x32xf32>
    %409 = tpu.matmul %408, %407, %cst_169 {dimension_numbers = #tpu.dot_dimension_numbers<[1], [0], [0], [1], [0, 0, 1, 1], [], []>} : vector<8x32xbf16>, vector<32x32xbf16>, vector<8x32xf32> -> vector<8x32xf32>
    %c0_170 = arith.constant 0 : index
    %c0_171 = arith.constant 0 : index
    %410 = vector.load %arg17[%c0_170, %c0_171] : memref<1x32xf32, #tpu.memory_space<vmem>>, vector<1x32xf32>
    %411 = vector.broadcast %410 : vector<1x32xf32> to vector<8x32xf32>
    %412 = arith.addf %409, %411 : vector<8x32xf32>
    %413 = arith.addf %30, %412 : vector<8x32xf32>
    %cst_172 = arith.constant dense<0.000000e+00> : vector<8xf32>
    %414 = vector.multi_reduction <add>, %413, %cst_172 [1] : vector<8x32xf32> to vector<8xf32>
    %415 = vector.shape_cast %414 : vector<8xf32> to vector<8x1xf32>
    %cst_173 = arith.constant 3.200000e+01 : f32
    %416 = vector.broadcast %cst_173 : f32 to vector<8x1xf32>
    %417 = arith.divf %415, %416 : vector<8x1xf32>
    %418 = vector.broadcast %417 : vector<8x1xf32> to vector<8x32xf32>
    %419 = arith.subf %413, %418 : vector<8x32xf32>
    %420 = arith.mulf %419, %419 : vector<8x32xf32>
    %cst_174 = arith.constant dense<0.000000e+00> : vector<8xf32>
    %421 = vector.multi_reduction <add>, %420, %cst_174 [1] : vector<8x32xf32> to vector<8xf32>
    %422 = vector.shape_cast %421 : vector<8xf32> to vector<8x1xf32>
    %cst_175 = arith.constant 3.200000e+01 : f32
    %423 = vector.broadcast %cst_175 : f32 to vector<8x1xf32>
    %424 = arith.divf %422, %423 : vector<8x1xf32>
    %cst_176 = arith.constant 9.99999974E-6 : f32
    %425 = vector.broadcast %cst_176 : f32 to vector<8x1xf32>
    %426 = arith.addf %424, %425 : vector<8x1xf32>
    %427 = math.rsqrt %426 : vector<8x1xf32>
    %428 = vector.broadcast %427 : vector<8x1xf32> to vector<8x32xf32>
    %429 = arith.mulf %419, %428 : vector<8x32xf32>
    %c0_177 = arith.constant 0 : index
    %c0_178 = arith.constant 0 : index
    %430 = vector.load %arg12[%c0_177, %c0_178] : memref<1x32xf32, #tpu.memory_space<vmem>>, vector<1x32xf32>
    %431 = vector.broadcast %430 : vector<1x32xf32> to vector<8x32xf32>
    %432 = arith.mulf %429, %431 : vector<8x32xf32>
    %c0_179 = arith.constant 0 : index
    %c0_180 = arith.constant 0 : index
    %433 = vector.load %arg11[%c0_179, %c0_180] : memref<1x32xf32, #tpu.memory_space<vmem>>, vector<1x32xf32>
    %434 = vector.broadcast %433 : vector<1x32xf32> to vector<8x32xf32>
    %435 = arith.addf %432, %434 : vector<8x32xf32>
    %c0_181 = arith.constant 0 : index
    %c0_182 = arith.constant 0 : index
    %436 = vector.load %arg6[%c0_181, %c0_182] : memref<32x32xbf16, #tpu.memory_space<vmem>>, vector<32x32xbf16>
    %437 = arith.truncf %435 : vector<8x32xf32> to vector<8x32xbf16>
    %cst_183 = arith.constant dense<0.000000e+00> : vector<8x32xf32>
    %438 = tpu.matmul %437, %436, %cst_183 {dimension_numbers = #tpu.dot_dimension_numbers<[1], [0], [0], [1], [0, 0, 1, 1], [], []>} : vector<8x32xbf16>, vector<32x32xbf16>, vector<8x32xf32> -> vector<8x32xf32>
    %c0_184 = arith.constant 0 : index
    %c0_185 = arith.constant 0 : index
    %439 = vector.load %arg5[%c0_184, %c0_185] : memref<1x32xf32, #tpu.memory_space<vmem>>, vector<1x32xf32>
    %440 = vector.broadcast %439 : vector<1x32xf32> to vector<8x32xf32>
    %441 = arith.addf %438, %440 : vector<8x32xf32>
    %c0_186 = arith.constant 0 : index
    %c0_187 = arith.constant 0 : index
    %442 = vector.load %arg2[%c0_186, %c0_187] : memref<32x64xbf16, #tpu.memory_space<vmem>>, vector<32x64xbf16>
    %443 = arith.truncf %332 : vector<8x32xf32> to vector<8x32xbf16>
    %cst_188 = arith.constant dense<0.000000e+00> : vector<8x64xf32>
    %444 = tpu.matmul %443, %442, %cst_188 {dimension_numbers = #tpu.dot_dimension_numbers<[1], [0], [0], [1], [0, 0, 1, 1], [], []>} : vector<8x32xbf16>, vector<32x64xbf16>, vector<8x64xf32> -> vector<8x64xf32>
    %c0_189 = arith.constant 0 : index
    %c0_190 = arith.constant 0 : index
    %445 = vector.load %arg1[%c0_189, %c0_190] : memref<1x64xf32, #tpu.memory_space<vmem>>, vector<1x64xf32>
    %446 = vector.broadcast %445 : vector<1x64xf32> to vector<8x64xf32>
    %447 = arith.addf %444, %446 : vector<8x64xf32>
    %448 = vector.extract_strided_slice %447 {offsets = [0, 0], sizes = [8, 32], strides = [1, 1]} : vector<8x64xf32> to vector<8x32xf32>
    %449 = vector.extract_strided_slice %447 {offsets = [0, 32], sizes = [8, 32], strides = [1, 1]} : vector<8x64xf32> to vector<8x32xf32>
    %450 = vector.extract_strided_slice %441 {offsets = [0, 0], sizes = [8, 8], strides = [1, 1]} : vector<8x32xf32> to vector<8x8xf32>
    %451 = vector.extract_strided_slice %448 {offsets = [0, 0], sizes = [8, 8], strides = [1, 1]} : vector<8x32xf32> to vector<8x8xf32>
    %452 = vector.extract_strided_slice %449 {offsets = [0, 0], sizes = [8, 8], strides = [1, 1]} : vector<8x32xf32> to vector<8x8xf32>
    %cst_191 = arith.constant dense<0.000000e+00> : vector<8x8xf32>
    %453 = tpu.matmul %450, %451, %cst_191 {dimension_numbers = #tpu.dot_dimension_numbers<[1], [1], [0], [0], [0, 0, 1, 0], [], []>} : vector<8x8xf32>, vector<8x8xf32>, vector<8x8xf32> -> vector<8x8xf32>
    %cst_192 = arith.constant 0.353553385 : f32
    %454 = vector.broadcast %cst_192 : f32 to vector<8x8xf32>
    %455 = arith.mulf %453, %454 : vector<8x8xf32>
    %cst_193 = arith.constant dense<0xFF800000> : vector<8xf32>
    %456 = vector.multi_reduction <maximumf>, %455, %cst_193 [1] : vector<8x8xf32> to vector<8xf32>
    %457 = vector.shape_cast %456 : vector<8xf32> to vector<8x1xf32>
    %458 = vector.broadcast %457 : vector<8x1xf32> to vector<8x8xf32>
    %459 = arith.subf %455, %458 : vector<8x8xf32>
    %460 = math.exp %459 : vector<8x8xf32>
    %cst_194 = arith.constant dense<0.000000e+00> : vector<8xf32>
    %461 = vector.multi_reduction <add>, %460, %cst_194 [1] : vector<8x8xf32> to vector<8xf32>
    %462 = vector.shape_cast %461 : vector<8xf32> to vector<8x1xf32>
    %463 = vector.broadcast %462 : vector<8x1xf32> to vector<8x8xf32>
    %464 = arith.divf %460, %463 : vector<8x8xf32>
    %cst_195 = arith.constant dense<0.000000e+00> : vector<8x8xf32>
    %465 = tpu.matmul %464, %452, %cst_195 {dimension_numbers = #tpu.dot_dimension_numbers<[1], [0], [0], [1], [0, 0, 1, 1], [], []>} : vector<8x8xf32>, vector<8x8xf32>, vector<8x8xf32> -> vector<8x8xf32>
    %466 = vector.extract_strided_slice %441 {offsets = [0, 8], sizes = [8, 8], strides = [1, 1]} : vector<8x32xf32> to vector<8x8xf32>
    %467 = vector.extract_strided_slice %448 {offsets = [0, 8], sizes = [8, 8], strides = [1, 1]} : vector<8x32xf32> to vector<8x8xf32>
    %468 = vector.extract_strided_slice %449 {offsets = [0, 8], sizes = [8, 8], strides = [1, 1]} : vector<8x32xf32> to vector<8x8xf32>
    %cst_196 = arith.constant dense<0.000000e+00> : vector<8x8xf32>
    %469 = tpu.matmul %466, %467, %cst_196 {dimension_numbers = #tpu.dot_dimension_numbers<[1], [1], [0], [0], [0, 0, 1, 0], [], []>} : vector<8x8xf32>, vector<8x8xf32>, vector<8x8xf32> -> vector<8x8xf32>
    %cst_197 = arith.constant 0.353553385 : f32
    %470 = vector.broadcast %cst_197 : f32 to vector<8x8xf32>
    %471 = arith.mulf %469, %470 : vector<8x8xf32>
    %cst_198 = arith.constant dense<0xFF800000> : vector<8xf32>
    %472 = vector.multi_reduction <maximumf>, %471, %cst_198 [1] : vector<8x8xf32> to vector<8xf32>
    %473 = vector.shape_cast %472 : vector<8xf32> to vector<8x1xf32>
    %474 = vector.broadcast %473 : vector<8x1xf32> to vector<8x8xf32>
    %475 = arith.subf %471, %474 : vector<8x8xf32>
    %476 = math.exp %475 : vector<8x8xf32>
    %cst_199 = arith.constant dense<0.000000e+00> : vector<8xf32>
    %477 = vector.multi_reduction <add>, %476, %cst_199 [1] : vector<8x8xf32> to vector<8xf32>
    %478 = vector.shape_cast %477 : vector<8xf32> to vector<8x1xf32>
    %479 = vector.broadcast %478 : vector<8x1xf32> to vector<8x8xf32>
    %480 = arith.divf %476, %479 : vector<8x8xf32>
    %cst_200 = arith.constant dense<0.000000e+00> : vector<8x8xf32>
    %481 = tpu.matmul %480, %468, %cst_200 {dimension_numbers = #tpu.dot_dimension_numbers<[1], [0], [0], [1], [0, 0, 1, 1], [], []>} : vector<8x8xf32>, vector<8x8xf32>, vector<8x8xf32> -> vector<8x8xf32>
    %482 = vector.extract_strided_slice %441 {offsets = [0, 16], sizes = [8, 8], strides = [1, 1]} : vector<8x32xf32> to vector<8x8xf32>
    %483 = vector.extract_strided_slice %448 {offsets = [0, 16], sizes = [8, 8], strides = [1, 1]} : vector<8x32xf32> to vector<8x8xf32>
    %484 = vector.extract_strided_slice %449 {offsets = [0, 16], sizes = [8, 8], strides = [1, 1]} : vector<8x32xf32> to vector<8x8xf32>
    %cst_201 = arith.constant dense<0.000000e+00> : vector<8x8xf32>
    %485 = tpu.matmul %482, %483, %cst_201 {dimension_numbers = #tpu.dot_dimension_numbers<[1], [1], [0], [0], [0, 0, 1, 0], [], []>} : vector<8x8xf32>, vector<8x8xf32>, vector<8x8xf32> -> vector<8x8xf32>
    %cst_202 = arith.constant 0.353553385 : f32
    %486 = vector.broadcast %cst_202 : f32 to vector<8x8xf32>
    %487 = arith.mulf %485, %486 : vector<8x8xf32>
    %cst_203 = arith.constant dense<0xFF800000> : vector<8xf32>
    %488 = vector.multi_reduction <maximumf>, %487, %cst_203 [1] : vector<8x8xf32> to vector<8xf32>
    %489 = vector.shape_cast %488 : vector<8xf32> to vector<8x1xf32>
    %490 = vector.broadcast %489 : vector<8x1xf32> to vector<8x8xf32>
    %491 = arith.subf %487, %490 : vector<8x8xf32>
    %492 = math.exp %491 : vector<8x8xf32>
    %cst_204 = arith.constant dense<0.000000e+00> : vector<8xf32>
    %493 = vector.multi_reduction <add>, %492, %cst_204 [1] : vector<8x8xf32> to vector<8xf32>
    %494 = vector.shape_cast %493 : vector<8xf32> to vector<8x1xf32>
    %495 = vector.broadcast %494 : vector<8x1xf32> to vector<8x8xf32>
    %496 = arith.divf %492, %495 : vector<8x8xf32>
    %cst_205 = arith.constant dense<0.000000e+00> : vector<8x8xf32>
    %497 = tpu.matmul %496, %484, %cst_205 {dimension_numbers = #tpu.dot_dimension_numbers<[1], [0], [0], [1], [0, 0, 1, 1], [], []>} : vector<8x8xf32>, vector<8x8xf32>, vector<8x8xf32> -> vector<8x8xf32>
    %498 = vector.extract_strided_slice %441 {offsets = [0, 24], sizes = [8, 8], strides = [1, 1]} : vector<8x32xf32> to vector<8x8xf32>
    %499 = vector.extract_strided_slice %448 {offsets = [0, 24], sizes = [8, 8], strides = [1, 1]} : vector<8x32xf32> to vector<8x8xf32>
    %500 = vector.extract_strided_slice %449 {offsets = [0, 24], sizes = [8, 8], strides = [1, 1]} : vector<8x32xf32> to vector<8x8xf32>
    %cst_206 = arith.constant dense<0.000000e+00> : vector<8x8xf32>
    %501 = tpu.matmul %498, %499, %cst_206 {dimension_numbers = #tpu.dot_dimension_numbers<[1], [1], [0], [0], [0, 0, 1, 0], [], []>} : vector<8x8xf32>, vector<8x8xf32>, vector<8x8xf32> -> vector<8x8xf32>
    %cst_207 = arith.constant 0.353553385 : f32
    %502 = vector.broadcast %cst_207 : f32 to vector<8x8xf32>
    %503 = arith.mulf %501, %502 : vector<8x8xf32>
    %cst_208 = arith.constant dense<0xFF800000> : vector<8xf32>
    %504 = vector.multi_reduction <maximumf>, %503, %cst_208 [1] : vector<8x8xf32> to vector<8xf32>
    %505 = vector.shape_cast %504 : vector<8xf32> to vector<8x1xf32>
    %506 = vector.broadcast %505 : vector<8x1xf32> to vector<8x8xf32>
    %507 = arith.subf %503, %506 : vector<8x8xf32>
    %508 = math.exp %507 : vector<8x8xf32>
    %cst_209 = arith.constant dense<0.000000e+00> : vector<8xf32>
    %509 = vector.multi_reduction <add>, %508, %cst_209 [1] : vector<8x8xf32> to vector<8xf32>
    %510 = vector.shape_cast %509 : vector<8xf32> to vector<8x1xf32>
    %511 = vector.broadcast %510 : vector<8x1xf32> to vector<8x8xf32>
    %512 = arith.divf %508, %511 : vector<8x8xf32>
    %cst_210 = arith.constant dense<0.000000e+00> : vector<8x8xf32>
    %513 = tpu.matmul %512, %500, %cst_210 {dimension_numbers = #tpu.dot_dimension_numbers<[1], [0], [0], [1], [0, 0, 1, 1], [], []>} : vector<8x8xf32>, vector<8x8xf32>, vector<8x8xf32> -> vector<8x8xf32>
    %514 = tpu.concatenate %465, %481, %497, %513 in 1 : vector<8x8xf32>, vector<8x8xf32>, vector<8x8xf32>, vector<8x8xf32> -> vector<8x32xf32>
    %c0_211 = arith.constant 0 : index
    %c0_212 = arith.constant 0 : index
    %515 = vector.load %arg4[%c0_211, %c0_212] : memref<32x32xbf16, #tpu.memory_space<vmem>>, vector<32x32xbf16>
    %516 = arith.truncf %514 : vector<8x32xf32> to vector<8x32xbf16>
    %cst_213 = arith.constant dense<0.000000e+00> : vector<8x32xf32>
    %517 = tpu.matmul %516, %515, %cst_213 {dimension_numbers = #tpu.dot_dimension_numbers<[1], [0], [0], [1], [0, 0, 1, 1], [], []>} : vector<8x32xbf16>, vector<32x32xbf16>, vector<8x32xf32> -> vector<8x32xf32>
    %c0_214 = arith.constant 0 : index
    %c0_215 = arith.constant 0 : index
    %518 = vector.load %arg3[%c0_214, %c0_215] : memref<1x32xf32, #tpu.memory_space<vmem>>, vector<1x32xf32>
    %519 = vector.broadcast %518 : vector<1x32xf32> to vector<8x32xf32>
    %520 = arith.addf %517, %519 : vector<8x32xf32>
    %521 = arith.addf %435, %520 : vector<8x32xf32>
    %cst_216 = arith.constant dense<0.000000e+00> : vector<8xf32>
    %522 = vector.multi_reduction <add>, %521, %cst_216 [1] : vector<8x32xf32> to vector<8xf32>
    %523 = vector.shape_cast %522 : vector<8xf32> to vector<8x1xf32>
    %cst_217 = arith.constant 3.200000e+01 : f32
    %524 = vector.broadcast %cst_217 : f32 to vector<8x1xf32>
    %525 = arith.divf %523, %524 : vector<8x1xf32>
    %526 = vector.broadcast %525 : vector<8x1xf32> to vector<8x32xf32>
    %527 = arith.subf %521, %526 : vector<8x32xf32>
    %528 = arith.mulf %527, %527 : vector<8x32xf32>
    %cst_218 = arith.constant dense<0.000000e+00> : vector<8xf32>
    %529 = vector.multi_reduction <add>, %528, %cst_218 [1] : vector<8x32xf32> to vector<8xf32>
    %530 = vector.shape_cast %529 : vector<8xf32> to vector<8x1xf32>
    %cst_219 = arith.constant 3.200000e+01 : f32
    %531 = vector.broadcast %cst_219 : f32 to vector<8x1xf32>
    %532 = arith.divf %530, %531 : vector<8x1xf32>
    %cst_220 = arith.constant 9.99999974E-6 : f32
    %533 = vector.broadcast %cst_220 : f32 to vector<8x1xf32>
    %534 = arith.addf %532, %533 : vector<8x1xf32>
    %535 = math.rsqrt %534 : vector<8x1xf32>
    %536 = vector.broadcast %535 : vector<8x1xf32> to vector<8x32xf32>
    %537 = arith.mulf %527, %536 : vector<8x32xf32>
    %c0_221 = arith.constant 0 : index
    %c0_222 = arith.constant 0 : index
    %538 = vector.load %arg14[%c0_221, %c0_222] : memref<1x32xf32, #tpu.memory_space<vmem>>, vector<1x32xf32>
    %539 = vector.broadcast %538 : vector<1x32xf32> to vector<8x32xf32>
    %540 = arith.mulf %537, %539 : vector<8x32xf32>
    %c0_223 = arith.constant 0 : index
    %c0_224 = arith.constant 0 : index
    %541 = vector.load %arg13[%c0_223, %c0_224] : memref<1x32xf32, #tpu.memory_space<vmem>>, vector<1x32xf32>
    %542 = vector.broadcast %541 : vector<1x32xf32> to vector<8x32xf32>
    %543 = arith.addf %540, %542 : vector<8x32xf32>
    %c0_225 = arith.constant 0 : index
    %c0_226 = arith.constant 0 : index
    %544 = vector.load %arg8[%c0_225, %c0_226] : memref<32x2048xbf16, #tpu.memory_space<vmem>>, vector<32x2048xbf16>
    %545 = arith.truncf %543 : vector<8x32xf32> to vector<8x32xbf16>
    %cst_227 = arith.constant dense<0.000000e+00> : vector<8x2048xf32>
    %546 = tpu.matmul %545, %544, %cst_227 {dimension_numbers = #tpu.dot_dimension_numbers<[1], [0], [0], [1], [0, 0, 1, 1], [], []>} : vector<8x32xbf16>, vector<32x2048xbf16>, vector<8x2048xf32> -> vector<8x2048xf32>
    %c0_228 = arith.constant 0 : index
    %c0_229 = arith.constant 0 : index
    %547 = vector.load %arg7[%c0_228, %c0_229] : memref<1x2048xf32, #tpu.memory_space<vmem>>, vector<1x2048xf32>
    %548 = vector.broadcast %547 : vector<1x2048xf32> to vector<8x2048xf32>
    %549 = arith.addf %546, %548 : vector<8x2048xf32>
    %cst_230 = arith.constant 0.000000e+00 : f32
    %550 = vector.broadcast %cst_230 : f32 to vector<8x2048xf32>
    %551 = arith.maximumf %549, %550 : vector<8x2048xf32>
    %c0_231 = arith.constant 0 : index
    %c0_232 = arith.constant 0 : index
    %552 = vector.load %arg10[%c0_231, %c0_232] : memref<2048x32xbf16, #tpu.memory_space<vmem>>, vector<2048x32xbf16>
    %553 = arith.truncf %551 : vector<8x2048xf32> to vector<8x2048xbf16>
    %cst_233 = arith.constant dense<0.000000e+00> : vector<8x32xf32>
    %554 = tpu.matmul %553, %552, %cst_233 {dimension_numbers = #tpu.dot_dimension_numbers<[1], [0], [0], [1], [0, 0, 1, 1], [], []>} : vector<8x2048xbf16>, vector<2048x32xbf16>, vector<8x32xf32> -> vector<8x32xf32>
    %c0_234 = arith.constant 0 : index
    %c0_235 = arith.constant 0 : index
    %555 = vector.load %arg9[%c0_234, %c0_235] : memref<1x32xf32, #tpu.memory_space<vmem>>, vector<1x32xf32>
    %556 = vector.broadcast %555 : vector<1x32xf32> to vector<8x32xf32>
    %557 = arith.addf %554, %556 : vector<8x32xf32>
    %558 = arith.addf %543, %557 : vector<8x32xf32>
    %cst_236 = arith.constant dense<0.000000e+00> : vector<8xf32>
    %559 = vector.multi_reduction <add>, %558, %cst_236 [1] : vector<8x32xf32> to vector<8xf32>
    %560 = vector.shape_cast %559 : vector<8xf32> to vector<8x1xf32>
    %cst_237 = arith.constant 3.200000e+01 : f32
    %561 = vector.broadcast %cst_237 : f32 to vector<8x1xf32>
    %562 = arith.divf %560, %561 : vector<8x1xf32>
    %563 = vector.broadcast %562 : vector<8x1xf32> to vector<8x32xf32>
    %564 = arith.subf %558, %563 : vector<8x32xf32>
    %565 = arith.mulf %564, %564 : vector<8x32xf32>
    %cst_238 = arith.constant dense<0.000000e+00> : vector<8xf32>
    %566 = vector.multi_reduction <add>, %565, %cst_238 [1] : vector<8x32xf32> to vector<8xf32>
    %567 = vector.shape_cast %566 : vector<8xf32> to vector<8x1xf32>
    %cst_239 = arith.constant 3.200000e+01 : f32
    %568 = vector.broadcast %cst_239 : f32 to vector<8x1xf32>
    %569 = arith.divf %567, %568 : vector<8x1xf32>
    %cst_240 = arith.constant 9.99999974E-6 : f32
    %570 = vector.broadcast %cst_240 : f32 to vector<8x1xf32>
    %571 = arith.addf %569, %570 : vector<8x1xf32>
    %572 = math.rsqrt %571 : vector<8x1xf32>
    %573 = vector.broadcast %572 : vector<8x1xf32> to vector<8x32xf32>
    %574 = arith.mulf %564, %573 : vector<8x32xf32>
    %c0_241 = arith.constant 0 : index
    %c0_242 = arith.constant 0 : index
    %575 = vector.load %arg16[%c0_241, %c0_242] : memref<1x32xf32, #tpu.memory_space<vmem>>, vector<1x32xf32>
    %576 = vector.broadcast %575 : vector<1x32xf32> to vector<8x32xf32>
    %577 = arith.mulf %574, %576 : vector<8x32xf32>
    %c0_243 = arith.constant 0 : index
    %c0_244 = arith.constant 0 : index
    %578 = vector.load %arg15[%c0_243, %c0_244] : memref<1x32xf32, #tpu.memory_space<vmem>>, vector<1x32xf32>
    %579 = vector.broadcast %578 : vector<1x32xf32> to vector<8x32xf32>
    %580 = arith.addf %577, %579 : vector<8x32xf32>
    %c0_245 = arith.constant 0 : index
    %c0_246 = arith.constant 0 : index
    %581 = vector.load %arg40[%c0_245, %c0_246] : memref<32x96xbf16, #tpu.memory_space<vmem>>, vector<32x96xbf16>
    %582 = arith.truncf %580 : vector<8x32xf32> to vector<8x32xbf16>
    %cst_247 = arith.constant dense<0.000000e+00> : vector<8x96xf32>
    %583 = tpu.matmul %582, %581, %cst_247 {dimension_numbers = #tpu.dot_dimension_numbers<[1], [0], [0], [1], [0, 0, 1, 1], [], []>} : vector<8x32xbf16>, vector<32x96xbf16>, vector<8x96xf32> -> vector<8x96xf32>
    %c0_248 = arith.constant 0 : index
    %c0_249 = arith.constant 0 : index
    %584 = vector.load %arg39[%c0_248, %c0_249] : memref<1x96xf32, #tpu.memory_space<vmem>>, vector<1x96xf32>
    %585 = vector.broadcast %584 : vector<1x96xf32> to vector<8x96xf32>
    %586 = arith.addf %583, %585 : vector<8x96xf32>
    %587 = vector.extract_strided_slice %586 {offsets = [0, 0], sizes = [8, 32], strides = [1, 1]} : vector<8x96xf32> to vector<8x32xf32>
    %588 = vector.extract_strided_slice %586 {offsets = [0, 32], sizes = [8, 32], strides = [1, 1]} : vector<8x96xf32> to vector<8x32xf32>
    %589 = vector.extract_strided_slice %586 {offsets = [0, 64], sizes = [8, 32], strides = [1, 1]} : vector<8x96xf32> to vector<8x32xf32>
    %590 = vector.extract_strided_slice %587 {offsets = [0, 0], sizes = [8, 8], strides = [1, 1]} : vector<8x32xf32> to vector<8x8xf32>
    %591 = vector.extract_strided_slice %588 {offsets = [0, 0], sizes = [8, 8], strides = [1, 1]} : vector<8x32xf32> to vector<8x8xf32>
    %592 = vector.extract_strided_slice %589 {offsets = [0, 0], sizes = [8, 8], strides = [1, 1]} : vector<8x32xf32> to vector<8x8xf32>
    %cst_250 = arith.constant dense<0.000000e+00> : vector<8x8xf32>
    %593 = tpu.matmul %590, %591, %cst_250 {dimension_numbers = #tpu.dot_dimension_numbers<[1], [1], [0], [0], [0, 0, 1, 0], [], []>} : vector<8x8xf32>, vector<8x8xf32>, vector<8x8xf32> -> vector<8x8xf32>
    %cst_251 = arith.constant 0.353553385 : f32
    %594 = vector.broadcast %cst_251 : f32 to vector<8x8xf32>
    %595 = arith.mulf %593, %594 : vector<8x8xf32>
    %cst_252 = arith.constant dense<0xFF800000> : vector<8xf32>
    %596 = vector.multi_reduction <maximumf>, %595, %cst_252 [1] : vector<8x8xf32> to vector<8xf32>
    %597 = vector.shape_cast %596 : vector<8xf32> to vector<8x1xf32>
    %598 = vector.broadcast %597 : vector<8x1xf32> to vector<8x8xf32>
    %599 = arith.subf %595, %598 : vector<8x8xf32>
    %600 = math.exp %599 : vector<8x8xf32>
    %cst_253 = arith.constant dense<0.000000e+00> : vector<8xf32>
    %601 = vector.multi_reduction <add>, %600, %cst_253 [1] : vector<8x8xf32> to vector<8xf32>
    %602 = vector.shape_cast %601 : vector<8xf32> to vector<8x1xf32>
    %603 = vector.broadcast %602 : vector<8x1xf32> to vector<8x8xf32>
    %604 = arith.divf %600, %603 : vector<8x8xf32>
    %cst_254 = arith.constant dense<0.000000e+00> : vector<8x8xf32>
    %605 = tpu.matmul %604, %592, %cst_254 {dimension_numbers = #tpu.dot_dimension_numbers<[1], [0], [0], [1], [0, 0, 1, 1], [], []>} : vector<8x8xf32>, vector<8x8xf32>, vector<8x8xf32> -> vector<8x8xf32>
    %606 = vector.extract_strided_slice %587 {offsets = [0, 8], sizes = [8, 8], strides = [1, 1]} : vector<8x32xf32> to vector<8x8xf32>
    %607 = vector.extract_strided_slice %588 {offsets = [0, 8], sizes = [8, 8], strides = [1, 1]} : vector<8x32xf32> to vector<8x8xf32>
    %608 = vector.extract_strided_slice %589 {offsets = [0, 8], sizes = [8, 8], strides = [1, 1]} : vector<8x32xf32> to vector<8x8xf32>
    %cst_255 = arith.constant dense<0.000000e+00> : vector<8x8xf32>
    %609 = tpu.matmul %606, %607, %cst_255 {dimension_numbers = #tpu.dot_dimension_numbers<[1], [1], [0], [0], [0, 0, 1, 0], [], []>} : vector<8x8xf32>, vector<8x8xf32>, vector<8x8xf32> -> vector<8x8xf32>
    %cst_256 = arith.constant 0.353553385 : f32
    %610 = vector.broadcast %cst_256 : f32 to vector<8x8xf32>
    %611 = arith.mulf %609, %610 : vector<8x8xf32>
    %cst_257 = arith.constant dense<0xFF800000> : vector<8xf32>
    %612 = vector.multi_reduction <maximumf>, %611, %cst_257 [1] : vector<8x8xf32> to vector<8xf32>
    %613 = vector.shape_cast %612 : vector<8xf32> to vector<8x1xf32>
    %614 = vector.broadcast %613 : vector<8x1xf32> to vector<8x8xf32>
    %615 = arith.subf %611, %614 : vector<8x8xf32>
    %616 = math.exp %615 : vector<8x8xf32>
    %cst_258 = arith.constant dense<0.000000e+00> : vector<8xf32>
    %617 = vector.multi_reduction <add>, %616, %cst_258 [1] : vector<8x8xf32> to vector<8xf32>
    %618 = vector.shape_cast %617 : vector<8xf32> to vector<8x1xf32>
    %619 = vector.broadcast %618 : vector<8x1xf32> to vector<8x8xf32>
    %620 = arith.divf %616, %619 : vector<8x8xf32>
    %cst_259 = arith.constant dense<0.000000e+00> : vector<8x8xf32>
    %621 = tpu.matmul %620, %608, %cst_259 {dimension_numbers = #tpu.dot_dimension_numbers<[1], [0], [0], [1], [0, 0, 1, 1], [], []>} : vector<8x8xf32>, vector<8x8xf32>, vector<8x8xf32> -> vector<8x8xf32>
    %622 = vector.extract_strided_slice %587 {offsets = [0, 16], sizes = [8, 8], strides = [1, 1]} : vector<8x32xf32> to vector<8x8xf32>
    %623 = vector.extract_strided_slice %588 {offsets = [0, 16], sizes = [8, 8], strides = [1, 1]} : vector<8x32xf32> to vector<8x8xf32>
    %624 = vector.extract_strided_slice %589 {offsets = [0, 16], sizes = [8, 8], strides = [1, 1]} : vector<8x32xf32> to vector<8x8xf32>
    %cst_260 = arith.constant dense<0.000000e+00> : vector<8x8xf32>
    %625 = tpu.matmul %622, %623, %cst_260 {dimension_numbers = #tpu.dot_dimension_numbers<[1], [1], [0], [0], [0, 0, 1, 0], [], []>} : vector<8x8xf32>, vector<8x8xf32>, vector<8x8xf32> -> vector<8x8xf32>
    %cst_261 = arith.constant 0.353553385 : f32
    %626 = vector.broadcast %cst_261 : f32 to vector<8x8xf32>
    %627 = arith.mulf %625, %626 : vector<8x8xf32>
    %cst_262 = arith.constant dense<0xFF800000> : vector<8xf32>
    %628 = vector.multi_reduction <maximumf>, %627, %cst_262 [1] : vector<8x8xf32> to vector<8xf32>
    %629 = vector.shape_cast %628 : vector<8xf32> to vector<8x1xf32>
    %630 = vector.broadcast %629 : vector<8x1xf32> to vector<8x8xf32>
    %631 = arith.subf %627, %630 : vector<8x8xf32>
    %632 = math.exp %631 : vector<8x8xf32>
    %cst_263 = arith.constant dense<0.000000e+00> : vector<8xf32>
    %633 = vector.multi_reduction <add>, %632, %cst_263 [1] : vector<8x8xf32> to vector<8xf32>
    %634 = vector.shape_cast %633 : vector<8xf32> to vector<8x1xf32>
    %635 = vector.broadcast %634 : vector<8x1xf32> to vector<8x8xf32>
    %636 = arith.divf %632, %635 : vector<8x8xf32>
    %cst_264 = arith.constant dense<0.000000e+00> : vector<8x8xf32>
    %637 = tpu.matmul %636, %624, %cst_264 {dimension_numbers = #tpu.dot_dimension_numbers<[1], [0], [0], [1], [0, 0, 1, 1], [], []>} : vector<8x8xf32>, vector<8x8xf32>, vector<8x8xf32> -> vector<8x8xf32>
    %638 = vector.extract_strided_slice %587 {offsets = [0, 24], sizes = [8, 8], strides = [1, 1]} : vector<8x32xf32> to vector<8x8xf32>
    %639 = vector.extract_strided_slice %588 {offsets = [0, 24], sizes = [8, 8], strides = [1, 1]} : vector<8x32xf32> to vector<8x8xf32>
    %640 = vector.extract_strided_slice %589 {offsets = [0, 24], sizes = [8, 8], strides = [1, 1]} : vector<8x32xf32> to vector<8x8xf32>
    %cst_265 = arith.constant dense<0.000000e+00> : vector<8x8xf32>
    %641 = tpu.matmul %638, %639, %cst_265 {dimension_numbers = #tpu.dot_dimension_numbers<[1], [1], [0], [0], [0, 0, 1, 0], [], []>} : vector<8x8xf32>, vector<8x8xf32>, vector<8x8xf32> -> vector<8x8xf32>
    %cst_266 = arith.constant 0.353553385 : f32
    %642 = vector.broadcast %cst_266 : f32 to vector<8x8xf32>
    %643 = arith.mulf %641, %642 : vector<8x8xf32>
    %cst_267 = arith.constant dense<0xFF800000> : vector<8xf32>
    %644 = vector.multi_reduction <maximumf>, %643, %cst_267 [1] : vector<8x8xf32> to vector<8xf32>
    %645 = vector.shape_cast %644 : vector<8xf32> to vector<8x1xf32>
    %646 = vector.broadcast %645 : vector<8x1xf32> to vector<8x8xf32>
    %647 = arith.subf %643, %646 : vector<8x8xf32>
    %648 = math.exp %647 : vector<8x8xf32>
    %cst_268 = arith.constant dense<0.000000e+00> : vector<8xf32>
    %649 = vector.multi_reduction <add>, %648, %cst_268 [1] : vector<8x8xf32> to vector<8xf32>
    %650 = vector.shape_cast %649 : vector<8xf32> to vector<8x1xf32>
    %651 = vector.broadcast %650 : vector<8x1xf32> to vector<8x8xf32>
    %652 = arith.divf %648, %651 : vector<8x8xf32>
    %cst_269 = arith.constant dense<0.000000e+00> : vector<8x8xf32>
    %653 = tpu.matmul %652, %640, %cst_269 {dimension_numbers = #tpu.dot_dimension_numbers<[1], [0], [0], [1], [0, 0, 1, 1], [], []>} : vector<8x8xf32>, vector<8x8xf32>, vector<8x8xf32> -> vector<8x8xf32>
    %654 = tpu.concatenate %605, %621, %637, %653 in 1 : vector<8x8xf32>, vector<8x8xf32>, vector<8x8xf32>, vector<8x8xf32> -> vector<8x32xf32>
    %c0_270 = arith.constant 0 : index
    %c0_271 = arith.constant 0 : index
    %655 = vector.load %arg38[%c0_270, %c0_271] : memref<32x32xbf16, #tpu.memory_space<vmem>>, vector<32x32xbf16>
    %656 = arith.truncf %654 : vector<8x32xf32> to vector<8x32xbf16>
    %cst_272 = arith.constant dense<0.000000e+00> : vector<8x32xf32>
    %657 = tpu.matmul %656, %655, %cst_272 {dimension_numbers = #tpu.dot_dimension_numbers<[1], [0], [0], [1], [0, 0, 1, 1], [], []>} : vector<8x32xbf16>, vector<32x32xbf16>, vector<8x32xf32> -> vector<8x32xf32>
    %c0_273 = arith.constant 0 : index
    %c0_274 = arith.constant 0 : index
    %658 = vector.load %arg37[%c0_273, %c0_274] : memref<1x32xf32, #tpu.memory_space<vmem>>, vector<1x32xf32>
    %659 = vector.broadcast %658 : vector<1x32xf32> to vector<8x32xf32>
    %660 = arith.addf %657, %659 : vector<8x32xf32>
    %661 = arith.addf %580, %660 : vector<8x32xf32>
    %cst_275 = arith.constant dense<0.000000e+00> : vector<8xf32>
    %662 = vector.multi_reduction <add>, %661, %cst_275 [1] : vector<8x32xf32> to vector<8xf32>
    %663 = vector.shape_cast %662 : vector<8xf32> to vector<8x1xf32>
    %cst_276 = arith.constant 3.200000e+01 : f32
    %664 = vector.broadcast %cst_276 : f32 to vector<8x1xf32>
    %665 = arith.divf %663, %664 : vector<8x1xf32>
    %666 = vector.broadcast %665 : vector<8x1xf32> to vector<8x32xf32>
    %667 = arith.subf %661, %666 : vector<8x32xf32>
    %668 = arith.mulf %667, %667 : vector<8x32xf32>
    %cst_277 = arith.constant dense<0.000000e+00> : vector<8xf32>
    %669 = vector.multi_reduction <add>, %668, %cst_277 [1] : vector<8x32xf32> to vector<8xf32>
    %670 = vector.shape_cast %669 : vector<8xf32> to vector<8x1xf32>
    %cst_278 = arith.constant 3.200000e+01 : f32
    %671 = vector.broadcast %cst_278 : f32 to vector<8x1xf32>
    %672 = arith.divf %670, %671 : vector<8x1xf32>
    %cst_279 = arith.constant 9.99999974E-6 : f32
    %673 = vector.broadcast %cst_279 : f32 to vector<8x1xf32>
    %674 = arith.addf %672, %673 : vector<8x1xf32>
    %675 = math.rsqrt %674 : vector<8x1xf32>
    %676 = vector.broadcast %675 : vector<8x1xf32> to vector<8x32xf32>
    %677 = arith.mulf %667, %676 : vector<8x32xf32>
    %c0_280 = arith.constant 0 : index
    %c0_281 = arith.constant 0 : index
    %678 = vector.load %arg32[%c0_280, %c0_281] : memref<1x32xf32, #tpu.memory_space<vmem>>, vector<1x32xf32>
    %679 = vector.broadcast %678 : vector<1x32xf32> to vector<8x32xf32>
    %680 = arith.mulf %677, %679 : vector<8x32xf32>
    %c0_282 = arith.constant 0 : index
    %c0_283 = arith.constant 0 : index
    %681 = vector.load %arg31[%c0_282, %c0_283] : memref<1x32xf32, #tpu.memory_space<vmem>>, vector<1x32xf32>
    %682 = vector.broadcast %681 : vector<1x32xf32> to vector<8x32xf32>
    %683 = arith.addf %680, %682 : vector<8x32xf32>
    %c0_284 = arith.constant 0 : index
    %c0_285 = arith.constant 0 : index
    %684 = vector.load %arg26[%c0_284, %c0_285] : memref<32x32xbf16, #tpu.memory_space<vmem>>, vector<32x32xbf16>
    %685 = arith.truncf %683 : vector<8x32xf32> to vector<8x32xbf16>
    %cst_286 = arith.constant dense<0.000000e+00> : vector<8x32xf32>
    %686 = tpu.matmul %685, %684, %cst_286 {dimension_numbers = #tpu.dot_dimension_numbers<[1], [0], [0], [1], [0, 0, 1, 1], [], []>} : vector<8x32xbf16>, vector<32x32xbf16>, vector<8x32xf32> -> vector<8x32xf32>
    %c0_287 = arith.constant 0 : index
    %c0_288 = arith.constant 0 : index
    %687 = vector.load %arg25[%c0_287, %c0_288] : memref<1x32xf32, #tpu.memory_space<vmem>>, vector<1x32xf32>
    %688 = vector.broadcast %687 : vector<1x32xf32> to vector<8x32xf32>
    %689 = arith.addf %686, %688 : vector<8x32xf32>
    %c0_289 = arith.constant 0 : index
    %c0_290 = arith.constant 0 : index
    %690 = vector.load %arg22[%c0_289, %c0_290] : memref<32x64xbf16, #tpu.memory_space<vmem>>, vector<32x64xbf16>
    %691 = arith.truncf %332 : vector<8x32xf32> to vector<8x32xbf16>
    %cst_291 = arith.constant dense<0.000000e+00> : vector<8x64xf32>
    %692 = tpu.matmul %691, %690, %cst_291 {dimension_numbers = #tpu.dot_dimension_numbers<[1], [0], [0], [1], [0, 0, 1, 1], [], []>} : vector<8x32xbf16>, vector<32x64xbf16>, vector<8x64xf32> -> vector<8x64xf32>
    %c0_292 = arith.constant 0 : index
    %c0_293 = arith.constant 0 : index
    %693 = vector.load %arg21[%c0_292, %c0_293] : memref<1x64xf32, #tpu.memory_space<vmem>>, vector<1x64xf32>
    %694 = vector.broadcast %693 : vector<1x64xf32> to vector<8x64xf32>
    %695 = arith.addf %692, %694 : vector<8x64xf32>
    %696 = vector.extract_strided_slice %695 {offsets = [0, 0], sizes = [8, 32], strides = [1, 1]} : vector<8x64xf32> to vector<8x32xf32>
    %697 = vector.extract_strided_slice %695 {offsets = [0, 32], sizes = [8, 32], strides = [1, 1]} : vector<8x64xf32> to vector<8x32xf32>
    %698 = vector.extract_strided_slice %689 {offsets = [0, 0], sizes = [8, 8], strides = [1, 1]} : vector<8x32xf32> to vector<8x8xf32>
    %699 = vector.extract_strided_slice %696 {offsets = [0, 0], sizes = [8, 8], strides = [1, 1]} : vector<8x32xf32> to vector<8x8xf32>
    %700 = vector.extract_strided_slice %697 {offsets = [0, 0], sizes = [8, 8], strides = [1, 1]} : vector<8x32xf32> to vector<8x8xf32>
    %cst_294 = arith.constant dense<0.000000e+00> : vector<8x8xf32>
    %701 = tpu.matmul %698, %699, %cst_294 {dimension_numbers = #tpu.dot_dimension_numbers<[1], [1], [0], [0], [0, 0, 1, 0], [], []>} : vector<8x8xf32>, vector<8x8xf32>, vector<8x8xf32> -> vector<8x8xf32>
    %cst_295 = arith.constant 0.353553385 : f32
    %702 = vector.broadcast %cst_295 : f32 to vector<8x8xf32>
    %703 = arith.mulf %701, %702 : vector<8x8xf32>
    %cst_296 = arith.constant dense<0xFF800000> : vector<8xf32>
    %704 = vector.multi_reduction <maximumf>, %703, %cst_296 [1] : vector<8x8xf32> to vector<8xf32>
    %705 = vector.shape_cast %704 : vector<8xf32> to vector<8x1xf32>
    %706 = vector.broadcast %705 : vector<8x1xf32> to vector<8x8xf32>
    %707 = arith.subf %703, %706 : vector<8x8xf32>
    %708 = math.exp %707 : vector<8x8xf32>
    %cst_297 = arith.constant dense<0.000000e+00> : vector<8xf32>
    %709 = vector.multi_reduction <add>, %708, %cst_297 [1] : vector<8x8xf32> to vector<8xf32>
    %710 = vector.shape_cast %709 : vector<8xf32> to vector<8x1xf32>
    %711 = vector.broadcast %710 : vector<8x1xf32> to vector<8x8xf32>
    %712 = arith.divf %708, %711 : vector<8x8xf32>
    %cst_298 = arith.constant dense<0.000000e+00> : vector<8x8xf32>
    %713 = tpu.matmul %712, %700, %cst_298 {dimension_numbers = #tpu.dot_dimension_numbers<[1], [0], [0], [1], [0, 0, 1, 1], [], []>} : vector<8x8xf32>, vector<8x8xf32>, vector<8x8xf32> -> vector<8x8xf32>
    %714 = vector.extract_strided_slice %689 {offsets = [0, 8], sizes = [8, 8], strides = [1, 1]} : vector<8x32xf32> to vector<8x8xf32>
    %715 = vector.extract_strided_slice %696 {offsets = [0, 8], sizes = [8, 8], strides = [1, 1]} : vector<8x32xf32> to vector<8x8xf32>
    %716 = vector.extract_strided_slice %697 {offsets = [0, 8], sizes = [8, 8], strides = [1, 1]} : vector<8x32xf32> to vector<8x8xf32>
    %cst_299 = arith.constant dense<0.000000e+00> : vector<8x8xf32>
    %717 = tpu.matmul %714, %715, %cst_299 {dimension_numbers = #tpu.dot_dimension_numbers<[1], [1], [0], [0], [0, 0, 1, 0], [], []>} : vector<8x8xf32>, vector<8x8xf32>, vector<8x8xf32> -> vector<8x8xf32>
    %cst_300 = arith.constant 0.353553385 : f32
    %718 = vector.broadcast %cst_300 : f32 to vector<8x8xf32>
    %719 = arith.mulf %717, %718 : vector<8x8xf32>
    %cst_301 = arith.constant dense<0xFF800000> : vector<8xf32>
    %720 = vector.multi_reduction <maximumf>, %719, %cst_301 [1] : vector<8x8xf32> to vector<8xf32>
    %721 = vector.shape_cast %720 : vector<8xf32> to vector<8x1xf32>
    %722 = vector.broadcast %721 : vector<8x1xf32> to vector<8x8xf32>
    %723 = arith.subf %719, %722 : vector<8x8xf32>
    %724 = math.exp %723 : vector<8x8xf32>
    %cst_302 = arith.constant dense<0.000000e+00> : vector<8xf32>
    %725 = vector.multi_reduction <add>, %724, %cst_302 [1] : vector<8x8xf32> to vector<8xf32>
    %726 = vector.shape_cast %725 : vector<8xf32> to vector<8x1xf32>
    %727 = vector.broadcast %726 : vector<8x1xf32> to vector<8x8xf32>
    %728 = arith.divf %724, %727 : vector<8x8xf32>
    %cst_303 = arith.constant dense<0.000000e+00> : vector<8x8xf32>
    %729 = tpu.matmul %728, %716, %cst_303 {dimension_numbers = #tpu.dot_dimension_numbers<[1], [0], [0], [1], [0, 0, 1, 1], [], []>} : vector<8x8xf32>, vector<8x8xf32>, vector<8x8xf32> -> vector<8x8xf32>
    %730 = vector.extract_strided_slice %689 {offsets = [0, 16], sizes = [8, 8], strides = [1, 1]} : vector<8x32xf32> to vector<8x8xf32>
    %731 = vector.extract_strided_slice %696 {offsets = [0, 16], sizes = [8, 8], strides = [1, 1]} : vector<8x32xf32> to vector<8x8xf32>
    %732 = vector.extract_strided_slice %697 {offsets = [0, 16], sizes = [8, 8], strides = [1, 1]} : vector<8x32xf32> to vector<8x8xf32>
    %cst_304 = arith.constant dense<0.000000e+00> : vector<8x8xf32>
    %733 = tpu.matmul %730, %731, %cst_304 {dimension_numbers = #tpu.dot_dimension_numbers<[1], [1], [0], [0], [0, 0, 1, 0], [], []>} : vector<8x8xf32>, vector<8x8xf32>, vector<8x8xf32> -> vector<8x8xf32>
    %cst_305 = arith.constant 0.353553385 : f32
    %734 = vector.broadcast %cst_305 : f32 to vector<8x8xf32>
    %735 = arith.mulf %733, %734 : vector<8x8xf32>
    %cst_306 = arith.constant dense<0xFF800000> : vector<8xf32>
    %736 = vector.multi_reduction <maximumf>, %735, %cst_306 [1] : vector<8x8xf32> to vector<8xf32>
    %737 = vector.shape_cast %736 : vector<8xf32> to vector<8x1xf32>
    %738 = vector.broadcast %737 : vector<8x1xf32> to vector<8x8xf32>
    %739 = arith.subf %735, %738 : vector<8x8xf32>
    %740 = math.exp %739 : vector<8x8xf32>
    %cst_307 = arith.constant dense<0.000000e+00> : vector<8xf32>
    %741 = vector.multi_reduction <add>, %740, %cst_307 [1] : vector<8x8xf32> to vector<8xf32>
    %742 = vector.shape_cast %741 : vector<8xf32> to vector<8x1xf32>
    %743 = vector.broadcast %742 : vector<8x1xf32> to vector<8x8xf32>
    %744 = arith.divf %740, %743 : vector<8x8xf32>
    %cst_308 = arith.constant dense<0.000000e+00> : vector<8x8xf32>
    %745 = tpu.matmul %744, %732, %cst_308 {dimension_numbers = #tpu.dot_dimension_numbers<[1], [0], [0], [1], [0, 0, 1, 1], [], []>} : vector<8x8xf32>, vector<8x8xf32>, vector<8x8xf32> -> vector<8x8xf32>
    %746 = vector.extract_strided_slice %689 {offsets = [0, 24], sizes = [8, 8], strides = [1, 1]} : vector<8x32xf32> to vector<8x8xf32>
    %747 = vector.extract_strided_slice %696 {offsets = [0, 24], sizes = [8, 8], strides = [1, 1]} : vector<8x32xf32> to vector<8x8xf32>
    %748 = vector.extract_strided_slice %697 {offsets = [0, 24], sizes = [8, 8], strides = [1, 1]} : vector<8x32xf32> to vector<8x8xf32>
    %cst_309 = arith.constant dense<0.000000e+00> : vector<8x8xf32>
    %749 = tpu.matmul %746, %747, %cst_309 {dimension_numbers = #tpu.dot_dimension_numbers<[1], [1], [0], [0], [0, 0, 1, 0], [], []>} : vector<8x8xf32>, vector<8x8xf32>, vector<8x8xf32> -> vector<8x8xf32>
    %cst_310 = arith.constant 0.353553385 : f32
    %750 = vector.broadcast %cst_310 : f32 to vector<8x8xf32>
    %751 = arith.mulf %749, %750 : vector<8x8xf32>
    %cst_311 = arith.constant dense<0xFF800000> : vector<8xf32>
    %752 = vector.multi_reduction <maximumf>, %751, %cst_311 [1] : vector<8x8xf32> to vector<8xf32>
    %753 = vector.shape_cast %752 : vector<8xf32> to vector<8x1xf32>
    %754 = vector.broadcast %753 : vector<8x1xf32> to vector<8x8xf32>
    %755 = arith.subf %751, %754 : vector<8x8xf32>
    %756 = math.exp %755 : vector<8x8xf32>
    %cst_312 = arith.constant dense<0.000000e+00> : vector<8xf32>
    %757 = vector.multi_reduction <add>, %756, %cst_312 [1] : vector<8x8xf32> to vector<8xf32>
    %758 = vector.shape_cast %757 : vector<8xf32> to vector<8x1xf32>
    %759 = vector.broadcast %758 : vector<8x1xf32> to vector<8x8xf32>
    %760 = arith.divf %756, %759 : vector<8x8xf32>
    %cst_313 = arith.constant dense<0.000000e+00> : vector<8x8xf32>
    %761 = tpu.matmul %760, %748, %cst_313 {dimension_numbers = #tpu.dot_dimension_numbers<[1], [0], [0], [1], [0, 0, 1, 1], [], []>} : vector<8x8xf32>, vector<8x8xf32>, vector<8x8xf32> -> vector<8x8xf32>
    %762 = tpu.concatenate %713, %729, %745, %761 in 1 : vector<8x8xf32>, vector<8x8xf32>, vector<8x8xf32>, vector<8x8xf32> -> vector<8x32xf32>
    %c0_314 = arith.constant 0 : index
    %c0_315 = arith.constant 0 : index
    %763 = vector.load %arg24[%c0_314, %c0_315] : memref<32x32xbf16, #tpu.memory_space<vmem>>, vector<32x32xbf16>
    %764 = arith.truncf %762 : vector<8x32xf32> to vector<8x32xbf16>
    %cst_316 = arith.constant dense<0.000000e+00> : vector<8x32xf32>
    %765 = tpu.matmul %764, %763, %cst_316 {dimension_numbers = #tpu.dot_dimension_numbers<[1], [0], [0], [1], [0, 0, 1, 1], [], []>} : vector<8x32xbf16>, vector<32x32xbf16>, vector<8x32xf32> -> vector<8x32xf32>
    %c0_317 = arith.constant 0 : index
    %c0_318 = arith.constant 0 : index
    %766 = vector.load %arg23[%c0_317, %c0_318] : memref<1x32xf32, #tpu.memory_space<vmem>>, vector<1x32xf32>
    %767 = vector.broadcast %766 : vector<1x32xf32> to vector<8x32xf32>
    %768 = arith.addf %765, %767 : vector<8x32xf32>
    %769 = arith.addf %683, %768 : vector<8x32xf32>
    %cst_319 = arith.constant dense<0.000000e+00> : vector<8xf32>
    %770 = vector.multi_reduction <add>, %769, %cst_319 [1] : vector<8x32xf32> to vector<8xf32>
    %771 = vector.shape_cast %770 : vector<8xf32> to vector<8x1xf32>
    %cst_320 = arith.constant 3.200000e+01 : f32
    %772 = vector.broadcast %cst_320 : f32 to vector<8x1xf32>
    %773 = arith.divf %771, %772 : vector<8x1xf32>
    %774 = vector.broadcast %773 : vector<8x1xf32> to vector<8x32xf32>
    %775 = arith.subf %769, %774 : vector<8x32xf32>
    %776 = arith.mulf %775, %775 : vector<8x32xf32>
    %cst_321 = arith.constant dense<0.000000e+00> : vector<8xf32>
    %777 = vector.multi_reduction <add>, %776, %cst_321 [1] : vector<8x32xf32> to vector<8xf32>
    %778 = vector.shape_cast %777 : vector<8xf32> to vector<8x1xf32>
    %cst_322 = arith.constant 3.200000e+01 : f32
    %779 = vector.broadcast %cst_322 : f32 to vector<8x1xf32>
    %780 = arith.divf %778, %779 : vector<8x1xf32>
    %cst_323 = arith.constant 9.99999974E-6 : f32
    %781 = vector.broadcast %cst_323 : f32 to vector<8x1xf32>
    %782 = arith.addf %780, %781 : vector<8x1xf32>
    %783 = math.rsqrt %782 : vector<8x1xf32>
    %784 = vector.broadcast %783 : vector<8x1xf32> to vector<8x32xf32>
    %785 = arith.mulf %775, %784 : vector<8x32xf32>
    %c0_324 = arith.constant 0 : index
    %c0_325 = arith.constant 0 : index
    %786 = vector.load %arg34[%c0_324, %c0_325] : memref<1x32xf32, #tpu.memory_space<vmem>>, vector<1x32xf32>
    %787 = vector.broadcast %786 : vector<1x32xf32> to vector<8x32xf32>
    %788 = arith.mulf %785, %787 : vector<8x32xf32>
    %c0_326 = arith.constant 0 : index
    %c0_327 = arith.constant 0 : index
    %789 = vector.load %arg33[%c0_326, %c0_327] : memref<1x32xf32, #tpu.memory_space<vmem>>, vector<1x32xf32>
    %790 = vector.broadcast %789 : vector<1x32xf32> to vector<8x32xf32>
    %791 = arith.addf %788, %790 : vector<8x32xf32>
    %c0_328 = arith.constant 0 : index
    %c0_329 = arith.constant 0 : index
    %792 = vector.load %arg28[%c0_328, %c0_329] : memref<32x2048xbf16, #tpu.memory_space<vmem>>, vector<32x2048xbf16>
    %793 = arith.truncf %791 : vector<8x32xf32> to vector<8x32xbf16>
    %cst_330 = arith.constant dense<0.000000e+00> : vector<8x2048xf32>
    %794 = tpu.matmul %793, %792, %cst_330 {dimension_numbers = #tpu.dot_dimension_numbers<[1], [0], [0], [1], [0, 0, 1, 1], [], []>} : vector<8x32xbf16>, vector<32x2048xbf16>, vector<8x2048xf32> -> vector<8x2048xf32>
    %c0_331 = arith.constant 0 : index
    %c0_332 = arith.constant 0 : index
    %795 = vector.load %arg27[%c0_331, %c0_332] : memref<1x2048xf32, #tpu.memory_space<vmem>>, vector<1x2048xf32>
    %796 = vector.broadcast %795 : vector<1x2048xf32> to vector<8x2048xf32>
    %797 = arith.addf %794, %796 : vector<8x2048xf32>
    %cst_333 = arith.constant 0.000000e+00 : f32
    %798 = vector.broadcast %cst_333 : f32 to vector<8x2048xf32>
    %799 = arith.maximumf %797, %798 : vector<8x2048xf32>
    %c0_334 = arith.constant 0 : index
    %c0_335 = arith.constant 0 : index
    %800 = vector.load %arg30[%c0_334, %c0_335] : memref<2048x32xbf16, #tpu.memory_space<vmem>>, vector<2048x32xbf16>
    %801 = arith.truncf %799 : vector<8x2048xf32> to vector<8x2048xbf16>
    %cst_336 = arith.constant dense<0.000000e+00> : vector<8x32xf32>
    %802 = tpu.matmul %801, %800, %cst_336 {dimension_numbers = #tpu.dot_dimension_numbers<[1], [0], [0], [1], [0, 0, 1, 1], [], []>} : vector<8x2048xbf16>, vector<2048x32xbf16>, vector<8x32xf32> -> vector<8x32xf32>
    %c0_337 = arith.constant 0 : index
    %c0_338 = arith.constant 0 : index
    %803 = vector.load %arg29[%c0_337, %c0_338] : memref<1x32xf32, #tpu.memory_space<vmem>>, vector<1x32xf32>
    %804 = vector.broadcast %803 : vector<1x32xf32> to vector<8x32xf32>
    %805 = arith.addf %802, %804 : vector<8x32xf32>
    %806 = arith.addf %791, %805 : vector<8x32xf32>
    %cst_339 = arith.constant dense<0.000000e+00> : vector<8xf32>
    %807 = vector.multi_reduction <add>, %806, %cst_339 [1] : vector<8x32xf32> to vector<8xf32>
    %808 = vector.shape_cast %807 : vector<8xf32> to vector<8x1xf32>
    %cst_340 = arith.constant 3.200000e+01 : f32
    %809 = vector.broadcast %cst_340 : f32 to vector<8x1xf32>
    %810 = arith.divf %808, %809 : vector<8x1xf32>
    %811 = vector.broadcast %810 : vector<8x1xf32> to vector<8x32xf32>
    %812 = arith.subf %806, %811 : vector<8x32xf32>
    %813 = arith.mulf %812, %812 : vector<8x32xf32>
    %cst_341 = arith.constant dense<0.000000e+00> : vector<8xf32>
    %814 = vector.multi_reduction <add>, %813, %cst_341 [1] : vector<8x32xf32> to vector<8xf32>
    %815 = vector.shape_cast %814 : vector<8xf32> to vector<8x1xf32>
    %cst_342 = arith.constant 3.200000e+01 : f32
    %816 = vector.broadcast %cst_342 : f32 to vector<8x1xf32>
    %817 = arith.divf %815, %816 : vector<8x1xf32>
    %cst_343 = arith.constant 9.99999974E-6 : f32
    %818 = vector.broadcast %cst_343 : f32 to vector<8x1xf32>
    %819 = arith.addf %817, %818 : vector<8x1xf32>
    %820 = math.rsqrt %819 : vector<8x1xf32>
    %821 = vector.broadcast %820 : vector<8x1xf32> to vector<8x32xf32>
    %822 = arith.mulf %812, %821 : vector<8x32xf32>
    %c0_344 = arith.constant 0 : index
    %c0_345 = arith.constant 0 : index
    %823 = vector.load %arg36[%c0_344, %c0_345] : memref<1x32xf32, #tpu.memory_space<vmem>>, vector<1x32xf32>
    %824 = vector.broadcast %823 : vector<1x32xf32> to vector<8x32xf32>
    %825 = arith.mulf %822, %824 : vector<8x32xf32>
    %c0_346 = arith.constant 0 : index
    %c0_347 = arith.constant 0 : index
    %826 = vector.load %arg35[%c0_346, %c0_347] : memref<1x32xf32, #tpu.memory_space<vmem>>, vector<1x32xf32>
    %827 = vector.broadcast %826 : vector<1x32xf32> to vector<8x32xf32>
    %828 = arith.addf %825, %827 : vector<8x32xf32>
    %cst_348 = arith.constant dense<0.000000e+00> : vector<8xf32>
    %829 = vector.multi_reduction <add>, %828, %cst_348 [1] : vector<8x32xf32> to vector<8xf32>
    %830 = vector.shape_cast %829 : vector<8xf32> to vector<8x1xf32>
    %cst_349 = arith.constant 3.200000e+01 : f32
    %831 = vector.broadcast %cst_349 : f32 to vector<8x1xf32>
    %832 = arith.divf %830, %831 : vector<8x1xf32>
    %833 = vector.broadcast %832 : vector<8x1xf32> to vector<8x32xf32>
    %834 = arith.subf %828, %833 : vector<8x32xf32>
    %835 = arith.mulf %834, %834 : vector<8x32xf32>
    %cst_350 = arith.constant dense<0.000000e+00> : vector<8xf32>
    %836 = vector.multi_reduction <add>, %835, %cst_350 [1] : vector<8x32xf32> to vector<8xf32>
    %837 = vector.shape_cast %836 : vector<8xf32> to vector<8x1xf32>
    %cst_351 = arith.constant 3.200000e+01 : f32
    %838 = vector.broadcast %cst_351 : f32 to vector<8x1xf32>
    %839 = arith.divf %837, %838 : vector<8x1xf32>
    %cst_352 = arith.constant 9.99999974E-6 : f32
    %840 = vector.broadcast %cst_352 : f32 to vector<8x1xf32>
    %841 = arith.addf %839, %840 : vector<8x1xf32>
    %842 = math.rsqrt %841 : vector<8x1xf32>
    %843 = vector.broadcast %842 : vector<8x1xf32> to vector<8x32xf32>
    %844 = arith.mulf %834, %843 : vector<8x32xf32>
    %c0_353 = arith.constant 0 : index
    %c0_354 = arith.constant 0 : index
    %845 = vector.load %arg42[%c0_353, %c0_354] : memref<1x32xf32, #tpu.memory_space<vmem>>, vector<1x32xf32>
    %846 = vector.broadcast %845 : vector<1x32xf32> to vector<8x32xf32>
    %847 = arith.mulf %844, %846 : vector<8x32xf32>
    %c0_355 = arith.constant 0 : index
    %c0_356 = arith.constant 0 : index
    %848 = vector.load %arg41[%c0_355, %c0_356] : memref<1x32xf32, #tpu.memory_space<vmem>>, vector<1x32xf32>
    %849 = vector.broadcast %848 : vector<1x32xf32> to vector<8x32xf32>
    %850 = arith.addf %847, %849 : vector<8x32xf32>
    %cst_357 = arith.constant dense<0.000000e+00> : vector<8xf32>
    %851 = vector.multi_reduction <add>, %850, %cst_357 [1] : vector<8x32xf32> to vector<8xf32>
    %852 = vector.shape_cast %851 : vector<8xf32> to vector<8x1xf32>
    %cst_358 = arith.constant 3.200000e+01 : f32
    %853 = vector.broadcast %cst_358 : f32 to vector<8x1xf32>
    %854 = arith.divf %852, %853 : vector<8x1xf32>
    %855 = vector.broadcast %854 : vector<8x1xf32> to vector<8x32xf32>
    %856 = arith.subf %850, %855 : vector<8x32xf32>
    %857 = arith.mulf %856, %856 : vector<8x32xf32>
    %cst_359 = arith.constant dense<0.000000e+00> : vector<8xf32>
    %858 = vector.multi_reduction <add>, %857, %cst_359 [1] : vector<8x32xf32> to vector<8xf32>
    %859 = vector.shape_cast %858 : vector<8xf32> to vector<8x1xf32>
    %cst_360 = arith.constant 3.200000e+01 : f32
    %860 = vector.broadcast %cst_360 : f32 to vector<8x1xf32>
    %861 = arith.divf %859, %860 : vector<8x1xf32>
    %cst_361 = arith.constant 9.99999974E-6 : f32
    %862 = vector.broadcast %cst_361 : f32 to vector<8x1xf32>
    %863 = arith.addf %861, %862 : vector<8x1xf32>
    %864 = math.rsqrt %863 : vector<8x1xf32>
    %865 = vector.broadcast %864 : vector<8x1xf32> to vector<8x32xf32>
    %866 = arith.mulf %856, %865 : vector<8x32xf32>
    %c0_362 = arith.constant 0 : index
    %c0_363 = arith.constant 0 : index
    %867 = vector.load %arg75[%c0_362, %c0_363] : memref<1x32xf32, #tpu.memory_space<vmem>>, vector<1x32xf32>
    %868 = vector.broadcast %867 : vector<1x32xf32> to vector<8x32xf32>
    %869 = arith.mulf %866, %868 : vector<8x32xf32>
    %c0_364 = arith.constant 0 : index
    %c0_365 = arith.constant 0 : index
    %870 = vector.load %arg74[%c0_364, %c0_365] : memref<1x32xf32, #tpu.memory_space<vmem>>, vector<1x32xf32>
    %871 = vector.broadcast %870 : vector<1x32xf32> to vector<8x32xf32>
    %872 = arith.addf %869, %871 : vector<8x32xf32>
    %c0_366 = arith.constant 0 : index
    %c0_367 = arith.constant 0 : index
    %873 = vector.load %arg76[%c0_366, %c0_367] : memref<32x16xbf16, #tpu.memory_space<vmem>>, vector<32x16xbf16>
    %874 = arith.truncf %872 : vector<8x32xf32> to vector<8x32xbf16>
    %cst_368 = arith.constant dense<0.000000e+00> : vector<8x16xf32>
    %875 = tpu.matmul %874, %873, %cst_368 {dimension_numbers = #tpu.dot_dimension_numbers<[1], [0], [0], [1], [0, 0, 1, 1], [], []>} : vector<8x32xbf16>, vector<32x16xbf16>, vector<8x16xf32> -> vector<8x16xf32>
    %c0_369 = arith.constant 0 : index
    %c0_370 = arith.constant 0 : index
    %876 = vector.load %arg73[%c0_369, %c0_370] : memref<1x16xf32, #tpu.memory_space<vmem>>, vector<1x16xf32>
    %877 = vector.broadcast %876 : vector<1x16xf32> to vector<8x16xf32>
    %878 = arith.addf %875, %877 : vector<8x16xf32>
    %c0_371 = arith.constant 0 : index
    %c0_372 = arith.constant 0 : index
    %879 = vector.load %arg77[%c0_371, %c0_372] : memref<8x16xf32, #tpu.memory_space<vmem>>, vector<8x16xf32>
    tpu.vector_store %arg77[%c0_371, %c0_372], %878 {strides = array<i32>} : memref<8x16xf32, #tpu.memory_space<vmem>>, vector<8x16xf32>,
    return
  }
}

</mosaic_0001>

<bundles_post_ra>
// kernel: simple_transformer_forward.1
= control target key start
LH: loop header
LB: loop body
LE: loop exit
PB: predicated region body
PF: predicated region fallthrough
CT: control target
= control target key end

     0   :  { %s17945_s6 = smov 1   ;;  %s17946_s10 = smov 2   ;;  %s20174_s0 = inlined_call_operand.smem [shape: u32[78], index: -1, kind: input, shape index: {}] }
   0x1   :  { %s18083_s5 = sld [smem:[%s20174_s0]]   ;;  %s17947_s14 = smov 3  }
   0x2   :  { %s18088_s9 = sld [smem:[%s20174_s0 + %s17945_s6]]   ;;  %s17948_s18 = smov 4  }
   0x3   :  { %s18093_s13 = sld [smem:[%s20174_s0 + %s17946_s10]]   ;;  %s17949_s22 = smov 5  }
   0x4   :  { %s18098_s17 = sld [smem:[%s20174_s0 + %s17947_s14]]   ;;  %s17950_s26 = smov 6  }
   0x5   :  { %s18103_s21 = sld [smem:[%s20174_s0 + %s17948_s18]]   ;;  %s17951_s30 = smov 7  }
   0x6   :  { %s18108_s25 = sld [smem:[%s20174_s0 + %s17949_s22]]   ;;  %s17952_s4 = smov 8  }
   0x7   :  { %20201 = sst [smem:[#allocation76_spill]] %s18083_s5  ;;  %s17953_s10 = smov 9  }
   0x8   :  { %20202 = sst [smem:[#allocation77_spill]] %s18088_s9  ;;  %s17954_s15 = smov 10  }
   0x9   :  { %20203 = sst [smem:[#allocation78_spill]] %s18093_s13  ;;  %s17955_s20 = smov 11  }
   0xa   :  { %20204 = sst [smem:[#allocation79_spill]] %s18098_s17  ;;  %s17957_s1 = smov 13  }
   0xb   :  { %20205 = sst [smem:[#allocation80_spill]] %s18103_s21  ;;  %s17958_s7 = smov 14  }
   0xc   :  { %20206 = sst [smem:[#allocation81_spill]] %s18108_s25  ;;  %s17960_s22 = smov 16  }
   0xd   :  { %s18113_s29 = sld [smem:[%s20174_s0 + %s17950_s26]]   ;;  %s17956_s26 = smov 12  }
   0xe   :  { %s18118_s3 = sld [smem:[%s20174_s0 + %s17951_s30]]   ;;  %s17961_s28 = smov 17  }
   0xf   :  { %s18123_s8 = sld [smem:[%s20174_s0 + %s17952_s4]]  }
  0x10   :  { %s18128_s14 = sld [smem:[%s20174_s0 + %s17953_s10]]  }
  0x11   :  { %s18133_s19 = sld [smem:[%s20174_s0 + %s17954_s15]]   ;;  %s17959_s15 = smov 15  }
  0x12   :  { %s18138_s24 = sld [smem:[%s20174_s0 + %s17955_s20]]  }
  0x13   :  { %20207 = sst [smem:[#allocation82_spill]] %s18113_s29 }
  0x14   :  { %20208 = sst [smem:[#allocation83_spill]] %s18118_s3 }
  0x15   :  { %20209 = sst [smem:[#allocation84_spill]] %s18123_s8 }
  0x16   :  { %20210 = sst [smem:[#allocation85_spill]] %s18128_s14 }
  0x17   :  { %20211 = sst [smem:[#allocation86_spill]] %s18133_s19 }
  0x18   :  { %20212 = sst [smem:[#allocation87_spill]] %s18138_s24 }
  0x19   :  { %s18143_s30 = sld [smem:[%s20174_s0 + %s17956_s26]]  }
  0x1a   :  { %s18148_s6 = sld [smem:[%s20174_s0 + %s17957_s1]]  }
  0x1b   :  { %s18153_s12 = sld [smem:[%s20174_s0 + %s17958_s7]]   ;;  %s17962_s7 = smov 18  }
  0x1c   :  { %s18158_s20 = sld [smem:[%s20174_s0 + %s17959_s15]]   ;;  %s17963_s15 = smov 19  }
  0x1d   :  { %s18163_s27 = sld [smem:[%s20174_s0 + %s17960_s22]]   ;;  %s17964_s22 = smov 20  }
  0x1e   :  { %s18168_s4 = sld [smem:[%s20174_s0 + %s17961_s28]]   ;;  %s17965_s28 = smov 21  }
  0x1f   :  { %20213 = sst [smem:[#allocation88_spill]] %s18143_s30 }
  0x20   :  { %20214 = sst [smem:[#allocation89_spill]] %s18148_s6 }
  0x21   :  { %20215 = sst [smem:[#allocation90_spill]] %s18153_s12 }
  0x22   :  { %20216 = sst [smem:[#allocation91_spill]] %s18158_s20 }
  0x23   :  { %20217 = sst [smem:[#allocation92_spill]] %s18163_s27 }
  0x24   :  { %20218 = sst [smem:[#allocation93_spill]] %s18168_s4 }
  0x25   :  { %s18173_s14 = sld [smem:[%s20174_s0 + %s17962_s7]]   ;;  %s17966_s7 = smov 22  }
  0x26   :  { %s18178_s20 = sld [smem:[%s20174_s0 + %s17963_s15]]   ;;  %s17967_s15 = smov 23  }
  0x27   :  { %s18183_s27 = sld [smem:[%s20174_s0 + %s17964_s22]]   ;;  %s17968_s22 = smov 24  }
  0x28   :  { %s18188_s3 = sld [smem:[%s20174_s0 + %s17965_s28]]   ;;  %s17969_s28 = smov 25  }
  0x29   :  { %s18193_s19 = sld [smem:[%s20174_s0 + %s17966_s7]]   ;;  %s17970_s7 = smov 26  }
  0x2a   :  { %s18198_s6 = sld [smem:[%s20174_s0 + %s17967_s15]]   ;;  %s17971_s15 = smov 27  }
  0x2b   :  { %20219 = sst [smem:[#allocation94_spill]] %s18173_s14 }
  0x2c   :  { %20220 = sst [smem:[#allocation95_spill]] %s18178_s20 }
  0x2d   :  { %20221 = sst [smem:[#allocation96_spill]] %s18183_s27 }
  0x2e   :  { %20222 = sst [smem:[#allocation97_spill]] %s18188_s3 }
  0x2f   :  { %20223 = sst [smem:[#allocation98_spill]] %s18193_s19 }
  0x30   :  { %20224 = sst [smem:[#allocation99_spill]] %s18198_s6 }
  0x31   :  { %s18203_s12 = sld [smem:[%s20174_s0 + %s17968_s22]]   ;;  %s17972_s22 = smov 28  }
  0x32   :  { %s18208_s3 = sld [smem:[%s20174_s0 + %s17969_s28]]   ;;  %s17973_s28 = smov 29  }
  0x33   :  { %s18213_s19 = sld [smem:[%s20174_s0 + %s17970_s7]]   ;;  %s17974_s7 = smov 30  }
  0x34   :  { %s18218_s8 = sld [smem:[%s20174_s0 + %s17971_s15]]   ;;  %s17975_s15 = smov 31  }
  0x35   :  { %s18228_s17 = sld [smem:[%s20174_s0 + %s17973_s28]]   ;;  %s17977_s28 = smov 33  }
  0x36   :  { %s18248_s21 = sld [smem:[%s20174_s0 + %s17977_s28]]   ;;  %s17981_s28 = smov 37  }
  0x37   :  { %20225 = sst [smem:[#allocation100_spill]] %s18203_s12 }
  0x38   :  { %s18223_s12 = sld [smem:[%s20174_s0 + %s17972_s22]]   ;;  %s17976_s22 = smov 32  }
  0x39   :  { %20226 = sst [smem:[#allocation101_spill]] %s18213_s19 }
  0x3a   :  { %20227 = sst [smem:[#allocation102_spill]] %s18218_s8 }
  0x3b   :  { %20229 = sst [smem:[#allocation104_spill]] %s18228_s17 }
  0x3c   :  { %s18233_s19 = sld [smem:[%s20174_s0 + %s17974_s7]]   ;;  %s17978_s7 = smov 34  }
  0x3d   :  { %s18238_s8 = sld [smem:[%s20174_s0 + %s17975_s15]]   ;;  %s17979_s15 = smov 35  }
  0x3e   :  { %20228 = sst [smem:[#allocation103_spill]] %s18223_s12 }
  0x3f   :  { %s18243_s12 = sld [smem:[%s20174_s0 + %s17976_s22]]   ;;  %s17980_s22 = smov 36  }
  0x40   :  { %s18258_s9 = sld [smem:[%s20174_s0 + %s17979_s15]]   ;;  %s17983_s15 = smov 39  }
  0x41   :  { %s18263_s25 = sld [smem:[%s20174_s0 + %s17980_s22]]   ;;  %s17984_s22 = smov 40  }
  0x42   :  { %20230 = sst [smem:[#allocation105_spill]] %s18233_s19 }
  0x43   :  { %s18253_s19 = sld [smem:[%s20174_s0 + %s17978_s7]]   ;;  %s17982_s7 = smov 38  }
  0x44   :  { %s18268_s24 = sld [smem:[%s20174_s0 + %s17981_s28]]   ;;  %s17985_s28 = smov 41  }
  0x45   :  { %20231 = sst [smem:[#allocation106_spill]] %s18243_s12 }
  0x46   :  { %s18273_s30 = sld [smem:[%s20174_s0 + %s17982_s7]]   ;;  %s17986_s7 = smov 42  }
  0x47   :  { %20233 = sst [smem:[#allocation108_spill]] %s18263_s25 }
  0x48   :  { %s18278_s13 = sld [smem:[%s20174_s0 + %s17983_s15]]   ;;  %s17987_s15 = smov 43  }
  0x49   :  { %20232 = sst [smem:[#allocation107_spill]] %s18253_s19 }
  0x4a   :  { %s18283_s29 = sld [smem:[%s20174_s0 + %s17984_s22]]   ;;  %s17988_s22 = smov 44  }
  0x4b   :  { %s18288_s4 = sld [smem:[%s20174_s0 + %s17985_s28]]   ;;  %s17989_s28 = smov 45  }
  0x4c   :  { %20234 = sst [smem:[#allocation109_spill]] %s18273_s30 }
  0x4d   :  { %s18293_s30 = sld [smem:[%s20174_s0 + %s17986_s7]]   ;;  %s17990_s7 = smov 46  }
  0x4e   :  { %20235 = sst [smem:[#allocation110_spill]] %s18278_s13 }
  0x4f   :  { %s18298_s14 = sld [smem:[%s20174_s0 + %s17987_s15]]   ;;  %s17991_s15 = smov 47  }
  0x50   :  { %20236 = sst [smem:[#allocation111_spill]] %s18283_s29 }
  0x51   :  { %s18303_s29 = sld [smem:[%s20174_s0 + %s17988_s22]]   ;;  %s17992_s22 = smov 48  }
  0x52   :  { %s18308_s20 = sld [smem:[%s20174_s0 + %s17989_s28]]   ;;  %s17993_s28 = smov 49  }
  0x53   :  { %20237 = sst [smem:[#allocation112_spill]] %s18293_s30 }
  0x54   :  { %s18313_s27 = sld [smem:[%s20174_s0 + %s17990_s7]]   ;;  %s17994_s7 = smov 50  }
  0x55   :  { %20238 = sst [smem:[#allocation113_spill]] %s18298_s14 }
  0x56   :  { %s18318_s14 = sld [smem:[%s20174_s0 + %s17991_s15]]   ;;  %s17995_s15 = smov 51  }
  0x57   :  { %20239 = sst [smem:[#allocation114_spill]] %s18303_s29 }
  0x58   :  { %s18323_s29 = sld [smem:[%s20174_s0 + %s17992_s22]]   ;;  %s17996_s22 = smov 52  }
  0x59   :  { %s18328_s5 = sld [smem:[%s20174_s0 + %s17993_s28]]   ;;  %s17997_s28 = smov 53  }
  0x5a   :  { %20240 = sst [smem:[#allocation115_spill]] %s18313_s27 }
  0x5b   :  { %s18333_s27 = sld [smem:[%s20174_s0 + %s17994_s7]]   ;;  %s17998_s7 = smov 54  }
  0x5c   :  { %20241 = sst [smem:[#allocation116_spill]] %s18318_s14 }
  0x5d   :  { %s18338_s14 = sld [smem:[%s20174_s0 + %s17995_s15]]   ;;  %s17999_s15 = smov 55  }
  0x5e   :  { %s18343_s30 = sld [smem:[%s20174_s0 + %s17996_s22]]   ;;  %s18000_s22 = smov 56  }
  0x5f   :  { %20242 = sst [smem:[#allocation117_spill]] %s18328_s5 }
  0x60   :  { %s18348_s5 = sld [smem:[%s20174_s0 + %s17997_s28]]   ;;  %s18001_s28 = smov 57  }
  0x61   :  { %s18353_s13 = sld [smem:[%s20174_s0 + %s17998_s7]]   ;;  %s18002_s7 = smov 58  }
  0x62   :  { %s18368_s25 = sld [smem:[%s20174_s0 + %s18001_s28]]   ;;  %s18005_s28 = smov 61  }
  0x63   :  { %20243 = sst [smem:[#allocation118_spill]] %s18338_s14 }
  0x64   :  { %20244 = sst [smem:[#allocation119_spill]] %s18343_s30 }
  0x65   :  { %s18358_s14 = sld [smem:[%s20174_s0 + %s17999_s15]]   ;;  %s18003_s15 = smov 59  }
  0x66   :  { %s18363_s30 = sld [smem:[%s20174_s0 + %s18000_s22]]   ;;  %s18004_s22 = smov 60  }
  0x67   :  { %20245 = sst [smem:[#allocation120_spill]] %s18353_s13 }
  0x68   :  { %20248 = sst [smem:[#allocation123_spill]] %s18368_s25 }
  0x69   :  { %s18373_s13 = sld [smem:[%s20174_s0 + %s18002_s7]]   ;;  %s18006_s7 = smov 62  }
  0x6a   :  { %s18388_s25 = sld [smem:[%s20174_s0 + %s18005_s28]]   ;;  %s18009_s28 = smov 65  }
  0x6b   :  { %20246 = sst [smem:[#allocation121_spill]] %s18358_s14 }
  0x6c   :  { %20247 = sst [smem:[#allocation122_spill]] %s18363_s30 }
  0x6d   :  { %s18378_s14 = sld [smem:[%s20174_s0 + %s18003_s15]]   ;;  %s18007_s15 = smov 63  }
  0x6e   :  { %s18383_s30 = sld [smem:[%s20174_s0 + %s18004_s22]]   ;;  %s18008_s22 = smov 64  }
  0x6f   :  { %20249 = sst [smem:[#allocation124_spill]] %s18373_s13 }
  0x70   :  { %s18393_s13 = sld [smem:[%s20174_s0 + %s18006_s7]]   ;;  %s18010_s7 = smov 66  }
  0x71   :  { %s18398_s19 = sld [smem:[%s20174_s0 + %s18007_s15]]   ;;  %s18011_s15 = smov 67  }
  0x72   :  { %s18408_s12 = sld [smem:[%s20174_s0 + %s18009_s28]]   ;;  %s18013_s28 = smov 69  }
  0x73   :  { %s18418_s17 = sld [smem:[%s20174_s0 + %s18011_s15]]   ;;  %s18015_s15 = smov 71  }
  0x74   :  { %20250 = sst [smem:[#allocation125_spill]] %s18383_s30 }
  0x75   :  { %s18403_s30 = sld [smem:[%s20174_s0 + %s18008_s22]]   ;;  %s18012_s22 = smov 68  }
  0x76   :  { %20251 = sst [smem:[#allocation126_spill]] %s18393_s13 }
  0x77   :  { %s18413_s13 = sld [smem:[%s20174_s0 + %s18010_s7]]   ;;  %s18014_s7 = smov 70  }
  0x78   :  { %20253 = sst [smem:[#allocation128_spill]] %s18408_s12 }
  0x79   :  { %s18428_s12 = sld [smem:[%s20174_s0 + %s18013_s28]]   ;;  %s18017_s28 = smov 73  }
  0x7a   :  { %s18438_s6 = sld [smem:[%s20174_s0 + %s18015_s15]]   ;;  %s18019_s15 = smov 75  }
  0x7b   :  { %20252 = sst [smem:[#allocation127_spill]] %s18403_s30 }
  0x7c   :  { %s18423_s30 = sld [smem:[%s20174_s0 + %s18012_s22]]   ;;  %s18016_s22 = smov 72  }
  0x7d   :  { %20254 = sst [smem:[#allocation129_spill]] %s18413_s13 }
  0x7e   :  { %s18433_s13 = sld [smem:[%s20174_s0 + %s18014_s7]]   ;;  %s18018_s7 = smov 74  }
  0x7f   :  { %20256 = sst [smem:[#allocation131_spill]] %s18428_s12 }
  0x80   :  { %20258 = sst [smem:[#allocation133_spill]] %s18438_s6 }
  0x81   :  { %s18448_s12 = sld [smem:[%s20174_s0 + %s18017_s28]]   ;;  %s18021_s28 = smov 77  }
  0x82   :  { %20255 = sst [smem:[#allocation130_spill]] %s18423_s30 }
  0x83   :  { %s18443_s30 = sld [smem:[%s20174_s0 + %s18016_s22]]   ;;  %s18020_s22 = smov 76  }
  0x84   :  { %20257 = sst [smem:[#allocation132_spill]] %s18433_s13 }
  0x85   :  { %s18453_s13 = sld [smem:[%s20174_s0 + %s18018_s7]]  }
  0x86   :  { %s18458_s6 = sld [smem:[%s20174_s0 + %s18019_s15]]  }
  0x87   :  { %20260 = sst [smem:[#allocation135_spill]] %s18448_s12 }
  0x88   :  { %s18468_s12 = sld [smem:[%s20174_s0 + %s18021_s28]]  }
  0x89   :  { %20259 = sst [smem:[#allocation134_spill]] %s18443_s30 }
  0x8a   :  { %s18463_s30 = sld [smem:[%s20174_s0 + %s18020_s22]]  }
  0x8b   :  { %160 = vsyncpa [#allocation3], 0 }
  0x8c   :  { %161 = vsyncpa [#allocation6], 0 }
  0x8d   :  { %162 = vsyncpa [#allocation9], 0 }
  0x8e   :  { %163 = vsyncpa [#allocation12], 0 }
  0x8f   :  { %164 = vsyncpa [#allocation15], 0 }
  0x90   :  { %165 = vsyncpa [#allocation18], 0 }
  0x91   :  { %166 = vsyncpa [#allocation21], 0 }
  0x92   :  { %167 = vsyncpa [#allocation24], 0 }
  0x93   :  { %168 = vsyncpa [#allocation27], 0 }
  0x94   :  { %169 = vsyncpa [#allocation30], 0 }
  0x95   :  { %170 = vsyncpa [#allocation33], 0 }
  0x96   :  { %171 = vsyncpa [#allocation36], 0 }
  0x97   :  { %172 = vsyncpa [#allocation39], 0 }
  0x98   :  { %173 = vsyncpa [#allocation42], 0 }
  0x99   :  { %174 = vsyncpa [#allocation45], 0 }
  0x9a   :  { %175 = vsyncpa [#allocation48], 0 }
  0x9b   :  { %176 = vsyncpa [#allocation51], 0 }
  0x9c   :  { %177 = vsyncpa [#allocation54], 0 }
  0x9d   :  { %178 = vsyncpa [#allocation4], 0  ;;  %s18022_s0 = smov [#allocation5]   ;;  %s18023_s10 = smov [#allocation8]  }
  0x9e   :  { %s243_s7 = sshll.u32 %s18022_s0, 4  ;;  %s271_s11 = sshll.u32 %s18023_s10, 4  ;;  %s244_s7 = int_to_ptr.vmem [resolvable:$true] %s243_s7  ;;  %s272_s11 = int_to_ptr.vmem [resolvable:$true] %s271_s11 }
  0x9f   :  { %s17195_s15 = scalar_lea.vmem %s244_s7, 16  ;;  %s17199_s16 = scalar_lea.vmem %s244_s7, 32 }
  0xa0   :  { %p17196_p0 = scmp.ne.s32.totalorder %s244_s7, %s17195_s15  ;;  %p17200_p1 = scmp.lt.s32.totalorder %s244_s7, %s244_s7 }
  0xa1   :  { %p17201_p2 = scmp.lt.s32.totalorder %s17199_s16, %s17195_s15 }
  0xa3   :  { %p17202_p3 = por %p17201_p2, %p17200_p1 }
  0xa5   :  { %p17203_p4 = pnand %p17202_p3, %p17196_p0 }
  0xa7   :  { %17206 = shalt.err (!%p17203_p4)
}
  0xa8   :  { %246 = dma.hbm_to_vmem [thread:$0]  %s18208_s3, 16, %s244_s7, [#allocation6]  }
  0xa9   :  { %s17215_s18 = scalar_lea.vmem %s272_s11, 16  ;;  %s17219_s22 = scalar_lea.vmem %s272_s11, 32 }
  0xaa   :  { %p17216_p5 = scmp.ne.s32.totalorder %s272_s11, %s17215_s18  ;;  %p17220_p6 = scmp.lt.s32.totalorder %s272_s11, %s272_s11 }
  0xab   :  { %p17221_p7 = scmp.lt.s32.totalorder %s17219_s22, %s17215_s18 }
  0xad   :  { %p17222_p8 = por %p17221_p7, %p17220_p6 }
  0xaf   :  { %p17223_p9 = pnand %p17222_p8, %p17216_p5 }
  0xb1   :  { %17226 = shalt.err (!%p17223_p9)
}
  0xb2   :  { %274 = dma.hbm_to_vmem [thread:$0]  %s18238_s8, 16, %s272_s11, [#allocation9]  }
  0xb3   :  { %s18024_s23 = smov [#allocation11]   ;;  %s18025_s28 = smov [#allocation14]  }
  0xb4   :  { %s291_s26 = sshll.u32 %s18024_s23, 4  ;;  %s311_s1 = sshll.u32 %s18025_s28, 4  ;;  %s292_s26 = int_to_ptr.vmem [resolvable:$true] %s291_s26  ;;  %s312_s1 = int_to_ptr.vmem [resolvable:$true] %s311_s1 }
  0xb5   :  { %s17235_s2 = scalar_lea.vmem %s292_s26, 16  ;;  %s17239_s0 = scalar_lea.vmem %s292_s26, 32 }
  0xb6   :  { %p17236_p10 = scmp.ne.s32.totalorder %s292_s26, %s17235_s2  ;;  %p17240_p11 = scmp.lt.s32.totalorder %s292_s26, %s292_s26 }
  0xb7   :  { %p17241_p12 = scmp.lt.s32.totalorder %s17239_s0, %s17235_s2 }
  0xb9   :  { %p17242_p13 = por %p17241_p12, %p17240_p11 }
  0xbb   :  { %p17243_p0 = pnand %p17242_p13, %p17236_p10 }
  0xbd   :  { %17246 = shalt.err (!%p17243_p0)
}
  0xbe   :  { %294 = dma.hbm_to_vmem [thread:$0]  %s18248_s21, 16, %s292_s26, [#allocation12]  }
  0xbf   :  { %s17255_s3 = scalar_lea.vmem %s312_s1, 16  ;;  %s17259_s7 = scalar_lea.vmem %s312_s1, 32 }
  0xc0   :  { %p17256_p1 = scmp.ne.s32.totalorder %s312_s1, %s17255_s3  ;;  %p17260_p2 = scmp.lt.s32.totalorder %s312_s1, %s312_s1 }
  0xc1   :  { %p17261_p3 = scmp.lt.s32.totalorder %s17259_s7, %s17255_s3 }
  0xc3   :  { %p17262_p4 = por %p17261_p3, %p17260_p2 }
  0xc5   :  { %p17263_p5 = pnand %p17262_p4, %p17256_p1 }
  0xc7   :  { %17266 = shalt.err (!%p17263_p5)
}
  0xc8   :  { %314 = dma.hbm_to_vmem [thread:$0]  %s18258_s9, 16, %s312_s1, [#allocation15]  }
  0xc9   :  { %s18026_s8 = smov [#allocation17]   ;;  %s18027_s11 = smov [#allocation20]  }
  0xca   :  { %s331_s10 = sshll.u32 %s18026_s8, 4  ;;  %s355_s15 = sshll.u32 %s18027_s11, 4  ;;  %s332_s10 = int_to_ptr.vmem [resolvable:$true] %s331_s10  ;;  %s356_s15 = int_to_ptr.vmem [resolvable:$true] %s355_s15 }
  0xcb   :  { %s17275_s16 = scalar_lea.vmem %s332_s10, 16  ;;  %s17279_s18 = scalar_lea.vmem %s332_s10, 32 }
  0xcc   :  { %p17276_p6 = scmp.ne.s32.totalorder %s332_s10, %s17275_s16  ;;  %p17280_p7 = scmp.lt.s32.totalorder %s332_s10, %s332_s10 }
  0xcd   :  { %p17281_p8 = scmp.lt.s32.totalorder %s17279_s18, %s17275_s16 }
  0xcf   :  { %p17282_p9 = por %p17281_p8, %p17280_p7 }
  0xd1   :  { %p17283_p10 = pnand %p17282_p9, %p17276_p6 }
  0xd3   :  { %17286 = shalt.err (!%p17283_p10)
}
  0xd4   :  { %334 = dma.hbm_to_vmem [thread:$0]  %s18268_s24, 16, %s332_s10, [#allocation18]  }
  0xd5   :  { %s17295_s21 = scalar_lea.vmem %s356_s15, 16  ;;  %s17299_s22 = scalar_lea.vmem %s356_s15, 32 }
  0xd6   :  { %p17296_p11 = scmp.ne.s32.totalorder %s356_s15, %s17295_s21  ;;  %p17300_p12 = scmp.lt.s32.totalorder %s356_s15, %s356_s15 }
  0xd7   :  { %p17301_p13 = scmp.lt.s32.totalorder %s17299_s22, %s17295_s21 }
  0xd9   :  { %p17302_p0 = por %p17301_p13, %p17300_p12 }
  0xdb   :  { %p17303_p1 = pnand %p17302_p0, %p17296_p11 }
  0xdd   :  { %17306 = shalt.err (!%p17303_p1)
}
  0xde   :  { %358 = dma.hbm_to_vmem [thread:$0]  %s18288_s4, 16, %s356_s15, [#allocation21]  }
  0xdf   :  { %s18028_s9 = smov [#allocation23]   ;;  %s18029_s26 = smov [#allocation26]  }
  0xe0   :  { %s379_s23 = sshll.u32 %s18028_s9, 4  ;;  %s401_s28 = sshll.u32 %s18029_s26, 4  ;;  %s380_s23 = int_to_ptr.vmem [resolvable:$true] %s379_s23  ;;  %s402_s28 = int_to_ptr.vmem [resolvable:$true] %s401_s28 }
  0xe1   :  { %s17315_s1 = scalar_lea.vmem %s380_s23, 16  ;;  %s17319_s2 = scalar_lea.vmem %s380_s23, 32 }
  0xe2   :  { %p17316_p2 = scmp.ne.s32.totalorder %s380_s23, %s17315_s1  ;;  %p17320_p3 = scmp.lt.s32.totalorder %s380_s23, %s380_s23 }
  0xe3   :  { %p17321_p4 = scmp.lt.s32.totalorder %s17319_s2, %s17315_s1 }
  0xe5   :  { %p17322_p5 = por %p17321_p4, %p17320_p3 }
  0xe7   :  { %p17323_p6 = pnand %p17322_p5, %p17316_p2 }
  0xe9   :  { %17326 = shalt.err (!%p17323_p6)
}
  0xea   :  { %382 = dma.hbm_to_vmem [thread:$0]  %s18308_s20, 16, %s380_s23, [#allocation24]  }
  0xeb   :  { %s17335_s24 = scalar_lea.vmem %s402_s28, 16  ;;  %s17339_s0 = scalar_lea.vmem %s402_s28, 32 }
  0xec   :  { %p17336_p7 = scmp.ne.s32.totalorder %s402_s28, %s17335_s24  ;;  %p17340_p8 = scmp.lt.s32.totalorder %s402_s28, %s402_s28 }
  0xed   :  { %p17341_p9 = scmp.lt.s32.totalorder %s17339_s0, %s17335_s24 }
  0xef   :  { %p17342_p10 = por %p17341_p9, %p17340_p8 }
  0xf1   :  { %p17343_p11 = pnand %p17342_p10, %p17336_p7 }
  0xf3   :  { %17346 = shalt.err (!%p17343_p11)
}
  0xf4   :  { %404 = dma.hbm_to_vmem [thread:$0]  %s18323_s29, 16, %s402_s28, [#allocation27]  }
  0xf5   :  { %s18030_s4 = smov [#allocation29]   ;;  %s18031_s7 = smov [#allocation32]  }
  0xf6   :  { %s421_s3 = sshll.u32 %s18030_s4, 4  ;;  %s443_s8 = sshll.u32 %s18031_s7, 4  ;;  %s422_s3 = int_to_ptr.vmem [resolvable:$true] %s421_s3  ;;  %s444_s8 = int_to_ptr.vmem [resolvable:$true] %s443_s8 }
  0xf7   :  { %s17355_s10 = scalar_lea.vmem %s422_s3, 16  ;;  %s17359_s11 = scalar_lea.vmem %s422_s3, 32 }
  0xf8   :  { %p17356_p12 = scmp.ne.s32.totalorder %s422_s3, %s17355_s10  ;;  %p17360_p13 = scmp.lt.s32.totalorder %s422_s3, %s422_s3 }
  0xf9   :  { %p17361_p0 = scmp.lt.s32.totalorder %s17359_s11, %s17355_s10 }
  0xfb   :  { %p17362_p1 = por %p17361_p0, %p17360_p13 }
  0xfd   :  { %p17363_p2 = pnand %p17362_p1, %p17356_p12 }
  0xff   :  { %17366 = shalt.err (!%p17363_p2)
}
 0x100   :  { %424 = dma.hbm_to_vmem [thread:$0]  %s18333_s27, 16, %s422_s3, [#allocation30]  }
 0x101   :  { %s17375_s20 = scalar_lea.vmem %s444_s8, 16  ;;  %s17379_s15 = scalar_lea.vmem %s444_s8, 32 }
 0x102   :  { %p17376_p3 = scmp.ne.s32.totalorder %s444_s8, %s17375_s20  ;;  %p17380_p4 = scmp.lt.s32.totalorder %s444_s8, %s444_s8 }
 0x103   :  { %p17381_p5 = scmp.lt.s32.totalorder %s17379_s15, %s17375_s20 }
 0x105   :  { %p17382_p6 = por %p17381_p5, %p17380_p4 }
 0x107   :  { %p17383_p7 = pnand %p17382_p6, %p17376_p3 }
 0x109   :  { %17386 = shalt.err (!%p17383_p7)
}
 0x10a   :  { %446 = dma.hbm_to_vmem [thread:$0]  %s18348_s5, 16, %s444_s8, [#allocation33]  }
 0x10b   :  { %s18032_s29 = smov [#allocation35]   ;;  %s18033_s18 = smov [#allocation38]  }
 0x10c   :  { %s471_s16 = sshll.u32 %s18032_s29, 4  ;;  %s491_s21 = sshll.u32 %s18033_s18, 4  ;;  %s472_s16 = int_to_ptr.vmem [resolvable:$true] %s471_s16  ;;  %s492_s21 = int_to_ptr.vmem [resolvable:$true] %s491_s21 }
 0x10d   :  { %s17395_s22 = scalar_lea.vmem %s472_s16, 16  ;;  %s17399_s9 = scalar_lea.vmem %s472_s16, 32 }
 0x10e   :  { %p17396_p8 = scmp.ne.s32.totalorder %s472_s16, %s17395_s22  ;;  %p17400_p9 = scmp.lt.s32.totalorder %s472_s16, %s472_s16 }
 0x10f   :  { %p17401_p10 = scmp.lt.s32.totalorder %s17399_s9, %s17395_s22 }
 0x111   :  { %p17402_p11 = por %p17401_p10, %p17400_p9 }
 0x113   :  { %p17403_p12 = pnand %p17402_p11, %p17396_p8 }
 0x115   :  { %17406 = shalt.err (!%p17403_p12)
}
 0x116   :  { %474 = dma.hbm_to_vmem [thread:$0]  %s18378_s14, 16, %s472_s16, [#allocation36]  }
 0x117   :  { %s17415_s27 = scalar_lea.vmem %s492_s21, 16  ;;  %s17419_s23 = scalar_lea.vmem %s492_s21, 32 }
 0x118   :  { %p17416_p13 = scmp.ne.s32.totalorder %s492_s21, %s17415_s27  ;;  %p17420_p0 = scmp.lt.s32.totalorder %s492_s21, %s492_s21 }
 0x119   :  { %p17421_p1 = scmp.lt.s32.totalorder %s17419_s23, %s17415_s27 }
 0x11b   :  { %p17422_p2 = por %p17421_p1, %p17420_p0 }
 0x11d   :  { %p17423_p3 = pnand %p17422_p2, %p17416_p13 }
 0x11f   :  { %17426 = shalt.err (!%p17423_p3)
}
 0x120   :  { %494 = dma.hbm_to_vmem [thread:$0]  %s18388_s25, 16, %s492_s21, [#allocation39]  }
 0x121   :  { %s18034_s5 = smov [#allocation41]   ;;  %s18035_s28 = smov [#allocation44]  }
 0x122   :  { %s511_s26 = sshll.u32 %s18034_s5, 4  ;;  %s535_s1 = sshll.u32 %s18035_s28, 4  ;;  %s512_s26 = int_to_ptr.vmem [resolvable:$true] %s511_s26  ;;  %s536_s1 = int_to_ptr.vmem [resolvable:$true] %s535_s1 }
 0x123   :  { %s17435_s2 = scalar_lea.vmem %s512_s26, 16  ;;  %s17439_s24 = scalar_lea.vmem %s512_s26, 32 }
 0x124   :  { %p17436_p4 = scmp.ne.s32.totalorder %s512_s26, %s17435_s2  ;;  %p17440_p5 = scmp.lt.s32.totalorder %s512_s26, %s512_s26 }
 0x125   :  { %p17441_p6 = scmp.lt.s32.totalorder %s17439_s24, %s17435_s2 }
 0x127   :  { %p17442_p7 = por %p17441_p6, %p17440_p5 }
 0x129   :  { %p17443_p8 = pnand %p17442_p7, %p17436_p4 }
 0x12b   :  { %17446 = shalt.err (!%p17443_p8)
}
 0x12c   :  { %514 = dma.hbm_to_vmem [thread:$0]  %s18398_s19, 16, %s512_s26, [#allocation42]  }
 0x12d   :  { %s17455_s14 = scalar_lea.vmem %s536_s1, 16  ;;  %s17459_s0 = scalar_lea.vmem %s536_s1, 32 }
 0x12e   :  { %p17456_p9 = scmp.ne.s32.totalorder %s536_s1, %s17455_s14  ;;  %p17460_p10 = scmp.lt.s32.totalorder %s536_s1, %s536_s1 }
 0x12f   :  { %p17461_p11 = scmp.lt.s32.totalorder %s17459_s0, %s17455_s14 }
 0x131   :  { %p17462_p12 = por %p17461_p11, %p17460_p10 }
 0x133   :  { %p17463_p13 = pnand %p17462_p12, %p17456_p9 }
 0x135   :  { %17466 = shalt.err (!%p17463_p13)
}
 0x136   :  { %538 = dma.hbm_to_vmem [thread:$0]  %s18418_s17, 16, %s536_s1, [#allocation45]  }
 0x137   :  { %s18036_s25 = smov [#allocation47]   ;;  %s18037_s3 = smov [#allocation50]  }
 0x138   :  { %s555_s4 = sshll.u32 %s18036_s25, 4  ;;  %s575_s7 = sshll.u32 %s18037_s3, 4  ;;  %s556_s4 = int_to_ptr.vmem [resolvable:$true] %s555_s4  ;;  %s576_s7 = int_to_ptr.vmem [resolvable:$true] %s575_s7 }
 0x139   :  { %s17475_s8 = scalar_lea.vmem %s556_s4, 16  ;;  %s17479_s10 = scalar_lea.vmem %s556_s4, 32 }
 0x13a   :  { %p17476_p0 = scmp.ne.s32.totalorder %s556_s4, %s17475_s8  ;;  %p17480_p1 = scmp.lt.s32.totalorder %s556_s4, %s556_s4 }
 0x13b   :  { %p17481_p2 = scmp.lt.s32.totalorder %s17479_s10, %s17475_s8 }
 0x13d   :  { %p17482_p3 = por %p17481_p2, %p17480_p1 }
 0x13f   :  { %p17483_p4 = pnand %p17482_p3, %p17476_p0 }
 0x141   :  { %17486 = shalt.err (!%p17483_p4)
}
 0x142   :  { %s20261_s19 = sld [smem:[#allocation131_spill]]  ;;  %s17495_s11 = scalar_lea.vmem %s576_s7, 16 }
 0x143   :  { %p17496_p5 = scmp.ne.s32.totalorder %s576_s7, %s17495_s11  ;;  %s17499_s20 = scalar_lea.vmem %s576_s7, 32 }
 0x144   :  { %p17500_p6 = scmp.lt.s32.totalorder %s576_s7, %s576_s7  ;;  %p17501_p7 = scmp.lt.s32.totalorder %s17499_s20, %s17495_s11 }
 0x146   :  { %p17502_p8 = por %p17501_p7, %p17500_p6 }
 0x148   :  { %558 = dma.hbm_to_vmem [thread:$0]  %s20261_s19, 16, %s556_s4, [#allocation48]  }
 0x149   :  { %p17503_p9 = pnand %p17502_p8, %p17496_p5 }
 0x14b   :  { %17506 = shalt.err (!%p17503_p9)
}
 0x14c   :  { %s20262_s17 = sld [smem:[#allocation133_spill]]  ;;  %s18038_s15 = smov [#allocation53]  }
 0x14d   :  { %s597_s29 = sshll.u32 %s18038_s15, 4  ;;  %s18039_s16 = smov [#allocation2]   ;;  %s598_s29 = int_to_ptr.vmem [resolvable:$true] %s597_s29 }
 0x14e   :  { %s231_s18 = sshll.u32 %s18039_s16, 4  ;;  %s17515_s21 = scalar_lea.vmem %s598_s29, 16  ;;  %s232_s18 = int_to_ptr.vmem [resolvable:$true] %s231_s18 }
 0x14f   :  { %p17516_p10 = scmp.ne.s32.totalorder %s598_s29, %s17515_s21  ;;  %s17519_s22 = scalar_lea.vmem %s598_s29, 32 }
 0x150   :  { %p17520_p11 = scmp.lt.s32.totalorder %s598_s29, %s598_s29  ;;  %p17521_p12 = scmp.lt.s32.totalorder %s17519_s22, %s17515_s21 }
 0x152   :  { %578 = dma.hbm_to_vmem [thread:$0]  %s20262_s17, 16, %s576_s7, [#allocation51]  }
 0x153   :  { %p17522_p13 = por %p17521_p12, %p17520_p11 }
 0x155   :  { %p17523_p0 = pnand %p17522_p13, %p17516_p10 }
 0x157   :  { %17526 = shalt.err (!%p17523_p0)
}
 0x158   :  { %600 = dma.hbm_to_vmem [thread:$0]  %s18453_s13, 16, %s598_s29, [#allocation54]  }
 0x159   :  { %s17535_s9 = scalar_lea.vmem %s232_s18, 16  ;;  %s17539_s27 = scalar_lea.vmem %s232_s18, 32 }
 0x15a   :  { %p17536_p1 = scmp.ne.s32.totalorder %s232_s18, %s17535_s9  ;;  %p17540_p2 = scmp.lt.s32.totalorder %s232_s18, %s232_s18 }
 0x15b   :  { %p17541_p3 = scmp.lt.s32.totalorder %s17539_s27, %s17535_s9 }
 0x15d   :  { %p17542_p4 = por %p17541_p3, %p17540_p2 }
 0x15f   :  { %p17543_p5 = pnand %p17542_p4, %p17536_p1 }
 0x161   :  { %17546 = shalt.err (!%p17543_p5)
}
 0x162   :  { %s20263_s23 = sld [smem:[#allocation99_spill]]  ;;  %s18040_s5 = smov [#allocation7]  }
 0x163   :  { %s259_s26 = sshll.u32 %s18040_s5, 4  ;;  %s18041_s28 = smov [#allocation10]   ;;  %s260_s26 = int_to_ptr.vmem [resolvable:$true] %s259_s26 }
 0x164   :  { %s281_s1 = sshll.u32 %s18041_s28, 4  ;;  %s17555_s2 = scalar_lea.vmem %s260_s26, 16  ;;  %s282_s1 = int_to_ptr.vmem [resolvable:$true] %s281_s1 }
 0x165   :  { %p17556_p6 = scmp.ne.s32.totalorder %s260_s26, %s17555_s2  ;;  %s17559_s24 = scalar_lea.vmem %s260_s26, 32 }
 0x166   :  { %p17560_p7 = scmp.lt.s32.totalorder %s260_s26, %s260_s26  ;;  %p17561_p8 = scmp.lt.s32.totalorder %s17559_s24, %s17555_s2 }
 0x168   :  { %234 = dma.hbm_to_vmem [thread:$0]  %s20263_s23, 16, %s232_s18, [#allocation3]  }
 0x169   :  { %p17562_p9 = por %p17561_p8, %p17560_p7 }
 0x16b   :  { %p17563_p10 = pnand %p17562_p9, %p17556_p6 }
 0x16d   :  { %17566 = shalt.err (!%p17563_p10)
}
 0x16e   :  { %s20264_s13 = sld [smem:[#allocation104_spill]]  ;;  %s17575_s14 = scalar_lea.vmem %s282_s1, 16 }
 0x16f   :  { %p17576_p11 = scmp.ne.s32.totalorder %s282_s1, %s17575_s14  ;;  %s17579_s0 = scalar_lea.vmem %s282_s1, 32 }
 0x170   :  { %p17580_p12 = scmp.lt.s32.totalorder %s282_s1, %s282_s1  ;;  %p17581_p13 = scmp.lt.s32.totalorder %s17579_s0, %s17575_s14 }
 0x172   :  { %p17582_p0 = por %p17581_p13, %p17580_p12 }
 0x174   :  { %262 = dma.hbm_to_vmem [thread:$0]  %s20264_s13, 16, %s260_s26, [#allocation6]  }
 0x175   :  { %p17583_p1 = pnand %p17582_p0, %p17576_p11 }
 0x177   :  { %17586 = shalt.err (!%p17583_p1)
}
 0x178   :  { %s20265_s25 = sld [smem:[#allocation106_spill]]  ;;  %s18042_s4 = smov [#allocation13]  }
 0x179   :  { %s301_s3 = sshll.u32 %s18042_s4, 4  ;;  %s18043_s7 = smov [#allocation16]   ;;  %s302_s3 = int_to_ptr.vmem [resolvable:$true] %s301_s3 }
 0x17a   :  { %s321_s8 = sshll.u32 %s18043_s7, 4  ;;  %s17595_s10 = scalar_lea.vmem %s302_s3, 16  ;;  %s322_s8 = int_to_ptr.vmem [resolvable:$true] %s321_s8 }
 0x17b   :  { %p17596_p2 = scmp.ne.s32.totalorder %s302_s3, %s17595_s10  ;;  %s17599_s19 = scalar_lea.vmem %s302_s3, 32 }
 0x17c   :  { %p17600_p3 = scmp.lt.s32.totalorder %s302_s3, %s302_s3  ;;  %p17601_p4 = scmp.lt.s32.totalorder %s17599_s19, %s17595_s10 }
 0x17e   :  { %284 = dma.hbm_to_vmem [thread:$0]  %s20265_s25, 16, %s282_s1, [#allocation9]  }
 0x17f   :  { %p17602_p5 = por %p17601_p4, %p17600_p3 }
 0x181   :  { %p17603_p6 = pnand %p17602_p5, %p17596_p2 }
 0x183   :  { %17606 = shalt.err (!%p17603_p6)
}
 0x184   :  { %s20266_s11 = sld [smem:[#allocation107_spill]]  ;;  %s17615_s20 = scalar_lea.vmem %s322_s8, 16 }
 0x185   :  { %p17616_p7 = scmp.ne.s32.totalorder %s322_s8, %s17615_s20  ;;  %s17619_s17 = scalar_lea.vmem %s322_s8, 32 }
 0x186   :  { %p17620_p8 = scmp.lt.s32.totalorder %s322_s8, %s322_s8  ;;  %p17621_p9 = scmp.lt.s32.totalorder %s17619_s17, %s17615_s20 }
 0x188   :  { %p17622_p10 = por %p17621_p9, %p17620_p8 }
 0x18a   :  { %304 = dma.hbm_to_vmem [thread:$0]  %s20266_s11, 16, %s302_s3, [#allocation12]  }
 0x18b   :  { %p17623_p11 = pnand %p17622_p10, %p17616_p7 }
 0x18d   :  { %17626 = shalt.err (!%p17623_p11)
}
 0x18e   :  { %s20267_s15 = sld [smem:[#allocation108_spill]]  ;;  %s18044_s29 = smov [#allocation19]  }
 0x18f   :  { %s343_s16 = sshll.u32 %s18044_s29, 4  ;;  %s18045_s18 = smov [#allocation22]   ;;  %s344_s16 = int_to_ptr.vmem [resolvable:$true] %s343_s16 }
 0x190   :  { %s365_s21 = sshll.u32 %s18045_s18, 4  ;;  %s17635_s22 = scalar_lea.vmem %s344_s16, 16  ;;  %s366_s21 = int_to_ptr.vmem [resolvable:$true] %s365_s21 }
 0x191   :  { %p17636_p12 = scmp.ne.s32.totalorder %s344_s16, %s17635_s22  ;;  %s17639_s9 = scalar_lea.vmem %s344_s16, 32 }
 0x192   :  { %p17640_p13 = scmp.lt.s32.totalorder %s344_s16, %s344_s16  ;;  %p17641_p0 = scmp.lt.s32.totalorder %s17639_s9, %s17635_s22 }
 0x194   :  { %324 = dma.hbm_to_vmem [thread:$0]  %s20267_s15, 16, %s322_s8, [#allocation15]  }
 0x195   :  { %p17642_p1 = por %p17641_p0, %p17640_p13 }
 0x197   :  { %p17643_p2 = pnand %p17642_p1, %p17636_p12 }
 0x199   :  { %17646 = shalt.err (!%p17643_p2)
}
 0x19a   :  { %s20268_s27 = sld [smem:[#allocation110_spill]]  ;;  %s17655_s23 = scalar_lea.vmem %s366_s21, 16 }
 0x19b   :  { %p17656_p3 = scmp.ne.s32.totalorder %s366_s21, %s17655_s23  ;;  %s17659_s5 = scalar_lea.vmem %s366_s21, 32 }
 0x19c   :  { %p17660_p4 = scmp.lt.s32.totalorder %s366_s21, %s366_s21  ;;  %p17661_p5 = scmp.lt.s32.totalorder %s17659_s5, %s17655_s23 }
 0x19e   :  { %p17662_p6 = por %p17661_p5, %p17660_p4 }
 0x1a0   :  { %346 = dma.hbm_to_vmem [thread:$0]  %s20268_s27, 16, %s344_s16, [#allocation18]  }
 0x1a1   :  { %p17663_p7 = pnand %p17662_p6, %p17656_p3 }
 0x1a3   :  { %17666 = shalt.err (!%p17663_p7)
}
 0x1a4   :  { %s20269_s26 = sld [smem:[#allocation112_spill]]  ;;  %s18046_s28 = smov [#allocation25]  }
 0x1a5   :  { %s391_s1 = sshll.u32 %s18046_s28, 4  ;;  %s18047_s2 = smov [#allocation28]   ;;  %s392_s1 = int_to_ptr.vmem [resolvable:$true] %s391_s1 }
 0x1a6   :  { %s411_s24 = sshll.u32 %s18047_s2, 4  ;;  %s17675_s13 = scalar_lea.vmem %s392_s1, 16  ;;  %s412_s24 = int_to_ptr.vmem [resolvable:$true] %s411_s24 }
 0x1a7   :  { %p17676_p8 = scmp.ne.s32.totalorder %s392_s1, %s17675_s13  ;;  %s17679_s14 = scalar_lea.vmem %s392_s1, 32 }
 0x1a8   :  { %p17680_p9 = scmp.lt.s32.totalorder %s392_s1, %s392_s1  ;;  %p17681_p10 = scmp.lt.s32.totalorder %s17679_s14, %s17675_s13 }
 0x1aa   :  { %368 = dma.hbm_to_vmem [thread:$0]  %s20269_s26, 16, %s366_s21, [#allocation21]  }
 0x1ab   :  { %p17682_p11 = por %p17681_p10, %p17680_p9 }
 0x1ad   :  { %p17683_p12 = pnand %p17682_p11, %p17676_p8 }
 0x1af   :  { %17686 = shalt.err (!%p17683_p12)
}
 0x1b0   :  { %s20270_s0 = sld [smem:[#allocation116_spill]]  ;;  %s17695_s25 = scalar_lea.vmem %s412_s24, 16 }
 0x1b1   :  { %p17696_p13 = scmp.ne.s32.totalorder %s412_s24, %s17695_s25  ;;  %s17699_s4 = scalar_lea.vmem %s412_s24, 32 }
 0x1b2   :  { %p17700_p0 = scmp.lt.s32.totalorder %s412_s24, %s412_s24  ;;  %p17701_p1 = scmp.lt.s32.totalorder %s17699_s4, %s17695_s25 }
 0x1b4   :  { %p17702_p2 = por %p17701_p1, %p17700_p0 }
 0x1b6   :  { %394 = dma.hbm_to_vmem [thread:$0]  %s20270_s0, 16, %s392_s1, [#allocation24]  }
 0x1b7   :  { %p17703_p3 = pnand %p17702_p2, %p17696_p13 }
 0x1b9   :  { %17706 = shalt.err (!%p17703_p3)
}
 0x1ba   :  { %s20271_s3 = sld [smem:[#allocation117_spill]]  ;;  %s18048_s7 = smov [#allocation31]  }
 0x1bb   :  { %s431_s8 = sshll.u32 %s18048_s7, 4  ;;  %s18049_s10 = smov [#allocation34]   ;;  %s432_s8 = int_to_ptr.vmem [resolvable:$true] %s431_s8 }
 0x1bc   :  { %s459_s19 = sshll.u32 %s18049_s10, 4  ;;  %s17715_s11 = scalar_lea.vmem %s432_s8, 16  ;;  %s460_s19 = int_to_ptr.vmem [resolvable:$true] %s459_s19 }
 0x1bd   :  { %p17716_p4 = scmp.ne.s32.totalorder %s432_s8, %s17715_s11  ;;  %s17719_s20 = scalar_lea.vmem %s432_s8, 32 }
 0x1be   :  { %p17720_p5 = scmp.lt.s32.totalorder %s432_s8, %s432_s8  ;;  %p17721_p6 = scmp.lt.s32.totalorder %s17719_s20, %s17715_s11 }
 0x1c0   :  { %414 = dma.hbm_to_vmem [thread:$0]  %s20271_s3, 16, %s412_s24, [#allocation27]  }
 0x1c1   :  { %p17722_p7 = por %p17721_p6, %p17720_p5 }
 0x1c3   :  { %p17723_p8 = pnand %p17722_p7, %p17716_p4 }
 0x1c5   :  { %17726 = shalt.err (!%p17723_p8)
}
 0x1c6   :  { %s20272_s17 = sld [smem:[#allocation118_spill]]  ;;  %s17735_s15 = scalar_lea.vmem %s460_s19, 16 }
 0x1c7   :  { %p17736_p9 = scmp.ne.s32.totalorder %s460_s19, %s17735_s15  ;;  %s17739_s29 = scalar_lea.vmem %s460_s19, 32 }
 0x1c8   :  { %p17740_p10 = scmp.lt.s32.totalorder %s460_s19, %s460_s19  ;;  %p17741_p11 = scmp.lt.s32.totalorder %s17739_s29, %s17735_s15 }
 0x1ca   :  { %p17742_p12 = por %p17741_p11, %p17740_p10 }
 0x1cc   :  { %434 = dma.hbm_to_vmem [thread:$0]  %s20272_s17, 16, %s432_s8, [#allocation30]  }
 0x1cd   :  { %p17743_p13 = pnand %p17742_p12, %p17736_p9 }
 0x1cf   :  { %17746 = shalt.err (!%p17743_p13)
}
 0x1d0   :  { %s20273_s16 = sld [smem:[#allocation123_spill]]  ;;  %s18050_s18 = smov [#allocation37]  }
 0x1d1   :  { %s481_s21 = sshll.u32 %s18050_s18, 4  ;;  %s18051_s22 = smov [#allocation40]   ;;  %s482_s21 = int_to_ptr.vmem [resolvable:$true] %s481_s21 }
 0x1d2   :  { %s501_s9 = sshll.u32 %s18051_s22, 4  ;;  %s17755_s27 = scalar_lea.vmem %s482_s21, 16  ;;  %s502_s9 = int_to_ptr.vmem [resolvable:$true] %s501_s9 }
 0x1d3   :  { %p17756_p0 = scmp.ne.s32.totalorder %s482_s21, %s17755_s27  ;;  %s17759_s23 = scalar_lea.vmem %s482_s21, 32 }
 0x1d4   :  { %p17760_p1 = scmp.lt.s32.totalorder %s482_s21, %s482_s21  ;;  %p17761_p2 = scmp.lt.s32.totalorder %s17759_s23, %s17755_s27 }
 0x1d6   :  { %462 = dma.hbm_to_vmem [thread:$0]  %s20273_s16, 16, %s460_s19, [#allocation33]  }
 0x1d7   :  { %p17762_p3 = por %p17761_p2, %p17760_p1 }
 0x1d9   :  { %p17763_p4 = pnand %p17762_p3, %p17756_p0 }
 0x1db   :  { %17766 = shalt.err (!%p17763_p4)
}
 0x1dc   :  { %s20274_s5 = sld [smem:[#allocation125_spill]]  ;;  %s17775_s26 = scalar_lea.vmem %s502_s9, 16 }
 0x1dd   :  { %p17776_p5 = scmp.ne.s32.totalorder %s502_s9, %s17775_s26  ;;  %s17779_s28 = scalar_lea.vmem %s502_s9, 32 }
 0x1de   :  { %p17780_p6 = scmp.lt.s32.totalorder %s502_s9, %s502_s9  ;;  %p17781_p7 = scmp.lt.s32.totalorder %s17779_s28, %s17775_s26 }
 0x1e0   :  { %p17782_p8 = por %p17781_p7, %p17780_p6 }
 0x1e2   :  { %484 = dma.hbm_to_vmem [thread:$0]  %s20274_s5, 16, %s482_s21, [#allocation36]  }
 0x1e3   :  { %p17783_p9 = pnand %p17782_p8, %p17776_p5 }
 0x1e5   :  { %17786 = shalt.err (!%p17783_p9)
}
 0x1e6   :  { %s20275_s1 = sld [smem:[#allocation126_spill]]  ;;  %s18052_s2 = smov [#allocation43]  }
 0x1e7   :  { %s523_s24 = sshll.u32 %s18052_s2, 4  ;;  %s18053_s13 = smov [#allocation46]   ;;  %s524_s24 = int_to_ptr.vmem [resolvable:$true] %s523_s24 }
 0x1e8   :  { %s545_s14 = sshll.u32 %s18053_s13, 4  ;;  %s17795_s0 = scalar_lea.vmem %s524_s24, 16  ;;  %s546_s14 = int_to_ptr.vmem [resolvable:$true] %s545_s14 }
 0x1e9   :  { %p17796_p10 = scmp.ne.s32.totalorder %s524_s24, %s17795_s0  ;;  %s17799_s25 = scalar_lea.vmem %s524_s24, 32 }
 0x1ea   :  { %p17800_p11 = scmp.lt.s32.totalorder %s524_s24, %s524_s24  ;;  %p17801_p12 = scmp.lt.s32.totalorder %s17799_s25, %s17795_s0 }
 0x1ec   :  { %504 = dma.hbm_to_vmem [thread:$0]  %s20275_s1, 16, %s502_s9, [#allocation39]  }
 0x1ed   :  { %p17802_p13 = por %p17801_p12, %p17800_p11 }
 0x1ef   :  { %p17803_p0 = pnand %p17802_p13, %p17796_p10 }
 0x1f1   :  { %17806 = shalt.err (!%p17803_p0)
}
 0x1f2   :  { %s20276_s4 = sld [smem:[#allocation128_spill]]  ;;  %s17815_s3 = scalar_lea.vmem %s546_s14, 16 }
 0x1f3   :  { %p17816_p1 = scmp.ne.s32.totalorder %s546_s14, %s17815_s3  ;;  %s17819_s7 = scalar_lea.vmem %s546_s14, 32 }
 0x1f4   :  { %p17820_p2 = scmp.lt.s32.totalorder %s546_s14, %s546_s14  ;;  %p17821_p3 = scmp.lt.s32.totalorder %s17819_s7, %s17815_s3 }
 0x1f6   :  { %p17822_p4 = por %p17821_p3, %p17820_p2 }
 0x1f8   :  { %526 = dma.hbm_to_vmem [thread:$0]  %s20276_s4, 16, %s524_s24, [#allocation42]  }
 0x1f9   :  { %p17823_p5 = pnand %p17822_p4, %p17816_p1 }
 0x1fb   :  { %17826 = shalt.err (!%p17823_p5)
}
 0x1fc   :  { %s20277_s8 = sld [smem:[#allocation130_spill]]  ;;  %s18054_s10 = smov [#allocation49]  }
 0x1fd   :  { %s565_s19 = sshll.u32 %s18054_s10, 4  ;;  %s18055_s11 = smov [#allocation52]   ;;  %s566_s19 = int_to_ptr.vmem [resolvable:$true] %s565_s19 }
 0x1fe   :  { %s587_s20 = sshll.u32 %s18055_s11, 4  ;;  %s17835_s17 = scalar_lea.vmem %s566_s19, 16  ;;  %s588_s20 = int_to_ptr.vmem [resolvable:$true] %s587_s20 }
 0x1ff   :  { %p17836_p6 = scmp.ne.s32.totalorder %s566_s19, %s17835_s17  ;;  %s17839_s15 = scalar_lea.vmem %s566_s19, 32 }
 0x200   :  { %p17840_p7 = scmp.lt.s32.totalorder %s566_s19, %s566_s19  ;;  %p17841_p8 = scmp.lt.s32.totalorder %s17839_s15, %s17835_s17 }
 0x202   :  { %548 = dma.hbm_to_vmem [thread:$0]  %s20277_s8, 16, %s546_s14, [#allocation45]  }
 0x203   :  { %p17842_p9 = por %p17841_p8, %p17840_p7 }
 0x205   :  { %p17843_p10 = pnand %p17842_p9, %p17836_p6 }
 0x207   :  { %17846 = shalt.err (!%p17843_p10)
}
 0x208   :  { %s20278_s29 = sld [smem:[#allocation132_spill]]  ;;  %s17855_s16 = scalar_lea.vmem %s588_s20, 16 }
 0x209   :  { %p17856_p11 = scmp.ne.s32.totalorder %s588_s20, %s17855_s16  ;;  %s17859_s18 = scalar_lea.vmem %s588_s20, 32 }
 0x20a   :  { %p17860_p12 = scmp.lt.s32.totalorder %s588_s20, %s588_s20  ;;  %p17861_p13 = scmp.lt.s32.totalorder %s17859_s18, %s17855_s16 }
 0x20c   :  { %p17862_p0 = por %p17861_p13, %p17860_p12 }
 0x20e   :  { %568 = dma.hbm_to_vmem [thread:$0]  %s20278_s29, 16, %s566_s19, [#allocation48]  }
 0x20f   :  { %p17863_p1 = pnand %p17862_p0, %p17856_p11 }
 0x211   :  { %17866 = shalt.err (!%p17863_p1)
}
 0x212   :  { %s20279_s21 = sld [smem:[#allocation135_spill]]  ;;  %s18056_s22 = smov [#allocation55]  }
 0x213   :  { %s607_s9 = sshll.u32 %s18056_s22, 4  ;;  %s608_s9 = int_to_ptr.vmem [resolvable:$true] %s607_s9 }
 0x214   :  { %s17875_s27 = scalar_lea.vmem %s608_s9, 16  ;;  %s17879_s23 = scalar_lea.vmem %s608_s9, 32 }
 0x215   :  { %p17876_p2 = scmp.ne.s32.totalorder %s608_s9, %s17875_s27  ;;  %p17880_p3 = scmp.lt.s32.totalorder %s608_s9, %s608_s9 }
 0x216   :  { %p17881_p4 = scmp.lt.s32.totalorder %s17879_s23, %s17875_s27 }
 0x218   :  { %590 = dma.hbm_to_vmem [thread:$0]  %s20279_s21, 16, %s588_s20, [#allocation51]  }
 0x219   :  { %p17882_p5 = por %p17881_p4, %p17880_p3 }
 0x21b   :  { %p17883_p6 = pnand %p17882_p5, %p17876_p2 }
 0x21d   :  { %17886 = shalt.err (!%p17883_p6)
}
 0x21e   :  { %610 = dma.hbm_to_vmem [thread:$0]  %s18458_s6, 16, %s608_s9, [#allocation54]  }
 0x21f   :  { %17907 = dma.done.wait [#allocation3], 16  }
 0x220   :  { %17908 = vsyncadd [#allocation3], 4294967280 }
 0x221   :  { %17909 = dma.done.wait [#allocation6], 32  }
 0x222   :  { %17910 = vsyncadd [#allocation6], 4294967264 }
 0x223   :  { %17911 = dma.done.wait [#allocation9], 32  }
 0x224   :  { %17912 = vsyncadd [#allocation9], 4294967264 }
 0x225   :  { %17913 = dma.done.wait [#allocation12], 32  }
 0x226   :  { %17914 = vsyncadd [#allocation12], 4294967264 }
 0x227   :  { %17915 = dma.done.wait [#allocation15], 32  }
 0x228   :  { %17916 = vsyncadd [#allocation15], 4294967264 }
 0x229   :  { %17917 = dma.done.wait [#allocation18], 32  }
 0x22a   :  { %17918 = vsyncadd [#allocation18], 4294967264 }
 0x22b   :  { %17919 = dma.done.wait [#allocation21], 32  }
 0x22c   :  { %17920 = vsyncadd [#allocation21], 4294967264 }
 0x22d   :  { %17921 = dma.done.wait [#allocation24], 32  }
 0x22e   :  { %17922 = vsyncadd [#allocation24], 4294967264 }
 0x22f   :  { %17923 = dma.done.wait [#allocation27], 32  }
 0x230   :  { %17924 = vsyncadd [#allocation27], 4294967264 }
 0x231   :  { %17925 = dma.done.wait [#allocation30], 32  }
 0x232   :  { %17926 = vsyncadd [#allocation30], 4294967264 }
 0x233   :  { %17927 = dma.done.wait [#allocation33], 32  }
 0x234   :  { %17928 = vsyncadd [#allocation33], 4294967264 }
 0x235   :  { %17929 = dma.done.wait [#allocation36], 32  }
 0x236   :  { %17930 = vsyncadd [#allocation36], 4294967264 }
 0x237   :  { %17931 = dma.done.wait [#allocation39], 32  }
 0x238   :  { %17932 = vsyncadd [#allocation39], 4294967264 }
 0x239   :  { %17933 = dma.done.wait [#allocation42], 32  }
 0x23a   :  { %17934 = vsyncadd [#allocation42], 4294967264 }
 0x23b   :  { %17935 = dma.done.wait [#allocation45], 32  }
 0x23c   :  { %17936 = vsyncadd [#allocation45], 4294967264 }
 0x23d   :  { %17937 = dma.done.wait [#allocation48], 32  }
 0x23e   :  { %17938 = vsyncadd [#allocation48], 4294967264 }
 0x23f   :  { %17939 = dma.done.wait [#allocation51], 32  }
 0x240   :  { %17940 = vsyncadd [#allocation51], 4294967264 }
 0x241   :  { %17941 = dma.done.wait [#allocation54], 32  }
 0x242   :  { %17942 = vsyncadd [#allocation54], 4294967264  ;;  %s20280_s6 = sld [smem:[#allocation134_spill]]  ;;  %v18057_v0 = vmov 0.0   ;;  %vm18058_vm0 = vmmov 0   ;;  %vm736_vm1 = vcmask 130048  }
 0x243   :  { %s20281_s5 = sld [smem:[#allocation76_spill]]  ;;  %16024 = vmatprep.subr.bf16.mxu0 %v18057_v0  ;;  %16026 = vmatprep.mubr.msk.bf16.mxu0 %vm18058_vm0, %v18057_v0  ;;  %vm781_vm2 = vcmask 261120   ;;  %v14338_v4 = vld [vmem:[#allocation47] ss:$0 sm:$0xff]  ;;  %v14341_v23 = vld [vmem:[#allocation50] ss:$0 sm:$0xff] }
 0x244   :  { %16030 = vmatprep.subr.bf16.mxu1 %v18057_v0  ;;  %16034 = vmatprep.mubr.msk.bf16.mxu1 %vm18058_vm0, %v18057_v0  ;;  %s20282_s26 = sld [smem:[#allocation120_spill]]  ;;  %v14342_v25 = vld [vmem:[#allocation49] ss:$0 sm:$0xff]  ;;  %v14343_v29 = vld [vmem:[#allocation32] ss:$0 sm:$0xff]  ;;  %s18059_s28 = smov 120  }
 0x245   :  { %s18060_s1 = smov 96   ;;  %s18061_s2 = smov 88   ;;  %vm882_vm3 = vcmask 64512   ;;  %vm1557_vm4 = vcmask 195584  }
 0x246   :  { %s18062_s24 = smov 80   ;;  %s18063_s13 = smov 112  }
 0x247   :  { %s18064_s14 = smov 72   ;;  %s18065_s0 = smov 104  }
 0x248   :  { %v16520_v1 = vld [vmem:[%s20280_s6] sm:$0xff]   ;;  %s18066_s25 = smov 64   ;;  %s18067_s4 = smov 48  }
 0x249   :  { %v719_v2 = vld [vmem:[%s20281_s5] sm:$0xff]  ;;  %16025 = vmatpush3.bf16.msra.mxu0 %v16520_v1  ;;  %s18068_s3 = smov 40   ;;  %s18069_s7 = smov 56  }
 0x24a   :  { %v722_v3 = vpack.c.bf16 %v719_v2, %v719_v2  ;;  %16038 = vmatprep.subr.mxu0 %v18057_v0  ;;  %v16521_v17 = vld [vmem:[%s20282_s26 + $0x8] sm:$0xff]   ;;  %v16522_v18 = vld [vmem:[%s20282_s26] sm:$0xff]   ;;  %s20283_s8 = sld [smem:[#allocation119_spill]]  ;;  %s18070_s10 = smov 8  }
 0x24b   :  { %16031 = vmatpush3.bf16.msra.mxu1 %v16521_v17  ;;  %s18071_s19 = smov 16   ;;  %s18072_s11 = smov 24  }
 0x24c   :  { %16027 = vmatmul.mubr.msk.bf16.vlgmr.msra.gmra.mxu0 %vm736_vm1, %v722_v3  ;;  %16032 = vmatprep.subr.bf16.mxu1 %v18057_v0  ;;  %s20284_s20 = sld [smem:[#allocation114_spill]] }
 0x24d   :  { %16040 = vmatprep.mubr.msk.f32.mxu0 %vm18058_vm0, %v18057_v0  ;;  %s20285_s17 = sld [smem:[#allocation115_spill]] }
 0x24e   :  { %s20286_s15 = sld [smem:[#allocation113_spill]] }
 0x24f   :  { %16033 = vmatpush3.bf16.msra.mxu1 %v16522_v18  ;;  %s20287_s29 = sld [smem:[#allocation129_spill]] }
 0x250   :  { %16048 = vmatprep.subr.mxu1 %v18057_v0  ;;  %s20288_s16 = sld [smem:[#allocation127_spill]] }
 0x251   :  { %s20289_s18 = sld [smem:[#allocation122_spill]] }
 0x252   :  { %s20290_s21 = sld [smem:[#allocation124_spill]] }
 0x253   :  { %s20291_s22 = sld [smem:[#allocation121_spill]] }
 0x254   :  { %s20292_s9 = sld [smem:[#allocation96_spill]] }
 0x255   :  { %s20293_s27 = sld [smem:[#allocation95_spill]] }
 0x256   :  { %s20294_s23 = sld [smem:[#allocation94_spill]] }
 0x257   :  { %s20295_s6 = sld [smem:[#allocation93_spill]] }
 0x258   :  { %s20296_s5 = sld [smem:[#allocation82_spill]] }
 0x259   :  { %s20297_s26 = sld [smem:[#allocation78_spill]] }
 0x30c   :  { %v774_v5 = vpop.f32.mrf.mxu0 }
 0x30d   :  { %v775_v6 = vadd.f32 %v14338_v4, %v774_v5 }
 0x30e   :  { %v16028_v7 = vpop.f32.mrf.mxu0 }
 0x30f   :  { %v780_v8 = vmax.f32 %v775_v6, 0.0 }
 0x310   :  { %v777_v9 = vpop.f32.mrf.mxu0 }
 0x311   :  { %v782_v10 = vsel %vm781_vm2, %v780_v8, 0.0 }
 0x312   :  { %783 = vadd.xlane.f32.xlu0 %v782_v10  ;;  %v16029_v11 = vpop.f32.mrf.mxu0 }
 0x39b   :  { %v784_v12 = vpop.xlane.xlu0 %783 }
 0x39c   :  { %v786_v13 = vmul.f32 0.03125, %v784_v12 }
 0x39e   :  { %v787_v14 = vsub.f32 %v780_v8, %v786_v13 }
 0x3a0   :  { %v788_v15 = vmul.f32 %v787_v14, %v787_v14 }
 0x3a2   :  { %v789_v16 = vsel %vm781_vm2, %v788_v15, 0.0 }
 0x3a3   :  { %790 = vadd.xlane.f32.xlu0 %v789_v16 }
 0x42c   :  { %v791_v19 = vpop.xlane.xlu0 %790 }
 0x42d   :  { %v792_v20 = vmul.f32 0.03125, %v791_v19 }
 0x42f   :  { %v793_v21 = vadd.f32 1e-05, %v792_v20 }
 0x431   :  { %17063 = vrsqrt.f32 %v793_v21 }
 0x43e   :  { %v17064_v22 = vpop.eup %17063 }
 0x43f   :  { %v795_v24 = vmul.f32 %v17064_v22, %v787_v14 }
 0x441   :  { %v803_v26 = vmul.f32 %v14341_v23, %v795_v24 }
 0x443   :  { %v18523_v27 = vadd.f32 %v14342_v25, %v803_v26 }
 0x445   :  { %v18527_v28 = vpack.c.bf16 %v18523_v27, %v18523_v27 }
 0x447   :  { %16035 = vmatmul.mubr.msk.bf16.vlgmr.msra.gmra.mxu1 %vm781_vm2, %v18527_v28 }
 0x448   :  { %16050 = vmatprep.mubr.msk.f32.mxu1 %vm18058_vm0, %v18057_v0 }
 0x507   :  { %v873_v30 = vpop.f32.mrf.mxu1 }
 0x508   :  { %v18533_v31 = vadd.f32 %v14343_v29, %v873_v30 }
 0x509   :  { %v16036_v32 = vpop.f32.mrf.mxu1 }
 0x50a   :  { %1045 = vrot.lane.b32.xlu0 %v18533_v31, %s18059_s28  ;;  %880 = vrot.lane.b32.xlu1 %v18533_v31, %s18060_s1 }
 0x50b   :  { %v876_v33 = vpop.f32.mrf.mxu1 }
 0x50c   :  { %v16523_v33 = vld [vmem:[%s20283_s8 + $0x8] sm:$0xff]  }
 0x50d   :  { %v16037_v34 = vpop.f32.mrf.mxu1 }
 0x50e   :  { %1047 = vrot.lane.b32.xlu1 %v18533_v31, %s18061_s2 }
 0x512   :  { %1213 = vrot.lane.b32.xlu1 %v18533_v31, %s18062_s24 }
 0x516   :  { %1211 = vrot.lane.b32.xlu1 %v18533_v31, %s18063_s13 }
 0x51a   :  { %1379 = vrot.lane.b32.xlu1 %v18533_v31, %s18064_s14 }
 0x51e   :  { %1377 = vrot.lane.b32.xlu1 %v18533_v31, %s18065_s0 }
 0x57c   :  { %v881_v35 = vpop.permute.xlu1 %880  ;;  %v1046_v37 = vpop.permute.xlu0 %1045 }
 0x57d   :  { %16039 = vmatpush3.xpose.msk.msra.mxu0 %vm882_vm3, %v881_v35 }
 0x57e   :  { %16043 = vmatprep.subr.mxu0 %v18057_v0 }
 0x580   :  { %16041 = vmatmul.mubr.msk.f32.vlgmr.msra.gmra.mxu0 %vm882_vm3, %v18533_v31  ;;  %v1048_v36 = vpop.permute.xlu1 %1047 }
 0x581   :  { %16049 = vmatpush3.xpose.msk.msra.mxu1 %vm882_vm3, %v1048_v36  ;;  %16045 = vmatprep.mubr.msk.f32.mxu0 %vm18058_vm0, %v18057_v0  ;;  %v16524_v36 = vld [vmem:[%s20283_s8] sm:$0xff]   ;;  %s20298_s8 = sld [smem:[#allocation88_spill]] }
 0x582   :  { %16058 = vmatprep.subr.mxu1 %v18057_v0 }
 0x584   :  { %16051 = vmatmul.mubr.msk.f32.vlgmr.msra.gmra.mxu1 %vm882_vm3, %v1046_v37  ;;  %v1214_v38 = vpop.permute.xlu1 %1213 }
 0x585   :  { %16059 = vmatpush3.xpose.msk.msra.mxu1 %vm882_vm3, %v1214_v38  ;;  %16060 = vmatprep.mubr.msk.f32.mxu1 %vm18058_vm0, %v18057_v0 }
 0x586   :  { %16068 = vmatprep.subr.mxu1 %v18057_v0 }
 0x588   :  { %v1212_v39 = vpop.permute.xlu1 %1211 }
 0x589   :  { %16061 = vmatmul.mubr.msk.f32.vlgmr.msra.gmra.mxu1 %vm882_vm3, %v1212_v39 }
 0x58a   :  { %16070 = vmatprep.mubr.msk.f32.mxu1 %vm18058_vm0, %v18057_v0 }
 0x58c   :  { %v1380_v40 = vpop.permute.xlu1 %1379 }
 0x58d   :  { %16069 = vmatpush3.xpose.msk.msra.mxu1 %vm882_vm3, %v1380_v40 }
 0x58e   :  { %16078 = vmatprep.subr.bf16.mxu1 %v18057_v0 }
 0x590   :  { %v1378_v41 = vpop.permute.xlu1 %1377 }
 0x591   :  { %16071 = vmatmul.mubr.msk.f32.vlgmr.msra.gmra.mxu1 %vm882_vm3, %v1378_v41 }
 0x592   :  { %16082 = vmatprep.mubr.msk.bf16.mxu1 %vm18058_vm0, %v18057_v0  ;;  %16079 = vmatpush3.bf16.msra.mxu1 %v16523_v33  ;;  %v14364_v33 = vld [vmem:[#allocation25] ss:$0 sm:$0xff] }
 0x593   :  { %16080 = vmatprep.subr.bf16.mxu1 %v18057_v0 }
 0x596   :  { %16081 = vmatpush3.bf16.msra.mxu1 %v16524_v36  ;;  %v1666_v36 = vld [vmem:[%s20284_s20 + $0x50] sm:$0xff] }
 0x640   :  { %v953_v42 = vpop.f32.mrf.mxu0 }
 0x641   :  { %v957_v43 = vmul.f32 0.35355338, %v953_v42 }
 0x642   :  { %v16042_v44 = vpop.f32.mrf.mxu0 }
 0x643   :  { %v958_v45 = vsel %vm882_vm3, %v957_v43, -inf }
 0x644   :  { %v1119_v46 = vpop.f32.mrf.mxu1  ;;  %959 = vmax.xlane.f32.xlu1 %v958_v45 }
 0x645   :  { %v1123_v47 = vmul.f32 0.35355338, %v1119_v46 }
 0x646   :  { %v16052_v48 = vpop.f32.mrf.mxu1 }
 0x647   :  { %v1124_v49 = vsel %vm882_vm3, %v1123_v47, -inf }
 0x648   :  { %1125 = vmax.xlane.f32.xlu0 %v1124_v49 }
 0x649   :  { %v1285_v50 = vpop.f32.mrf.mxu1 }
 0x64a   :  { %v1289_v51 = vmul.f32 0.35355338, %v1285_v50  ;;  %v14359_v50 = vld [vmem:[#allocation31] ss:$0 sm:$0xff] }
 0x64b   :  { %v16062_v52 = vpop.f32.mrf.mxu1 }
 0x64c   :  { %v1290_v53 = vsel %vm882_vm3, %v1289_v51, -inf }
 0x64d   :  { %1291 = vmax.xlane.f32.xlu1 %v1290_v53 }
 0x651   :  { %v1451_v54 = vpop.f32.mrf.mxu1 }
 0x652   :  { %v1455_v55 = vmul.f32 0.35355338, %v1451_v54 }
 0x653   :  { %v16072_v56 = vpop.f32.mrf.mxu1 }
 0x654   :  { %v1456_v57 = vsel %vm882_vm3, %v1455_v55, -inf }
 0x655   :  { %1457 = vmax.xlane.f32.xlu0 %v1456_v57 }
 0x65e   :  { %969 = vrot.lane.b32.xlu1 %v18533_v31, %s18066_s25 }
 0x6cd   :  { %v960_v58 = vpop.xlane.xlu1 %959 }
 0x6ce   :  { %v961_v59 = vsub.f32 %v957_v43, %v960_v58 }
 0x6d0   :  { %v962_v60 = vmul.f32 1.442695, %v961_v59 }
 0x6d1   :  { %v1126_v61 = vpop.xlane.xlu0 %1125 }
 0x6d2   :  { %17065 = vpow2.f32 %v962_v60  ;;  %v1127_v62 = vsub.f32 %v1123_v47, %v1126_v61 }
 0x6d4   :  { %v1128_v63 = vmul.f32 1.442695, %v1127_v62 }
 0x6d6   :  { %17067 = vpow2.f32 %v1128_v63  ;;  %v1292_v1 = vpop.xlane.xlu1 %1291  ;;  %v1672_v63 = vld [vmem:[%s20284_s20 + $0x80] sm:$0xff] }
 0x6d7   :  { %v1293_v2 = vsub.f32 %v1289_v51, %v1292_v1  ;;  %v1680_v1 = vld [vmem:[%s20284_s20 + $0xc0] sm:$0xff] }
 0x6d9   :  { %v1294_v3 = vmul.f32 1.442695, %v1293_v2  ;;  %v1673_v2 = vld [vmem:[%s20284_s20 + $0x88] sm:$0xff] }
 0x6da   :  { %v970_v4 = vpop.permute.xlu1 %969 }
 0x6db   :  { %17069 = vpow2.f32 %v1294_v3  ;;  %16044 = vmatpush3.msra.mxu0 %v970_v4  ;;  %v14382_v3 = vcombine.high %v1672_v63, %v1680_v1  ;;  %v1681_v4 = vld [vmem:[%s20284_s20 + $0xc8] sm:$0xff] }
 0x6dc   :  { %16053 = vmatprep.subr.mxu0 %v18057_v0 }
 0x6de   :  { %v1458_v5 = vpop.xlane.xlu0 %1457 }
 0x6df   :  { %v17066_v6 = vpop.eup %17065  ;;  %v1459_v7 = vsub.f32 %v1455_v55, %v1458_v5  ;;  %v14381_v5 = vcombine.low %v1672_v63, %v1680_v1 }
 0x6e0   :  { %v964_v8 = vsel %vm882_vm3, %v17066_v6, 0.0 }
 0x6e1   :  { %v1460_v9 = vmul.f32 1.442695, %v1459_v7  ;;  %965 = vadd.xlane.f32.xlu1 %v964_v8  ;;  %v14384_v7 = vcombine.high %v1673_v2, %v1681_v4  ;;  %v1656_v8 = vld [vmem:[%s20284_s20] sm:$0xff] }
 0x6e3   :  { %v17068_v10 = vpop.eup %17067  ;;  %17071 = vpow2.f32 %v1460_v9  ;;  %1989 = vmatprep.subr.bf16.mxu1 %v14384_v7  ;;  %v1664_v9 = vld [vmem:[%s20284_s20 + $0x40] sm:$0xff]  ;;  %v1671_v7 = vld [vmem:[%s20284_s20 + $0x78] sm:$0xff] }
 0x6e4   :  { %v1130_v11 = vsel %vm882_vm3, %v17068_v10, 0.0 }
 0x6e5   :  { %1131 = vadd.xlane.f32.xlu0 %v1130_v11  ;;  %v14366_v11 = vcombine.high %v1656_v8, %v1664_v9 }
 0x6e8   :  { %v17070_v12 = vpop.eup %17069 }
 0x6e9   :  { %v1296_v13 = vsel %vm882_vm3, %v17070_v12, 0.0 }
 0x6ea   :  { %1297 = vadd.xlane.f32.xlu1 %v1296_v13  ;;  %v14365_v13 = vcombine.low %v1656_v8, %v1664_v9 }
 0x6f0   :  { %v17072_v14 = vpop.eup %17071 }
 0x6f1   :  { %v1462_v15 = vsel %vm882_vm3, %v17072_v14, 0.0 }
 0x6f2   :  { %1463 = vadd.xlane.f32.xlu0 %v1462_v15 }
 0x6fb   :  { %1301 = vrot.lane.b32.xlu1 %v18533_v31, %s18067_s4 }
 0x6ff   :  { %1467 = vrot.lane.b32.xlu1 %v18533_v31, %s18068_s3 }
 0x708   :  { %1135 = vrot.lane.b32.xlu0 %v18533_v31, %s18069_s7 }
 0x76a   :  { %v966_v16 = vpop.xlane.xlu1 %965 }
 0x76b   :  { %17073 = vrcp.f32 %v966_v16  ;;  %v1674_v16 = vld [vmem:[%s20284_s20 + $0x90] sm:$0xff] }
 0x76e   :  { %v1132_v17 = vpop.xlane.xlu0 %1131 }
 0x76f   :  { %17075 = vrcp.f32 %v1132_v17  ;;  %v1682_v17 = vld [vmem:[%s20284_s20 + $0xd0] sm:$0xff] }
 0x773   :  { %v1298_v18 = vpop.xlane.xlu1 %1297 }
 0x774   :  { %17077 = vrcp.f32 %v1298_v18  ;;  %v1675_v18 = vld [vmem:[%s20284_s20 + $0x98] sm:$0xff] }
 0x777   :  { %v1302_v23 = vpop.permute.xlu1 %1301 }
 0x778   :  { %v17074_v19 = vpop.eup %17073 }
 0x779   :  { %v968_v20 = vmul.f32 %v17074_v19, %v17066_v6  ;;  %v14383_v6 = vcombine.low %v1673_v2, %v1681_v4  ;;  %v18073_v19 = vmov 0   ;;  %v1662_v4 = vld [vmem:[%s20284_s20 + $0x30] sm:$0xff] }
 0x77b   :  { %v1464_v21 = vpop.xlane.xlu0 %1463  ;;  %16046 = vmatmul.mubr.msk.f32.vlgmr.msra.gmra.mxu0 %vm882_vm3, %v968_v20  ;;  %v1468_v30 = vpop.permute.xlu1 %1467  ;;  %v14386_v20 = vcombine.high %v1674_v16, %v1682_v17 }
 0x77c   :  { %v17076_v22 = vpop.eup %17075  ;;  %17079 = vrcp.f32 %v1464_v21  ;;  %16055 = vmatprep.mubr.msk.f32.mxu0 %vm18058_vm0, %v18057_v0  ;;  %v1683_v21 = vld [vmem:[%s20284_s20 + $0xd8] sm:$0xff] }
 0x77d   :  { %v1134_v25 = vmul.f32 %v17076_v22, %v17068_v10  ;;  %v1657_v10 = vld [vmem:[%s20284_s20 + $0x8] sm:$0xff]  ;;  %v14385_v22 = vcombine.low %v1674_v16, %v1682_v17  ;;  %v16527_v16 = vld [vmem:[%s20285_s17 + $0x38] sm:$0xff]  }
 0x77e   :  { %v16528_v17 = vld [vmem:[%s20285_s17 + $0xb8] sm:$0xff]  }
 0x77f   :  { %v1136_v24 = vpop.permute.xlu0 %1135 }
 0x780   :  { %16054 = vmatpush3.msra.mxu0 %v1136_v24  ;;  %v14388_v24 = vcombine.high %v1675_v18, %v1683_v21 }
 0x781   :  { %v17078_v26 = vpop.eup %17077  ;;  %16056 = vmatmul.mubr.msk.f32.vlgmr.msra.gmra.mxu0 %vm882_vm3, %v1134_v25  ;;  %16063 = vmatprep.subr.mxu0 %v18057_v0 }
 0x782   :  { %16064 = vmatpush3.msra.mxu0 %v1302_v23  ;;  %16065 = vmatprep.mubr.msk.f32.mxu0 %vm18058_vm0, %v18057_v0  ;;  %v1300_v29 = vmul.f32 %v17078_v26, %v17070_v12  ;;  %v1665_v12 = vld [vmem:[%s20284_s20 + $0x48] sm:$0xff]  ;;  %v14387_v23 = vcombine.low %v1675_v18, %v1683_v21  ;;  %v16529_v18 = vld [vmem:[%s20285_s17 + $0x70] sm:$0xff]  }
 0x783   :  { %16073 = vmatprep.subr.mxu0 %v18057_v0  ;;  %v14368_v15 = vcombine.high %v1657_v10, %v1665_v12  ;;  %v16531_v21 = vld [vmem:[%s20285_s17 + $0x30] sm:$0xff]  }
 0x785   :  { %16066 = vmatmul.mubr.msk.f32.vlgmr.msra.gmra.mxu0 %vm882_vm3, %v1300_v29 }
 0x786   :  { %16074 = vmatpush3.msra.mxu0 %v1468_v30  ;;  %16075 = vmatprep.mubr.msk.f32.mxu0 %vm18058_vm0, %v18057_v0 }
 0x787   :  { %1948 = vmatprep.subr.bf16.mxu0 %v14382_v3 }
 0x789   :  { %v17080_v31 = vpop.eup %17079 }
 0x78a   :  { %v1466_v32 = vmul.f32 %v17080_v31, %v17072_v14  ;;  %v14367_v14 = vcombine.low %v1657_v10, %v1665_v12  ;;  %v14363_v31 = vld [vmem:[#allocation26] ss:$0 sm:$0xff] }
 0x78c   :  { %16076 = vmatmul.mubr.msk.f32.vlgmr.msra.gmra.mxu0 %vm882_vm3, %v1466_v32 }
 0x78d   :  { %1949 = vmatpush1.bf16.msra.mxu0 %v14381_v5  ;;  %1968 = vmatprep.mubr.bf16.mxu0 %v18073_v19  ;;  %v1670_v5 = vld [vmem:[%s20284_s20 + $0x70] sm:$0xff] }
 0x78e   :  { %1950 = vmatprep.subr.bf16.mxu0 %v14366_v11  ;;  %v14378_v10 = vcombine.high %v1662_v4, %v1670_v5  ;;  %v14377_v12 = vcombine.low %v1662_v4, %v1670_v5 }
 0x791   :  { %1951 = vmatpush1.bf16.msra.mxu0 %v14365_v13 }
 0x792   :  { %2030 = vmatprep.subr.bf16.mxu0 %v14386_v20  ;;  %v16530_v20 = vld [vmem:[%s20285_s17 + $0xf0] sm:$0xff]  }
 0x83b   :  { %v1041_v34 = vpop.f32.mrf.mxu0 }
 0x83d   :  { %v16047_v35 = vpop.f32.mrf.mxu0 }
 0x83e   :  { %v1658_v35 = vld [vmem:[%s20284_s20 + $0x10] sm:$0xff] }
 0x841   :  { %v1207_v37 = vpop.f32.mrf.mxu0 }
 0x842   :  { %1544 = vrot.lane.b32.xlu0 %v1207_v37, %s18070_s10  ;;  %v1659_v37 = vld [vmem:[%s20284_s20 + $0x18] sm:$0xff] }
 0x843   :  { %v16057_v38 = vpop.f32.mrf.mxu0 }
 0x844   :  { %v1667_v38 = vld [vmem:[%s20284_s20 + $0x58] sm:$0xff] }
 0x845   :  { %v1373_v39 = vpop.f32.mrf.mxu0 }
 0x846   :  { %1548 = vrot.lane.b32.xlu1 %v1373_v39, %s18071_s19 }
 0x847   :  { %v16067_v40 = vpop.f32.mrf.mxu0 }
 0x84c   :  { %v1539_v41 = vpop.f32.mrf.mxu0 }
 0x84d   :  { %1552 = vrot.lane.b32.xlu0 %v1539_v41, %s18072_s11  ;;  %v14370_v41 = vcombine.high %v1658_v35, %v1666_v36 }
 0x84e   :  { %v16077_v42 = vpop.f32.mrf.mxu0 }
 0x84f   :  { %v14372_v42 = vcombine.high %v1659_v37, %v1667_v38 }
 0x8b4   :  { %v1545_v43 = vpop.permute.xlu0 %1544 }
 0x8b5   :  { %v1555_v45 = vsel %vm882_vm3, %v1041_v34, %v1545_v43  ;;  %v1676_v43 = vld [vmem:[%s20284_s20 + $0xa0] sm:$0xff] }
 0x8b8   :  { %v1549_v44 = vpop.permute.xlu1 %1548 }
 0x8b9   :  { %v1556_v46 = vsel %vm736_vm1, %v1555_v45, %v1549_v44  ;;  %v1684_v44 = vld [vmem:[%s20284_s20 + $0xe0] sm:$0xff]  ;;  %v1677_v45 = vld [vmem:[%s20284_s20 + $0xa8] sm:$0xff] }
 0x8bf   :  { %v1553_v47 = vpop.permute.xlu0 %1552 }
 0x8c0   :  { %v1558_v48 = vsel %vm1557_vm4, %v1556_v46, %v1553_v47  ;;  %v1685_v46 = vld [vmem:[%s20284_s20 + $0xe8] sm:$0xff]  ;;  %v14369_v47 = vcombine.low %v1658_v35, %v1666_v36  ;;  %v16543_v35 = vld [vmem:[%s20285_s17 + $0x18] sm:$0xff]  }
 0x8c1   :  { %v1563_v49 = vpack.c.bf16 %v1558_v48, %v1558_v48  ;;  %v14371_v48 = vcombine.low %v1659_v37, %v1667_v38  ;;  %v16544_v36 = vld [vmem:[%s20285_s17 + $0x98] sm:$0xff]   ;;  %v16545_v37 = vld [vmem:[%s20285_s17 + $0x50] sm:$0xff]  }
 0x8c2   :  { %v16546_v38 = vld [vmem:[%s20285_s17 + $0xd0] sm:$0xff]  }
 0x8c3   :  { %16083 = vmatmul.mubr.msk.bf16.vlgmr.msra.gmra.mxu1 %vm781_vm2, %v1563_v49  ;;  %v14390_v49 = vcombine.high %v1676_v43, %v1684_v44 }
 0x8c4   :  { %1990 = vmatpush1.bf16.msra.mxu1 %v14383_v6  ;;  %2009 = vmatprep.mubr.bf16.mxu1 %v18073_v19  ;;  %v1663_v6 = vld [vmem:[%s20284_s20 + $0x38] sm:$0xff] }
 0x8c5   :  { %1991 = vmatprep.subr.bf16.mxu1 %v14368_v15  ;;  %v14380_v11 = vcombine.high %v1663_v6, %v1671_v7  ;;  %v14379_v13 = vcombine.low %v1663_v6, %v1671_v7  ;;  %v16526_v15 = vld [vmem:[%s20285_s17 + $0xf8] sm:$0xff]  }
 0x8c8   :  { %1992 = vmatpush1.bf16.msra.mxu1 %v14367_v14  ;;  %v16525_v14 = vld [vmem:[%s20285_s17 + $0x78] sm:$0xff]  }
 0x8c9   :  { %2071 = vmatprep.subr.bf16.mxu1 %v14388_v24  ;;  %v16534_v24 = vld [vmem:[%s20285_s17 + $0xe8] sm:$0xff]  }
 0x983   :  { %v1620_v51 = vpop.f32.mrf.mxu1 }
 0x984   :  { %v1621_v52 = vadd.f32 %v14359_v50, %v1620_v51  ;;  %v14392_v50 = vcombine.high %v1677_v45, %v1685_v46  ;;  %v1660_v51 = vld [vmem:[%s20284_s20 + $0x20] sm:$0xff] }
 0x985   :  { %v16084_v53 = vpop.f32.mrf.mxu1 }
 0x986   :  { %v1626_v54 = vadd.f32 %v1621_v52, %v18523_v27  ;;  %v1668_v52 = vld [vmem:[%s20284_s20 + $0x60] sm:$0xff]  ;;  %v1661_v53 = vld [vmem:[%s20284_s20 + $0x28] sm:$0xff] }
 0x987   :  { %v1623_v55 = vpop.f32.mrf.mxu1  ;;  %v14373_v63 = vcombine.low %v1660_v51, %v1668_v52 }
 0x988   :  { %v1627_v56 = vsel %vm781_vm2, %v1626_v54, 0.0  ;;  %v14389_v55 = vcombine.low %v1676_v43, %v1684_v44  ;;  %v16550_v43 = vld [vmem:[%s20285_s17 + $0xc8] sm:$0xff]  }
 0x989   :  { %1628 = vadd.xlane.f32.xlu1 %v1627_v56  ;;  %v16085_v57 = vpop.f32.mrf.mxu1  ;;  %v14391_v56 = vcombine.low %v1677_v45, %v1685_v46  ;;  %v16551_v44 = vld [vmem:[%s20285_s17 + $0x8] sm:$0xff]   ;;  %v16553_v46 = vld [vmem:[%s20285_s17 + $0x40] sm:$0xff]  }
 0x98a   :  { %v14374_v57 = vcombine.high %v1660_v51, %v1668_v52  ;;  %v16552_v45 = vld [vmem:[%s20285_s17 + $0x88] sm:$0xff]   ;;  %v16558_v51 = vld [vmem:[%s20285_s17 + $0x1f8] sm:$0xff]   ;;  %v1693_v52 = vlaneseq }
 0xa12   :  { %v1629_v58 = vpop.xlane.xlu1 %1628 }
 0xa13   :  { %v1630_v59 = vmul.f32 0.03125, %v1629_v58 }
 0xa15   :  { %v1631_v60 = vsub.f32 %v1626_v54, %v1630_v59  ;;  %v1669_v54 = vld [vmem:[%s20284_s20 + $0x68] sm:$0xff]  ;;  %v1678_v59 = vld [vmem:[%s20284_s20 + $0xb0] sm:$0xff] }
 0xa16   :  { %v14376_v58 = vcombine.high %v1661_v53, %v1669_v54  ;;  %v14375_v1 = vcombine.low %v1661_v53, %v1669_v54  ;;  %v18708_v53 = vshrl.u32 %v1693_v52, 7 }
 0xa17   :  { %v1632_v61 = vmul.f32 %v1631_v60, %v1631_v60 }
 0xa18   :  { %v18711_v54 = vsub.s32 0, %v18708_v53 }
 0xa19   :  { %v1633_v62 = vsel %vm781_vm2, %v1632_v61, 0.0  ;;  %v1679_v61 = vld [vmem:[%s20284_s20 + $0xb8] sm:$0xff] }
 0xa1a   :  { %1634 = vadd.xlane.f32.xlu0 %v1633_v62  ;;  %v1687_v62 = vld [vmem:[%s20284_s20 + $0xf8] sm:$0xff] }
 0xa1b   :  { %v14396_v3 = vcombine.high %v1679_v61, %v1687_v62  ;;  %v14395_v9 = vcombine.low %v1679_v61, %v1687_v62 }
 0xaa3   :  { %v1635_v25 = vpop.xlane.xlu0 %1634 }
 0xaa4   :  { %v1636_v26 = vmul.f32 0.03125, %v1635_v25  ;;  %v16535_v25 = vld [vmem:[%s20285_s17 + $0x28] sm:$0xff]  }
 0xaa6   :  { %v1637_v29 = vadd.f32 1e-05, %v1636_v26  ;;  %v16536_v26 = vld [vmem:[%s20285_s17 + $0xa8] sm:$0xff]  }
 0xaa8   :  { %17081 = vrsqrt.f32 %v1637_v29  ;;  %v16537_v29 = vld [vmem:[%s20285_s17 + $0x60] sm:$0xff]  }
 0xab5   :  { %v17082_v30 = vpop.eup %17081 }
 0xab6   :  { %v1639_v32 = vmul.f32 %v17082_v30, %v1631_v60  ;;  %v1686_v60 = vld [vmem:[%s20284_s20 + $0xf0] sm:$0xff]  ;;  %v16538_v30 = vld [vmem:[%s20285_s17 + $0xe0] sm:$0xff]   ;;  %s20299_s20 = sld [smem:[#allocation87_spill]] }
 0xab7   :  { %v14394_v2 = vcombine.high %v1678_v59, %v1686_v60  ;;  %v14393_v8 = vcombine.low %v1678_v59, %v1686_v60 }
 0xab8   :  { %v1647_v34 = vmul.f32 %v14363_v31, %v1639_v32  ;;  %v16539_v31 = vld [vmem:[%s20285_s17 + $0x20] sm:$0xff]  }
 0xab9   :  { %v16540_v32 = vld [vmem:[%s20285_s17 + $0xa0] sm:$0xff]  }
 0xaba   :  { %v18630_v39 = vadd.f32 %v14364_v33, %v1647_v34  ;;  %v16541_v33 = vld [vmem:[%s20285_s17 + $0x58] sm:$0xff]  }
 0xabb   :  { %v16542_v34 = vld [vmem:[%s20285_s17 + $0xd8] sm:$0xff]  }
 0xabc   :  { %v18634_v40 = vpack.c.bf16 %v18630_v39, %v18630_v39 }
 0xabe   :  { %14397 = vmatmul.mubr.msk.bf16.vlgmr.msra.gmra.mxu0 %vm781_vm2, %v18634_v40  ;;  %14398 = vmatmul.mubr.msk.bf16.vlgmr.msra.gmra.mxu1 %vm781_vm2, %v18634_v40 }
 0xabf   :  { %2031 = vmatpush1.bf16.msra.mxu0 %v14385_v22  ;;  %2072 = vmatpush1.bf16.msra.mxu1 %v14387_v23  ;;  %v16532_v22 = vld [vmem:[%s20285_s17 + $0xb0] sm:$0xff]   ;;  %v16533_v23 = vld [vmem:[%s20285_s17 + $0x68] sm:$0xff]  }
 0xac0   :  { %2032 = vmatprep.subr.bf16.mxu0 %v14370_v41  ;;  %2073 = vmatprep.subr.bf16.mxu1 %v14372_v42  ;;  %v16548_v41 = vld [vmem:[%s20285_s17 + $0x90] sm:$0xff]   ;;  %v16549_v42 = vld [vmem:[%s20285_s17 + $0x48] sm:$0xff]  }
 0xac1   :  { %2050 = vmatprep.mubr.bf16.mxu0 %v18073_v19  ;;  %2091 = vmatprep.mubr.bf16.mxu1 %v18073_v19 }
 0xac3   :  { %2033 = vmatpush1.bf16.msra.mxu0 %v14369_v47  ;;  %2074 = vmatpush1.bf16.msra.mxu1 %v14371_v48  ;;  %v16554_v47 = vld [vmem:[%s20285_s17 + $0xc0] sm:$0xff]  }
 0xac4   :  { %2112 = vmatprep.subr.bf16.mxu0 %v14390_v49  ;;  %2153 = vmatprep.subr.bf16.mxu1 %v14392_v50  ;;  %v16555_v48 = vld [vmem:[%s20285_s17] sm:$0xff]   ;;  %v16557_v50 = vld [vmem:[%s20285_s17 + $0x178] sm:$0xff]  }
 0xac5   :  { %v16556_v49 = vld [vmem:[%s20285_s17 + $0x80] sm:$0xff]  }
 0xac6   :  { %14399 = vmatmul.mubr.msk.bf16.vlgmr.msra.gmra.mxu0 %vm781_vm2, %v18634_v40  ;;  %14400 = vmatmul.mubr.msk.bf16.vlgmr.msra.gmra.mxu1 %vm781_vm2, %v18634_v40 }
 0xac7   :  { %2113 = vmatpush1.bf16.msra.mxu0 %v14389_v55  ;;  %2154 = vmatpush1.bf16.msra.mxu1 %v14391_v56  ;;  %v18714_v55 = vsub.s32 2, %v18708_v53  ;;  %v18717_v56 = vld [vmem:[%s20286_s15] sm:$0xff] }
 0xac8   :  { %2114 = vmatprep.subr.bf16.mxu0 %v14374_v57  ;;  %2155 = vmatprep.subr.bf16.mxu1 %v14376_v58  ;;  %v18720_v57 = vsub.s32 1, %v18708_v53  ;;  %v18723_v58 = vsub.s32 3, %v18708_v53  ;;  %v1696_v59 = vrot.slane %v18717_v56, %v18711_v54 }
 0xac9   :  { %2132 = vmatprep.mubr.bf16.mxu0 %v18073_v19  ;;  %2173 = vmatprep.mubr.bf16.mxu1 %v18073_v19  ;;  %v1704_v60 = vrot.slane %v18717_v56, %v18714_v55 }
 0xaca   :  { %v1700_v61 = vrot.slane %v18717_v56, %v18720_v57  ;;  %v1708_v62 = vrot.slane %v18717_v56, %v18723_v58 }
 0xacb   :  { %2115 = vmatpush1.bf16.msra.mxu0 %v14373_v63  ;;  %2156 = vmatpush1.bf16.msra.mxu1 %v14375_v1 }
 0xacc   :  { %2194 = vmatprep.subr.bf16.mxu0 %v14394_v2  ;;  %2235 = vmatprep.subr.bf16.mxu1 %v14396_v3 }
 0xace   :  { %14401 = vmatmul.mubr.msk.bf16.vlgmr.msra.gmra.mxu0 %vm781_vm2, %v18634_v40  ;;  %14402 = vmatmul.mubr.msk.bf16.vlgmr.msra.gmra.mxu1 %vm781_vm2, %v18634_v40 }
 0xacf   :  { %2195 = vmatpush1.bf16.msra.mxu0 %v14393_v8  ;;  %2236 = vmatpush1.bf16.msra.mxu1 %v14395_v9  ;;  %v18734_v8 = vsub.s32 5, %v18708_v53  ;;  %v18737_v9 = vsub.s32 7, %v18708_v53 }
 0xad0   :  { %2196 = vmatprep.subr.bf16.mxu0 %v14378_v10  ;;  %2237 = vmatprep.subr.bf16.mxu1 %v14380_v11 }
 0xad1   :  { %2214 = vmatprep.mubr.bf16.mxu0 %v18073_v19  ;;  %2255 = vmatprep.mubr.bf16.mxu1 %v18073_v19 }
 0xad3   :  { %2197 = vmatpush1.bf16.msra.mxu0 %v14377_v12  ;;  %2238 = vmatpush1.bf16.msra.mxu1 %v14379_v13 }
 0xad4   :  { %15201 = vmatprep.subr.bf16.mxu0 %v16525_v14  ;;  %15223 = vmatprep.subr.bf16.mxu1 %v16526_v15 }
 0xad6   :  { %14403 = vmatmul.mubr.msk.bf16.vlgmr.msra.gmra.mxu0 %vm781_vm2, %v18634_v40  ;;  %14404 = vmatmul.mubr.msk.bf16.vlgmr.msra.gmra.mxu1 %vm781_vm2, %v18634_v40  ;;  %v16547_v40 = vld [vmem:[%s20285_s17 + $0x10] sm:$0xff]  }
 0xad7   :  { %15202 = vmatpush3.bf16.msra.mxu0 %v16527_v16  ;;  %15224 = vmatpush3.bf16.msra.mxu1 %v16528_v17 }
 0xad8   :  { %15203 = vmatprep.subr.bf16.mxu0 %v16529_v18  ;;  %15225 = vmatprep.subr.bf16.mxu1 %v16530_v20 }
 0xadb   :  { %15204 = vmatpush3.bf16.msra.mxu0 %v16531_v21  ;;  %15226 = vmatpush3.bf16.msra.mxu1 %v16532_v22  ;;  %v1716_v21 = vrot.slane %v18717_v56, %v18734_v8  ;;  %v1724_v22 = vrot.slane %v18717_v56, %v18737_v9 }
 0xadc   :  { %15205 = vmatprep.subr.bf16.mxu0 %v16533_v23  ;;  %15227 = vmatprep.subr.bf16.mxu1 %v16534_v24  ;;  %v16559_v23 = vld [vmem:[%s20285_s17 + $0x138] sm:$0xff]  }
 0xadd   :  { %v16560_v24 = vld [vmem:[%s20285_s17 + $0x1b8] sm:$0xff]  }
 0xadf   :  { %15206 = vmatpush3.bf16.msra.mxu0 %v16535_v25  ;;  %15228 = vmatpush3.bf16.msra.mxu1 %v16536_v26 }
 0xae0   :  { %15207 = vmatprep.subr.bf16.mxu0 %v16537_v29  ;;  %15229 = vmatprep.subr.bf16.mxu1 %v16538_v30 }
 0xae3   :  { %15208 = vmatpush3.bf16.msra.mxu0 %v16539_v31  ;;  %15230 = vmatpush3.bf16.msra.mxu1 %v16540_v32  ;;  %v16561_v31 = vld [vmem:[%s20285_s17 + $0x170] sm:$0xff]  }
 0xae4   :  { %15209 = vmatprep.subr.bf16.mxu0 %v16541_v33  ;;  %15231 = vmatprep.subr.bf16.mxu1 %v16542_v34  ;;  %v16562_v32 = vld [vmem:[%s20285_s17 + $0x1f0] sm:$0xff]  }
 0xae7   :  { %15210 = vmatpush3.bf16.msra.mxu0 %v16543_v35  ;;  %15232 = vmatpush3.bf16.msra.mxu1 %v16544_v36 }
 0xae8   :  { %15211 = vmatprep.subr.bf16.mxu0 %v16545_v37  ;;  %15233 = vmatprep.subr.bf16.mxu1 %v16546_v38  ;;  %v16563_v37 = vld [vmem:[%s20285_s17 + $0x130] sm:$0xff]  }
 0xae9   :  { %v16564_v38 = vld [vmem:[%s20285_s17 + $0x1b0] sm:$0xff]  }
 0xaeb   :  { %15212 = vmatpush3.bf16.msra.mxu0 %v16547_v40  ;;  %15234 = vmatpush3.bf16.msra.mxu1 %v16548_v41 }
 0xaec   :  { %15213 = vmatprep.subr.bf16.mxu0 %v16549_v42  ;;  %15235 = vmatprep.subr.bf16.mxu1 %v16550_v43  ;;  %v16565_v42 = vld [vmem:[%s20285_s17 + $0x168] sm:$0xff]  }
 0xaed   :  { %v16566_v43 = vld [vmem:[%s20285_s17 + $0x1e8] sm:$0xff]  }
 0xaef   :  { %15214 = vmatpush3.bf16.msra.mxu0 %v16551_v44  ;;  %15236 = vmatpush3.bf16.msra.mxu1 %v16552_v45 }
 0xaf0   :  { %15215 = vmatprep.subr.bf16.mxu0 %v16553_v46  ;;  %15237 = vmatprep.subr.bf16.mxu1 %v16554_v47 }
 0xaf3   :  { %15216 = vmatpush3.bf16.msra.mxu0 %v16555_v48  ;;  %15238 = vmatpush3.bf16.msra.mxu1 %v16556_v49 }
 0xaf4   :  { %15245 = vmatprep.subr.bf16.mxu0 %v16557_v50  ;;  %15267 = vmatprep.subr.bf16.mxu1 %v16558_v51  ;;  %v16567_v50 = vld [vmem:[%s20285_s17 + $0x128] sm:$0xff]  }
 0xaf5   :  { %v16568_v51 = vld [vmem:[%s20285_s17 + $0x1a8] sm:$0xff]  }
 0xb7e   :  { %v1970_v63 = vpop.f32.mrf.mxu0  ;;  %v2011_v1 = vpop.f32.mrf.mxu1 }
 0xb7f   :  { %v1971_v2 = vadd.f32 %v1970_v63, %v1696_v59  ;;  %v2012_v3 = vadd.f32 %v2011_v1, %v1704_v60  ;;  %v16569_v60 = vld [vmem:[%s20285_s17 + $0x160] sm:$0xff]   ;;  %v18764_v1 = vsub.s32 6, %v18708_v53 }
 0xb80   :  { %v1972_v4 = vpop.f32.mrf.mxu0  ;;  %v2013_v5 = vpop.f32.mrf.mxu1 }
 0xb81   :  { %v1973_v6 = vadd.f32 %v1972_v4, %v1700_v61  ;;  %v2014_v7 = vadd.f32 %v2013_v5, %v1708_v62  ;;  %v2264_v10 = vmax.f32 %v1971_v2, 0.0  ;;  %v2266_v11 = vmax.f32 %v2012_v3, 0.0  ;;  %v16570_v61 = vld [vmem:[%s20285_s17 + $0x1e0] sm:$0xff]   ;;  %v18769_v4 = vld [vmem:[%s20286_s15 + $0x8] sm:$0xff]  ;;  %s20301_s15 = sld [smem:[#allocation77_spill]] }
 0xb82   :  { %v1974_v12 = vpop.f32.mrf.mxu0  ;;  %v2015_v13 = vpop.f32.mrf.mxu1  ;;  %v16571_v2 = vld [vmem:[%s20285_s17 + $0x120] sm:$0xff]  }
 0xb83   :  { %v2265_v14 = vmax.f32 %v1973_v6, 0.0  ;;  %v2267_v15 = vmax.f32 %v2014_v7, 0.0  ;;  %v2536_v25 = vpack.c.bf16 %v2264_v10, %v2264_v10  ;;  %v2538_v26 = vpack.c.bf16 %v2266_v11, %v2266_v11  ;;  %v16572_v3 = vld [vmem:[%s20285_s17 + $0x1a0] sm:$0xff]   ;;  %v16573_v7 = vld [vmem:[%s20285_s17 + $0x158] sm:$0xff]  }
 0xb84   :  { %v1975_v16 = vpop.f32.mrf.mxu0  ;;  %v2016_v17 = vpop.f32.mrf.mxu1  ;;  %v16574_v10 = vld [vmem:[%s20285_s17 + $0x1d8] sm:$0xff]   ;;  %v1752_v11 = vrot.slane %v18769_v4, %v18764_v1 }
 0xb85   :  { %v2537_v18 = vpack.c.bf16 %v2265_v14, %v2265_v14  ;;  %v2539_v20 = vpack.c.bf16 %v2267_v15, %v2267_v15  ;;  %v16575_v14 = vld [vmem:[%s20285_s17 + $0x118] sm:$0xff]   ;;  %v18778_v16 = vsub.s32 4, %v18708_v53  ;;  %v16580_v53 = vld [vmem:[%s20285_s17 + $0x190] sm:$0xff]  }
 0xb86   :  { %v18745_v29 = vpop.f32.mrf.mxu0  ;;  %v18747_v30 = vpop.f32.mrf.mxu1  ;;  %v16576_v15 = vld [vmem:[%s20285_s17 + $0x198] sm:$0xff]  }
 0xb87   :  { %3359 = vmatprep.mubr.bf16.mxu0 %v2537_v18  ;;  %3399 = vmatprep.mubr.bf16.mxu1 %v2539_v20  ;;  %v16577_v20 = vld [vmem:[%s20285_s17 + $0x150] sm:$0xff]  }
 0xb88   :  { %v2054_v33 = vpop.f32.mrf.mxu0  ;;  %v2095_v34 = vpop.f32.mrf.mxu1  ;;  %3360 = vmatmul.mubr.bf16.vlgmr.msra.gmra.mxu0 %v2536_v25  ;;  %3400 = vmatmul.mubr.bf16.vlgmr.msra.gmra.mxu1 %v2538_v26  ;;  %v16579_v25 = vld [vmem:[%s20285_s17 + $0x110] sm:$0xff]   ;;  %v1712_v26 = vrot.slane %v18717_v56, %v18778_v16 }
 0xb89   :  { %v2055_v35 = vadd.f32 %v2054_v33, %v1716_v21  ;;  %v2096_v36 = vadd.f32 %v2095_v34, %v1724_v22  ;;  %15246 = vmatpush3.bf16.msra.mxu0 %v16559_v23  ;;  %15268 = vmatpush3.bf16.msra.mxu1 %v16560_v24  ;;  %v16578_v21 = vld [vmem:[%s20285_s17 + $0x1d0] sm:$0xff]   ;;  %v16581_v34 = vld [vmem:[%s20285_s17 + $0x148] sm:$0xff]  }
 0xb8a   :  { %v2056_v40 = vpop.f32.mrf.mxu0  ;;  %v2097_v41 = vpop.f32.mrf.mxu1  ;;  %15247 = vmatprep.subr.bf16.mxu0 %v16561_v31  ;;  %15269 = vmatprep.subr.bf16.mxu1 %v16562_v32  ;;  %v1720_v31 = vrot.slane %v18717_v56, %v18764_v1  ;;  %v16583_v56 = vld [vmem:[%s20285_s17 + $0x108] sm:$0xff]  }
 0xb8b   :  { %v2269_v44 = vmax.f32 %v2055_v35, 0.0  ;;  %v2271_v45 = vmax.f32 %v2096_v36, 0.0  ;;  %v16582_v35 = vld [vmem:[%s20285_s17 + $0x1c8] sm:$0xff]   ;;  %v1732_v36 = vrot.slane %v18769_v4, %v18720_v57 }
 0xb8c   :  { %v2057_v46 = vpop.f32.mrf.mxu0  ;;  %v2098_v47 = vpop.f32.mrf.mxu1  ;;  %v16584_v41 = vld [vmem:[%s20285_s17 + $0x188] sm:$0xff]  }
 0xb8d   :  { %v2541_v48 = vpack.c.bf16 %v2269_v44, %v2269_v44  ;;  %v2543_v49 = vpack.c.bf16 %v2271_v45, %v2271_v45  ;;  %15248 = vmatpush3.bf16.msra.mxu0 %v16563_v37  ;;  %15270 = vmatpush3.bf16.msra.mxu1 %v16564_v38  ;;  %v1740_v37 = vrot.slane %v18769_v4, %v18723_v58  ;;  %v16585_v44 = vld [vmem:[%s20285_s17 + $0x140] sm:$0xff]  }
 0xb8e   :  { %v18757_v52 = vpop.f32.mrf.mxu0  ;;  %v18759_v59 = vpop.f32.mrf.mxu1  ;;  %15249 = vmatprep.subr.bf16.mxu0 %v16565_v42  ;;  %15271 = vmatprep.subr.bf16.mxu1 %v16566_v43  ;;  %v2053_v42 = vadd.f32 %v18745_v29, %v1712_v26  ;;  %v2094_v43 = vadd.f32 %v18747_v30, %v1720_v31  ;;  %v16586_v45 = vld [vmem:[%s20285_s17 + $0x1c0] sm:$0xff]   ;;  %v16589_v29 = vld [vmem:[%s20285_s17 + $0x278] sm:$0xff]  }
 0xb8f   :  { %3439 = vmatprep.mubr.bf16.mxu0 %v2541_v48  ;;  %3479 = vmatprep.mubr.bf16.mxu1 %v2543_v49  ;;  %v16587_v48 = vld [vmem:[%s20285_s17 + $0x100] sm:$0xff]   ;;  %v16590_v30 = vld [vmem:[%s20285_s17 + $0x2f8] sm:$0xff]  }
 0xb90   :  { %v2136_v62 = vpop.f32.mrf.mxu0  ;;  %v2177_v63 = vpop.f32.mrf.mxu1  ;;  %v16588_v49 = vld [vmem:[%s20285_s17 + $0x180] sm:$0xff]   ;;  %v16605_v26 = vld [vmem:[%s20285_s17 + $0x258] sm:$0xff]  }
 0xb91   :  { %15250 = vmatpush3.bf16.msra.mxu0 %v16567_v50  ;;  %15272 = vmatpush3.bf16.msra.mxu1 %v16568_v51  ;;  %v2137_v46 = vadd.f32 %v2136_v62, %v1732_v36  ;;  %v2178_v47 = vadd.f32 %v2177_v63, %v1740_v37  ;;  %v2268_v50 = vmax.f32 %v2053_v42, 0.0  ;;  %v2270_v51 = vmax.f32 %v2094_v43, 0.0  ;;  %v16591_v62 = vld [vmem:[%s20285_s17 + $0x238] sm:$0xff]   ;;  %v16611_v36 = vld [vmem:[%s20285_s17 + $0x210] sm:$0xff]  }
 0xb92   :  { %v2138_v5 = vpop.f32.mrf.mxu0  ;;  %v2179_v6 = vpop.f32.mrf.mxu1  ;;  %15251 = vmatprep.subr.bf16.mxu0 %v16569_v60  ;;  %15273 = vmatprep.subr.bf16.mxu1 %v16570_v61  ;;  %v16606_v31 = vld [vmem:[%s20285_s17 + $0x2d8] sm:$0xff]   ;;  %v1728_v37 = vrot.slane %v18769_v4, %v18711_v54  ;;  %v1748_v42 = vrot.slane %v18769_v4, %v18734_v8  ;;  %v1756_v43 = vrot.slane %v18769_v4, %v18737_v9 }
 0xb93   :  { %v2273_v60 = vmax.f32 %v2137_v46, 0.0  ;;  %v2275_v61 = vmax.f32 %v2178_v47, 0.0  ;;  %v2540_v63 = vpack.c.bf16 %v2268_v50, %v2268_v50  ;;  %v16593_v6 = vld [vmem:[%s20285_s17 + $0x270] sm:$0xff]   ;;  %v16616_v46 = vld [vmem:[%s20285_s17 + $0x288] sm:$0xff]   ;;  %v16617_v47 = vld [vmem:[%s20285_s17 + $0x240] sm:$0xff]  }
 0xb94   :  { %v2139_v12 = vpop.f32.mrf.mxu0  ;;  %v2180_v13 = vpop.f32.mrf.mxu1 }
 0xb95   :  { %15252 = vmatpush3.bf16.msra.mxu0 %v16571_v2  ;;  %15274 = vmatpush3.bf16.msra.mxu1 %v16572_v3  ;;  %v2542_v2 = vpack.c.bf16 %v2270_v51, %v2270_v51  ;;  %v16592_v3 = vld [vmem:[%s20285_s17 + $0x2b8] sm:$0xff]   ;;  %v2545_v5 = vpack.c.bf16 %v2273_v60, %v2273_v60  ;;  %v16596_v12 = vld [vmem:[%s20285_s17 + $0x2b0] sm:$0xff]   ;;  %v16597_v13 = vld [vmem:[%s20285_s17 + $0x268] sm:$0xff]  }
 0xb96   :  { %v18780_v17 = vpop.f32.mrf.mxu0  ;;  %v2257_v18 = vpop.f32.mrf.mxu1  ;;  %15253 = vmatprep.subr.bf16.mxu0 %v16573_v7  ;;  %15275 = vmatprep.subr.bf16.mxu1 %v16574_v10  ;;  %v16594_v7 = vld [vmem:[%s20285_s17 + $0x2f0] sm:$0xff]   ;;  %v2547_v10 = vpack.c.bf16 %v2275_v61, %v2275_v61  ;;  %v16621_v60 = vld [vmem:[%s20285_s17 + $0x378] sm:$0xff]  }
 0xb97   :  { %v18784_v22 = vadd.f32 %v2257_v18, %v1752_v11  ;;  %v16595_v11 = vld [vmem:[%s20285_s17 + $0x230] sm:$0xff]   ;;  %v16600_v18 = vld [vmem:[%s20285_s17 + $0x2a8] sm:$0xff]  }
 0xb98   :  { %v18786_v23 = vpop.f32.mrf.mxu0  ;;  %v18788_v24 = vpop.f32.mrf.mxu1 }
 0xb99   :  { %15254 = vmatpush3.bf16.msra.mxu0 %v16575_v14  ;;  %15276 = vmatpush3.bf16.msra.mxu1 %v16576_v15  ;;  %v16598_v14 = vld [vmem:[%s20285_s17 + $0x2e8] sm:$0xff]   ;;  %v2219_v50 = vadd.f32 %v18786_v23, %v1748_v42  ;;  %v2260_v51 = vadd.f32 %v18788_v24, %v1756_v43  ;;  %v16623_v23 = vld [vmem:[%s20285_s17 + $0x338] sm:$0xff]  }
 0xb9a   :  { %v2220_v32 = vpop.f32.mrf.mxu0  ;;  %v2261_v33 = vpop.f32.mrf.mxu1  ;;  %15255 = vmatprep.subr.bf16.mxu0 %v16577_v20  ;;  %15277 = vmatprep.subr.bf16.mxu1 %v16578_v21  ;;  %v16599_v15 = vld [vmem:[%s20285_s17 + $0x228] sm:$0xff]   ;;  %v16601_v20 = vld [vmem:[%s20285_s17 + $0x260] sm:$0xff]   ;;  %v16624_v24 = vld [vmem:[%s20285_s17 + $0x3b8] sm:$0xff]  }
 0xb9b   :  { %v16602_v21 = vld [vmem:[%s20285_s17 + $0x2e0] sm:$0xff]   ;;  %v16607_v32 = vld [vmem:[%s20285_s17 + $0x218] sm:$0xff]   ;;  %v16648_v43 = vld [vmem:[%s20285_s17 + $0x388] sm:$0xff]  }
 0xb9c   :  { %v2221_v38 = vpop.f32.mrf.mxu0  ;;  %v2262_v40 = vpop.f32.mrf.mxu1  ;;  %v16608_v33 = vld [vmem:[%s20285_s17 + $0x298] sm:$0xff]  }
 0xb9d   :  { %15256 = vmatpush3.bf16.msra.mxu0 %v16579_v25  ;;  %15278 = vmatpush3.bf16.msra.mxu1 %v16580_v53  ;;  %v16603_v25 = vld [vmem:[%s20285_s17 + $0x220] sm:$0xff]   ;;  %v16612_v38 = vld [vmem:[%s20285_s17 + $0x290] sm:$0xff]   ;;  %v16613_v40 = vld [vmem:[%s20285_s17 + $0x248] sm:$0xff]  }
 0xb9e   :  { %15257 = vmatprep.subr.bf16.mxu0 %v16581_v34  ;;  %15279 = vmatprep.subr.bf16.mxu1 %v16582_v35  ;;  %v16604_v53 = vld [vmem:[%s20285_s17 + $0x2a0] sm:$0xff]   ;;  %v16609_v34 = vld [vmem:[%s20285_s17 + $0x250] sm:$0xff]  }
 0xb9f   :  { %v16610_v35 = vld [vmem:[%s20285_s17 + $0x2d0] sm:$0xff]  }
 0xba1   :  { %15258 = vmatpush3.bf16.msra.mxu0 %v16583_v56  ;;  %15280 = vmatpush3.bf16.msra.mxu1 %v16584_v41  ;;  %v1736_v56 = vrot.slane %v18769_v4, %v18714_v55  ;;  %v16614_v41 = vld [vmem:[%s20285_s17 + $0x2c8] sm:$0xff]  }
 0xba2   :  { %15259 = vmatprep.subr.bf16.mxu0 %v16585_v44  ;;  %15281 = vmatprep.subr.bf16.mxu1 %v16586_v45  ;;  %v16615_v44 = vld [vmem:[%s20285_s17 + $0x208] sm:$0xff]   ;;  %v2135_v45 = vadd.f32 %v18757_v52, %v1728_v37  ;;  %v16620_v52 = vld [vmem:[%s20285_s17 + $0x280] sm:$0xff]   ;;  %v1744_v37 = vrot.slane %v18769_v4, %v18778_v16 }
 0xba3   :  { %v16651_v4 = vld [vmem:[%s20285_s17 + $0x300] sm:$0xff]  }
 0xba4   :  { %v2217_v42 = vadd.f32 %v18780_v17, %v1744_v37 }
 0xba5   :  { %15260 = vmatpush3.bf16.msra.mxu0 %v16587_v48  ;;  %15282 = vmatpush3.bf16.msra.mxu1 %v16588_v49  ;;  %v2176_v48 = vadd.f32 %v18759_v59, %v1736_v56  ;;  %v16618_v49 = vld [vmem:[%s20285_s17 + $0x2c0] sm:$0xff]   ;;  %v16622_v59 = vld [vmem:[%s20285_s17 + $0x3f8] sm:$0xff]   ;;  %v16646_v56 = vld [vmem:[%s20285_s17 + $0x3c8] sm:$0xff]  }
 0xba6   :  { %15289 = vmatprep.subr.bf16.mxu0 %v16589_v29  ;;  %15311 = vmatprep.subr.bf16.mxu1 %v16590_v30  ;;  %v16619_v29 = vld [vmem:[%s20285_s17 + $0x200] sm:$0xff]   ;;  %v2272_v30 = vmax.f32 %v2135_v45, 0.0 }
 0xba7   :  { %v2274_v61 = vmax.f32 %v2176_v48, 0.0  ;;  %v16650_v45 = vld [vmem:[%s20285_s17 + $0x3c0] sm:$0xff]   ;;  %v2278_v48 = vmax.f32 %v18784_v22, 0.0  ;;  %v14405_v22 = vld [vmem:[#allocation23] ss:$0 sm:$0xff] }
 0xba8   :  { %3440 = vmatmul.mubr.bf16.vlgmr.msra.gmra.mxu0 %v2540_v63  ;;  %3480 = vmatmul.mubr.bf16.vlgmr.msra.gmra.mxu1 %v2542_v2  ;;  %v2279_v63 = vmax.f32 %v2260_v51, 0.0  ;;  %v2544_v2 = vpack.c.bf16 %v2272_v30, %v2272_v30 }
 0xba9   :  { %15290 = vmatpush3.bf16.msra.mxu0 %v16591_v62  ;;  %3519 = vmatprep.mubr.bf16.mxu0 %v2545_v5  ;;  %v2277_v62 = vmax.f32 %v2219_v50, 0.0  ;;  %v16625_v5 = vld [vmem:[%s20285_s17 + $0x370] sm:$0xff]   ;;  %v2550_v17 = vpack.c.bf16 %v2278_v48, %v2278_v48 }
 0xbaa   :  { %15312 = vmatpush3.bf16.msra.mxu1 %v16592_v3  ;;  %3559 = vmatprep.mubr.bf16.mxu1 %v2547_v10  ;;  %v2546_v3 = vpack.c.bf16 %v2274_v61, %v2274_v61  ;;  %v2551_v10 = vpack.c.bf16 %v2279_v63, %v2279_v63 }
 0xbab   :  { %15291 = vmatprep.subr.bf16.mxu0 %v16593_v6  ;;  %15313 = vmatprep.subr.bf16.mxu1 %v16594_v7  ;;  %v2549_v6 = vpack.c.bf16 %v2277_v62, %v2277_v62  ;;  %v16626_v7 = vld [vmem:[%s20285_s17 + $0x3f0] sm:$0xff]  }
 0xbad   :  { %15292 = vmatpush3.bf16.msra.mxu0 %v16595_v11  ;;  %v16627_v11 = vld [vmem:[%s20285_s17 + $0x330] sm:$0xff]  }
 0xbae   :  { %15314 = vmatpush3.bf16.msra.mxu1 %v16596_v12  ;;  %15293 = vmatprep.subr.bf16.mxu0 %v16597_v13  ;;  %v16628_v12 = vld [vmem:[%s20285_s17 + $0x3b0] sm:$0xff]   ;;  %v16629_v13 = vld [vmem:[%s20285_s17 + $0x368] sm:$0xff]  }
 0xbaf   :  { %15315 = vmatprep.subr.bf16.mxu1 %v16598_v14  ;;  %v16630_v14 = vld [vmem:[%s20285_s17 + $0x3e8] sm:$0xff]  }
 0xbb1   :  { %15294 = vmatpush3.bf16.msra.mxu0 %v16599_v15  ;;  %v16631_v15 = vld [vmem:[%s20285_s17 + $0x328] sm:$0xff]  }
 0xbb2   :  { %15316 = vmatpush3.bf16.msra.mxu1 %v16600_v18  ;;  %15295 = vmatprep.subr.bf16.mxu0 %v16601_v20  ;;  %v16632_v18 = vld [vmem:[%s20285_s17 + $0x3a8] sm:$0xff]   ;;  %v16633_v20 = vld [vmem:[%s20285_s17 + $0x360] sm:$0xff]  }
 0xbb3   :  { %15317 = vmatprep.subr.bf16.mxu1 %v16602_v21  ;;  %v16634_v21 = vld [vmem:[%s20285_s17 + $0x3e0] sm:$0xff]  }
 0xbb5   :  { %15296 = vmatpush3.bf16.msra.mxu0 %v16603_v25  ;;  %v16635_v25 = vld [vmem:[%s20285_s17 + $0x320] sm:$0xff]  }
 0xbb6   :  { %15318 = vmatpush3.bf16.msra.mxu1 %v16604_v53  ;;  %15297 = vmatprep.subr.bf16.mxu0 %v16605_v26  ;;  %v16636_v53 = vld [vmem:[%s20285_s17 + $0x3a0] sm:$0xff]   ;;  %v16637_v26 = vld [vmem:[%s20285_s17 + $0x358] sm:$0xff]  }
 0xbb7   :  { %15319 = vmatprep.subr.bf16.mxu1 %v16606_v31  ;;  %v16638_v31 = vld [vmem:[%s20285_s17 + $0x3d8] sm:$0xff]  }
 0xbb9   :  { %15298 = vmatpush3.bf16.msra.mxu0 %v16607_v32  ;;  %v16639_v32 = vld [vmem:[%s20285_s17 + $0x318] sm:$0xff]  }
 0xbba   :  { %15320 = vmatpush3.bf16.msra.mxu1 %v16608_v33  ;;  %15299 = vmatprep.subr.bf16.mxu0 %v16609_v34  ;;  %v16640_v33 = vld [vmem:[%s20285_s17 + $0x398] sm:$0xff]   ;;  %v16641_v34 = vld [vmem:[%s20285_s17 + $0x350] sm:$0xff]  }
 0xbbb   :  { %15321 = vmatprep.subr.bf16.mxu1 %v16610_v35  ;;  %v16642_v35 = vld [vmem:[%s20285_s17 + $0x3d0] sm:$0xff]  }
 0xbbd   :  { %15300 = vmatpush3.bf16.msra.mxu0 %v16611_v36  ;;  %v16643_v36 = vld [vmem:[%s20285_s17 + $0x310] sm:$0xff]  }
 0xbbe   :  { %15322 = vmatpush3.bf16.msra.mxu1 %v16612_v38  ;;  %15301 = vmatprep.subr.bf16.mxu0 %v16613_v40  ;;  %v16644_v38 = vld [vmem:[%s20285_s17 + $0x390] sm:$0xff]   ;;  %v16645_v40 = vld [vmem:[%s20285_s17 + $0x348] sm:$0xff]  }
 0xbbf   :  { %15323 = vmatprep.subr.bf16.mxu1 %v16614_v41  ;;  %v16647_v41 = vld [vmem:[%s20285_s17 + $0x308] sm:$0xff]  }
 0xbc1   :  { %15302 = vmatpush3.bf16.msra.mxu0 %v16615_v44  ;;  %v16649_v44 = vld [vmem:[%s20285_s17 + $0x340] sm:$0xff]  }
 0xbc2   :  { %15324 = vmatpush3.bf16.msra.mxu1 %v16616_v46  ;;  %15303 = vmatprep.subr.bf16.mxu0 %v16617_v47  ;;  %v2276_v46 = vmax.f32 %v2217_v42, 0.0  ;;  %v16652_v47 = vld [vmem:[%s20285_s17 + $0x380] sm:$0xff]   ;;  %s20300_s17 = sld [smem:[#allocation81_spill]] }
 0xbc3   :  { %15325 = vmatprep.subr.bf16.mxu1 %v16618_v49 }
 0xbc4   :  { %v2548_v49 = vpack.c.bf16 %v2276_v46, %v2276_v46 }
 0xbc5   :  { %15304 = vmatpush3.bf16.msra.mxu0 %v16619_v29 }
 0xbc6   :  { %15326 = vmatpush3.bf16.msra.mxu1 %v16620_v52  ;;  %15333 = vmatprep.subr.bf16.mxu0 %v16621_v60 }
 0xbc7   :  { %15355 = vmatprep.subr.bf16.mxu1 %v16622_v59 }
 0xbc8   :  { %3520 = vmatmul.mubr.bf16.vlgmr.msra.gmra.mxu0 %v2544_v2 }
 0xbc9   :  { %3560 = vmatmul.mubr.bf16.vlgmr.msra.gmra.mxu1 %v2546_v3  ;;  %15334 = vmatpush3.bf16.msra.mxu0 %v16623_v23 }
 0xbca   :  { %3599 = vmatprep.mubr.bf16.mxu0 %v2549_v6  ;;  %15356 = vmatpush3.bf16.msra.mxu1 %v16624_v24 }
 0xbcb   :  { %3639 = vmatprep.mubr.bf16.mxu1 %v2551_v10  ;;  %15335 = vmatprep.subr.bf16.mxu0 %v16625_v5 }
 0xbcc   :  { %15357 = vmatprep.subr.bf16.mxu1 %v16626_v7 }
 0xbcd   :  { %15336 = vmatpush3.bf16.msra.mxu0 %v16627_v11 }
 0xbce   :  { %15358 = vmatpush3.bf16.msra.mxu1 %v16628_v12  ;;  %15337 = vmatprep.subr.bf16.mxu0 %v16629_v13 }
 0xbcf   :  { %15359 = vmatprep.subr.bf16.mxu1 %v16630_v14 }
 0xbd1   :  { %15338 = vmatpush3.bf16.msra.mxu0 %v16631_v15 }
 0xbd2   :  { %15360 = vmatpush3.bf16.msra.mxu1 %v16632_v18  ;;  %15339 = vmatprep.subr.bf16.mxu0 %v16633_v20 }
 0xbd3   :  { %15361 = vmatprep.subr.bf16.mxu1 %v16634_v21 }
 0xbd5   :  { %15340 = vmatpush3.bf16.msra.mxu0 %v16635_v25 }
 0xbd6   :  { %15362 = vmatpush3.bf16.msra.mxu1 %v16636_v53  ;;  %15341 = vmatprep.subr.bf16.mxu0 %v16637_v26 }
 0xbd7   :  { %15363 = vmatprep.subr.bf16.mxu1 %v16638_v31 }
 0xbd9   :  { %15342 = vmatpush3.bf16.msra.mxu0 %v16639_v32 }
 0xbda   :  { %15364 = vmatpush3.bf16.msra.mxu1 %v16640_v33  ;;  %15343 = vmatprep.subr.bf16.mxu0 %v16641_v34 }
 0xbdb   :  { %15365 = vmatprep.subr.bf16.mxu1 %v16642_v35 }
 0xbdd   :  { %15344 = vmatpush3.bf16.msra.mxu0 %v16643_v36 }
 0xbde   :  { %15366 = vmatpush3.bf16.msra.mxu1 %v16644_v38  ;;  %15345 = vmatprep.subr.bf16.mxu0 %v16645_v40 }
 0xbdf   :  { %15367 = vmatprep.subr.bf16.mxu1 %v16646_v56 }
 0xbe1   :  { %15346 = vmatpush3.bf16.msra.mxu0 %v16647_v41 }
 0xbe2   :  { %15368 = vmatpush3.bf16.msra.mxu1 %v16648_v43  ;;  %15347 = vmatprep.subr.bf16.mxu0 %v16649_v44 }
 0xbe3   :  { %15369 = vmatprep.subr.bf16.mxu1 %v16650_v45 }
 0xbe5   :  { %15348 = vmatpush3.bf16.msra.mxu0 %v16651_v4 }
 0xbe6   :  { %15370 = vmatpush3.bf16.msra.mxu1 %v16652_v47  ;;  %16086 = vmatprep.subr.bf16.mxu0 %v18057_v0 }
 0xbe7   :  { %16094 = vmatprep.subr.mxu1 %v18057_v0 }
 0xbe8   :  { %3600 = vmatmul.mubr.bf16.vlgmr.msra.gmra.mxu0 %v2548_v49 }
 0xbe9   :  { %3640 = vmatmul.mubr.bf16.vlgmr.msra.gmra.mxu1 %v2550_v17  ;;  %16090 = vmatprep.mubr.msk.bf16.mxu0 %vm18058_vm0, %v18057_v0 }
 0xbea   :  { %16096 = vmatprep.mubr.msk.f32.mxu1 %vm18058_vm0, %v18057_v0 }
 0xc48   :  { %v15217_v50 = vpop.f32.mrf.mxu0  ;;  %v15239_v51 = vpop.f32.mrf.mxu1 }
 0xc4a   :  { %v15218_v29 = vpop.f32.mrf.mxu0  ;;  %v15240_v30 = vpop.f32.mrf.mxu1 }
 0xc4b   :  { %v15219_v52 = vadd.f32 %v15218_v29, %v15217_v50  ;;  %v15241_v62 = vadd.f32 %v15240_v30, %v15239_v51 }
 0xc4c   :  { %v15220_v60 = vpop.f32.mrf.mxu0  ;;  %v15242_v61 = vpop.f32.mrf.mxu1 }
 0xc4d   :  { %v3362_v59 = vadd.f32 %v15219_v52, %v14405_v22  ;;  %v16653_v52 = vld [vmem:[%s20287_s29 + $0x8] sm:$0xff]   ;;  %v16654_v60 = vld [vmem:[%s20287_s29] sm:$0xff]   ;;  %s20302_s29 = sld [smem:[#allocation80_spill]] }
 0xc4e   :  { %v15221_v63 = vpop.f32.mrf.mxu0  ;;  %v15243_v23 = vpop.f32.mrf.mxu1  ;;  %16087 = vmatpush3.bf16.msra.mxu0 %v16653_v52 }
 0xc4f   :  { %v3402_v2 = vadd.f32 %v15241_v62, %v3362_v59  ;;  %16088 = vmatprep.subr.bf16.mxu0 %v18057_v0  ;;  %v14534_v63 = vld [vmem:[#allocation29] ss:$0 sm:$0xff] }
 0xc52   :  { %16089 = vmatpush3.bf16.msra.mxu0 %v16654_v60 }
 0xc53   :  { %16099 = vmatprep.subr.mxu0 %v18057_v0 }
 0xc68   :  { %v15261_v24 = vpop.f32.mrf.mxu0  ;;  %v15283_v3 = vpop.f32.mrf.mxu1 }
 0xc6a   :  { %v15262_v5 = vpop.f32.mrf.mxu0  ;;  %v15284_v6 = vpop.f32.mrf.mxu1 }
 0xc6b   :  { %v15263_v26 = vadd.f32 %v15262_v5, %v15261_v24  ;;  %v15285_v32 = vadd.f32 %v15284_v6, %v15283_v3  ;;  %v14536_v6 = vld [vmem:[#allocation43] ss:$0 sm:$0xff] }
 0xc6c   :  { %v15264_v7 = vpop.f32.mrf.mxu0  ;;  %v15286_v10 = vpop.f32.mrf.mxu1 }
 0xc6d   :  { %v3442_v31 = vadd.f32 %v15263_v26, %v3402_v2  ;;  %v14535_v2 = vld [vmem:[#allocation28] ss:$0 sm:$0xff] }
 0xc6e   :  { %v15265_v11 = vpop.f32.mrf.mxu0  ;;  %v15287_v12 = vpop.f32.mrf.mxu1 }
 0xc6f   :  { %v3482_v34 = vadd.f32 %v15285_v32, %v3442_v31 }
 0xc88   :  { %v15305_v13 = vpop.f32.mrf.mxu0 }
 0xc89   :  { %v15327_v14 = vpop.f32.mrf.mxu1 }
 0xc8a   :  { %v15306_v15 = vpop.f32.mrf.mxu0 }
 0xc8b   :  { %v15328_v18 = vpop.f32.mrf.mxu1  ;;  %v15307_v33 = vadd.f32 %v15306_v15, %v15305_v13 }
 0xc8c   :  { %v15308_v20 = vpop.f32.mrf.mxu0  ;;  %v15329_v37 = vadd.f32 %v15328_v18, %v15327_v14 }
 0xc8d   :  { %v15330_v21 = vpop.f32.mrf.mxu1  ;;  %v3522_v35 = vadd.f32 %v15307_v33, %v3482_v34 }
 0xc8e   :  { %v15309_v25 = vpop.f32.mrf.mxu0 }
 0xc8f   :  { %v15331_v53 = vpop.f32.mrf.mxu1  ;;  %v3562_v56 = vadd.f32 %v15329_v37, %v3522_v35 }
 0xca8   :  { %v15349_v36 = vpop.f32.mrf.mxu0 }
 0xca9   :  { %v15371_v38 = vpop.f32.mrf.mxu1 }
 0xcaa   :  { %v15350_v40 = vpop.f32.mrf.mxu0 }
 0xcab   :  { %v15351_v41 = vadd.f32 %v15350_v40, %v15349_v36  ;;  %v15372_v42 = vpop.f32.mrf.mxu1 }
 0xcac   :  { %v15352_v43 = vpop.f32.mrf.mxu0  ;;  %v15373_v45 = vadd.f32 %v15372_v42, %v15371_v38 }
 0xcad   :  { %v3602_v44 = vadd.f32 %v15351_v41, %v3562_v56  ;;  %v15374_v4 = vpop.f32.mrf.mxu1 }
 0xcae   :  { %v15353_v46 = vpop.f32.mrf.mxu0 }
 0xcaf   :  { %v3642_v47 = vadd.f32 %v15373_v45, %v3602_v44  ;;  %v15375_v48 = vpop.f32.mrf.mxu1 }
 0xcb1   :  { %v3647_v49 = vadd.f32 %v3642_v47, %v18630_v39 }
 0xcb3   :  { %v3648_v17 = vsel %vm781_vm2, %v3647_v49, 0.0 }
 0xcb4   :  { %3649 = vadd.xlane.f32.xlu0 %v3648_v17 }
 0xd3d   :  { %v3650_v50 = vpop.xlane.xlu0 %3649 }
 0xd3e   :  { %v3651_v51 = vmul.f32 0.03125, %v3650_v50 }
 0xd40   :  { %v3652_v22 = vsub.f32 %v3647_v49, %v3651_v51 }
 0xd42   :  { %v3653_v29 = vmul.f32 %v3652_v22, %v3652_v22 }
 0xd44   :  { %v3654_v30 = vsel %vm781_vm2, %v3653_v29, 0.0 }
 0xd45   :  { %3655 = vadd.xlane.f32.xlu1 %v3654_v30 }
 0xdce   :  { %v3656_v61 = vpop.xlane.xlu1 %3655 }
 0xdcf   :  { %v3657_v39 = vmul.f32 0.03125, %v3656_v61 }
 0xdd1   :  { %v3658_v59 = vadd.f32 1e-05, %v3657_v39 }
 0xdd3   :  { %17083 = vrsqrt.f32 %v3658_v59 }
 0xde0   :  { %v17084_v62 = vpop.eup %17083 }
 0xde1   :  { %v3660_v23 = vmul.f32 %v17084_v62, %v3652_v22 }
 0xde3   :  { %v3668_v24 = vmul.f32 %v14534_v63, %v3660_v23 }
 0xde5   :  { %v18903_v3 = vadd.f32 %v14535_v2, %v3668_v24 }
 0xde7   :  { %v3681_v5 = vpack.c.bf16 %v18903_v3, %v18903_v3 }
 0xde9   :  { %16091 = vmatmul.mubr.msk.bf16.vlgmr.msra.gmra.mxu0 %vm781_vm2, %v3681_v5 }
 0xdea   :  { %16101 = vmatprep.mubr.msk.f32.mxu0 %vm18058_vm0, %v18057_v0 }
 0xea9   :  { %v3738_v7 = vpop.f32.mrf.mxu0 }
 0xeaa   :  { %v18910_v10 = vadd.f32 %v14536_v6, %v3738_v7 }
 0xeab   :  { %v16092_v11 = vpop.f32.mrf.mxu0 }
 0xeac   :  { %3911 = vrot.lane.b32.xlu1 %v18910_v10, %s18061_s2  ;;  %3745 = vrot.lane.b32.xlu0 %v18910_v10, %s18060_s1 }
 0xead   :  { %v3741_v12 = vpop.f32.mrf.mxu0 }
 0xeaf   :  { %v16093_v13 = vpop.f32.mrf.mxu0 }
 0xeb0   :  { %3909 = vrot.lane.b32.xlu1 %v18910_v10, %s18059_s28  ;;  %4077 = vrot.lane.b32.xlu0 %v18910_v10, %s18062_s24 }
 0xeb4   :  { %4075 = vrot.lane.b32.xlu1 %v18910_v10, %s18063_s13  ;;  %4243 = vrot.lane.b32.xlu0 %v18910_v10, %s18064_s14 }
 0xeb8   :  { %4241 = vrot.lane.b32.xlu1 %v18910_v10, %s18065_s0 }
 0xf1e   :  { %v3912_v14 = vpop.permute.xlu1 %3911  ;;  %v3746_v15 = vpop.permute.xlu0 %3745 }
 0xf1f   :  { %16095 = vmatpush3.xpose.msk.msra.mxu1 %vm882_vm3, %v3746_v15 }
 0xf20   :  { %16104 = vmatprep.subr.mxu1 %v18057_v0 }
 0xf22   :  { %v3910_v18 = vpop.permute.xlu1 %3909  ;;  %16097 = vmatmul.mubr.msk.f32.vlgmr.msra.gmra.mxu1 %vm882_vm3, %v18910_v10  ;;  %v4078_v20 = vpop.permute.xlu0 %4077 }
 0xf23   :  { %16105 = vmatpush3.xpose.msk.msra.mxu1 %vm882_vm3, %v3912_v14  ;;  %16106 = vmatprep.mubr.msk.f32.mxu1 %vm18058_vm0, %v18057_v0 }
 0xf24   :  { %16114 = vmatprep.subr.mxu1 %v18057_v0 }
 0xf26   :  { %16107 = vmatmul.mubr.msk.f32.vlgmr.msra.gmra.mxu1 %vm882_vm3, %v3910_v18  ;;  %v4076_v21 = vpop.permute.xlu1 %4075  ;;  %v4244_v25 = vpop.permute.xlu0 %4243 }
 0xf27   :  { %16115 = vmatpush3.xpose.msk.msra.mxu1 %vm882_vm3, %v4078_v20  ;;  %16116 = vmatprep.mubr.msk.f32.mxu1 %vm18058_vm0, %v18057_v0 }
 0xf28   :  { %16124 = vmatprep.subr.mxu1 %v18057_v0 }
 0xf2a   :  { %16117 = vmatmul.mubr.msk.f32.vlgmr.msra.gmra.mxu1 %vm882_vm3, %v4076_v21  ;;  %v4242_v53 = vpop.permute.xlu1 %4241 }
 0xf2b   :  { %16125 = vmatpush3.xpose.msk.msra.mxu1 %vm882_vm3, %v4244_v25  ;;  %16126 = vmatprep.mubr.msk.f32.mxu1 %vm18058_vm0, %v18057_v0 }
 0xf2c   :  { %16134 = vmatprep.subr.bf16.mxu1 %v18057_v0 }
 0xf2e   :  { %16127 = vmatmul.mubr.msk.f32.vlgmr.msra.gmra.mxu1 %vm882_vm3, %v4242_v53 }
 0xf2f   :  { %16138 = vmatprep.mubr.msk.bf16.mxu1 %vm18058_vm0, %v18057_v0 }
 0xfe2   :  { %v3817_v26 = vpop.f32.mrf.mxu1 }
 0xfe3   :  { %v3821_v31 = vmul.f32 0.35355338, %v3817_v26 }
 0xfe4   :  { %v16098_v32 = vpop.f32.mrf.mxu1 }
 0xfe5   :  { %v3822_v33 = vsel %vm882_vm3, %v3821_v31, -inf }
 0xfe6   :  { %3823 = vmax.xlane.f32.xlu0 %v3822_v33  ;;  %v3983_v34 = vpop.f32.mrf.mxu1  ;;  %v16656_v33 = vld [vmem:[%s20288_s16] sm:$0xff]  }
 0xfe7   :  { %v3987_v35 = vmul.f32 0.35355338, %v3983_v34 }
 0xfe8   :  { %v16108_v36 = vpop.f32.mrf.mxu1 }
 0xfe9   :  { %v3988_v37 = vsel %vm882_vm3, %v3987_v35, -inf }
 0xfea   :  { %3989 = vmax.xlane.f32.xlu1 %v3988_v37  ;;  %v4149_v38 = vpop.f32.mrf.mxu1 }
 0xfeb   :  { %v4153_v40 = vmul.f32 0.35355338, %v4149_v38 }
 0xfec   :  { %v16118_v56 = vpop.f32.mrf.mxu1 }
 0xfed   :  { %v4154_v41 = vsel %vm882_vm3, %v4153_v40, -inf }
 0xfee   :  { %4155 = vmax.xlane.f32.xlu0 %v4154_v41  ;;  %v4315_v42 = vpop.f32.mrf.mxu1 }
 0xfef   :  { %v4319_v43 = vmul.f32 0.35355338, %v4315_v42 }
 0xff0   :  { %v16128_v44 = vpop.f32.mrf.mxu1 }
 0xff1   :  { %v4320_v45 = vsel %vm882_vm3, %v4319_v43, -inf }
 0xff2   :  { %4321 = vmax.xlane.f32.xlu0 %v4320_v45 }
 0xffb   :  { %3833 = vrot.lane.b32.xlu1 %v18910_v10, %s18066_s25 }
0x106f   :  { %v3824_v4 = vpop.xlane.xlu0 %3823 }
0x1070   :  { %v3825_v46 = vsub.f32 %v3821_v31, %v3824_v4  ;;  %v16655_v31 = vld [vmem:[%s20288_s16 + $0x8] sm:$0xff]   ;;  %s20303_s16 = sld [smem:[#allocation79_spill]] }
0x1071   :  { %16135 = vmatpush3.bf16.msra.mxu1 %v16655_v31 }
0x1072   :  { %v3826_v47 = vmul.f32 1.442695, %v3825_v46  ;;  %16136 = vmatprep.subr.bf16.mxu1 %v18057_v0 }
0x1073   :  { %v3990_v48 = vpop.xlane.xlu1 %3989 }
0x1074   :  { %17085 = vpow2.f32 %v3826_v47  ;;  %v3991_v49 = vsub.f32 %v3987_v35, %v3990_v48  ;;  %v14552_v47 = vld [vmem:[#allocation41] ss:$0 sm:$0xff] }
0x1075   :  { %16137 = vmatpush3.bf16.msra.mxu1 %v16656_v33 }
0x1076   :  { %v3992_v17 = vmul.f32 1.442695, %v3991_v49 }
0x1077   :  { %v3834_v50 = vpop.permute.xlu1 %3833  ;;  %v4156_v51 = vpop.xlane.xlu0 %4155 }
0x1078   :  { %17087 = vpow2.f32 %v3992_v17  ;;  %v4157_v22 = vsub.f32 %v4153_v40, %v4156_v51  ;;  %16100 = vmatpush3.msra.mxu0 %v3834_v50 }
0x1079   :  { %16109 = vmatprep.subr.mxu0 %v18057_v0 }
0x107a   :  { %v4158_v29 = vmul.f32 1.442695, %v4157_v22 }
0x107b   :  { %v4322_v30 = vpop.xlane.xlu0 %4321 }
0x107c   :  { %17089 = vpow2.f32 %v4158_v29  ;;  %v4323_v52 = vsub.f32 %v4319_v43, %v4322_v30 }
0x107e   :  { %v4324_v60 = vmul.f32 1.442695, %v4323_v52 }
0x1080   :  { %17091 = vpow2.f32 %v4324_v60 }
0x1081   :  { %v17086_v61 = vpop.eup %17085 }
0x1082   :  { %v3828_v39 = vsel %vm882_vm3, %v17086_v61, 0.0 }
0x1083   :  { %3829 = vadd.xlane.f32.xlu1 %v3828_v39 }
0x1085   :  { %v17088_v59 = vpop.eup %17087 }
0x1086   :  { %v3994_v62 = vsel %vm882_vm3, %v17088_v59, 0.0 }
0x1087   :  { %3995 = vadd.xlane.f32.xlu0 %v3994_v62  ;;  %v4543_v62 = vld [vmem:[%s20289_s18 + $0xc0] sm:$0xff] }
0x1089   :  { %v17090_v63 = vpop.eup %17089 }
0x108a   :  { %v4160_v23 = vsel %vm882_vm3, %v17090_v63, 0.0 }
0x108b   :  { %4161 = vadd.xlane.f32.xlu1 %v4160_v23  ;;  %v4544_v23 = vld [vmem:[%s20289_s18 + $0xc8] sm:$0xff] }
0x108d   :  { %v17092_v2 = vpop.eup %17091 }
0x108e   :  { %v4326_v24 = vsel %vm882_vm3, %v17092_v2, 0.0 }
0x108f   :  { %4327 = vadd.xlane.f32.xlu0 %v4326_v24 }
0x109c   :  { %4165 = vrot.lane.b32.xlu1 %v18910_v10, %s18067_s4 }
0x10a0   :  { %4331 = vrot.lane.b32.xlu1 %v18910_v10, %s18068_s3 }
0x10a5   :  { %3999 = vrot.lane.b32.xlu0 %v18910_v10, %s18069_s7 }
0x110c   :  { %v3830_v5 = vpop.xlane.xlu1 %3829 }
0x110d   :  { %17093 = vrcp.f32 %v3830_v5 }
0x1110   :  { %v3996_v6 = vpop.xlane.xlu0 %3995 }
0x1111   :  { %17095 = vrcp.f32 %v3996_v6  ;;  %v4519_v6 = vld [vmem:[%s20289_s18] sm:$0xff] }
0x1114   :  { %v4162_v7 = vpop.xlane.xlu1 %4161 }
0x1115   :  { %17097 = vrcp.f32 %v4162_v7  ;;  %v4527_v7 = vld [vmem:[%s20289_s18 + $0x40] sm:$0xff] }
0x1118   :  { %v4328_v11 = vpop.xlane.xlu0 %4327  ;;  %v4166_v18 = vpop.permute.xlu1 %4165 }
0x1119   :  { %17099 = vrcp.f32 %v4328_v11  ;;  %v4520_v11 = vld [vmem:[%s20289_s18 + $0x8] sm:$0xff] }
0x111a   :  { %v17094_v12 = vpop.eup %17093 }
0x111b   :  { %v3832_v13 = vmul.f32 %v17094_v12, %v17086_v61  ;;  %v14559_v12 = vcombine.high %v4519_v6, %v4527_v7 }
0x111c   :  { %v4000_v14 = vpop.permute.xlu0 %3999  ;;  %v4332_v25 = vpop.permute.xlu1 %4331 }
0x111d   :  { %16102 = vmatmul.mubr.msk.f32.vlgmr.msra.gmra.mxu0 %vm882_vm3, %v3832_v13  ;;  %v4528_v13 = vld [vmem:[%s20289_s18 + $0x48] sm:$0xff] }
0x111e   :  { %v17096_v15 = vpop.eup %17095  ;;  %16110 = vmatpush3.msra.mxu0 %v4000_v14  ;;  %16111 = vmatprep.mubr.msk.f32.mxu0 %vm18058_vm0, %v18057_v0  ;;  %v14558_v14 = vcombine.low %v4519_v6, %v4527_v7 }
0x111f   :  { %16119 = vmatprep.subr.mxu0 %v18057_v0  ;;  %v3998_v10 = vmul.f32 %v17096_v15, %v17088_v59  ;;  %v4535_v59 = vld [vmem:[%s20289_s18 + $0x80] sm:$0xff]  ;;  %v14560_v15 = vcombine.low %v4520_v11, %v4528_v13 }
0x1121   :  { %16112 = vmatmul.mubr.msk.f32.vlgmr.msra.gmra.mxu0 %vm882_vm3, %v3998_v10  ;;  %v4537_v10 = vld [vmem:[%s20289_s18 + $0x90] sm:$0xff] }
0x1122   :  { %v17098_v20 = vpop.eup %17097  ;;  %16120 = vmatpush3.msra.mxu0 %v4166_v18  ;;  %16121 = vmatprep.mubr.msk.f32.mxu0 %vm18058_vm0, %v18057_v0  ;;  %v14561_v18 = vcombine.high %v4520_v11, %v4528_v13  ;;  %v4525_v13 = vld [vmem:[%s20289_s18 + $0x30] sm:$0xff] }
0x1123   :  { %16129 = vmatprep.subr.mxu0 %v18057_v0  ;;  %v4164_v21 = vmul.f32 %v17098_v20, %v17090_v63  ;;  %v4536_v63 = vld [vmem:[%s20289_s18 + $0x88] sm:$0xff]  ;;  %v4545_v20 = vld [vmem:[%s20289_s18 + $0xd0] sm:$0xff] }
0x1124   :  { %v14576_v24 = vcombine.low %v4536_v63, %v4544_v23  ;;  %v14577_v5 = vcombine.high %v4536_v63, %v4544_v23  ;;  %v4541_v23 = vld [vmem:[%s20289_s18 + $0xb0] sm:$0xff] }
0x1125   :  { %16122 = vmatmul.mubr.msk.f32.vlgmr.msra.gmra.mxu0 %vm882_vm3, %v4164_v21  ;;  %v4538_v21 = vld [vmem:[%s20289_s18 + $0x98] sm:$0xff] }
0x1126   :  { %v17100_v53 = vpop.eup %17099  ;;  %16130 = vmatpush3.msra.mxu0 %v4332_v25  ;;  %16131 = vmatprep.mubr.msk.f32.mxu0 %vm18058_vm0, %v18057_v0  ;;  %v14578_v25 = vcombine.low %v4537_v10, %v4545_v20 }
0x1127   :  { %v4330_v26 = vmul.f32 %v17100_v53, %v17092_v2  ;;  %v14574_v2 = vcombine.low %v4535_v59, %v4543_v62  ;;  %4852 = vmatprep.subr.bf16.mxu1 %v14577_v5  ;;  %v14579_v53 = vcombine.high %v4537_v10, %v4545_v20  ;;  %v4550_v5 = vld [vmem:[%s20289_s18 + $0xf8] sm:$0xff] }
0x1129   :  { %16132 = vmatmul.mubr.msk.f32.vlgmr.msra.gmra.mxu0 %vm882_vm3, %v4330_v26  ;;  %v4546_v26 = vld [vmem:[%s20289_s18 + $0xd8] sm:$0xff] }
0x112a   :  { %4831 = vmatprep.mubr.bf16.mxu0 %v18073_v19  ;;  %v14580_v31 = vcombine.low %v4538_v21, %v4546_v26 }
0x11dd   :  { %v3905_v32 = vpop.f32.mrf.mxu0 }
0x11df   :  { %v16103_v34 = vpop.f32.mrf.mxu0 }
0x11e1   :  { %v4071_v35 = vpop.f32.mrf.mxu0 }
0x11e2   :  { %4408 = vrot.lane.b32.xlu0 %v4071_v35, %s18070_s10 }
0x11e3   :  { %v16113_v36 = vpop.f32.mrf.mxu0 }
0x11e5   :  { %v4237_v37 = vpop.f32.mrf.mxu0 }
0x11e6   :  { %4412 = vrot.lane.b32.xlu1 %v4237_v37, %s18071_s19  ;;  %v14556_v37 = vld [vmem:[#allocation37] ss:$0 sm:$0xff] }
0x11e7   :  { %v16123_v38 = vpop.f32.mrf.mxu0 }
0x11e9   :  { %v4403_v40 = vpop.f32.mrf.mxu0 }
0x11ea   :  { %4416 = vrot.lane.b32.xlu0 %v4403_v40, %s18072_s11  ;;  %v14557_v40 = vld [vmem:[#allocation35] ss:$0 sm:$0xff] }
0x11eb   :  { %v16133_v56 = vpop.f32.mrf.mxu0 }
0x1254   :  { %v4409_v41 = vpop.permute.xlu0 %4408 }
0x1255   :  { %v4419_v43 = vsel %vm882_vm3, %v3905_v32, %v4409_v41  ;;  %v14581_v32 = vcombine.high %v4538_v21, %v4546_v26  ;;  %v4521_v41 = vld [vmem:[%s20289_s18 + $0x10] sm:$0xff] }
0x1258   :  { %v4413_v42 = vpop.permute.xlu1 %4412 }
0x1259   :  { %v4420_v44 = vsel %vm736_vm1, %v4419_v43, %v4413_v42  ;;  %v4529_v42 = vld [vmem:[%s20289_s18 + $0x50] sm:$0xff]  ;;  %v4522_v43 = vld [vmem:[%s20289_s18 + $0x18] sm:$0xff] }
0x125c   :  { %v4417_v45 = vpop.permute.xlu0 %4416 }
0x125d   :  { %v4421_v4 = vsel %vm1557_vm4, %v4420_v44, %v4417_v45  ;;  %v4530_v44 = vld [vmem:[%s20289_s18 + $0x58] sm:$0xff] }
0x125e   :  { %v4426_v46 = vpack.c.bf16 %v4421_v4, %v4421_v4 }
0x1260   :  { %16139 = vmatmul.mubr.msk.bf16.vlgmr.msra.gmra.mxu1 %vm781_vm2, %v4426_v46  ;;  %v14563_v46 = vcombine.high %v4521_v41, %v4529_v42 }
0x1261   :  { %4872 = vmatprep.mubr.bf16.mxu1 %v18073_v19  ;;  %4853 = vmatpush1.bf16.msra.mxu1 %v14576_v24  ;;  %v4542_v24 = vld [vmem:[%s20289_s18 + $0xb8] sm:$0xff] }
0x1262   :  { %4854 = vmatprep.subr.bf16.mxu1 %v14561_v18  ;;  %v4534_v18 = vld [vmem:[%s20289_s18 + $0x78] sm:$0xff]  ;;  %v14588_v20 = vcombine.low %v4542_v24, %v4550_v5 }
0x1265   :  { %4855 = vmatpush1.bf16.msra.mxu1 %v14560_v15  ;;  %v4526_v15 = vld [vmem:[%s20289_s18 + $0x38] sm:$0xff] }
0x1266   :  { %4934 = vmatprep.subr.bf16.mxu1 %v14581_v32  ;;  %v14572_v26 = vcombine.low %v4526_v15, %v4534_v18  ;;  %v16658_v32 = vld [vmem:[%s20290_s21 + $0xf8] sm:$0xff]  }
0x1320   :  { %v4483_v48 = vpop.f32.mrf.mxu1 }
0x1321   :  { %v4484_v49 = vadd.f32 %v14552_v47, %v4483_v48  ;;  %v14565_v47 = vcombine.high %v4522_v43, %v4530_v44  ;;  %v4539_v48 = vld [vmem:[%s20289_s18 + $0xa0] sm:$0xff] }
0x1322   :  { %v16140_v17 = vpop.f32.mrf.mxu1 }
0x1323   :  { %v4489_v50 = vadd.f32 %v4484_v49, %v18903_v3  ;;  %v14575_v3 = vcombine.high %v4535_v59, %v4543_v62  ;;  %v4547_v49 = vld [vmem:[%s20289_s18 + $0xe0] sm:$0xff]  ;;  %v4540_v17 = vld [vmem:[%s20289_s18 + $0xa8] sm:$0xff] }
0x1324   :  { %v4486_v51 = vpop.f32.mrf.mxu1  ;;  %v14582_v59 = vcombine.low %v4539_v48, %v4547_v49 }
0x1325   :  { %v4490_v22 = vsel %vm781_vm2, %v4489_v50, 0.0  ;;  %4811 = vmatprep.subr.bf16.mxu0 %v14575_v3  ;;  %v14562_v51 = vcombine.low %v4521_v41, %v4529_v42  ;;  %v16667_v41 = vld [vmem:[%s20290_s21 + $0x28] sm:$0xff]  }
0x1326   :  { %4491 = vadd.xlane.f32.xlu1 %v4490_v22  ;;  %v16141_v29 = vpop.f32.mrf.mxu1  ;;  %4812 = vmatpush1.bf16.msra.mxu0 %v14574_v2  ;;  %v14564_v22 = vcombine.low %v4522_v43, %v4530_v44  ;;  %v4549_v2 = vld [vmem:[%s20289_s18 + $0xf0] sm:$0xff]  ;;  %v16668_v42 = vld [vmem:[%s20290_s21 + $0xa8] sm:$0xff]   ;;  %v16669_v43 = vld [vmem:[%s20290_s21 + $0x60] sm:$0xff]  }
0x1327   :  { %4813 = vmatprep.subr.bf16.mxu0 %v14559_v12  ;;  %v14583_v29 = vcombine.high %v4539_v48, %v4547_v49  ;;  %v14587_v11 = vcombine.high %v4541_v23, %v4549_v2  ;;  %v14589_v12 = vcombine.high %v4542_v24, %v4550_v5  ;;  %v14586_v10 = vcombine.low %v4541_v23, %v4549_v2  ;;  %v16670_v44 = vld [vmem:[%s20290_s21 + $0xe0] sm:$0xff]   ;;  %v16674_v48 = vld [vmem:[%s20290_s21 + $0xd8] sm:$0xff]  }
0x1328   :  { %v16675_v49 = vld [vmem:[%s20290_s21 + $0x18] sm:$0xff]   ;;  %v19086_v2 = vld [vmem:[%s20291_s22] sm:$0xff] }
0x1329   :  { %v16690_v23 = vld [vmem:[%s20290_s21 + $0x1f8] sm:$0xff]   ;;  %v4559_v24 = vrot.slane %v19086_v2, %v18711_v54  ;;  %v4567_v5 = vrot.slane %v19086_v2, %v18714_v55 }
0x132a   :  { %4814 = vmatpush1.bf16.msra.mxu0 %v14558_v14  ;;  %v4533_v14 = vld [vmem:[%s20289_s18 + $0x70] sm:$0xff] }
0x132b   :  { %4893 = vmatprep.subr.bf16.mxu0 %v14579_v53  ;;  %v14571_v21 = vcombine.high %v4525_v13, %v4533_v14  ;;  %v14570_v53 = vcombine.low %v4525_v13, %v4533_v14 }
0x13af   :  { %v4492_v30 = vpop.xlane.xlu1 %4491 }
0x13b0   :  { %v4493_v52 = vmul.f32 0.03125, %v4492_v30 }
0x13b2   :  { %v4494_v60 = vsub.f32 %v4489_v50, %v4493_v52  ;;  %v4548_v50 = vld [vmem:[%s20289_s18 + $0xe8] sm:$0xff]  ;;  %v4523_v52 = vld [vmem:[%s20289_s18 + $0x20] sm:$0xff] }
0x13b3   :  { %v14585_v30 = vcombine.high %v4540_v17, %v4548_v50  ;;  %v14584_v62 = vcombine.low %v4540_v17, %v4548_v50  ;;  %v16676_v17 = vld [vmem:[%s20290_s21 + $0x98] sm:$0xff]   ;;  %v16677_v50 = vld [vmem:[%s20290_s21 + $0x50] sm:$0xff]  }
0x13b4   :  { %v4495_v61 = vmul.f32 %v4494_v60, %v4494_v60 }
0x13b6   :  { %v4496_v39 = vsel %vm781_vm2, %v4495_v61, 0.0  ;;  %v4524_v61 = vld [vmem:[%s20289_s18 + $0x28] sm:$0xff] }
0x13b7   :  { %4497 = vadd.xlane.f32.xlu0 %v4496_v39  ;;  %v4532_v39 = vld [vmem:[%s20289_s18 + $0x68] sm:$0xff] }
0x13b8   :  { %v14569_v3 = vcombine.high %v4524_v61, %v4532_v39  ;;  %v14568_v7 = vcombine.low %v4524_v61, %v4532_v39  ;;  %v16684_v61 = vld [vmem:[%s20290_s21 + $0x88] sm:$0xff]   ;;  %v16685_v39 = vld [vmem:[%s20290_s21 + $0x40] sm:$0xff]  }
0x1440   :  { %v4498_v33 = vpop.xlane.xlu0 %4497 }
0x1441   :  { %v4499_v34 = vmul.f32 0.03125, %v4498_v33  ;;  %v16659_v33 = vld [vmem:[%s20290_s21 + $0x38] sm:$0xff]  }
0x1443   :  { %v4500_v35 = vadd.f32 1e-05, %v4499_v34  ;;  %v16660_v34 = vld [vmem:[%s20290_s21 + $0xb8] sm:$0xff]  }
0x1445   :  { %17101 = vrsqrt.f32 %v4500_v35  ;;  %v16661_v35 = vld [vmem:[%s20290_s21 + $0x70] sm:$0xff]  }
0x1452   :  { %v17102_v36 = vpop.eup %17101 }
0x1453   :  { %v4502_v38 = vmul.f32 %v17102_v36, %v4494_v60  ;;  %v4531_v60 = vld [vmem:[%s20289_s18 + $0x60] sm:$0xff]  ;;  %v16662_v36 = vld [vmem:[%s20290_s21 + $0xf0] sm:$0xff]   ;;  %s20304_s18 = sld [smem:[#allocation84_spill]] }
0x1454   :  { %v14567_v63 = vcombine.high %v4523_v52, %v4531_v60  ;;  %v14566_v6 = vcombine.low %v4523_v52, %v4531_v60  ;;  %v16682_v52 = vld [vmem:[%s20290_s21 + $0xc8] sm:$0xff]  }
0x1455   :  { %v4510_v56 = vmul.f32 %v14556_v37, %v4502_v38  ;;  %v16663_v37 = vld [vmem:[%s20290_s21 + $0x30] sm:$0xff]   ;;  %v16683_v60 = vld [vmem:[%s20290_s21 + $0x8] sm:$0xff]  }
0x1456   :  { %v16664_v38 = vld [vmem:[%s20290_s21 + $0xb0] sm:$0xff]  }
0x1457   :  { %v19007_v45 = vadd.f32 %v14557_v40, %v4510_v56  ;;  %v16665_v40 = vld [vmem:[%s20290_s21 + $0x68] sm:$0xff]  }
0x1458   :  { %v16666_v56 = vld [vmem:[%s20290_s21 + $0xe8] sm:$0xff]  }
0x1459   :  { %v19011_v4 = vpack.c.bf16 %v19007_v45, %v19007_v45 }
0x145b   :  { %14590 = vmatmul.mubr.msk.bf16.vlgmr.msra.gmra.mxu0 %vm781_vm2, %v19011_v4  ;;  %14591 = vmatmul.mubr.msk.bf16.vlgmr.msra.gmra.mxu1 %vm781_vm2, %v19011_v4 }
0x145c   :  { %4894 = vmatpush1.bf16.msra.mxu0 %v14578_v25  ;;  %4935 = vmatpush1.bf16.msra.mxu1 %v14580_v31  ;;  %v14573_v25 = vcombine.high %v4526_v15, %v4534_v18  ;;  %v16657_v31 = vld [vmem:[%s20290_s21 + $0x78] sm:$0xff]  }
0x145d   :  { %4895 = vmatprep.subr.bf16.mxu0 %v14563_v46  ;;  %4936 = vmatprep.subr.bf16.mxu1 %v14565_v47  ;;  %v16672_v46 = vld [vmem:[%s20290_s21 + $0xa0] sm:$0xff]   ;;  %v16673_v47 = vld [vmem:[%s20290_s21 + $0x58] sm:$0xff]  }
0x145e   :  { %4913 = vmatprep.mubr.bf16.mxu0 %v18073_v19  ;;  %4954 = vmatprep.mubr.bf16.mxu1 %v18073_v19 }
0x1460   :  { %4896 = vmatpush1.bf16.msra.mxu0 %v14562_v51  ;;  %4937 = vmatpush1.bf16.msra.mxu1 %v14564_v22  ;;  %v16678_v51 = vld [vmem:[%s20290_s21 + $0xd0] sm:$0xff]  }
0x1461   :  { %4975 = vmatprep.subr.bf16.mxu0 %v14583_v29  ;;  %5016 = vmatprep.subr.bf16.mxu1 %v14585_v30  ;;  %v16679_v22 = vld [vmem:[%s20290_s21 + $0x10] sm:$0xff]   ;;  %v16681_v30 = vld [vmem:[%s20290_s21 + $0x48] sm:$0xff]  }
0x1462   :  { %v16680_v29 = vld [vmem:[%s20290_s21 + $0x90] sm:$0xff]  }
0x1463   :  { %14592 = vmatmul.mubr.msk.bf16.vlgmr.msra.gmra.mxu0 %vm781_vm2, %v19011_v4  ;;  %14593 = vmatmul.mubr.msk.bf16.vlgmr.msra.gmra.mxu1 %vm781_vm2, %v19011_v4 }
0x1464   :  { %4976 = vmatpush1.bf16.msra.mxu0 %v14582_v59  ;;  %5017 = vmatpush1.bf16.msra.mxu1 %v14584_v62  ;;  %v16686_v59 = vld [vmem:[%s20290_s21 + $0xc0] sm:$0xff]  }
0x1465   :  { %4977 = vmatprep.subr.bf16.mxu0 %v14567_v63  ;;  %5018 = vmatprep.subr.bf16.mxu1 %v14569_v3  ;;  %v16687_v62 = vld [vmem:[%s20290_s21] sm:$0xff]   ;;  %v16689_v3 = vld [vmem:[%s20290_s21 + $0x178] sm:$0xff]  }
0x1466   :  { %4995 = vmatprep.mubr.bf16.mxu0 %v18073_v19  ;;  %5036 = vmatprep.mubr.bf16.mxu1 %v18073_v19  ;;  %v16688_v63 = vld [vmem:[%s20290_s21 + $0x80] sm:$0xff]  }
0x1468   :  { %4978 = vmatpush1.bf16.msra.mxu0 %v14566_v6  ;;  %5019 = vmatpush1.bf16.msra.mxu1 %v14568_v7  ;;  %v4563_v6 = vrot.slane %v19086_v2, %v18720_v57  ;;  %v4571_v7 = vrot.slane %v19086_v2, %v18723_v58 }
0x1469   :  { %5057 = vmatprep.subr.bf16.mxu0 %v14587_v11  ;;  %5098 = vmatprep.subr.bf16.mxu1 %v14589_v12 }
0x146b   :  { %14594 = vmatmul.mubr.msk.bf16.vlgmr.msra.gmra.mxu0 %vm781_vm2, %v19011_v4  ;;  %14595 = vmatmul.mubr.msk.bf16.vlgmr.msra.gmra.mxu1 %vm781_vm2, %v19011_v4 }
0x146c   :  { %5058 = vmatpush1.bf16.msra.mxu0 %v14586_v10  ;;  %5099 = vmatpush1.bf16.msra.mxu1 %v14588_v20 }
0x146d   :  { %5059 = vmatprep.subr.bf16.mxu0 %v14571_v21  ;;  %5100 = vmatprep.subr.bf16.mxu1 %v14573_v25 }
0x146e   :  { %5077 = vmatprep.mubr.bf16.mxu0 %v18073_v19  ;;  %5118 = vmatprep.mubr.bf16.mxu1 %v18073_v19 }
0x1470   :  { %5060 = vmatpush1.bf16.msra.mxu0 %v14570_v53  ;;  %5101 = vmatpush1.bf16.msra.mxu1 %v14572_v26 }
0x1471   :  { %15399 = vmatprep.subr.bf16.mxu0 %v16657_v31  ;;  %15421 = vmatprep.subr.bf16.mxu1 %v16658_v32 }
0x1473   :  { %14596 = vmatmul.mubr.msk.bf16.vlgmr.msra.gmra.mxu0 %vm781_vm2, %v19011_v4  ;;  %14597 = vmatmul.mubr.msk.bf16.vlgmr.msra.gmra.mxu1 %vm781_vm2, %v19011_v4  ;;  %v16671_v4 = vld [vmem:[%s20290_s21 + $0x20] sm:$0xff]  }
0x1474   :  { %15400 = vmatpush3.bf16.msra.mxu0 %v16659_v33  ;;  %15422 = vmatpush3.bf16.msra.mxu1 %v16660_v34 }
0x1475   :  { %15401 = vmatprep.subr.bf16.mxu0 %v16661_v35  ;;  %15423 = vmatprep.subr.bf16.mxu1 %v16662_v36 }
0x1478   :  { %15402 = vmatpush3.bf16.msra.mxu0 %v16663_v37  ;;  %15424 = vmatpush3.bf16.msra.mxu1 %v16664_v38  ;;  %v4579_v37 = vrot.slane %v19086_v2, %v18734_v8  ;;  %v4587_v38 = vrot.slane %v19086_v2, %v18737_v9 }
0x1479   :  { %15403 = vmatprep.subr.bf16.mxu0 %v16665_v40  ;;  %15425 = vmatprep.subr.bf16.mxu1 %v16666_v56  ;;  %v16691_v40 = vld [vmem:[%s20290_s21 + $0x138] sm:$0xff]  }
0x147a   :  { %v16692_v56 = vld [vmem:[%s20290_s21 + $0x1b8] sm:$0xff]  }
0x147c   :  { %15404 = vmatpush3.bf16.msra.mxu0 %v16667_v41  ;;  %15426 = vmatpush3.bf16.msra.mxu1 %v16668_v42 }
0x147d   :  { %15405 = vmatprep.subr.bf16.mxu0 %v16669_v43  ;;  %15427 = vmatprep.subr.bf16.mxu1 %v16670_v44 }
0x1480   :  { %15406 = vmatpush3.bf16.msra.mxu0 %v16671_v4  ;;  %15428 = vmatpush3.bf16.msra.mxu1 %v16672_v46  ;;  %v16693_v4 = vld [vmem:[%s20290_s21 + $0x170] sm:$0xff]  }
0x1481   :  { %15407 = vmatprep.subr.bf16.mxu0 %v16673_v47  ;;  %15429 = vmatprep.subr.bf16.mxu1 %v16674_v48  ;;  %v16694_v46 = vld [vmem:[%s20290_s21 + $0x1f0] sm:$0xff]  }
0x1484   :  { %15408 = vmatpush3.bf16.msra.mxu0 %v16675_v49  ;;  %15430 = vmatpush3.bf16.msra.mxu1 %v16676_v17 }
0x1485   :  { %15409 = vmatprep.subr.bf16.mxu0 %v16677_v50  ;;  %15431 = vmatprep.subr.bf16.mxu1 %v16678_v51  ;;  %v16695_v50 = vld [vmem:[%s20290_s21 + $0x130] sm:$0xff]  }
0x1486   :  { %v16696_v51 = vld [vmem:[%s20290_s21 + $0x1b0] sm:$0xff]  }
0x1488   :  { %15410 = vmatpush3.bf16.msra.mxu0 %v16679_v22  ;;  %15432 = vmatpush3.bf16.msra.mxu1 %v16680_v29 }
0x1489   :  { %15411 = vmatprep.subr.bf16.mxu0 %v16681_v30  ;;  %15433 = vmatprep.subr.bf16.mxu1 %v16682_v52  ;;  %v16697_v30 = vld [vmem:[%s20290_s21 + $0x168] sm:$0xff]  }
0x148a   :  { %v16698_v52 = vld [vmem:[%s20290_s21 + $0x1e8] sm:$0xff]  }
0x148c   :  { %15412 = vmatpush3.bf16.msra.mxu0 %v16683_v60  ;;  %15434 = vmatpush3.bf16.msra.mxu1 %v16684_v61 }
0x148d   :  { %15413 = vmatprep.subr.bf16.mxu0 %v16685_v39  ;;  %15435 = vmatprep.subr.bf16.mxu1 %v16686_v59 }
0x1490   :  { %15414 = vmatpush3.bf16.msra.mxu0 %v16687_v62  ;;  %15436 = vmatpush3.bf16.msra.mxu1 %v16688_v63 }
0x1491   :  { %15443 = vmatprep.subr.bf16.mxu0 %v16689_v3  ;;  %15465 = vmatprep.subr.bf16.mxu1 %v16690_v23  ;;  %v16699_v3 = vld [vmem:[%s20290_s21 + $0x128] sm:$0xff]  }
0x1492   :  { %v16700_v23 = vld [vmem:[%s20290_s21 + $0x1a8] sm:$0xff]  }
0x151b   :  { %v4833_v11 = vpop.f32.mrf.mxu0  ;;  %v4874_v12 = vpop.f32.mrf.mxu1 }
0x151c   :  { %v4834_v13 = vadd.f32 %v4833_v11, %v4559_v24  ;;  %v4875_v14 = vadd.f32 %v4874_v12, %v4567_v5 }
0x151d   :  { %v4835_v15 = vpop.f32.mrf.mxu0  ;;  %v4876_v18 = vpop.f32.mrf.mxu1 }
0x151e   :  { %v4836_v10 = vadd.f32 %v4835_v15, %v4563_v6  ;;  %v4877_v20 = vadd.f32 %v4876_v18, %v4571_v7  ;;  %v5127_v21 = vmax.f32 %v4834_v13, 0.0  ;;  %v5129_v25 = vmax.f32 %v4875_v14, 0.0  ;;  %v16701_v6 = vld [vmem:[%s20290_s21 + $0x160] sm:$0xff]   ;;  %v19123_v15 = vld [vmem:[%s20291_s22 + $0x8] sm:$0xff]  ;;  %s20306_s22 = sld [smem:[#allocation89_spill]] }
0x151f   :  { %v4837_v53 = vpop.f32.mrf.mxu0  ;;  %v4878_v26 = vpop.f32.mrf.mxu1  ;;  %v16702_v7 = vld [vmem:[%s20290_s21 + $0x1e0] sm:$0xff]  }
0x1520   :  { %v5128_v31 = vmax.f32 %v4836_v10, 0.0  ;;  %v5130_v32 = vmax.f32 %v4877_v20, 0.0  ;;  %v5399_v41 = vpack.c.bf16 %v5127_v21, %v5127_v21  ;;  %v5401_v42 = vpack.c.bf16 %v5129_v25, %v5129_v25  ;;  %v16703_v13 = vld [vmem:[%s20290_s21 + $0x120] sm:$0xff]   ;;  %v16705_v20 = vld [vmem:[%s20290_s21 + $0x158] sm:$0xff]  }
0x1521   :  { %v4838_v33 = vpop.f32.mrf.mxu0  ;;  %v4879_v34 = vpop.f32.mrf.mxu1  ;;  %v16704_v14 = vld [vmem:[%s20290_s21 + $0x1a0] sm:$0xff]   ;;  %v16706_v21 = vld [vmem:[%s20290_s21 + $0x1d8] sm:$0xff]   ;;  %v4615_v25 = vrot.slane %v19123_v15, %v18764_v1 }
0x1522   :  { %v5400_v35 = vpack.c.bf16 %v5128_v31, %v5128_v31  ;;  %v5402_v36 = vpack.c.bf16 %v5130_v32, %v5130_v32  ;;  %v16707_v31 = vld [vmem:[%s20290_s21 + $0x118] sm:$0xff]  }
0x1523   :  { %v19102_v43 = vpop.f32.mrf.mxu0  ;;  %v19104_v44 = vpop.f32.mrf.mxu1  ;;  %v16708_v32 = vld [vmem:[%s20290_s21 + $0x198] sm:$0xff]  }
0x1524   :  { %6222 = vmatprep.mubr.bf16.mxu0 %v5400_v35  ;;  %6262 = vmatprep.mubr.bf16.mxu1 %v5402_v36  ;;  %v16709_v35 = vld [vmem:[%s20290_s21 + $0x150] sm:$0xff]  }
0x1525   :  { %v4917_v47 = vpop.f32.mrf.mxu0  ;;  %v4958_v48 = vpop.f32.mrf.mxu1  ;;  %6223 = vmatmul.mubr.bf16.vlgmr.msra.gmra.mxu0 %v5399_v41  ;;  %6263 = vmatmul.mubr.bf16.vlgmr.msra.gmra.mxu1 %v5401_v42  ;;  %v16710_v36 = vld [vmem:[%s20290_s21 + $0x1d0] sm:$0xff]   ;;  %v4575_v42 = vrot.slane %v19086_v2, %v18778_v16 }
0x1526   :  { %v4918_v49 = vadd.f32 %v4917_v47, %v4579_v37  ;;  %v4959_v17 = vadd.f32 %v4958_v48, %v4587_v38  ;;  %15444 = vmatpush3.bf16.msra.mxu0 %v16691_v40  ;;  %15466 = vmatpush3.bf16.msra.mxu1 %v16692_v56  ;;  %v16711_v56 = vld [vmem:[%s20290_s21 + $0x110] sm:$0xff]   ;;  %v16713_v48 = vld [vmem:[%s20290_s21 + $0x148] sm:$0xff]  }
0x1527   :  { %v4919_v22 = vpop.f32.mrf.mxu0  ;;  %v4960_v29 = vpop.f32.mrf.mxu1  ;;  %15445 = vmatprep.subr.bf16.mxu0 %v16693_v4  ;;  %15467 = vmatprep.subr.bf16.mxu1 %v16694_v46  ;;  %v16712_v41 = vld [vmem:[%s20290_s21 + $0x190] sm:$0xff]   ;;  %v4583_v4 = vrot.slane %v19086_v2, %v18764_v1  ;;  %v16715_v2 = vld [vmem:[%s20290_s21 + $0x108] sm:$0xff]  }
0x1528   :  { %v5132_v60 = vmax.f32 %v4918_v49, 0.0  ;;  %v5134_v61 = vmax.f32 %v4959_v17, 0.0  ;;  %v16714_v49 = vld [vmem:[%s20290_s21 + $0x1c8] sm:$0xff]   ;;  %v4595_v17 = vrot.slane %v19123_v15, %v18720_v57 }
0x1529   :  { %v4920_v39 = vpop.f32.mrf.mxu0  ;;  %v4961_v59 = vpop.f32.mrf.mxu1  ;;  %v16716_v29 = vld [vmem:[%s20290_s21 + $0x188] sm:$0xff]  }
0x152a   :  { %v5404_v62 = vpack.c.bf16 %v5132_v60, %v5132_v60  ;;  %v5406_v63 = vpack.c.bf16 %v5134_v61, %v5134_v61  ;;  %15446 = vmatpush3.bf16.msra.mxu0 %v16695_v50  ;;  %15468 = vmatpush3.bf16.msra.mxu1 %v16696_v51  ;;  %v4603_v50 = vrot.slane %v19123_v15, %v18723_v58  ;;  %v16717_v60 = vld [vmem:[%s20290_s21 + $0x140] sm:$0xff]  }
0x152b   :  { %v19114_v24 = vpop.f32.mrf.mxu0  ;;  %v19116_v5 = vpop.f32.mrf.mxu1  ;;  %15447 = vmatprep.subr.bf16.mxu0 %v16697_v30  ;;  %15469 = vmatprep.subr.bf16.mxu1 %v16698_v52  ;;  %v4916_v30 = vadd.f32 %v19102_v43, %v4575_v42  ;;  %v4957_v52 = vadd.f32 %v19104_v44, %v4583_v4  ;;  %v16718_v61 = vld [vmem:[%s20290_s21 + $0x1c0] sm:$0xff]   ;;  %v16721_v43 = vld [vmem:[%s20290_s21 + $0x278] sm:$0xff]  }
0x152c   :  { %6302 = vmatprep.mubr.bf16.mxu0 %v5404_v62  ;;  %6342 = vmatprep.mubr.bf16.mxu1 %v5406_v63  ;;  %v16719_v62 = vld [vmem:[%s20290_s21 + $0x100] sm:$0xff]   ;;  %v16722_v44 = vld [vmem:[%s20290_s21 + $0x2f8] sm:$0xff]  }
0x152d   :  { %v4999_v11 = vpop.f32.mrf.mxu0  ;;  %v5040_v12 = vpop.f32.mrf.mxu1  ;;  %v16720_v63 = vld [vmem:[%s20290_s21 + $0x180] sm:$0xff]   ;;  %v16737_v42 = vld [vmem:[%s20290_s21 + $0x258] sm:$0xff]  }
0x152e   :  { %15448 = vmatpush3.bf16.msra.mxu0 %v16699_v3  ;;  %15470 = vmatpush3.bf16.msra.mxu1 %v16700_v23  ;;  %v5000_v39 = vadd.f32 %v4999_v11, %v4595_v17  ;;  %v5041_v59 = vadd.f32 %v5040_v12, %v4603_v50  ;;  %v5131_v3 = vmax.f32 %v4916_v30, 0.0  ;;  %v5133_v23 = vmax.f32 %v4957_v52, 0.0  ;;  %v16723_v11 = vld [vmem:[%s20290_s21 + $0x238] sm:$0xff]   ;;  %v16743_v17 = vld [vmem:[%s20290_s21 + $0x210] sm:$0xff]  }
0x152f   :  { %v5001_v18 = vpop.f32.mrf.mxu0  ;;  %v5042_v10 = vpop.f32.mrf.mxu1  ;;  %15449 = vmatprep.subr.bf16.mxu0 %v16701_v6  ;;  %15471 = vmatprep.subr.bf16.mxu1 %v16702_v7  ;;  %v16738_v4 = vld [vmem:[%s20290_s21 + $0x2d8] sm:$0xff]   ;;  %v4591_v50 = vrot.slane %v19123_v15, %v18711_v54  ;;  %v4611_v30 = vrot.slane %v19123_v15, %v18734_v8  ;;  %v4619_v52 = vrot.slane %v19123_v15, %v18737_v9 }
0x1530   :  { %v5136_v6 = vmax.f32 %v5000_v39, 0.0  ;;  %v5138_v7 = vmax.f32 %v5041_v59, 0.0  ;;  %v5403_v12 = vpack.c.bf16 %v5131_v3, %v5131_v3  ;;  %v16725_v10 = vld [vmem:[%s20290_s21 + $0x270] sm:$0xff]   ;;  %v16748_v39 = vld [vmem:[%s20290_s21 + $0x288] sm:$0xff]   ;;  %v16749_v59 = vld [vmem:[%s20290_s21 + $0x240] sm:$0xff]  }
0x1531   :  { %v5002_v53 = vpop.f32.mrf.mxu0  ;;  %v5043_v26 = vpop.f32.mrf.mxu1 }
0x1532   :  { %15450 = vmatpush3.bf16.msra.mxu0 %v16703_v13  ;;  %15472 = vmatpush3.bf16.msra.mxu1 %v16704_v14  ;;  %v5405_v13 = vpack.c.bf16 %v5133_v23, %v5133_v23  ;;  %v16724_v14 = vld [vmem:[%s20290_s21 + $0x2b8] sm:$0xff]   ;;  %v5408_v18 = vpack.c.bf16 %v5136_v6, %v5136_v6  ;;  %v16728_v53 = vld [vmem:[%s20290_s21 + $0x2b0] sm:$0xff]   ;;  %v16729_v26 = vld [vmem:[%s20290_s21 + $0x268] sm:$0xff]  }
0x1533   :  { %v19131_v33 = vpop.f32.mrf.mxu0  ;;  %v5120_v34 = vpop.f32.mrf.mxu1  ;;  %15451 = vmatprep.subr.bf16.mxu0 %v16705_v20  ;;  %15473 = vmatprep.subr.bf16.mxu1 %v16706_v21  ;;  %v16726_v20 = vld [vmem:[%s20290_s21 + $0x2f0] sm:$0xff]   ;;  %v5410_v21 = vpack.c.bf16 %v5138_v7, %v5138_v7  ;;  %v16753_v6 = vld [vmem:[%s20290_s21 + $0x378] sm:$0xff]  }
0x1534   :  { %v19135_v37 = vadd.f32 %v5120_v34, %v4615_v25  ;;  %v16727_v25 = vld [vmem:[%s20290_s21 + $0x230] sm:$0xff]   ;;  %v16732_v34 = vld [vmem:[%s20290_s21 + $0x2a8] sm:$0xff]  }
0x1535   :  { %v19137_v38 = vpop.f32.mrf.mxu0  ;;  %v19139_v40 = vpop.f32.mrf.mxu1 }
0x1536   :  { %15452 = vmatpush3.bf16.msra.mxu0 %v16707_v31  ;;  %15474 = vmatpush3.bf16.msra.mxu1 %v16708_v32  ;;  %v16730_v31 = vld [vmem:[%s20290_s21 + $0x2e8] sm:$0xff]   ;;  %v5082_v3 = vadd.f32 %v19137_v38, %v4611_v30  ;;  %v5123_v23 = vadd.f32 %v19139_v40, %v4619_v52  ;;  %v16755_v38 = vld [vmem:[%s20290_s21 + $0x338] sm:$0xff]  }
0x1537   :  { %v5083_v46 = vpop.f32.mrf.mxu0  ;;  %v5124_v47 = vpop.f32.mrf.mxu1  ;;  %15453 = vmatprep.subr.bf16.mxu0 %v16709_v35  ;;  %15475 = vmatprep.subr.bf16.mxu1 %v16710_v36  ;;  %v16731_v32 = vld [vmem:[%s20290_s21 + $0x228] sm:$0xff]   ;;  %v16733_v35 = vld [vmem:[%s20290_s21 + $0x260] sm:$0xff]   ;;  %v16756_v40 = vld [vmem:[%s20290_s21 + $0x3b8] sm:$0xff]  }
0x1538   :  { %v16734_v36 = vld [vmem:[%s20290_s21 + $0x2e0] sm:$0xff]   ;;  %v16739_v46 = vld [vmem:[%s20290_s21 + $0x218] sm:$0xff]   ;;  %v16780_v52 = vld [vmem:[%s20290_s21 + $0x388] sm:$0xff]  }
0x1539   :  { %v5084_v51 = vpop.f32.mrf.mxu0  ;;  %v5125_v22 = vpop.f32.mrf.mxu1  ;;  %v16740_v47 = vld [vmem:[%s20290_s21 + $0x298] sm:$0xff]  }
0x153a   :  { %15454 = vmatpush3.bf16.msra.mxu0 %v16711_v56  ;;  %15476 = vmatpush3.bf16.msra.mxu1 %v16712_v41  ;;  %v16735_v56 = vld [vmem:[%s20290_s21 + $0x220] sm:$0xff]   ;;  %v16744_v51 = vld [vmem:[%s20290_s21 + $0x290] sm:$0xff]   ;;  %v16745_v22 = vld [vmem:[%s20290_s21 + $0x248] sm:$0xff]  }
0x153b   :  { %15455 = vmatprep.subr.bf16.mxu0 %v16713_v48  ;;  %15477 = vmatprep.subr.bf16.mxu1 %v16714_v49  ;;  %v16736_v41 = vld [vmem:[%s20290_s21 + $0x2a0] sm:$0xff]   ;;  %v16741_v48 = vld [vmem:[%s20290_s21 + $0x250] sm:$0xff]  }
0x153c   :  { %v16742_v49 = vld [vmem:[%s20290_s21 + $0x2d0] sm:$0xff]  }
0x153e   :  { %15456 = vmatpush3.bf16.msra.mxu0 %v16715_v2  ;;  %15478 = vmatpush3.bf16.msra.mxu1 %v16716_v29  ;;  %v4599_v2 = vrot.slane %v19123_v15, %v18714_v55  ;;  %v16746_v29 = vld [vmem:[%s20290_s21 + $0x2c8] sm:$0xff]  }
0x153f   :  { %15457 = vmatprep.subr.bf16.mxu0 %v16717_v60  ;;  %15479 = vmatprep.subr.bf16.mxu1 %v16718_v61  ;;  %v16747_v60 = vld [vmem:[%s20290_s21 + $0x208] sm:$0xff]   ;;  %v4998_v61 = vadd.f32 %v19114_v24, %v4591_v50  ;;  %v16752_v24 = vld [vmem:[%s20290_s21 + $0x280] sm:$0xff]   ;;  %v4607_v50 = vrot.slane %v19123_v15, %v18778_v16 }
0x1540   :  { %v16783_v15 = vld [vmem:[%s20290_s21 + $0x300] sm:$0xff]  }
0x1541   :  { %v5080_v30 = vadd.f32 %v19131_v33, %v4607_v50 }
0x1542   :  { %15458 = vmatpush3.bf16.msra.mxu0 %v16719_v62  ;;  %15480 = vmatpush3.bf16.msra.mxu1 %v16720_v63  ;;  %v5039_v62 = vadd.f32 %v19116_v5, %v4599_v2  ;;  %v16750_v63 = vld [vmem:[%s20290_s21 + $0x2c0] sm:$0xff]   ;;  %v16754_v5 = vld [vmem:[%s20290_s21 + $0x3f8] sm:$0xff]   ;;  %v16778_v2 = vld [vmem:[%s20290_s21 + $0x3c8] sm:$0xff]  }
0x1543   :  { %15487 = vmatprep.subr.bf16.mxu0 %v16721_v43  ;;  %15509 = vmatprep.subr.bf16.mxu1 %v16722_v44  ;;  %v16751_v43 = vld [vmem:[%s20290_s21 + $0x200] sm:$0xff]   ;;  %v5135_v44 = vmax.f32 %v4998_v61, 0.0 }
0x1544   :  { %v5137_v7 = vmax.f32 %v5039_v62, 0.0  ;;  %v16782_v61 = vld [vmem:[%s20290_s21 + $0x3c0] sm:$0xff]   ;;  %v5141_v62 = vmax.f32 %v19135_v37, 0.0 }
0x1545   :  { %6303 = vmatmul.mubr.bf16.vlgmr.msra.gmra.mxu0 %v5403_v12  ;;  %6343 = vmatmul.mubr.bf16.vlgmr.msra.gmra.mxu1 %v5405_v13  ;;  %v5142_v12 = vmax.f32 %v5123_v23, 0.0  ;;  %v5407_v13 = vpack.c.bf16 %v5135_v44, %v5135_v44  ;;  %v16786_v23 = vld [vmem:[%s20292_s9] sm:$0xff]   ;;  %v14598_v44 = vld [vmem:[#allocation34] ss:$0 sm:$0xff] }
0x1546   :  { %15488 = vmatpush3.bf16.msra.mxu0 %v16723_v11  ;;  %6382 = vmatprep.mubr.bf16.mxu0 %v5408_v18  ;;  %v5140_v11 = vmax.f32 %v5082_v3, 0.0  ;;  %v16757_v18 = vld [vmem:[%s20290_s21 + $0x370] sm:$0xff]   ;;  %v5413_v3 = vpack.c.bf16 %v5141_v62, %v5141_v62  ;;  %v14731_v62 = vld [vmem:[%s20293_s27] ss:$0 sm:$0xff]  ;;  %s20308_s27 = sld [smem:[#allocation83_spill]] }
0x1547   :  { %15510 = vmatpush3.bf16.msra.mxu1 %v16724_v14  ;;  %6422 = vmatprep.mubr.bf16.mxu1 %v5410_v21  ;;  %v5409_v14 = vpack.c.bf16 %v5137_v7, %v5137_v7  ;;  %v5414_v21 = vpack.c.bf16 %v5142_v12, %v5142_v12 }
0x1548   :  { %15489 = vmatprep.subr.bf16.mxu0 %v16725_v10  ;;  %15511 = vmatprep.subr.bf16.mxu1 %v16726_v20  ;;  %v5412_v10 = vpack.c.bf16 %v5140_v11, %v5140_v11  ;;  %v16758_v20 = vld [vmem:[%s20290_s21 + $0x3f0] sm:$0xff]  }
0x154a   :  { %15490 = vmatpush3.bf16.msra.mxu0 %v16727_v25  ;;  %v16759_v25 = vld [vmem:[%s20290_s21 + $0x330] sm:$0xff]  }
0x154b   :  { %15512 = vmatpush3.bf16.msra.mxu1 %v16728_v53  ;;  %15491 = vmatprep.subr.bf16.mxu0 %v16729_v26  ;;  %v16760_v53 = vld [vmem:[%s20290_s21 + $0x3b0] sm:$0xff]   ;;  %v16761_v26 = vld [vmem:[%s20290_s21 + $0x368] sm:$0xff]  }
0x154c   :  { %15513 = vmatprep.subr.bf16.mxu1 %v16730_v31  ;;  %v16762_v31 = vld [vmem:[%s20290_s21 + $0x3e8] sm:$0xff]  }
0x154e   :  { %15492 = vmatpush3.bf16.msra.mxu0 %v16731_v32  ;;  %v16763_v32 = vld [vmem:[%s20290_s21 + $0x328] sm:$0xff]  }
0x154f   :  { %15514 = vmatpush3.bf16.msra.mxu1 %v16732_v34  ;;  %15493 = vmatprep.subr.bf16.mxu0 %v16733_v35  ;;  %v16764_v34 = vld [vmem:[%s20290_s21 + $0x3a8] sm:$0xff]   ;;  %v16765_v35 = vld [vmem:[%s20290_s21 + $0x360] sm:$0xff]  }
0x1550   :  { %15515 = vmatprep.subr.bf16.mxu1 %v16734_v36  ;;  %v16766_v36 = vld [vmem:[%s20290_s21 + $0x3e0] sm:$0xff]  }
0x1552   :  { %15494 = vmatpush3.bf16.msra.mxu0 %v16735_v56  ;;  %v16767_v56 = vld [vmem:[%s20290_s21 + $0x320] sm:$0xff]  }
0x1553   :  { %15516 = vmatpush3.bf16.msra.mxu1 %v16736_v41  ;;  %15495 = vmatprep.subr.bf16.mxu0 %v16737_v42  ;;  %v16768_v41 = vld [vmem:[%s20290_s21 + $0x3a0] sm:$0xff]   ;;  %v16769_v42 = vld [vmem:[%s20290_s21 + $0x358] sm:$0xff]  }
0x1554   :  { %15517 = vmatprep.subr.bf16.mxu1 %v16738_v4  ;;  %v16770_v4 = vld [vmem:[%s20290_s21 + $0x3d8] sm:$0xff]  }
0x1556   :  { %15496 = vmatpush3.bf16.msra.mxu0 %v16739_v46  ;;  %v16771_v46 = vld [vmem:[%s20290_s21 + $0x318] sm:$0xff]  }
0x1557   :  { %15518 = vmatpush3.bf16.msra.mxu1 %v16740_v47  ;;  %15497 = vmatprep.subr.bf16.mxu0 %v16741_v48  ;;  %v16772_v47 = vld [vmem:[%s20290_s21 + $0x398] sm:$0xff]   ;;  %v16773_v48 = vld [vmem:[%s20290_s21 + $0x350] sm:$0xff]  }
0x1558   :  { %15519 = vmatprep.subr.bf16.mxu1 %v16742_v49  ;;  %v16774_v49 = vld [vmem:[%s20290_s21 + $0x3d0] sm:$0xff]  }
0x155a   :  { %15498 = vmatpush3.bf16.msra.mxu0 %v16743_v17  ;;  %v16775_v17 = vld [vmem:[%s20290_s21 + $0x310] sm:$0xff]  }
0x155b   :  { %15520 = vmatpush3.bf16.msra.mxu1 %v16744_v51  ;;  %15499 = vmatprep.subr.bf16.mxu0 %v16745_v22  ;;  %v16776_v51 = vld [vmem:[%s20290_s21 + $0x390] sm:$0xff]   ;;  %v16777_v22 = vld [vmem:[%s20290_s21 + $0x348] sm:$0xff]  }
0x155c   :  { %15521 = vmatprep.subr.bf16.mxu1 %v16746_v29  ;;  %v16779_v29 = vld [vmem:[%s20290_s21 + $0x308] sm:$0xff]  }
0x155e   :  { %15500 = vmatpush3.bf16.msra.mxu0 %v16747_v60  ;;  %v16781_v60 = vld [vmem:[%s20290_s21 + $0x340] sm:$0xff]  }
0x155f   :  { %15522 = vmatpush3.bf16.msra.mxu1 %v16748_v39  ;;  %15501 = vmatprep.subr.bf16.mxu0 %v16749_v59  ;;  %v5139_v39 = vmax.f32 %v5080_v30, 0.0  ;;  %v16784_v59 = vld [vmem:[%s20290_s21 + $0x380] sm:$0xff]   ;;  %s20305_s21 = sld [smem:[#allocation90_spill]] }
0x1560   :  { %15523 = vmatprep.subr.bf16.mxu1 %v16750_v63  ;;  %v16785_v63 = vld [vmem:[%s20292_s9 + $0x8] sm:$0xff]   ;;  %s20307_s9 = sld [smem:[#allocation86_spill]] }
0x1561   :  { %v5411_v33 = vpack.c.bf16 %v5139_v39, %v5139_v39 }
0x1562   :  { %15502 = vmatpush3.bf16.msra.mxu0 %v16751_v43 }
0x1563   :  { %15524 = vmatpush3.bf16.msra.mxu1 %v16752_v24  ;;  %15531 = vmatprep.subr.bf16.mxu0 %v16753_v6 }
0x1564   :  { %15553 = vmatprep.subr.bf16.mxu1 %v16754_v5 }
0x1565   :  { %6383 = vmatmul.mubr.bf16.vlgmr.msra.gmra.mxu0 %v5407_v13 }
0x1566   :  { %6423 = vmatmul.mubr.bf16.vlgmr.msra.gmra.mxu1 %v5409_v14  ;;  %15532 = vmatpush3.bf16.msra.mxu0 %v16755_v38 }
0x1567   :  { %6462 = vmatprep.mubr.bf16.mxu0 %v5412_v10  ;;  %15554 = vmatpush3.bf16.msra.mxu1 %v16756_v40 }
0x1568   :  { %6502 = vmatprep.mubr.bf16.mxu1 %v5414_v21  ;;  %15533 = vmatprep.subr.bf16.mxu0 %v16757_v18 }
0x1569   :  { %15555 = vmatprep.subr.bf16.mxu1 %v16758_v20 }
0x156a   :  { %15534 = vmatpush3.bf16.msra.mxu0 %v16759_v25 }
0x156b   :  { %15556 = vmatpush3.bf16.msra.mxu1 %v16760_v53  ;;  %15535 = vmatprep.subr.bf16.mxu0 %v16761_v26 }
0x156c   :  { %15557 = vmatprep.subr.bf16.mxu1 %v16762_v31 }
0x156e   :  { %15536 = vmatpush3.bf16.msra.mxu0 %v16763_v32 }
0x156f   :  { %15558 = vmatpush3.bf16.msra.mxu1 %v16764_v34  ;;  %15537 = vmatprep.subr.bf16.mxu0 %v16765_v35 }
0x1570   :  { %15559 = vmatprep.subr.bf16.mxu1 %v16766_v36 }
0x1572   :  { %15538 = vmatpush3.bf16.msra.mxu0 %v16767_v56 }
0x1573   :  { %15560 = vmatpush3.bf16.msra.mxu1 %v16768_v41  ;;  %15539 = vmatprep.subr.bf16.mxu0 %v16769_v42 }
0x1574   :  { %15561 = vmatprep.subr.bf16.mxu1 %v16770_v4 }
0x1576   :  { %15540 = vmatpush3.bf16.msra.mxu0 %v16771_v46 }
0x1577   :  { %15562 = vmatpush3.bf16.msra.mxu1 %v16772_v47  ;;  %15541 = vmatprep.subr.bf16.mxu0 %v16773_v48 }
0x1578   :  { %15563 = vmatprep.subr.bf16.mxu1 %v16774_v49 }
0x157a   :  { %15542 = vmatpush3.bf16.msra.mxu0 %v16775_v17 }
0x157b   :  { %15564 = vmatpush3.bf16.msra.mxu1 %v16776_v51  ;;  %15543 = vmatprep.subr.bf16.mxu0 %v16777_v22 }
0x157c   :  { %15565 = vmatprep.subr.bf16.mxu1 %v16778_v2 }
0x157e   :  { %15544 = vmatpush3.bf16.msra.mxu0 %v16779_v29 }
0x157f   :  { %15566 = vmatpush3.bf16.msra.mxu1 %v16780_v52  ;;  %15545 = vmatprep.subr.bf16.mxu0 %v16781_v60 }
0x1580   :  { %15567 = vmatprep.subr.bf16.mxu1 %v16782_v61 }
0x1582   :  { %15546 = vmatpush3.bf16.msra.mxu0 %v16783_v15 }
0x1583   :  { %15568 = vmatpush3.bf16.msra.mxu1 %v16784_v59  ;;  %16142 = vmatprep.subr.bf16.mxu0 %v18057_v0 }
0x1584   :  { %16150 = vmatprep.subr.mxu1 %v18057_v0 }
0x1585   :  { %6463 = vmatmul.mubr.bf16.vlgmr.msra.gmra.mxu0 %v5411_v33 }
0x1586   :  { %6503 = vmatmul.mubr.bf16.vlgmr.msra.gmra.mxu1 %v5413_v3  ;;  %16143 = vmatpush3.bf16.msra.mxu0 %v16785_v63 }
0x1587   :  { %16144 = vmatprep.subr.bf16.mxu0 %v18057_v0  ;;  %16146 = vmatprep.mubr.msk.bf16.mxu0 %vm18058_vm0, %v18057_v0 }
0x1588   :  { %16152 = vmatprep.mubr.msk.f32.mxu1 %vm18058_vm0, %v18057_v0 }
0x158a   :  { %16145 = vmatpush3.bf16.msra.mxu0 %v16786_v23 }
0x158b   :  { %16155 = vmatprep.subr.mxu0 %v18057_v0 }
0x158d   :  { %16147 = vmatmul.mubr.msk.bf16.vlgmr.msra.gmra.mxu0 %vm781_vm2, %v18527_v28 }
0x158e   :  { %16157 = vmatprep.mubr.msk.f32.mxu0 %vm18058_vm0, %v18057_v0 }
0x15e5   :  { %v15415_v37 = vpop.f32.mrf.mxu0  ;;  %v15437_v43 = vpop.f32.mrf.mxu1 }
0x15e7   :  { %v15416_v24 = vpop.f32.mrf.mxu0  ;;  %v15438_v6 = vpop.f32.mrf.mxu1 }
0x15e8   :  { %v15417_v7 = vadd.f32 %v15416_v24, %v15415_v37  ;;  %v15439_v5 = vadd.f32 %v15438_v6, %v15437_v43 }
0x15e9   :  { %v15418_v11 = vpop.f32.mrf.mxu0  ;;  %v15440_v12 = vpop.f32.mrf.mxu1 }
0x15ea   :  { %v6225_v38 = vadd.f32 %v15417_v7, %v14598_v44 }
0x15eb   :  { %v15419_v13 = vpop.f32.mrf.mxu0  ;;  %v15441_v40 = vpop.f32.mrf.mxu1 }
0x15ec   :  { %v6265_v14 = vadd.f32 %v15439_v5, %v6225_v38 }
0x1605   :  { %v15459_v18 = vpop.f32.mrf.mxu0  ;;  %v15481_v10 = vpop.f32.mrf.mxu1 }
0x1607   :  { %v15460_v20 = vpop.f32.mrf.mxu0  ;;  %v15482_v28 = vpop.f32.mrf.mxu1 }
0x1608   :  { %v15461_v21 = vadd.f32 %v15460_v20, %v15459_v18  ;;  %v15483_v25 = vadd.f32 %v15482_v28, %v15481_v10 }
0x1609   :  { %v15462_v53 = vpop.f32.mrf.mxu0  ;;  %v15484_v26 = vpop.f32.mrf.mxu1 }
0x160a   :  { %v6305_v31 = vadd.f32 %v15461_v21, %v6265_v14 }
0x160b   :  { %v15463_v32 = vpop.f32.mrf.mxu0  ;;  %v15485_v34 = vpop.f32.mrf.mxu1 }
0x160c   :  { %v6345_v35 = vadd.f32 %v15483_v25, %v6305_v31 }
0x1625   :  { %v15503_v36 = vpop.f32.mrf.mxu0 }
0x1626   :  { %v15525_v56 = vpop.f32.mrf.mxu1 }
0x1627   :  { %v15504_v41 = vpop.f32.mrf.mxu0 }
0x1628   :  { %v15505_v42 = vadd.f32 %v15504_v41, %v15503_v36  ;;  %v15526_v4 = vpop.f32.mrf.mxu1 }
0x1629   :  { %v15527_v46 = vadd.f32 %v15526_v4, %v15525_v56  ;;  %v15506_v47 = vpop.f32.mrf.mxu0 }
0x162a   :  { %v6385_v48 = vadd.f32 %v15505_v42, %v6345_v35  ;;  %v15528_v49 = vpop.f32.mrf.mxu1 }
0x162b   :  { %v15507_v17 = vpop.f32.mrf.mxu0 }
0x162c   :  { %v6425_v50 = vadd.f32 %v15527_v46, %v6385_v48  ;;  %v15529_v51 = vpop.f32.mrf.mxu1 }
0x1645   :  { %v15547_v22 = vpop.f32.mrf.mxu0 }
0x1646   :  { %v15569_v2 = vpop.f32.mrf.mxu1 }
0x1647   :  { %v15548_v29 = vpop.f32.mrf.mxu0 }
0x1648   :  { %v15549_v30 = vadd.f32 %v15548_v29, %v15547_v22  ;;  %v15570_v52 = vpop.f32.mrf.mxu1 }
0x1649   :  { %v15571_v60 = vadd.f32 %v15570_v52, %v15569_v2  ;;  %v15550_v61 = vpop.f32.mrf.mxu0 }
0x164a   :  { %v6465_v15 = vadd.f32 %v15549_v30, %v6425_v50  ;;  %v15572_v39 = vpop.f32.mrf.mxu1 }
0x164b   :  { %v15551_v59 = vpop.f32.mrf.mxu0 }
0x164c   :  { %v19256_v63 = vadd.f32 %v15571_v60, %v6465_v15  ;;  %v15573_v33 = vpop.f32.mrf.mxu1 }
0x164d   :  { %v6626_v3 = vpop.f32.mrf.mxu0 }
0x164e   :  { %v19258_v23 = vadd.f32 %v14731_v62, %v6626_v3 }
0x164f   :  { %v16148_v37 = vpop.f32.mrf.mxu0 }
0x1650   :  { %6799 = vrot.lane.b32.xlu1 %v19258_v23, %s18061_s2  ;;  %6633 = vrot.lane.b32.xlu0 %v19258_v23, %s18060_s1 }
0x1651   :  { %v6629_v43 = vpop.f32.mrf.mxu0 }
0x1653   :  { %v16149_v44 = vpop.f32.mrf.mxu0 }
0x1654   :  { %6797 = vrot.lane.b32.xlu1 %v19258_v23, %s18059_s28  ;;  %6965 = vrot.lane.b32.xlu0 %v19258_v23, %s18062_s24 }
0x1658   :  { %6963 = vrot.lane.b32.xlu1 %v19258_v23, %s18063_s13  ;;  %7131 = vrot.lane.b32.xlu0 %v19258_v23, %s18064_s14 }
0x165c   :  { %7129 = vrot.lane.b32.xlu1 %v19258_v23, %s18065_s0 }
0x16c2   :  { %v6800_v24 = vpop.permute.xlu1 %6799  ;;  %v6634_v6 = vpop.permute.xlu0 %6633 }
0x16c3   :  { %16151 = vmatpush3.xpose.msk.msra.mxu1 %vm882_vm3, %v6634_v6 }
0x16c4   :  { %16160 = vmatprep.subr.mxu1 %v18057_v0 }
0x16c6   :  { %v6798_v7 = vpop.permute.xlu1 %6797  ;;  %16153 = vmatmul.mubr.msk.f32.vlgmr.msra.gmra.mxu1 %vm882_vm3, %v19258_v23  ;;  %v6966_v5 = vpop.permute.xlu0 %6965 }
0x16c7   :  { %16161 = vmatpush3.xpose.msk.msra.mxu1 %vm882_vm3, %v6800_v24  ;;  %16162 = vmatprep.mubr.msk.f32.mxu1 %vm18058_vm0, %v18057_v0 }
0x16c8   :  { %16170 = vmatprep.subr.mxu1 %v18057_v0 }
0x16ca   :  { %16163 = vmatmul.mubr.msk.f32.vlgmr.msra.gmra.mxu1 %vm882_vm3, %v6798_v7  ;;  %v6964_v11 = vpop.permute.xlu1 %6963  ;;  %v7132_v12 = vpop.permute.xlu0 %7131 }
0x16cb   :  { %16171 = vmatpush3.xpose.msk.msra.mxu1 %vm882_vm3, %v6966_v5  ;;  %16172 = vmatprep.mubr.msk.f32.mxu1 %vm18058_vm0, %v18057_v0 }
0x16cc   :  { %16180 = vmatprep.subr.mxu1 %v18057_v0 }
0x16ce   :  { %16173 = vmatmul.mubr.msk.f32.vlgmr.msra.gmra.mxu1 %vm882_vm3, %v6964_v11  ;;  %v7130_v38 = vpop.permute.xlu1 %7129 }
0x16cf   :  { %16181 = vmatpush3.xpose.msk.msra.mxu1 %vm882_vm3, %v7132_v12  ;;  %16182 = vmatprep.mubr.msk.f32.mxu1 %vm18058_vm0, %v18057_v0 }
0x16d0   :  { %16190 = vmatprep.subr.bf16.mxu1 %v18057_v0 }
0x16d2   :  { %16183 = vmatmul.mubr.msk.f32.vlgmr.msra.gmra.mxu1 %vm882_vm3, %v7130_v38 }
0x16d3   :  { %16194 = vmatprep.mubr.msk.bf16.mxu1 %vm18058_vm0, %v18057_v0 }
0x1786   :  { %v6705_v13 = vpop.f32.mrf.mxu1 }
0x1787   :  { %v6709_v40 = vmul.f32 0.35355338, %v6705_v13 }
0x1788   :  { %v16154_v14 = vpop.f32.mrf.mxu1 }
0x1789   :  { %v6710_v18 = vsel %vm882_vm3, %v6709_v40, -inf }
0x178a   :  { %6711 = vmax.xlane.f32.xlu0 %v6710_v18  ;;  %v6871_v10 = vpop.f32.mrf.mxu1  ;;  %v16788_v18 = vld [vmem:[%s20294_s23] sm:$0xff]  }
0x178b   :  { %v6875_v20 = vmul.f32 0.35355338, %v6871_v10 }
0x178c   :  { %v16164_v28 = vpop.f32.mrf.mxu1 }
0x178d   :  { %v6876_v21 = vsel %vm882_vm3, %v6875_v20, -inf }
0x178e   :  { %6877 = vmax.xlane.f32.xlu1 %v6876_v21  ;;  %v7037_v25 = vpop.f32.mrf.mxu1 }
0x178f   :  { %v7041_v53 = vmul.f32 0.35355338, %v7037_v25 }
0x1790   :  { %v16174_v26 = vpop.f32.mrf.mxu1 }
0x1791   :  { %v7042_v31 = vsel %vm882_vm3, %v7041_v53, -inf }
0x1792   :  { %7043 = vmax.xlane.f32.xlu0 %v7042_v31  ;;  %v7203_v32 = vpop.f32.mrf.mxu1  ;;  %v6510_v31 = vadd.f32 %v19256_v63, %v19007_v45 }
0x1793   :  { %v7207_v34 = vmul.f32 0.35355338, %v7203_v32 }
0x1794   :  { %v16184_v35 = vpop.f32.mrf.mxu1  ;;  %v6511_v32 = vsel %vm781_vm2, %v6510_v31, 0.0 }
0x1795   :  { %v7208_v36 = vsel %vm882_vm3, %v7207_v34, -inf }
0x1796   :  { %7209 = vmax.xlane.f32.xlu0 %v7208_v36 }
0x179f   :  { %6721 = vrot.lane.b32.xlu1 %v19258_v23, %s18066_s25 }
0x1813   :  { %v6712_v56 = vpop.xlane.xlu0 %6711 }
0x1814   :  { %v6713_v41 = vsub.f32 %v6709_v40, %v6712_v56  ;;  %v16787_v40 = vld [vmem:[%s20294_s23 + $0x8] sm:$0xff]   ;;  %s20309_s23 = sld [smem:[#allocation85_spill]] }
0x1815   :  { %16191 = vmatpush3.bf16.msra.mxu1 %v16787_v40  ;;  %v16791_v40 = vld [vmem:[%s20297_s26 + $0x8] sm:$0xff]  }
0x1816   :  { %v6714_v42 = vmul.f32 1.442695, %v6713_v41  ;;  %16192 = vmatprep.subr.bf16.mxu1 %v18057_v0 }
0x1817   :  { %v6878_v4 = vpop.xlane.xlu1 %6877 }
0x1818   :  { %17103 = vpow2.f32 %v6714_v42  ;;  %v6879_v46 = vsub.f32 %v6875_v20, %v6878_v4 }
0x1819   :  { %16193 = vmatpush3.bf16.msra.mxu1 %v16788_v18 }
0x181a   :  { %v6880_v47 = vmul.f32 1.442695, %v6879_v46  ;;  %16206 = vmatprep.subr.bf16.mxu1 %v18057_v0 }
0x181b   :  { %v6722_v48 = vpop.permute.xlu1 %6721  ;;  %v7044_v49 = vpop.xlane.xlu0 %7043 }
0x181c   :  { %17105 = vpow2.f32 %v6880_v47  ;;  %v7045_v17 = vsub.f32 %v7041_v53, %v7044_v49  ;;  %16156 = vmatpush3.msra.mxu0 %v6722_v48  ;;  %v14747_v49 = vld [vmem:[%s20295_s6] ss:$0 sm:$0xff]  ;;  %s20310_s6 = sld [smem:[#allocation111_spill]] }
0x181d   :  { %16165 = vmatprep.subr.mxu0 %v18057_v0 }
0x181e   :  { %v7046_v50 = vmul.f32 1.442695, %v7045_v17 }
0x181f   :  { %v7210_v51 = vpop.xlane.xlu0 %7209 }
0x1820   :  { %17107 = vpow2.f32 %v7046_v50  ;;  %v7211_v22 = vsub.f32 %v7207_v34, %v7210_v51 }
0x1822   :  { %v7212_v2 = vmul.f32 1.442695, %v7211_v22 }
0x1824   :  { %17109 = vpow2.f32 %v7212_v2 }
0x1825   :  { %v17104_v29 = vpop.eup %17103 }
0x1826   :  { %v6716_v30 = vsel %vm882_vm3, %v17104_v29, 0.0 }
0x1827   :  { %6717 = vadd.xlane.f32.xlu1 %v6716_v30 }
0x1829   :  { %v17106_v52 = vpop.eup %17105 }
0x182a   :  { %v6882_v60 = vsel %vm882_vm3, %v17106_v52, 0.0 }
0x182b   :  { %6883 = vadd.xlane.f32.xlu0 %v6882_v60 }
0x182d   :  { %v17108_v61 = vpop.eup %17107 }
0x182e   :  { %v7048_v15 = vsel %vm882_vm3, %v17108_v61, 0.0 }
0x182f   :  { %7049 = vadd.xlane.f32.xlu1 %v7048_v15 }
0x1831   :  { %v17110_v39 = vpop.eup %17109 }
0x1832   :  { %v7214_v59 = vsel %vm882_vm3, %v17110_v39, 0.0 }
0x1833   :  { %7215 = vadd.xlane.f32.xlu0 %v7214_v59 }
0x1840   :  { %7053 = vrot.lane.b32.xlu1 %v19258_v23, %s18067_s4 }
0x1844   :  { %7219 = vrot.lane.b32.xlu1 %v19258_v23, %s18068_s3 }
0x1849   :  { %6887 = vrot.lane.b32.xlu0 %v19258_v23, %s18069_s7 }
0x18b0   :  { %v6718_v62 = vpop.xlane.xlu1 %6717 }
0x18b1   :  { %17111 = vrcp.f32 %v6718_v62  ;;  %v14728_v62 = vld [vmem:[#allocation38] ss:$0 sm:$0xff] }
0x18b4   :  { %v6884_v33 = vpop.xlane.xlu0 %6883 }
0x18b5   :  { %17113 = vrcp.f32 %v6884_v33 }
0x18b8   :  { %v7050_v3 = vpop.xlane.xlu1 %7049 }
0x18b9   :  { %17115 = vrcp.f32 %v7050_v3 }
0x18bc   :  { %v7216_v37 = vpop.xlane.xlu0 %7215  ;;  %v7054_v7 = vpop.permute.xlu1 %7053 }
0x18bd   :  { %17117 = vrcp.f32 %v7216_v37 }
0x18be   :  { %v17112_v43 = vpop.eup %17111 }
0x18bf   :  { %v6720_v44 = vmul.f32 %v17112_v43, %v17104_v29 }
0x18c0   :  { %v6888_v24 = vpop.permute.xlu0 %6887  ;;  %v7220_v12 = vpop.permute.xlu1 %7219 }
0x18c1   :  { %16158 = vmatmul.mubr.msk.f32.vlgmr.msra.gmra.mxu0 %vm882_vm3, %v6720_v44 }
0x18c2   :  { %v17114_v6 = vpop.eup %17113  ;;  %16166 = vmatpush3.msra.mxu0 %v6888_v24  ;;  %16167 = vmatprep.mubr.msk.f32.mxu0 %vm18058_vm0, %v18057_v0 }
0x18c3   :  { %16175 = vmatprep.subr.mxu0 %v18057_v0  ;;  %v6886_v23 = vmul.f32 %v17114_v6, %v17106_v52 }
0x18c5   :  { %16168 = vmatmul.mubr.msk.f32.vlgmr.msra.gmra.mxu0 %vm882_vm3, %v6886_v23 }
0x18c6   :  { %v17116_v5 = vpop.eup %17115  ;;  %16176 = vmatpush3.msra.mxu0 %v7054_v7  ;;  %16177 = vmatprep.mubr.msk.f32.mxu0 %vm18058_vm0, %v18057_v0 }
0x18c7   :  { %16185 = vmatprep.subr.mxu0 %v18057_v0  ;;  %v7052_v11 = vmul.f32 %v17116_v5, %v17108_v61 }
0x18c9   :  { %16178 = vmatmul.mubr.msk.f32.vlgmr.msra.gmra.mxu0 %vm882_vm3, %v7052_v11 }
0x18ca   :  { %v17118_v38 = vpop.eup %17117  ;;  %16186 = vmatpush3.msra.mxu0 %v7220_v12  ;;  %16187 = vmatprep.mubr.msk.f32.mxu0 %vm18058_vm0, %v18057_v0 }
0x18cb   :  { %v7218_v13 = vmul.f32 %v17118_v38, %v17110_v39  ;;  %16198 = vmatprep.subr.bf16.mxu0 %v18057_v0  ;;  %v14727_v39 = vld [vmem:[#allocation40] ss:$0 sm:$0xff]  ;;  %v16789_v38 = vld [vmem:[%s20296_s5 + $0x8] sm:$0xff]  }
0x18cd   :  { %16188 = vmatmul.mubr.msk.f32.vlgmr.msra.gmra.mxu0 %vm882_vm3, %v7218_v13  ;;  %v16790_v13 = vld [vmem:[%s20296_s5] sm:$0xff]   ;;  %s20311_s5 = sld [smem:[#allocation92_spill]] }
0x18ce   :  { %16202 = vmatprep.mubr.msk.bf16.mxu0 %vm18058_vm0, %v18057_v0  ;;  %16199 = vmatpush3.bf16.msra.mxu0 %v16789_v38 }
0x18cf   :  { %16200 = vmatprep.subr.bf16.mxu0 %v18057_v0 }
0x18d2   :  { %16201 = vmatpush3.bf16.msra.mxu0 %v16790_v13 }
0x18d3   :  { %16214 = vmatprep.subr.mxu0 %v18057_v0 }
0x1981   :  { %v6793_v14 = vpop.f32.mrf.mxu0 }
0x1983   :  { %v16159_v10 = vpop.f32.mrf.mxu0 }
0x1985   :  { %v6959_v20 = vpop.f32.mrf.mxu0 }
0x1986   :  { %7296 = vrot.lane.b32.xlu0 %v6959_v20, %s18070_s10 }
0x1987   :  { %v16169_v28 = vpop.f32.mrf.mxu0 }
0x1989   :  { %v7125_v21 = vpop.f32.mrf.mxu0 }
0x198a   :  { %7300 = vrot.lane.b32.xlu1 %v7125_v21, %s18071_s19  ;;  %v14751_v21 = vld [vmem:[%s20298_s8] ss:$0 sm:$0xff] }
0x198b   :  { %v16179_v25 = vpop.f32.mrf.mxu0 }
0x198d   :  { %v7291_v53 = vpop.f32.mrf.mxu0 }
0x198e   :  { %7304 = vrot.lane.b32.xlu0 %v7291_v53, %s18072_s11  ;;  %v14752_v53 = vld [vmem:[%s20299_s20] ss:$0 sm:$0xff] }
0x198f   :  { %v16189_v26 = vpop.f32.mrf.mxu0 }
0x19ae   :  { %6512 = vadd.xlane.f32.xlu1 %v6511_v32 }
0x19f8   :  { %v7297_v34 = vpop.permute.xlu0 %7296 }
0x19f9   :  { %v7307_v36 = vsel %vm882_vm3, %v6793_v14, %v7297_v34  ;;  %v16792_v14 = vld [vmem:[%s20297_s26] sm:$0xff]   ;;  %s20312_s26 = sld [smem:[#allocation91_spill]] }
0x19fc   :  { %v7301_v35 = vpop.permute.xlu1 %7300 }
0x19fd   :  { %v7308_v56 = vsel %vm736_vm1, %v7307_v36, %v7301_v35 }
0x1a00   :  { %v7305_v41 = vpop.permute.xlu0 %7304 }
0x1a01   :  { %v7309_v42 = vsel %vm1557_vm4, %v7308_v56, %v7305_v41  ;;  %v14729_v41 = vld [vmem:[#allocation46] ss:$0 sm:$0xff] }
0x1a02   :  { %v7314_v4 = vpack.c.bf16 %v7309_v42, %v7309_v42 }
0x1a04   :  { %16195 = vmatmul.mubr.msk.bf16.vlgmr.msra.gmra.mxu1 %vm781_vm2, %v7314_v4  ;;  %v14730_v4 = vld [vmem:[#allocation44] ss:$0 sm:$0xff] }
0x1a05   :  { %16210 = vmatprep.mubr.msk.bf16.mxu1 %vm18058_vm0, %v18057_v0  ;;  %16207 = vmatpush3.bf16.msra.mxu1 %v16791_v40 }
0x1a06   :  { %16208 = vmatprep.subr.bf16.mxu1 %v18057_v0 }
0x1a09   :  { %16209 = vmatpush3.bf16.msra.mxu1 %v16792_v14 }
0x1a0a   :  { %16224 = vmatprep.subr.mxu1 %v18057_v0 }
0x1a37   :  { %v6513_v45 = vpop.xlane.xlu1 %6512 }
0x1a38   :  { %v6514_v63 = vmul.f32 0.03125, %v6513_v45 }
0x1a3a   :  { %v6515_v46 = vsub.f32 %v6510_v31, %v6514_v63 }
0x1a3c   :  { %v6516_v47 = vmul.f32 %v6515_v46, %v6515_v46 }
0x1a3e   :  { %v6517_v48 = vsel %vm781_vm2, %v6516_v47, 0.0  ;;  %v14753_v47 = vld [vmem:[%s20300_s17] ss:$0 sm:$0xff] }
0x1a3f   :  { %6518 = vadd.xlane.f32.xlu0 %v6517_v48 }
0x1ac4   :  { %v7371_v17 = vpop.f32.mrf.mxu1 }
0x1ac5   :  { %v7372_v50 = vadd.f32 %v14747_v49, %v7371_v17 }
0x1ac6   :  { %v16196_v51 = vpop.f32.mrf.mxu1 }
0x1ac7   :  { %v7377_v22 = vadd.f32 %v7372_v50, %v18523_v27 }
0x1ac8   :  { %v7374_v2 = vpop.f32.mrf.mxu1  ;;  %v6519_v29 = vpop.xlane.xlu0 %6518 }
0x1ac9   :  { %v6520_v30 = vmul.f32 0.03125, %v6519_v29  ;;  %v7378_v52 = vsel %vm781_vm2, %v7377_v22, 0.0 }
0x1aca   :  { %v16197_v60 = vpop.f32.mrf.mxu1  ;;  %7379 = vadd.xlane.f32.xlu1 %v7378_v52 }
0x1acb   :  { %v6521_v61 = vadd.f32 1e-05, %v6520_v30 }
0x1acd   :  { %17119 = vrsqrt.f32 %v6521_v61 }
0x1ada   :  { %v17120_v15 = vpop.eup %17119 }
0x1adb   :  { %v6523_v59 = vmul.f32 %v17120_v15, %v6515_v46 }
0x1add   :  { %v6531_v33 = vmul.f32 %v14727_v39, %v6523_v59 }
0x1adf   :  { %v6539_v3 = vadd.f32 %v14728_v62, %v6531_v33 }
0x1ae1   :  { %v6540_v37 = vsel %vm781_vm2, %v6539_v3, 0.0 }
0x1ae2   :  { %6541 = vadd.xlane.f32.xlu0 %v6540_v37 }
0x1b53   :  { %v7380_v27 = vpop.xlane.xlu1 %7379 }
0x1b54   :  { %v7381_v43 = vmul.f32 0.03125, %v7380_v27 }
0x1b56   :  { %v7382_v44 = vsub.f32 %v7377_v22, %v7381_v43  ;;  %v14757_v22 = vld [vmem:[%s20301_s15] ss:$0 sm:$0xff] }
0x1b58   :  { %v7383_v24 = vmul.f32 %v7382_v44, %v7382_v44 }
0x1b5a   :  { %v7384_v6 = vsel %vm781_vm2, %v7383_v24, 0.0 }
0x1b5b   :  { %7385 = vadd.xlane.f32.xlu1 %v7384_v6 }
0x1b6b   :  { %v6542_v7 = vpop.xlane.xlu0 %6541 }
0x1b6c   :  { %v6543_v23 = vmul.f32 0.03125, %v6542_v7 }
0x1b6e   :  { %v6544_v5 = vsub.f32 %v6539_v3, %v6543_v23 }
0x1b70   :  { %v6545_v11 = vmul.f32 %v6544_v5, %v6544_v5 }
0x1b72   :  { %v6546_v12 = vsel %vm781_vm2, %v6545_v11, 0.0 }
0x1b73   :  { %6547 = vadd.xlane.f32.xlu0 %v6546_v12 }
0x1be4   :  { %v7386_v18 = vpop.xlane.xlu1 %7385 }
0x1be5   :  { %v7387_v10 = vmul.f32 0.03125, %v7386_v18 }
0x1be7   :  { %v7388_v20 = vadd.f32 1e-05, %v7387_v10 }
0x1be9   :  { %17121 = vrsqrt.f32 %v7388_v20 }
0x1bf6   :  { %v17122_v28 = vpop.eup %17121 }
0x1bf7   :  { %v7390_v25 = vmul.f32 %v17122_v28, %v7382_v44 }
0x1bf9   :  { %v7398_v26 = vmul.f32 %v14751_v21, %v7390_v25 }
0x1bfb   :  { %v19360_v31 = vadd.f32 %v14752_v53, %v7398_v26 }
0x1bfc   :  { %v6548_v32 = vpop.xlane.xlu0 %6547 }
0x1bfd   :  { %v6549_v34 = vmul.f32 0.03125, %v6548_v32  ;;  %v7411_v35 = vpack.c.bf16 %v19360_v31, %v19360_v31 }
0x1bff   :  { %v6550_v36 = vadd.f32 1e-05, %v6549_v34  ;;  %16203 = vmatmul.mubr.msk.bf16.vlgmr.msra.gmra.mxu0 %vm781_vm2, %v7411_v35 }
0x1c00   :  { %16216 = vmatprep.mubr.msk.f32.mxu0 %vm18058_vm0, %v18057_v0 }
0x1c01   :  { %17123 = vrsqrt.f32 %v6550_v36 }
0x1c0e   :  { %v17124_v56 = vpop.eup %17123 }
0x1c0f   :  { %v6552_v42 = vmul.f32 %v17124_v56, %v6544_v5 }
0x1c11   :  { %v6560_v45 = vmul.f32 %v14729_v41, %v6552_v42 }
0x1c13   :  { %v6568_v63 = vadd.f32 %v14730_v4, %v6560_v45 }
0x1c15   :  { %v19367_v46 = vpack.c.bf16 %v6568_v63, %v6568_v63 }
0x1c17   :  { %16211 = vmatmul.mubr.msk.bf16.vlgmr.msra.gmra.mxu1 %vm781_vm2, %v19367_v46 }
0x1c18   :  { %16226 = vmatprep.mubr.msk.f32.mxu1 %vm18058_vm0, %v18057_v0 }
0x1cbf   :  { %v7468_v48 = vpop.f32.mrf.mxu0 }
0x1cc0   :  { %v7469_v49 = vadd.f32 %v14753_v47, %v7468_v48 }
0x1cc1   :  { %v16204_v17 = vpop.f32.mrf.mxu0 }
0x1cc2   :  { %7705 = vrot.lane.b32.xlu1 %v7469_v49, %s18059_s28 }
0x1cc3   :  { %v7471_v50 = vpop.f32.mrf.mxu0 }
0x1cc5   :  { %v16205_v51 = vpop.f32.mrf.mxu0 }
0x1cd7   :  { %v7535_v2 = vpop.f32.mrf.mxu1 }
0x1cd8   :  { %v19376_v29 = vadd.f32 %v14757_v22, %v7535_v2 }
0x1cd9   :  { %v16212_v30 = vpop.f32.mrf.mxu1 }
0x1cda   :  { %7707 = vrot.lane.b32.xlu0 %v19376_v29, %s18059_s28  ;;  %16215 = vmatpush3.xpose.msk.msra.mxu0 %vm882_vm3, %v19376_v29 }
0x1cdb   :  { %7873 = vrot.lane.b32.xlu1 %v19376_v29, %s18063_s13  ;;  %v7538_v52 = vpop.f32.mrf.mxu1  ;;  %16219 = vmatprep.subr.mxu0 %v18057_v0 }
0x1cdd   :  { %v16213_v60 = vpop.f32.mrf.mxu1  ;;  %16217 = vmatmul.mubr.msk.f32.vlgmr.msra.gmra.mxu0 %vm882_vm3, %v7469_v49 }
0x1cde   :  { %7871 = vrot.lane.b32.xlu0 %v7469_v49, %s18063_s13  ;;  %16221 = vmatprep.mubr.msk.f32.mxu0 %vm18058_vm0, %v18057_v0 }
0x1cdf   :  { %8039 = vrot.lane.b32.xlu1 %v19376_v29, %s18065_s0 }
0x1ce2   :  { %8037 = vrot.lane.b32.xlu0 %v7469_v49, %s18065_s0 }
0x1d34   :  { %v7706_v61 = vpop.permute.xlu1 %7705 }
0x1d4c   :  { %v7708_v15 = vpop.permute.xlu0 %7707 }
0x1d4d   :  { %16225 = vmatpush3.xpose.msk.msra.mxu1 %vm882_vm3, %v7708_v15  ;;  %v7874_v39 = vpop.permute.xlu1 %7873 }
0x1d4e   :  { %16234 = vmatprep.subr.mxu1 %v18057_v0 }
0x1d50   :  { %16227 = vmatmul.mubr.msk.f32.vlgmr.msra.gmra.mxu1 %vm882_vm3, %v7706_v61  ;;  %v7872_v59 = vpop.permute.xlu0 %7871 }
0x1d51   :  { %16235 = vmatpush3.xpose.msk.msra.mxu1 %vm882_vm3, %v7874_v39  ;;  %16236 = vmatprep.mubr.msk.f32.mxu1 %vm18058_vm0, %v18057_v0  ;;  %v8040_v62 = vpop.permute.xlu1 %8039 }
0x1d52   :  { %16244 = vmatprep.subr.mxu1 %v18057_v0 }
0x1d54   :  { %16237 = vmatmul.mubr.msk.f32.vlgmr.msra.gmra.mxu1 %vm882_vm3, %v7872_v59  ;;  %v8038_v33 = vpop.permute.xlu0 %8037 }
0x1d55   :  { %16245 = vmatpush3.xpose.msk.msra.mxu1 %vm882_vm3, %v8040_v62  ;;  %16246 = vmatprep.mubr.msk.f32.mxu1 %vm18058_vm0, %v18057_v0 }
0x1d56   :  { %16254 = vmatprep.subr.bf16.mxu1 %v18057_v0 }
0x1d58   :  { %16247 = vmatmul.mubr.msk.f32.vlgmr.msra.gmra.mxu1 %vm882_vm3, %v8038_v33 }
0x1d59   :  { %16258 = vmatprep.mubr.msk.bf16.mxu1 %vm18058_vm0, %v18057_v0 }
0x1d9d   :  { %v7613_v3 = vpop.f32.mrf.mxu0 }
0x1d9e   :  { %v7617_v37 = vmul.f32 0.35355338, %v7613_v3 }
0x1d9f   :  { %v16218_v27 = vpop.f32.mrf.mxu0 }
0x1da0   :  { %v7618_v43 = vsel %vm882_vm3, %v7617_v37, -inf  ;;  %v16793_v27 = vld [vmem:[%s20302_s29 + $0x8] sm:$0xff]  }
0x1da1   :  { %7619 = vmax.xlane.f32.xlu1 %v7618_v43  ;;  %16255 = vmatpush3.bf16.msra.mxu1 %v16793_v27  ;;  %v16794_v43 = vld [vmem:[%s20302_s29] sm:$0xff]  }
0x1da2   :  { %16256 = vmatprep.subr.bf16.mxu1 %v18057_v0 }
0x1da5   :  { %16257 = vmatpush3.bf16.msra.mxu1 %v16794_v43 }
0x1e10   :  { %v7779_v44 = vpop.f32.mrf.mxu1 }
0x1e11   :  { %v7783_v24 = vmul.f32 0.35355338, %v7779_v44 }
0x1e12   :  { %v16228_v6 = vpop.f32.mrf.mxu1 }
0x1e13   :  { %v7784_v7 = vsel %vm882_vm3, %v7783_v24, -inf }
0x1e14   :  { %7785 = vmax.xlane.f32.xlu0 %v7784_v7  ;;  %v7945_v23 = vpop.f32.mrf.mxu1 }
0x1e15   :  { %v7949_v5 = vmul.f32 0.35355338, %v7945_v23 }
0x1e16   :  { %v16238_v11 = vpop.f32.mrf.mxu1 }
0x1e17   :  { %v7950_v12 = vsel %vm882_vm3, %v7949_v5, -inf }
0x1e18   :  { %7951 = vmax.xlane.f32.xlu0 %v7950_v12  ;;  %v8111_v38 = vpop.f32.mrf.mxu1 }
0x1e19   :  { %v8115_v13 = vmul.f32 0.35355338, %v8111_v38 }
0x1e1a   :  { %v16248_v40 = vpop.f32.mrf.mxu1 }
0x1e1b   :  { %v8116_v14 = vsel %vm882_vm3, %v8115_v13, -inf }
0x1e1c   :  { %8117 = vmax.xlane.f32.xlu1 %v8116_v14 }
0x1e2a   :  { %v7620_v18 = vpop.xlane.xlu1 %7619 }
0x1e2b   :  { %v7621_v10 = vsub.f32 %v7617_v37, %v7620_v18 }
0x1e2d   :  { %v7622_v20 = vmul.f32 1.442695, %v7621_v10  ;;  %7795 = vrot.lane.b32.xlu1 %v19376_v29, %s18061_s2  ;;  %v14773_v10 = vld [vmem:[%s20303_s16] ss:$0 sm:$0xff] }
0x1e2f   :  { %17125 = vpow2.f32 %v7622_v20 }
0x1e3c   :  { %v17126_v28 = vpop.eup %17125 }
0x1e3d   :  { %v7624_v21 = vsel %vm882_vm3, %v17126_v28, 0.0 }
0x1e3e   :  { %7625 = vadd.xlane.f32.xlu0 %v7624_v21 }
0x1e54   :  { %7629 = vrot.lane.b32.xlu0 %v19376_v29, %s18060_s1 }
0x1e9d   :  { %v7786_v25 = vpop.xlane.xlu0 %7785 }
0x1e9e   :  { %v7787_v53 = vsub.f32 %v7783_v24, %v7786_v25 }
0x1ea0   :  { %v7788_v26 = vmul.f32 1.442695, %v7787_v53 }
0x1ea1   :  { %v7952_v32 = vpop.xlane.xlu0 %7951 }
0x1ea2   :  { %17127 = vpow2.f32 %v7788_v26  ;;  %v7953_v34 = vsub.f32 %v7949_v5, %v7952_v32 }
0x1ea4   :  { %v7954_v35 = vmul.f32 1.442695, %v7953_v34 }
0x1ea5   :  { %v8118_v36 = vpop.xlane.xlu1 %8117 }
0x1ea6   :  { %17129 = vpow2.f32 %v7954_v35  ;;  %v8119_v56 = vsub.f32 %v8115_v13, %v8118_v36 }
0x1ea8   :  { %v8120_v41 = vmul.f32 1.442695, %v8119_v56 }
0x1ea9   :  { %v7796_v22 = vpop.permute.xlu1 %7795 }
0x1eaa   :  { %17131 = vpow2.f32 %v8120_v41 }
0x1eaf   :  { %v17128_v42 = vpop.eup %17127 }
0x1eb0   :  { %v7790_v4 = vsel %vm882_vm3, %v17128_v42, 0.0 }
0x1eb1   :  { %7791 = vadd.xlane.f32.xlu1 %v7790_v4  ;;  %v8339_v4 = vld [vmem:[%s20304_s18 + $0xc0] sm:$0xff] }
0x1eb3   :  { %v17130_v45 = vpop.eup %17129 }
0x1eb4   :  { %v7956_v63 = vsel %vm882_vm3, %v17130_v45, 0.0 }
0x1eb5   :  { %7957 = vadd.xlane.f32.xlu0 %v7956_v63  ;;  %v8340_v63 = vld [vmem:[%s20304_s18 + $0xc8] sm:$0xff] }
0x1eb7   :  { %v17132_v47 = vpop.eup %17131 }
0x1eb8   :  { %v8122_v48 = vsel %vm882_vm3, %v17132_v47, 0.0 }
0x1eb9   :  { %8123 = vadd.xlane.f32.xlu1 %v8122_v48 }
0x1ec7   :  { %v7626_v49 = vpop.xlane.xlu0 %7625 }
0x1ec8   :  { %17133 = vrcp.f32 %v7626_v49 }
0x1eca   :  { %7961 = vrot.lane.b32.xlu1 %v19376_v29, %s18062_s24 }
0x1ecb   :  { %8127 = vrot.lane.b32.xlu0 %v19376_v29, %s18064_s14  ;;  %v7630_v17 = vpop.permute.xlu0 %7629 }
0x1ecc   :  { %16220 = vmatpush3.msra.mxu0 %v7630_v17  ;;  %v8315_v17 = vld [vmem:[%s20304_s18] sm:$0xff] }
0x1ecd   :  { %16229 = vmatprep.subr.mxu0 %v18057_v0 }
0x1ed5   :  { %v17134_v50 = vpop.eup %17133 }
0x1ed6   :  { %v7628_v51 = vmul.f32 %v17134_v50, %v17126_v28  ;;  %v8323_v50 = vld [vmem:[%s20304_s18 + $0x40] sm:$0xff] }
0x1ed8   :  { %16222 = vmatmul.mubr.msk.f32.vlgmr.msra.gmra.mxu0 %vm882_vm3, %v7628_v51  ;;  %v8316_v51 = vld [vmem:[%s20304_s18 + $0x8] sm:$0xff] }
0x1ed9   :  { %16230 = vmatpush3.msra.mxu0 %v7796_v22  ;;  %16231 = vmatprep.mubr.msk.f32.mxu0 %vm18058_vm0, %v18057_v0  ;;  %v14780_v22 = vcombine.high %v8315_v17, %v8323_v50 }
0x1eda   :  { %16239 = vmatprep.subr.mxu0 %v18057_v0 }
0x1f3a   :  { %v7792_v2 = vpop.xlane.xlu1 %7791 }
0x1f3b   :  { %17135 = vrcp.f32 %v7792_v2  ;;  %v8324_v2 = vld [vmem:[%s20304_s18 + $0x48] sm:$0xff] }
0x1f3e   :  { %v7958_v30 = vpop.xlane.xlu0 %7957 }
0x1f3f   :  { %17137 = vrcp.f32 %v7958_v30  ;;  %v14779_v30 = vcombine.low %v8315_v17, %v8323_v50 }
0x1f42   :  { %v8124_v29 = vpop.xlane.xlu1 %8123  ;;  %v8128_v59 = vpop.permute.xlu0 %8127 }
0x1f43   :  { %17139 = vrcp.f32 %v8124_v29  ;;  %v14781_v29 = vcombine.low %v8316_v51, %v8324_v2 }
0x1f46   :  { %v7962_v61 = vpop.permute.xlu1 %7961 }
0x1f48   :  { %v17136_v52 = vpop.eup %17135 }
0x1f49   :  { %v7794_v60 = vmul.f32 %v17136_v52, %v17128_v42  ;;  %v8331_v42 = vld [vmem:[%s20304_s18 + $0x80] sm:$0xff]  ;;  %v14782_v52 = vcombine.high %v8316_v51, %v8324_v2  ;;  %v8329_v2 = vld [vmem:[%s20304_s18 + $0x70] sm:$0xff] }
0x1f4b   :  { %16232 = vmatmul.mubr.msk.f32.vlgmr.msra.gmra.mxu0 %vm882_vm3, %v7794_v60  ;;  %v8333_v60 = vld [vmem:[%s20304_s18 + $0x90] sm:$0xff] }
0x1f4c   :  { %v17138_v15 = vpop.eup %17137  ;;  %16240 = vmatpush3.msra.mxu0 %v7962_v61  ;;  %16241 = vmatprep.mubr.msk.f32.mxu0 %vm18058_vm0, %v18057_v0  ;;  %v8341_v61 = vld [vmem:[%s20304_s18 + $0xd0] sm:$0xff] }
0x1f4d   :  { %v7960_v39 = vmul.f32 %v17138_v15, %v17130_v45  ;;  %16249 = vmatprep.subr.mxu0 %v18057_v0  ;;  %v8332_v45 = vld [vmem:[%s20304_s18 + $0x88] sm:$0xff]  ;;  %v8334_v15 = vld [vmem:[%s20304_s18 + $0x98] sm:$0xff] }
0x1f4e   :  { %v14797_v48 = vcombine.low %v8332_v45, %v8340_v63  ;;  %v14798_v49 = vcombine.high %v8332_v45, %v8340_v63  ;;  %v8345_v63 = vld [vmem:[%s20304_s18 + $0xf0] sm:$0xff] }
0x1f4f   :  { %16242 = vmatmul.mubr.msk.f32.vlgmr.msra.gmra.mxu0 %vm882_vm3, %v7960_v39  ;;  %v14799_v39 = vcombine.low %v8333_v60, %v8341_v61 }
0x1f50   :  { %v17140_v62 = vpop.eup %17139  ;;  %16250 = vmatpush3.msra.mxu0 %v8128_v59  ;;  %16251 = vmatprep.mubr.msk.f32.mxu0 %vm18058_vm0, %v18057_v0  ;;  %v14800_v59 = vcombine.high %v8333_v60, %v8341_v61 }
0x1f51   :  { %v8126_v33 = vmul.f32 %v17140_v62, %v17132_v47  ;;  %v14795_v47 = vcombine.low %v8331_v42, %v8339_v4  ;;  %8648 = vmatprep.subr.bf16.mxu1 %v14798_v49  ;;  %v8342_v62 = vld [vmem:[%s20304_s18 + $0xd8] sm:$0xff] }
0x1f53   :  { %16252 = vmatmul.mubr.msk.f32.vlgmr.msra.gmra.mxu0 %vm882_vm3, %v8126_v33  ;;  %v14801_v33 = vcombine.low %v8334_v15, %v8342_v62 }
0x1f54   :  { %8627 = vmatprep.mubr.bf16.mxu0 %v18073_v19 }
0x1f98   :  { %v7701_v3 = vpop.f32.mrf.mxu0 }
0x1f9a   :  { %v16223_v37 = vpop.f32.mrf.mxu0 }
0x200b   :  { %v7867_v44 = vpop.f32.mrf.mxu0 }
0x200c   :  { %8204 = vrot.lane.b32.xlu1 %v7867_v44, %s18070_s10 }
0x200d   :  { %v16233_v24 = vpop.f32.mrf.mxu0 }
0x200e   :  { %v14777_v24 = vld [vmem:[%s20305_s21] ss:$0 sm:$0xff] }
0x200f   :  { %v8033_v6 = vpop.f32.mrf.mxu0 }
0x2010   :  { %8208 = vrot.lane.b32.xlu0 %v8033_v6, %s18071_s19 }
0x2011   :  { %v16243_v7 = vpop.f32.mrf.mxu0 }
0x2012   :  { %v14778_v7 = vld [vmem:[%s20306_s22] ss:$0 sm:$0xff] }
0x2013   :  { %v8199_v23 = vpop.f32.mrf.mxu0 }
0x2014   :  { %8212 = vrot.lane.b32.xlu1 %v8199_v23, %s18072_s11 }
0x2015   :  { %v16253_v5 = vpop.f32.mrf.mxu0 }
0x2016   :  { %v8317_v5 = vld [vmem:[%s20304_s18 + $0x10] sm:$0xff] }
0x207e   :  { %v8205_v11 = vpop.permute.xlu1 %8204 }
0x207f   :  { %v8215_v38 = vsel %vm882_vm3, %v7701_v3, %v8205_v11  ;;  %v14802_v3 = vcombine.high %v8334_v15, %v8342_v62  ;;  %v8325_v11 = vld [vmem:[%s20304_s18 + $0x50] sm:$0xff]  ;;  %v16795_v62 = vld [vmem:[%s20307_s9 + $0x78] sm:$0xff]  }
0x2082   :  { %v8209_v12 = vpop.permute.xlu0 %8208 }
0x2083   :  { %v8216_v13 = vsel %vm736_vm1, %v8215_v38, %v8209_v12  ;;  %v8318_v12 = vld [vmem:[%s20304_s18 + $0x18] sm:$0xff] }
0x2084   :  { %v8326_v38 = vld [vmem:[%s20304_s18 + $0x58] sm:$0xff] }
0x2086   :  { %v8213_v40 = vpop.permute.xlu1 %8212 }
0x2087   :  { %v8217_v14 = vsel %vm1557_vm4, %v8216_v13, %v8213_v40 }
0x2088   :  { %v8222_v18 = vpack.c.bf16 %v8217_v14, %v8217_v14  ;;  %v14784_v14 = vcombine.high %v8317_v5, %v8325_v11 }
0x208a   :  { %16259 = vmatmul.mubr.msk.bf16.vlgmr.msra.gmra.mxu1 %vm781_vm2, %v8222_v18  ;;  %v14786_v18 = vcombine.high %v8318_v12, %v8326_v38 }
0x208b   :  { %8668 = vmatprep.mubr.bf16.mxu1 %v18073_v19  ;;  %8649 = vmatpush1.bf16.msra.mxu1 %v14797_v48  ;;  %v8346_v48 = vld [vmem:[%s20304_s18 + $0xf8] sm:$0xff] }
0x208c   :  { %8650 = vmatprep.subr.bf16.mxu1 %v14782_v52 }
0x208f   :  { %8651 = vmatpush1.bf16.msra.mxu1 %v14781_v29  ;;  %v8330_v29 = vld [vmem:[%s20304_s18 + $0x78] sm:$0xff] }
0x2090   :  { %8730 = vmatprep.subr.bf16.mxu1 %v14802_v3  ;;  %v16797_v3 = vld [vmem:[%s20307_s9 + $0x38] sm:$0xff]  }
0x214a   :  { %v8279_v20 = vpop.f32.mrf.mxu1 }
0x214b   :  { %v8280_v28 = vadd.f32 %v14773_v10, %v8279_v20  ;;  %v8335_v10 = vld [vmem:[%s20304_s18 + $0xa0] sm:$0xff] }
0x214c   :  { %v16260_v21 = vpop.f32.mrf.mxu1  ;;  %v8343_v20 = vld [vmem:[%s20304_s18 + $0xe0] sm:$0xff] }
0x214d   :  { %v8285_v25 = vadd.f32 %v8280_v28, %v19360_v31  ;;  %v14796_v31 = vcombine.high %v8331_v42, %v8339_v4  ;;  %v8336_v28 = vld [vmem:[%s20304_s18 + $0xa8] sm:$0xff] }
0x214e   :  { %v8282_v53 = vpop.f32.mrf.mxu1  ;;  %v8344_v21 = vld [vmem:[%s20304_s18 + $0xe8] sm:$0xff] }
0x214f   :  { %v8286_v26 = vsel %vm781_vm2, %v8285_v25, 0.0  ;;  %8607 = vmatprep.subr.bf16.mxu0 %v14796_v31  ;;  %v14785_v53 = vcombine.low %v8318_v12, %v8326_v38  ;;  %v14805_v42 = vcombine.low %v8336_v28, %v8344_v21  ;;  %v8337_v31 = vld [vmem:[%s20304_s18 + $0xb0] sm:$0xff]  ;;  %v16808_v12 = vld [vmem:[%s20307_s9 + $0xe0] sm:$0xff]  }
0x2150   :  { %8287 = vadd.xlane.f32.xlu0 %v8286_v26  ;;  %v16261_v32 = vpop.f32.mrf.mxu1  ;;  %8608 = vmatpush1.bf16.msra.mxu0 %v14795_v47  ;;  %v14804_v26 = vcombine.high %v8335_v10, %v8343_v20  ;;  %v8338_v47 = vld [vmem:[%s20304_s18 + $0xb8] sm:$0xff]  ;;  %v14808_v50 = vcombine.high %v8337_v31, %v8345_v63  ;;  %v14807_v52 = vcombine.low %v8337_v31, %v8345_v63  ;;  %v16809_v38 = vld [vmem:[%s20307_s9 + $0x20] sm:$0xff]  }
0x2151   :  { %8609 = vmatprep.subr.bf16.mxu0 %v14780_v22  ;;  %v14806_v32 = vcombine.high %v8336_v28, %v8344_v21  ;;  %v14810_v51 = vcombine.high %v8338_v47, %v8346_v48  ;;  %v8321_v22 = vld [vmem:[%s20304_s18 + $0x30] sm:$0xff]  ;;  %v14809_v60 = vcombine.low %v8338_v47, %v8346_v48  ;;  %v19549_v31 = vld [vmem:[%s20308_s27] sm:$0xff] }
0x2152   :  { %v14792_v61 = vcombine.high %v8321_v22, %v8329_v2  ;;  %v16815_v28 = vld [vmem:[%s20307_s9 + $0x50] sm:$0xff]   ;;  %v8355_v63 = vrot.slane %v19549_v31, %v18711_v54  ;;  %v8363_v47 = vrot.slane %v19549_v31, %v18714_v55  ;;  %v8359_v48 = vrot.slane %v19549_v31, %v18720_v57 }
0x2153   :  { %v16816_v21 = vld [vmem:[%s20307_s9 + $0xd0] sm:$0xff]  }
0x2154   :  { %8610 = vmatpush1.bf16.msra.mxu0 %v14779_v30  ;;  %v8322_v30 = vld [vmem:[%s20304_s18 + $0x38] sm:$0xff] }
0x2155   :  { %8689 = vmatprep.subr.bf16.mxu0 %v14800_v59  ;;  %v14794_v15 = vcombine.high %v8322_v30, %v8330_v29  ;;  %v14793_v59 = vcombine.low %v8322_v30, %v8330_v29 }
0x21d9   :  { %v8288_v34 = vpop.xlane.xlu0 %8287 }
0x21da   :  { %v8289_v35 = vmul.f32 0.03125, %v8288_v34  ;;  %v8319_v34 = vld [vmem:[%s20304_s18 + $0x20] sm:$0xff] }
0x21dc   :  { %v8290_v36 = vsub.f32 %v8285_v25, %v8289_v35  ;;  %v14783_v25 = vcombine.low %v8317_v5, %v8325_v11  ;;  %v8327_v35 = vld [vmem:[%s20304_s18 + $0x60] sm:$0xff]  ;;  %v16806_v5 = vld [vmem:[%s20307_s9 + $0xa8] sm:$0xff]  }
0x21dd   :  { %v14788_v4 = vcombine.high %v8319_v34, %v8327_v35  ;;  %v14787_v49 = vcombine.low %v8319_v34, %v8327_v35  ;;  %v16807_v11 = vld [vmem:[%s20307_s9 + $0x60] sm:$0xff]   ;;  %v16821_v34 = vld [vmem:[%s20307_s9 + $0x8] sm:$0xff]  }
0x21de   :  { %v8291_v56 = vmul.f32 %v8290_v36, %v8290_v36  ;;  %v16822_v35 = vld [vmem:[%s20307_s9 + $0x88] sm:$0xff]  }
0x21e0   :  { %v8292_v41 = vsel %vm781_vm2, %v8291_v56, 0.0  ;;  %v8328_v56 = vld [vmem:[%s20304_s18 + $0x68] sm:$0xff] }
0x21e1   :  { %8293 = vadd.xlane.f32.xlu1 %v8292_v41  ;;  %v14803_v41 = vcombine.low %v8335_v10, %v8343_v20  ;;  %v16813_v10 = vld [vmem:[%s20307_s9 + $0x18] sm:$0xff]  }
0x21e2   :  { %v16814_v20 = vld [vmem:[%s20307_s9 + $0x98] sm:$0xff]  }
0x226a   :  { %v8294_v37 = vpop.xlane.xlu1 %8293 }
0x226b   :  { %v8295_v27 = vmul.f32 0.03125, %v8294_v37  ;;  %v16798_v37 = vld [vmem:[%s20307_s9 + $0xb8] sm:$0xff]  }
0x226d   :  { %v8296_v43 = vadd.f32 1e-05, %v8295_v27  ;;  %v16799_v27 = vld [vmem:[%s20307_s9 + $0x70] sm:$0xff]  }
0x226f   :  { %17141 = vrsqrt.f32 %v8296_v43  ;;  %v16800_v43 = vld [vmem:[%s20307_s9 + $0xf0] sm:$0xff]  }
0x227c   :  { %v17142_v44 = vpop.eup %17141 }
0x227d   :  { %v8298_v6 = vmul.f32 %v17142_v44, %v8290_v36  ;;  %v8320_v36 = vld [vmem:[%s20304_s18 + $0x28] sm:$0xff]  ;;  %v16801_v44 = vld [vmem:[%s20307_s9 + $0x30] sm:$0xff]  }
0x227e   :  { %v14790_v45 = vcombine.high %v8320_v36, %v8328_v56  ;;  %v14789_v17 = vcombine.low %v8320_v36, %v8328_v56  ;;  %v16823_v36 = vld [vmem:[%s20307_s9 + $0x40] sm:$0xff]  }
0x227f   :  { %v8306_v23 = vmul.f32 %v14777_v24, %v8298_v6  ;;  %v16802_v24 = vld [vmem:[%s20307_s9 + $0xb0] sm:$0xff]   ;;  %v16803_v6 = vld [vmem:[%s20307_s9 + $0x68] sm:$0xff]   ;;  %v16824_v56 = vld [vmem:[%s20307_s9 + $0xc0] sm:$0xff]  }
0x2281   :  { %v19470_v13 = vadd.f32 %v14778_v7, %v8306_v23  ;;  %v16804_v7 = vld [vmem:[%s20307_s9 + $0xe8] sm:$0xff]  }
0x2282   :  { %v16805_v23 = vld [vmem:[%s20307_s9 + $0x28] sm:$0xff]  }
0x2283   :  { %v19474_v40 = vpack.c.bf16 %v19470_v13, %v19470_v13 }
0x2285   :  { %14811 = vmatmul.mubr.msk.bf16.vlgmr.msra.gmra.mxu0 %vm781_vm2, %v19474_v40  ;;  %14812 = vmatmul.mubr.msk.bf16.vlgmr.msra.gmra.mxu1 %vm781_vm2, %v19474_v40 }
0x2286   :  { %8690 = vmatpush1.bf16.msra.mxu0 %v14799_v39  ;;  %8731 = vmatpush1.bf16.msra.mxu1 %v14801_v33  ;;  %v14791_v39 = vcombine.low %v8321_v22, %v8329_v2  ;;  %v16796_v33 = vld [vmem:[%s20307_s9 + $0xf8] sm:$0xff]  }
0x2287   :  { %8691 = vmatprep.subr.bf16.mxu0 %v14784_v14  ;;  %8732 = vmatprep.subr.bf16.mxu1 %v14786_v18  ;;  %v16811_v14 = vld [vmem:[%s20307_s9 + $0x58] sm:$0xff]  }
0x2288   :  { %8709 = vmatprep.mubr.bf16.mxu0 %v18073_v19  ;;  %8750 = vmatprep.mubr.bf16.mxu1 %v18073_v19  ;;  %v16812_v18 = vld [vmem:[%s20307_s9 + $0xd8] sm:$0xff]  }
0x228a   :  { %8692 = vmatpush1.bf16.msra.mxu0 %v14783_v25  ;;  %8733 = vmatpush1.bf16.msra.mxu1 %v14785_v53  ;;  %v16817_v25 = vld [vmem:[%s20307_s9 + $0x10] sm:$0xff]  }
0x228b   :  { %8771 = vmatprep.subr.bf16.mxu0 %v14804_v26  ;;  %8812 = vmatprep.subr.bf16.mxu1 %v14806_v32  ;;  %v16818_v53 = vld [vmem:[%s20307_s9 + $0x90] sm:$0xff]   ;;  %v16819_v26 = vld [vmem:[%s20307_s9 + $0x48] sm:$0xff]  }
0x228c   :  { %v16820_v32 = vld [vmem:[%s20307_s9 + $0xc8] sm:$0xff]  }
0x228d   :  { %14813 = vmatmul.mubr.msk.bf16.vlgmr.msra.gmra.mxu0 %vm781_vm2, %v19474_v40  ;;  %14814 = vmatmul.mubr.msk.bf16.vlgmr.msra.gmra.mxu1 %vm781_vm2, %v19474_v40 }
0x228e   :  { %8772 = vmatpush1.bf16.msra.mxu0 %v14803_v41  ;;  %8813 = vmatpush1.bf16.msra.mxu1 %v14805_v42  ;;  %v16825_v41 = vld [vmem:[%s20307_s9] sm:$0xff]  }
0x228f   :  { %8773 = vmatprep.subr.bf16.mxu0 %v14788_v4  ;;  %8814 = vmatprep.subr.bf16.mxu1 %v14790_v45  ;;  %v16826_v42 = vld [vmem:[%s20307_s9 + $0x80] sm:$0xff]   ;;  %v16827_v4 = vld [vmem:[%s20307_s9 + $0x178] sm:$0xff]  }
0x2290   :  { %8791 = vmatprep.mubr.bf16.mxu0 %v18073_v19  ;;  %8832 = vmatprep.mubr.bf16.mxu1 %v18073_v19  ;;  %v16828_v45 = vld [vmem:[%s20307_s9 + $0x1f8] sm:$0xff]  }
0x2292   :  { %8774 = vmatpush1.bf16.msra.mxu0 %v14787_v49  ;;  %8815 = vmatpush1.bf16.msra.mxu1 %v14789_v17  ;;  %v8367_v49 = vrot.slane %v19549_v31, %v18723_v58 }
0x2293   :  { %8853 = vmatprep.subr.bf16.mxu0 %v14808_v50  ;;  %8894 = vmatprep.subr.bf16.mxu1 %v14810_v51 }
0x2295   :  { %14815 = vmatmul.mubr.msk.bf16.vlgmr.msra.gmra.mxu0 %vm781_vm2, %v19474_v40  ;;  %14816 = vmatmul.mubr.msk.bf16.vlgmr.msra.gmra.mxu1 %vm781_vm2, %v19474_v40 }
0x2296   :  { %8854 = vmatpush1.bf16.msra.mxu0 %v14807_v52  ;;  %8895 = vmatpush1.bf16.msra.mxu1 %v14809_v60 }
0x2297   :  { %8855 = vmatprep.subr.bf16.mxu0 %v14792_v61  ;;  %8896 = vmatprep.subr.bf16.mxu1 %v14794_v15 }
0x2298   :  { %8873 = vmatprep.mubr.bf16.mxu0 %v18073_v19  ;;  %8914 = vmatprep.mubr.bf16.mxu1 %v18073_v19 }
0x229a   :  { %8856 = vmatpush1.bf16.msra.mxu0 %v14791_v39  ;;  %8897 = vmatpush1.bf16.msra.mxu1 %v14793_v59 }
0x229b   :  { %15622 = vmatprep.subr.bf16.mxu0 %v16795_v62  ;;  %15644 = vmatprep.subr.bf16.mxu1 %v16796_v33 }
0x229d   :  { %14817 = vmatmul.mubr.msk.bf16.vlgmr.msra.gmra.mxu0 %vm781_vm2, %v19474_v40  ;;  %14818 = vmatmul.mubr.msk.bf16.vlgmr.msra.gmra.mxu1 %vm781_vm2, %v19474_v40  ;;  %v16810_v40 = vld [vmem:[%s20307_s9 + $0xa0] sm:$0xff]  }
0x229e   :  { %15623 = vmatpush3.bf16.msra.mxu0 %v16797_v3  ;;  %15645 = vmatpush3.bf16.msra.mxu1 %v16798_v37 }
0x229f   :  { %15624 = vmatprep.subr.bf16.mxu0 %v16799_v27  ;;  %15646 = vmatprep.subr.bf16.mxu1 %v16800_v43  ;;  %v8375_v43 = vrot.slane %v19549_v31, %v18734_v8 }
0x22a2   :  { %15625 = vmatpush3.bf16.msra.mxu0 %v16801_v44  ;;  %15647 = vmatpush3.bf16.msra.mxu1 %v16802_v24  ;;  %v8383_v44 = vrot.slane %v19549_v31, %v18737_v9  ;;  %v16829_v24 = vld [vmem:[%s20307_s9 + $0x138] sm:$0xff]  }
0x22a3   :  { %15626 = vmatprep.subr.bf16.mxu0 %v16803_v6  ;;  %15648 = vmatprep.subr.bf16.mxu1 %v16804_v7  ;;  %v16830_v6 = vld [vmem:[%s20307_s9 + $0x1b8] sm:$0xff]  }
0x22a6   :  { %15627 = vmatpush3.bf16.msra.mxu0 %v16805_v23  ;;  %15649 = vmatpush3.bf16.msra.mxu1 %v16806_v5 }
0x22a7   :  { %15628 = vmatprep.subr.bf16.mxu0 %v16807_v11  ;;  %15650 = vmatprep.subr.bf16.mxu1 %v16808_v12  ;;  %v16831_v12 = vld [vmem:[%s20307_s9 + $0x170] sm:$0xff]  }
0x22aa   :  { %15629 = vmatpush3.bf16.msra.mxu0 %v16809_v38  ;;  %15651 = vmatpush3.bf16.msra.mxu1 %v16810_v40  ;;  %v16832_v38 = vld [vmem:[%s20307_s9 + $0x1f0] sm:$0xff]  }
0x22ab   :  { %15630 = vmatprep.subr.bf16.mxu0 %v16811_v14  ;;  %15652 = vmatprep.subr.bf16.mxu1 %v16812_v18 }
0x22ae   :  { %15631 = vmatpush3.bf16.msra.mxu0 %v16813_v10  ;;  %15653 = vmatpush3.bf16.msra.mxu1 %v16814_v20  ;;  %v16833_v20 = vld [vmem:[%s20307_s9 + $0x130] sm:$0xff]  }
0x22af   :  { %15632 = vmatprep.subr.bf16.mxu0 %v16815_v28  ;;  %15654 = vmatprep.subr.bf16.mxu1 %v16816_v21  ;;  %v16834_v28 = vld [vmem:[%s20307_s9 + $0x1b0] sm:$0xff]  }
0x22b2   :  { %15633 = vmatpush3.bf16.msra.mxu0 %v16817_v25  ;;  %15655 = vmatpush3.bf16.msra.mxu1 %v16818_v53  ;;  %v16835_v53 = vld [vmem:[%s20307_s9 + $0x168] sm:$0xff]  }
0x22b3   :  { %15634 = vmatprep.subr.bf16.mxu0 %v16819_v26  ;;  %15656 = vmatprep.subr.bf16.mxu1 %v16820_v32  ;;  %v16836_v26 = vld [vmem:[%s20307_s9 + $0x1e8] sm:$0xff]  }
0x22b6   :  { %15635 = vmatpush3.bf16.msra.mxu0 %v16821_v34  ;;  %15657 = vmatpush3.bf16.msra.mxu1 %v16822_v35 }
0x22b7   :  { %15636 = vmatprep.subr.bf16.mxu0 %v16823_v36  ;;  %15658 = vmatprep.subr.bf16.mxu1 %v16824_v56 }
0x22ba   :  { %15637 = vmatpush3.bf16.msra.mxu0 %v16825_v41  ;;  %15659 = vmatpush3.bf16.msra.mxu1 %v16826_v42  ;;  %v16837_v42 = vld [vmem:[%s20307_s9 + $0x128] sm:$0xff]  }
0x22bb   :  { %15666 = vmatprep.subr.bf16.mxu0 %v16827_v4  ;;  %15688 = vmatprep.subr.bf16.mxu1 %v16828_v45  ;;  %v16838_v4 = vld [vmem:[%s20307_s9 + $0x1a8] sm:$0xff]  }
0x2345   :  { %v8629_v17 = vpop.f32.mrf.mxu0  ;;  %v8670_v50 = vpop.f32.mrf.mxu1 }
0x2346   :  { %v8630_v51 = vadd.f32 %v8629_v17, %v8355_v63  ;;  %v8671_v22 = vadd.f32 %v8670_v50, %v8363_v47  ;;  %v16839_v47 = vld [vmem:[%s20307_s9 + $0x160] sm:$0xff]  }
0x2347   :  { %v8631_v2 = vpop.f32.mrf.mxu0  ;;  %v8672_v30 = vpop.f32.mrf.mxu1  ;;  %v16841_v50 = vld [vmem:[%s20307_s9 + $0x120] sm:$0xff]  }
0x2348   :  { %v8632_v29 = vadd.f32 %v8631_v2, %v8359_v48  ;;  %v8673_v52 = vadd.f32 %v8672_v30, %v8367_v49  ;;  %v8923_v60 = vmax.f32 %v8630_v51, 0.0  ;;  %v8925_v61 = vmax.f32 %v8671_v22, 0.0  ;;  %v16840_v48 = vld [vmem:[%s20307_s9 + $0x1e0] sm:$0xff]   ;;  %v19586_v22 = vld [vmem:[%s20308_s27 + $0x8] sm:$0xff] }
0x2349   :  { %v8633_v15 = vpop.f32.mrf.mxu0  ;;  %v8674_v39 = vpop.f32.mrf.mxu1  ;;  %v16842_v51 = vld [vmem:[%s20307_s9 + $0x1a0] sm:$0xff]  }
0x234a   :  { %v8924_v59 = vmax.f32 %v8632_v29, 0.0  ;;  %v8926_v62 = vmax.f32 %v8673_v52, 0.0  ;;  %v9195_v7 = vpack.c.bf16 %v8923_v60, %v8923_v60  ;;  %v9197_v23 = vpack.c.bf16 %v8925_v61, %v8925_v61  ;;  %v16843_v29 = vld [vmem:[%s20307_s9 + $0x158] sm:$0xff]  }
0x234b   :  { %v8634_v33 = vpop.f32.mrf.mxu0  ;;  %v8675_v3 = vpop.f32.mrf.mxu1  ;;  %v16844_v52 = vld [vmem:[%s20307_s9 + $0x1d8] sm:$0xff]   ;;  %v8411_v60 = vrot.slane %v19586_v22, %v18764_v1 }
0x234c   :  { %v9196_v37 = vpack.c.bf16 %v8924_v59, %v8924_v59  ;;  %v9198_v27 = vpack.c.bf16 %v8926_v62, %v8926_v62  ;;  %v16845_v39 = vld [vmem:[%s20307_s9 + $0x118] sm:$0xff]   ;;  %v16847_v3 = vld [vmem:[%s20307_s9 + $0x150] sm:$0xff]  }
0x234d   :  { %v19565_v5 = vpop.f32.mrf.mxu0  ;;  %v19567_v11 = vpop.f32.mrf.mxu1  ;;  %v16846_v59 = vld [vmem:[%s20307_s9 + $0x198] sm:$0xff]  }
0x234e   :  { %10018 = vmatprep.mubr.bf16.mxu0 %v9196_v37  ;;  %10058 = vmatprep.mubr.bf16.mxu1 %v9198_v27  ;;  %v16848_v37 = vld [vmem:[%s20307_s9 + $0x1d0] sm:$0xff]  }
0x234f   :  { %v8713_v40 = vpop.f32.mrf.mxu0  ;;  %v8754_v14 = vpop.f32.mrf.mxu1  ;;  %10019 = vmatmul.mubr.bf16.vlgmr.msra.gmra.mxu0 %v9195_v7  ;;  %10059 = vmatmul.mubr.bf16.vlgmr.msra.gmra.mxu1 %v9197_v23  ;;  %v8371_v7 = vrot.slane %v19549_v31, %v18778_v16  ;;  %v8379_v23 = vrot.slane %v19549_v31, %v18764_v1  ;;  %v16853_v31 = vld [vmem:[%s20307_s9 + $0x108] sm:$0xff]  }
0x2350   :  { %v8714_v18 = vadd.f32 %v8713_v40, %v8375_v43  ;;  %v8755_v10 = vadd.f32 %v8754_v14, %v8383_v44  ;;  %15667 = vmatpush3.bf16.msra.mxu0 %v16829_v24  ;;  %15689 = vmatpush3.bf16.msra.mxu1 %v16830_v6  ;;  %v16849_v24 = vld [vmem:[%s20307_s9 + $0x110] sm:$0xff]   ;;  %v16851_v40 = vld [vmem:[%s20307_s9 + $0x148] sm:$0xff]  }
0x2351   :  { %v8715_v21 = vpop.f32.mrf.mxu0  ;;  %v8756_v25 = vpop.f32.mrf.mxu1  ;;  %15668 = vmatprep.subr.bf16.mxu0 %v16831_v12  ;;  %15690 = vmatprep.subr.bf16.mxu1 %v16832_v38  ;;  %v16850_v6 = vld [vmem:[%s20307_s9 + $0x190] sm:$0xff]   ;;  %v16852_v14 = vld [vmem:[%s20307_s9 + $0x1c8] sm:$0xff]  }
0x2352   :  { %v8928_v32 = vmax.f32 %v8714_v18, 0.0  ;;  %v8930_v34 = vmax.f32 %v8755_v10, 0.0  ;;  %v8391_v18 = vrot.slane %v19586_v22, %v18720_v57  ;;  %v8399_v10 = vrot.slane %v19586_v22, %v18723_v58  ;;  %v16854_v21 = vld [vmem:[%s20307_s9 + $0x188] sm:$0xff]  }
0x2353   :  { %v8716_v35 = vpop.f32.mrf.mxu0  ;;  %v8757_v36 = vpop.f32.mrf.mxu1  ;;  %v8712_v25 = vadd.f32 %v19565_v5, %v8371_v7  ;;  %v16859_v5 = vld [vmem:[%s20307_s9 + $0x278] sm:$0xff]  }
0x2354   :  { %v9200_v56 = vpack.c.bf16 %v8928_v32, %v8928_v32  ;;  %v9202_v41 = vpack.c.bf16 %v8930_v34, %v8930_v34  ;;  %15669 = vmatpush3.bf16.msra.mxu0 %v16833_v20  ;;  %15691 = vmatpush3.bf16.msra.mxu1 %v16834_v28  ;;  %v16856_v32 = vld [vmem:[%s20307_s9 + $0x1c0] sm:$0xff]   ;;  %v16876_v7 = vld [vmem:[%s20307_s9 + $0x2d8] sm:$0xff]  }
0x2355   :  { %v19577_v45 = vpop.f32.mrf.mxu0  ;;  %v19579_v63 = vpop.f32.mrf.mxu1  ;;  %15670 = vmatprep.subr.bf16.mxu0 %v16835_v53  ;;  %15692 = vmatprep.subr.bf16.mxu1 %v16836_v26  ;;  %v8753_v53 = vadd.f32 %v19567_v11, %v8379_v23  ;;  %v16855_v26 = vld [vmem:[%s20307_s9 + $0x140] sm:$0xff]   ;;  %v16860_v11 = vld [vmem:[%s20307_s9 + $0x2f8] sm:$0xff]  }
0x2356   :  { %10098 = vmatprep.mubr.bf16.mxu0 %v9200_v56  ;;  %10138 = vmatprep.mubr.bf16.mxu1 %v9202_v41  ;;  %v16857_v36 = vld [vmem:[%s20307_s9 + $0x100] sm:$0xff]   ;;  %v8927_v41 = vmax.f32 %v8712_v25, 0.0  ;;  %v16877_v23 = vld [vmem:[%s20307_s9 + $0x218] sm:$0xff]   ;;  %v8415_v25 = vrot.slane %v19586_v22, %v18737_v9 }
0x2357   :  { %v8795_v49 = vpop.f32.mrf.mxu0  ;;  %v8836_v17 = vpop.f32.mrf.mxu1  ;;  %v16858_v56 = vld [vmem:[%s20307_s9 + $0x180] sm:$0xff]  }
0x2358   :  { %15671 = vmatpush3.bf16.msra.mxu0 %v16837_v42  ;;  %15693 = vmatpush3.bf16.msra.mxu1 %v16838_v4  ;;  %v8796_v34 = vadd.f32 %v8795_v49, %v8391_v18  ;;  %v8837_v35 = vadd.f32 %v8836_v17, %v8399_v10  ;;  %v8929_v42 = vmax.f32 %v8753_v53, 0.0  ;;  %v9199_v49 = vpack.c.bf16 %v8927_v41, %v8927_v41  ;;  %v16882_v10 = vld [vmem:[%s20307_s9 + $0x290] sm:$0xff]   ;;  %v16885_v53 = vld [vmem:[%s20307_s9 + $0x208] sm:$0xff]  }
0x2359   :  { %v8797_v2 = vpop.f32.mrf.mxu0  ;;  %v8838_v30 = vpop.f32.mrf.mxu1  ;;  %15672 = vmatprep.subr.bf16.mxu0 %v16839_v47  ;;  %15694 = vmatprep.subr.bf16.mxu1 %v16840_v48  ;;  %v16861_v48 = vld [vmem:[%s20307_s9 + $0x238] sm:$0xff]   ;;  %v8387_v18 = vrot.slane %v19586_v22, %v18711_v54 }
0x235a   :  { %v8932_v4 = vmax.f32 %v8796_v34, 0.0  ;;  %v8934_v47 = vmax.f32 %v8837_v35, 0.0  ;;  %v9201_v17 = vpack.c.bf16 %v8929_v42, %v8929_v42  ;;  %v16863_v2 = vld [vmem:[%s20307_s9 + $0x270] sm:$0xff]   ;;  %v16887_v34 = vld [vmem:[%s20307_s9 + $0x240] sm:$0xff]  }
0x235b   :  { %v8798_v61 = vpop.f32.mrf.mxu0  ;;  %v8839_v15 = vpop.f32.mrf.mxu1  ;;  %v16864_v30 = vld [vmem:[%s20307_s9 + $0x2f0] sm:$0xff]   ;;  %v16889_v42 = vld [vmem:[%s20307_s9 + $0x200] sm:$0xff]  }
0x235c   :  { %15673 = vmatpush3.bf16.msra.mxu0 %v16841_v50  ;;  %15695 = vmatpush3.bf16.msra.mxu1 %v16842_v51  ;;  %v16862_v50 = vld [vmem:[%s20307_s9 + $0x2b8] sm:$0xff]   ;;  %v9204_v51 = vpack.c.bf16 %v8932_v4, %v8932_v4  ;;  %v16867_v61 = vld [vmem:[%s20307_s9 + $0x268] sm:$0xff]  }
0x235d   :  { %v19594_v62 = vpop.f32.mrf.mxu0  ;;  %v8916_v33 = vpop.f32.mrf.mxu1  ;;  %15674 = vmatprep.subr.bf16.mxu0 %v16843_v29  ;;  %15696 = vmatprep.subr.bf16.mxu1 %v16844_v52  ;;  %v9206_v29 = vpack.c.bf16 %v8934_v47, %v8934_v47  ;;  %v16865_v52 = vld [vmem:[%s20307_s9 + $0x230] sm:$0xff]   ;;  %v16868_v15 = vld [vmem:[%s20307_s9 + $0x2e8] sm:$0xff]  }
0x235e   :  { %v19598_v27 = vadd.f32 %v8916_v33, %v8411_v60  ;;  %v16866_v60 = vld [vmem:[%s20307_s9 + $0x2b0] sm:$0xff]   ;;  %v16871_v33 = vld [vmem:[%s20307_s9 + $0x260] sm:$0xff]  }
0x235f   :  { %v19600_v43 = vpop.f32.mrf.mxu0  ;;  %v19602_v44 = vpop.f32.mrf.mxu1 }
0x2360   :  { %15675 = vmatpush3.bf16.msra.mxu0 %v16845_v39  ;;  %15697 = vmatpush3.bf16.msra.mxu1 %v16846_v59  ;;  %v16869_v39 = vld [vmem:[%s20307_s9 + $0x228] sm:$0xff]   ;;  %v8919_v41 = vadd.f32 %v19602_v44, %v8415_v25  ;;  %v16894_v44 = vld [vmem:[%s20307_s9 + $0x3b8] sm:$0xff]   ;;  %v16919_v25 = vld [vmem:[%s20307_s9 + $0x340] sm:$0xff]  }
0x2361   :  { %v8879_v12 = vpop.f32.mrf.mxu0  ;;  %v8920_v38 = vpop.f32.mrf.mxu1  ;;  %15676 = vmatprep.subr.bf16.mxu0 %v16847_v3  ;;  %15698 = vmatprep.subr.bf16.mxu1 %v16848_v37  ;;  %v16870_v59 = vld [vmem:[%s20307_s9 + $0x2a8] sm:$0xff]   ;;  %v16872_v3 = vld [vmem:[%s20307_s9 + $0x2e0] sm:$0xff]  }
0x2362   :  { %v16873_v37 = vld [vmem:[%s20307_s9 + $0x220] sm:$0xff]   ;;  %v16878_v12 = vld [vmem:[%s20307_s9 + $0x298] sm:$0xff]   ;;  %v16879_v38 = vld [vmem:[%s20307_s9 + $0x250] sm:$0xff]  }
0x2363   :  { %v8880_v20 = vpop.f32.mrf.mxu0  ;;  %v8921_v28 = vpop.f32.mrf.mxu1 }
0x2364   :  { %15677 = vmatpush3.bf16.msra.mxu0 %v16849_v24  ;;  %15699 = vmatpush3.bf16.msra.mxu1 %v16850_v6  ;;  %v16874_v24 = vld [vmem:[%s20307_s9 + $0x2a0] sm:$0xff]   ;;  %v16875_v6 = vld [vmem:[%s20307_s9 + $0x258] sm:$0xff]   ;;  %v16883_v20 = vld [vmem:[%s20307_s9 + $0x248] sm:$0xff]   ;;  %v8395_v28 = vrot.slane %v19586_v22, %v18714_v55 }
0x2365   :  { %15678 = vmatprep.subr.bf16.mxu0 %v16851_v40  ;;  %15700 = vmatprep.subr.bf16.mxu1 %v16852_v14  ;;  %v16880_v40 = vld [vmem:[%s20307_s9 + $0x2d0] sm:$0xff]  }
0x2366   :  { %v16881_v14 = vld [vmem:[%s20307_s9 + $0x210] sm:$0xff]   ;;  %v8835_v35 = vadd.f32 %v19579_v63, %v8395_v28  ;;  %v16892_v63 = vld [vmem:[%s20307_s9 + $0x3f8] sm:$0xff]   ;;  %v16917_v28 = vld [vmem:[%s20307_s9 + $0x308] sm:$0xff]  }
0x2368   :  { %15679 = vmatpush3.bf16.msra.mxu0 %v16853_v31  ;;  %15701 = vmatpush3.bf16.msra.mxu1 %v16854_v21  ;;  %v16884_v31 = vld [vmem:[%s20307_s9 + $0x2c8] sm:$0xff]   ;;  %v8407_v21 = vrot.slane %v19586_v22, %v18734_v8  ;;  %v8933_v4 = vmax.f32 %v8835_v35, 0.0 }
0x2369   :  { %15680 = vmatprep.subr.bf16.mxu0 %v16855_v26  ;;  %15702 = vmatprep.subr.bf16.mxu1 %v16856_v32  ;;  %v8794_v26 = vadd.f32 %v19577_v45, %v8387_v18  ;;  %v16886_v32 = vld [vmem:[%s20307_s9 + $0x288] sm:$0xff]   ;;  %v16890_v45 = vld [vmem:[%s20307_s9 + $0x280] sm:$0xff]   ;;  %v16914_v18 = vld [vmem:[%s20307_s9 + $0x390] sm:$0xff]  }
0x236c   :  { %15681 = vmatpush3.bf16.msra.mxu0 %v16857_v36  ;;  %15703 = vmatpush3.bf16.msra.mxu1 %v16858_v56  ;;  %v16888_v36 = vld [vmem:[%s20307_s9 + $0x2c0] sm:$0xff]   ;;  %v8878_v56 = vadd.f32 %v19600_v43, %v8407_v21  ;;  %v16893_v43 = vld [vmem:[%s20307_s9 + $0x338] sm:$0xff]   ;;  %v16918_v21 = vld [vmem:[%s20307_s9 + $0x388] sm:$0xff]  }
0x236d   :  { %15710 = vmatprep.subr.bf16.mxu0 %v16859_v5  ;;  %15732 = vmatprep.subr.bf16.mxu1 %v16860_v11  ;;  %v8931_v5 = vmax.f32 %v8794_v26, 0.0  ;;  %v16891_v11 = vld [vmem:[%s20307_s9 + $0x378] sm:$0xff]  }
0x236e   :  { %v8936_v47 = vmax.f32 %v8878_v56, 0.0 }
0x236f   :  { %10099 = vmatmul.mubr.bf16.vlgmr.msra.gmra.mxu0 %v9199_v49  ;;  %10139 = vmatmul.mubr.bf16.vlgmr.msra.gmra.mxu1 %v9201_v17  ;;  %v9203_v49 = vpack.c.bf16 %v8931_v5, %v8931_v5  ;;  %v9205_v17 = vpack.c.bf16 %v8933_v4, %v8933_v4 }
0x2370   :  { %15711 = vmatpush3.bf16.msra.mxu0 %v16861_v48  ;;  %10178 = vmatprep.mubr.bf16.mxu0 %v9204_v51  ;;  %v8938_v48 = vmax.f32 %v8919_v41, 0.0  ;;  %v9208_v51 = vpack.c.bf16 %v8936_v47, %v8936_v47 }
0x2371   :  { %15733 = vmatpush3.bf16.msra.mxu1 %v16862_v50  ;;  %10218 = vmatprep.mubr.bf16.mxu1 %v9206_v29  ;;  %v16895_v50 = vld [vmem:[%s20307_s9 + $0x370] sm:$0xff]  }
0x2372   :  { %15712 = vmatprep.subr.bf16.mxu0 %v16863_v2  ;;  %15734 = vmatprep.subr.bf16.mxu1 %v16864_v30  ;;  %v16896_v2 = vld [vmem:[%s20307_s9 + $0x3f0] sm:$0xff]   ;;  %v9210_v30 = vpack.c.bf16 %v8938_v48, %v8938_v48 }
0x2373   :  { %v16897_v29 = vld [vmem:[%s20307_s9 + $0x330] sm:$0xff]  }
0x2374   :  { %15713 = vmatpush3.bf16.msra.mxu0 %v16865_v52  ;;  %v16898_v52 = vld [vmem:[%s20307_s9 + $0x3b0] sm:$0xff]  }
0x2375   :  { %15735 = vmatpush3.bf16.msra.mxu1 %v16866_v60  ;;  %15714 = vmatprep.subr.bf16.mxu0 %v16867_v61  ;;  %v16899_v60 = vld [vmem:[%s20307_s9 + $0x368] sm:$0xff]  }
0x2376   :  { %15736 = vmatprep.subr.bf16.mxu1 %v16868_v15  ;;  %v16900_v61 = vld [vmem:[%s20307_s9 + $0x3e8] sm:$0xff]  }
0x2377   :  { %v16901_v15 = vld [vmem:[%s20307_s9 + $0x328] sm:$0xff]  }
0x2378   :  { %15715 = vmatpush3.bf16.msra.mxu0 %v16869_v39  ;;  %v16902_v39 = vld [vmem:[%s20307_s9 + $0x3a8] sm:$0xff]  }
0x2379   :  { %15737 = vmatpush3.bf16.msra.mxu1 %v16870_v59  ;;  %15716 = vmatprep.subr.bf16.mxu0 %v16871_v33  ;;  %v16903_v59 = vld [vmem:[%s20307_s9 + $0x360] sm:$0xff]  }
0x237a   :  { %15738 = vmatprep.subr.bf16.mxu1 %v16872_v3  ;;  %v16904_v33 = vld [vmem:[%s20307_s9 + $0x3e0] sm:$0xff]  }
0x237b   :  { %v16905_v3 = vld [vmem:[%s20307_s9 + $0x320] sm:$0xff]  }
0x237c   :  { %15717 = vmatpush3.bf16.msra.mxu0 %v16873_v37  ;;  %v16906_v37 = vld [vmem:[%s20307_s9 + $0x3a0] sm:$0xff]  }
0x237d   :  { %15739 = vmatpush3.bf16.msra.mxu1 %v16874_v24  ;;  %15718 = vmatprep.subr.bf16.mxu0 %v16875_v6  ;;  %v16907_v24 = vld [vmem:[%s20307_s9 + $0x358] sm:$0xff]  }
0x237e   :  { %15740 = vmatprep.subr.bf16.mxu1 %v16876_v7  ;;  %v16908_v6 = vld [vmem:[%s20307_s9 + $0x3d8] sm:$0xff]  }
0x237f   :  { %v16909_v7 = vld [vmem:[%s20307_s9 + $0x318] sm:$0xff]  }
0x2380   :  { %15719 = vmatpush3.bf16.msra.mxu0 %v16877_v23  ;;  %v16910_v23 = vld [vmem:[%s20307_s9 + $0x398] sm:$0xff]  }
0x2381   :  { %15741 = vmatpush3.bf16.msra.mxu1 %v16878_v12  ;;  %15720 = vmatprep.subr.bf16.mxu0 %v16879_v38  ;;  %v16911_v12 = vld [vmem:[%s20307_s9 + $0x350] sm:$0xff]  }
0x2382   :  { %15742 = vmatprep.subr.bf16.mxu1 %v16880_v40  ;;  %v16912_v38 = vld [vmem:[%s20307_s9 + $0x3d0] sm:$0xff]  }
0x2383   :  { %v16913_v40 = vld [vmem:[%s20307_s9 + $0x310] sm:$0xff]  }
0x2384   :  { %15721 = vmatpush3.bf16.msra.mxu0 %v16881_v14  ;;  %v8403_v14 = vrot.slane %v19586_v22, %v18778_v16  ;;  %v16921_v22 = vld [vmem:[%s20307_s9 + $0x300] sm:$0xff]  }
0x2385   :  { %15743 = vmatpush3.bf16.msra.mxu1 %v16882_v10  ;;  %15722 = vmatprep.subr.bf16.mxu0 %v16883_v20  ;;  %v16915_v10 = vld [vmem:[%s20307_s9 + $0x348] sm:$0xff]  }
0x2386   :  { %15744 = vmatprep.subr.bf16.mxu1 %v16884_v31  ;;  %v16916_v20 = vld [vmem:[%s20307_s9 + $0x3c8] sm:$0xff]   ;;  %v8876_v31 = vadd.f32 %v19594_v62, %v8403_v14 }
0x2388   :  { %15723 = vmatpush3.bf16.msra.mxu0 %v16885_v53  ;;  %v16920_v53 = vld [vmem:[%s20307_s9 + $0x3c0] sm:$0xff]   ;;  %v8935_v26 = vmax.f32 %v8876_v31, 0.0 }
0x2389   :  { %15745 = vmatpush3.bf16.msra.mxu1 %v16886_v32  ;;  %15724 = vmatprep.subr.bf16.mxu0 %v16887_v34  ;;  %v16922_v32 = vld [vmem:[%s20307_s9 + $0x380] sm:$0xff]   ;;  %v8937_v34 = vmax.f32 %v19598_v27, 0.0 }
0x238a   :  { %15746 = vmatprep.subr.bf16.mxu1 %v16888_v36  ;;  %v9207_v35 = vpack.c.bf16 %v8935_v26, %v8935_v26  ;;  %v14819_v27 = vld [vmem:[%s20309_s23] ss:$0 sm:$0xff] }
0x238b   :  { %v9209_v62 = vpack.c.bf16 %v8937_v34, %v8937_v34 }
0x238c   :  { %15725 = vmatpush3.bf16.msra.mxu0 %v16889_v42 }
0x238d   :  { %15747 = vmatpush3.bf16.msra.mxu1 %v16890_v45  ;;  %15754 = vmatprep.subr.bf16.mxu0 %v16891_v11 }
0x238e   :  { %15776 = vmatprep.subr.bf16.mxu1 %v16892_v63 }
0x238f   :  { %10179 = vmatmul.mubr.bf16.vlgmr.msra.gmra.mxu0 %v9203_v49 }
0x2390   :  { %10219 = vmatmul.mubr.bf16.vlgmr.msra.gmra.mxu1 %v9205_v17  ;;  %15755 = vmatpush3.bf16.msra.mxu0 %v16893_v43 }
0x2391   :  { %10258 = vmatprep.mubr.bf16.mxu0 %v9208_v51  ;;  %15777 = vmatpush3.bf16.msra.mxu1 %v16894_v44 }
0x2392   :  { %10298 = vmatprep.mubr.bf16.mxu1 %v9210_v30  ;;  %15756 = vmatprep.subr.bf16.mxu0 %v16895_v50 }
0x2393   :  { %15778 = vmatprep.subr.bf16.mxu1 %v16896_v2 }
0x2394   :  { %15757 = vmatpush3.bf16.msra.mxu0 %v16897_v29 }
0x2395   :  { %15779 = vmatpush3.bf16.msra.mxu1 %v16898_v52  ;;  %15758 = vmatprep.subr.bf16.mxu0 %v16899_v60 }
0x2396   :  { %15780 = vmatprep.subr.bf16.mxu1 %v16900_v61 }
0x2398   :  { %15759 = vmatpush3.bf16.msra.mxu0 %v16901_v15 }
0x2399   :  { %15781 = vmatpush3.bf16.msra.mxu1 %v16902_v39  ;;  %15760 = vmatprep.subr.bf16.mxu0 %v16903_v59 }
0x239a   :  { %15782 = vmatprep.subr.bf16.mxu1 %v16904_v33 }
0x239c   :  { %15761 = vmatpush3.bf16.msra.mxu0 %v16905_v3 }
0x239d   :  { %15783 = vmatpush3.bf16.msra.mxu1 %v16906_v37  ;;  %15762 = vmatprep.subr.bf16.mxu0 %v16907_v24 }
0x239e   :  { %15784 = vmatprep.subr.bf16.mxu1 %v16908_v6 }
0x23a0   :  { %15763 = vmatpush3.bf16.msra.mxu0 %v16909_v7 }
0x23a1   :  { %15785 = vmatpush3.bf16.msra.mxu1 %v16910_v23  ;;  %15764 = vmatprep.subr.bf16.mxu0 %v16911_v12 }
0x23a2   :  { %15786 = vmatprep.subr.bf16.mxu1 %v16912_v38 }
0x23a4   :  { %15765 = vmatpush3.bf16.msra.mxu0 %v16913_v40 }
0x23a5   :  { %15787 = vmatpush3.bf16.msra.mxu1 %v16914_v18  ;;  %15766 = vmatprep.subr.bf16.mxu0 %v16915_v10 }
0x23a6   :  { %15788 = vmatprep.subr.bf16.mxu1 %v16916_v20 }
0x23a8   :  { %15767 = vmatpush3.bf16.msra.mxu0 %v16917_v28 }
0x23a9   :  { %15789 = vmatpush3.bf16.msra.mxu1 %v16918_v21  ;;  %15768 = vmatprep.subr.bf16.mxu0 %v16919_v25 }
0x23aa   :  { %15790 = vmatprep.subr.bf16.mxu1 %v16920_v53 }
0x23ac   :  { %15769 = vmatpush3.bf16.msra.mxu0 %v16921_v22 }
0x23ad   :  { %15791 = vmatpush3.bf16.msra.mxu1 %v16922_v32  ;;  %16262 = vmatprep.subr.bf16.mxu0 %v18057_v0 }
0x23ae   :  { %16270 = vmatprep.subr.mxu1 %v18057_v0 }
0x23af   :  { %10259 = vmatmul.mubr.bf16.vlgmr.msra.gmra.mxu0 %v9207_v35 }
0x23b0   :  { %10299 = vmatmul.mubr.bf16.vlgmr.msra.gmra.mxu1 %v9209_v62  ;;  %16266 = vmatprep.mubr.msk.bf16.mxu0 %vm18058_vm0, %v18057_v0 }
0x23b1   :  { %16272 = vmatprep.mubr.msk.f32.mxu1 %vm18058_vm0, %v18057_v0 }
0x240f   :  { %v15638_v36 = vpop.f32.mrf.mxu0  ;;  %v15660_v56 = vpop.f32.mrf.mxu1 }
0x2411   :  { %v15639_v41 = vpop.f32.mrf.mxu0  ;;  %v15661_v42 = vpop.f32.mrf.mxu1 }
0x2412   :  { %v15640_v5 = vadd.f32 %v15639_v41, %v15638_v36  ;;  %v15662_v45 = vadd.f32 %v15661_v42, %v15660_v56  ;;  %v16923_v42 = vld [vmem:[%s20310_s6 + $0x8] sm:$0xff]  }
0x2413   :  { %v15641_v11 = vpop.f32.mrf.mxu0  ;;  %v15663_v4 = vpop.f32.mrf.mxu1  ;;  %16263 = vmatpush3.bf16.msra.mxu0 %v16923_v42 }
0x2414   :  { %v10021_v63 = vadd.f32 %v15640_v5, %v14819_v27  ;;  %v16924_v5 = vld [vmem:[%s20310_s6] sm:$0xff]   ;;  %16264 = vmatprep.subr.bf16.mxu0 %v18057_v0 }
0x2415   :  { %v15642_v47 = vpop.f32.mrf.mxu0  ;;  %v15664_v48 = vpop.f32.mrf.mxu1 }
0x2416   :  { %v10061_v43 = vadd.f32 %v15662_v45, %v10021_v63  ;;  %v14948_v63 = vld [vmem:[%s20311_s5] ss:$0 sm:$0xff] }
0x2417   :  { %16265 = vmatpush3.bf16.msra.mxu0 %v16924_v5  ;;  %v14949_v48 = vld [vmem:[%s20312_s26] ss:$0 sm:$0xff] }
0x2418   :  { %16275 = vmatprep.subr.mxu0 %v18057_v0 }
0x242f   :  { %v15682_v49 = vpop.f32.mrf.mxu0  ;;  %v15704_v44 = vpop.f32.mrf.mxu1 }
0x2431   :  { %v15683_v17 = vpop.f32.mrf.mxu0  ;;  %v15705_v50 = vpop.f32.mrf.mxu1 }
0x2432   :  { %v15684_v37 = vadd.f32 %v15683_v17, %v15682_v49  ;;  %v15706_v6 = vadd.f32 %v15705_v50, %v15704_v44  ;;  %v14950_v17 = vld [vmem:[#allocation19] ss:$0 sm:$0xff] }
0x2433   :  { %v15685_v51 = vpop.f32.mrf.mxu0  ;;  %v15707_v2 = vpop.f32.mrf.mxu1 }
0x2434   :  { %v10101_v24 = vadd.f32 %v15684_v37, %v10061_v43 }
0x2435   :  { %v15686_v30 = vpop.f32.mrf.mxu0  ;;  %v15708_v29 = vpop.f32.mrf.mxu1 }
0x2436   :  { %v10141_v23 = vadd.f32 %v15706_v6, %v10101_v24 }
0x244f   :  { %v15726_v52 = vpop.f32.mrf.mxu0 }
0x2450   :  { %v15748_v60 = vpop.f32.mrf.mxu1 }
0x2451   :  { %v15727_v61 = vpop.f32.mrf.mxu0 }
0x2452   :  { %v15749_v15 = vpop.f32.mrf.mxu1  ;;  %v15728_v7 = vadd.f32 %v15727_v61, %v15726_v52 }
0x2453   :  { %v15729_v39 = vpop.f32.mrf.mxu0  ;;  %v15750_v40 = vadd.f32 %v15749_v15, %v15748_v60 }
0x2454   :  { %v15751_v59 = vpop.f32.mrf.mxu1  ;;  %v10181_v12 = vadd.f32 %v15728_v7, %v10141_v23 }
0x2455   :  { %v15730_v33 = vpop.f32.mrf.mxu0 }
0x2456   :  { %v15752_v3 = vpop.f32.mrf.mxu1  ;;  %v10221_v10 = vadd.f32 %v15750_v40, %v10181_v12 }
0x246f   :  { %v15770_v38 = vpop.f32.mrf.mxu0 }
0x2470   :  { %v15792_v14 = vpop.f32.mrf.mxu1 }
0x2471   :  { %v15771_v18 = vpop.f32.mrf.mxu0 }
0x2472   :  { %v15772_v20 = vadd.f32 %v15771_v18, %v15770_v38  ;;  %v15793_v28 = vpop.f32.mrf.mxu1 }
0x2473   :  { %v15773_v31 = vpop.f32.mrf.mxu0  ;;  %v15794_v25 = vadd.f32 %v15793_v28, %v15792_v14 }
0x2474   :  { %v10261_v21 = vadd.f32 %v15772_v20, %v10221_v10  ;;  %v15795_v53 = vpop.f32.mrf.mxu1 }
0x2475   :  { %v15774_v22 = vpop.f32.mrf.mxu0 }
0x2476   :  { %v10301_v26 = vadd.f32 %v15794_v25, %v10261_v21  ;;  %v15796_v32 = vpop.f32.mrf.mxu1 }
0x2478   :  { %v10306_v34 = vadd.f32 %v10301_v26, %v19470_v13 }
0x247a   :  { %v10307_v35 = vsel %vm781_vm2, %v10306_v34, 0.0 }
0x247b   :  { %10308 = vadd.xlane.f32.xlu0 %v10307_v35 }
0x2504   :  { %v10309_v62 = vpop.xlane.xlu0 %10308 }
0x2505   :  { %v10310_v36 = vmul.f32 0.03125, %v10309_v62 }
0x2507   :  { %v10311_v56 = vsub.f32 %v10306_v34, %v10310_v36 }
0x2509   :  { %v10312_v27 = vmul.f32 %v10311_v56, %v10311_v56 }
0x250b   :  { %v10313_v41 = vsel %vm781_vm2, %v10312_v27, 0.0 }
0x250c   :  { %10314 = vadd.xlane.f32.xlu0 %v10313_v41 }
0x2595   :  { %v10315_v13 = vpop.xlane.xlu0 %10314 }
0x2596   :  { %v10316_v45 = vmul.f32 0.03125, %v10315_v13 }
0x2598   :  { %v10317_v11 = vadd.f32 1e-05, %v10316_v45 }
0x259a   :  { %17143 = vrsqrt.f32 %v10317_v11 }
0x25a7   :  { %v17144_v4 = vpop.eup %17143 }
0x25a8   :  { %v10319_v47 = vmul.f32 %v17144_v4, %v10311_v56 }
0x25aa   :  { %v10327_v43 = vmul.f32 %v14948_v63, %v10319_v47 }
0x25ac   :  { %v19720_v49 = vadd.f32 %v14949_v48, %v10327_v43 }
0x25ae   :  { %v10340_v44 = vpack.c.bf16 %v19720_v49, %v19720_v49 }
0x25b0   :  { %16267 = vmatmul.mubr.msk.bf16.vlgmr.msra.gmra.mxu0 %vm781_vm2, %v10340_v44 }
0x25b1   :  { %16277 = vmatprep.mubr.msk.f32.mxu0 %vm18058_vm0, %v18057_v0 }
0x2670   :  { %v10397_v50 = vpop.f32.mrf.mxu0 }
0x2671   :  { %v19727_v51 = vadd.f32 %v14950_v17, %v10397_v50 }
0x2672   :  { %v16268_v2 = vpop.f32.mrf.mxu0 }
0x2673   :  { %10570 = vrot.lane.b32.xlu0 %v19727_v51, %s18061_s2  ;;  %10404 = vrot.lane.b32.xlu1 %v19727_v51, %s18060_s1 }
0x2674   :  { %v10400_v30 = vpop.f32.mrf.mxu0 }
0x2676   :  { %v16269_v29 = vpop.f32.mrf.mxu0 }
0x2677   :  { %10734 = vrot.lane.b32.xlu0 %v19727_v51, %s18063_s13  ;;  %10568 = vrot.lane.b32.xlu1 %v19727_v51, %s18059_s28 }
0x267b   :  { %10900 = vrot.lane.b32.xlu0 %v19727_v51, %s18065_s0  ;;  %10736 = vrot.lane.b32.xlu1 %v19727_v51, %s18062_s24 }
0x267f   :  { %10902 = vrot.lane.b32.xlu1 %v19727_v51, %s18064_s14 }
0x26e5   :  { %v10405_v52 = vpop.permute.xlu1 %10404  ;;  %v10571_v60 = vpop.permute.xlu0 %10570 }
0x26e6   :  { %16271 = vmatpush3.xpose.msk.msra.mxu1 %vm882_vm3, %v10405_v52 }
0x26e7   :  { %16280 = vmatprep.subr.mxu1 %v18057_v0 }
0x26e9   :  { %16273 = vmatmul.mubr.msk.f32.vlgmr.msra.gmra.mxu1 %vm882_vm3, %v19727_v51  ;;  %v10569_v61 = vpop.permute.xlu1 %10568  ;;  %v10735_v39 = vpop.permute.xlu0 %10734 }
0x26ea   :  { %16281 = vmatpush3.xpose.msk.msra.mxu1 %vm882_vm3, %v10571_v60  ;;  %16282 = vmatprep.mubr.msk.f32.mxu1 %vm18058_vm0, %v18057_v0 }
0x26eb   :  { %16290 = vmatprep.subr.mxu1 %v18057_v0 }
0x26ed   :  { %16283 = vmatmul.mubr.msk.f32.vlgmr.msra.gmra.mxu1 %vm882_vm3, %v10569_v61  ;;  %v10737_v15 = vpop.permute.xlu1 %10736  ;;  %v10901_v33 = vpop.permute.xlu0 %10900 }
0x26ee   :  { %16291 = vmatpush3.xpose.msk.msra.mxu1 %vm882_vm3, %v10737_v15  ;;  %16292 = vmatprep.mubr.msk.f32.mxu1 %vm18058_vm0, %v18057_v0 }
0x26ef   :  { %16300 = vmatprep.subr.mxu1 %v18057_v0 }
0x26f1   :  { %16293 = vmatmul.mubr.msk.f32.vlgmr.msra.gmra.mxu1 %vm882_vm3, %v10735_v39  ;;  %v10903_v59 = vpop.permute.xlu1 %10902 }
0x26f2   :  { %16301 = vmatpush3.xpose.msk.msra.mxu1 %vm882_vm3, %v10903_v59  ;;  %16302 = vmatprep.mubr.msk.f32.mxu1 %vm18058_vm0, %v18057_v0 }
0x26f3   :  { %16310 = vmatprep.subr.bf16.mxu1 %v18057_v0 }
0x26f5   :  { %16303 = vmatmul.mubr.msk.f32.vlgmr.msra.gmra.mxu1 %vm882_vm3, %v10901_v33 }
0x26f6   :  { %16314 = vmatprep.mubr.msk.bf16.mxu1 %vm18058_vm0, %v18057_v0 }
0x27a9   :  { %v10476_v3 = vpop.f32.mrf.mxu1 }
0x27aa   :  { %v10480_v37 = vmul.f32 0.35355338, %v10476_v3 }
0x27ab   :  { %v16274_v24 = vpop.f32.mrf.mxu1 }
0x27ac   :  { %v10481_v6 = vsel %vm882_vm3, %v10480_v37, -inf }
0x27ad   :  { %10482 = vmax.xlane.f32.xlu1 %v10481_v6  ;;  %v10642_v7 = vpop.f32.mrf.mxu1 }
0x27ae   :  { %v10646_v23 = vmul.f32 0.35355338, %v10642_v7 }
0x27af   :  { %v16284_v12 = vpop.f32.mrf.mxu1 }
0x27b0   :  { %v10647_v38 = vsel %vm882_vm3, %v10646_v23, -inf }
0x27b1   :  { %10648 = vmax.xlane.f32.xlu0 %v10647_v38  ;;  %v10808_v40 = vpop.f32.mrf.mxu1 }
0x27b2   :  { %v10812_v14 = vmul.f32 0.35355338, %v10808_v40 }
0x27b3   :  { %v16294_v18 = vpop.f32.mrf.mxu1 }
0x27b4   :  { %v10813_v10 = vsel %vm882_vm3, %v10812_v14, -inf }
0x27b5   :  { %10814 = vmax.xlane.f32.xlu0 %v10813_v10  ;;  %v10974_v20 = vpop.f32.mrf.mxu1 }
0x27b6   :  { %v10978_v28 = vmul.f32 0.35355338, %v10974_v20 }
0x27b7   :  { %v16304_v31 = vpop.f32.mrf.mxu1 }
0x27b8   :  { %v10979_v21 = vsel %vm882_vm3, %v10978_v28, -inf }
0x27b9   :  { %10980 = vmax.xlane.f32.xlu1 %v10979_v21 }
0x27ca   :  { %10658 = vrot.lane.b32.xlu1 %v19727_v51, %s18069_s7  ;;  %s20316_s7 = sld [smem:[#allocation101_spill]] }
0x2836   :  { %v10483_v25 = vpop.xlane.xlu1 %10482 }
0x2837   :  { %v10484_v53 = vsub.f32 %v10480_v37, %v10483_v25 }
0x2839   :  { %v10485_v22 = vmul.f32 1.442695, %v10484_v53 }
0x283a   :  { %v10649_v26 = vpop.xlane.xlu0 %10648 }
0x283b   :  { %17145 = vpow2.f32 %v10485_v22  ;;  %v10650_v32 = vsub.f32 %v10646_v23, %v10649_v26  ;;  %v14966_v26 = vld [vmem:[#allocation17] ss:$0 sm:$0xff] }
0x283d   :  { %v10651_v34 = vmul.f32 1.442695, %v10650_v32 }
0x283e   :  { %v10815_v45 = vpop.xlane.xlu0 %10814 }
0x283f   :  { %17147 = vpow2.f32 %v10651_v34  ;;  %v10816_v11 = vsub.f32 %v10812_v14, %v10815_v45 }
0x2841   :  { %v10817_v4 = vmul.f32 1.442695, %v10816_v11 }
0x2842   :  { %v10981_v35 = vpop.xlane.xlu1 %10980 }
0x2843   :  { %v10982_v62 = vsub.f32 %v10978_v28, %v10981_v35 }
0x2845   :  { %v10983_v36 = vmul.f32 1.442695, %v10982_v62 }
0x2846   :  { %v10659_v48 = vpop.permute.xlu1 %10658 }
0x2847   :  { %17149 = vpow2.f32 %v10983_v36 }
0x2848   :  { %v17146_v56 = vpop.eup %17145  ;;  %17151 = vpow2.f32 %v10817_v4 }
0x2849   :  { %v10487_v27 = vsel %vm882_vm3, %v17146_v56, 0.0 }
0x284a   :  { %10488 = vadd.xlane.f32.xlu0 %v10487_v27 }
0x284c   :  { %v17148_v41 = vpop.eup %17147 }
0x284d   :  { %v10653_v42 = vsel %vm882_vm3, %v17148_v41, 0.0 }
0x284e   :  { %10654 = vadd.xlane.f32.xlu1 %v10653_v42 }
0x2854   :  { %v17150_v5 = vpop.eup %17149 }
0x2855   :  { %v10985_v13 = vsel %vm882_vm3, %v17150_v5, 0.0  ;;  %v17152_v63 = vpop.eup %17151 }
0x2856   :  { %10986 = vadd.xlane.f32.xlu1 %v10985_v13  ;;  %v10819_v47 = vsel %vm882_vm3, %v17152_v63, 0.0 }
0x2860   :  { %10492 = vrot.lane.b32.xlu0 %v19727_v51, %s18066_s25  ;;  %s20313_s25 = sld [smem:[#allocation109_spill]] }
0x2866   :  { %v16925_v7 = vld [vmem:[%s20313_s25 + $0x8] sm:$0xff]   ;;  %v16926_v23 = vld [vmem:[%s20313_s25] sm:$0xff]  }
0x2867   :  { %10824 = vrot.lane.b32.xlu1 %v19727_v51, %s18067_s4  ;;  %16311 = vmatpush3.bf16.msra.mxu1 %v16925_v7  ;;  %s20314_s4 = sld [smem:[#allocation98_spill]] }
0x2868   :  { %16312 = vmatprep.subr.bf16.mxu1 %v18057_v0 }
0x286b   :  { %16313 = vmatpush3.bf16.msra.mxu1 %v16926_v23 }
0x286c   :  { %16326 = vmatprep.subr.bf16.mxu1 %v18057_v0 }
0x286d   :  { %v16927_v25 = vld [vmem:[%s20314_s4 + $0x8] sm:$0xff]   ;;  %v16928_v22 = vld [vmem:[%s20314_s4] sm:$0xff]  }
0x287f   :  { %10820 = vadd.xlane.f32.xlu0 %v10819_v47 }
0x2895   :  { %10990 = vrot.lane.b32.xlu0 %v19727_v51, %s18068_s3  ;;  %s20315_s3 = sld [smem:[#allocation97_spill]] }
0x28d3   :  { %v10489_v43 = vpop.xlane.xlu0 %10488 }
0x28d4   :  { %17153 = vrcp.f32 %v10489_v43  ;;  %v16929_v43 = vld [vmem:[%s20316_s7 + $0x8] sm:$0xff]  }
0x28d7   :  { %v10493_v44 = vpop.permute.xlu0 %10492  ;;  %v10655_v17 = vpop.xlane.xlu1 %10654 }
0x28d8   :  { %17155 = vrcp.f32 %v10655_v17  ;;  %16276 = vmatpush3.msra.mxu0 %v10493_v44  ;;  %v16930_v44 = vld [vmem:[%s20316_s7] sm:$0xff]  }
0x28d9   :  { %16285 = vmatprep.subr.mxu0 %v18057_v0 }
0x28df   :  { %v10987_v30 = vpop.xlane.xlu1 %10986 }
0x28e1   :  { %v17154_v50 = vpop.eup %17153 }
0x28e2   :  { %v10491_v2 = vmul.f32 %v17154_v50, %v17146_v56 }
0x28e3   :  { %v10825_v52 = vpop.permute.xlu1 %10824 }
0x28e4   :  { %16278 = vmatmul.mubr.msk.f32.vlgmr.msra.gmra.mxu0 %vm882_vm3, %v10491_v2 }
0x28e5   :  { %v17156_v29 = vpop.eup %17155  ;;  %16286 = vmatpush3.msra.mxu0 %v10659_v48  ;;  %16287 = vmatprep.mubr.msk.f32.mxu0 %vm18058_vm0, %v18057_v0 }
0x28e6   :  { %v10657_v51 = vmul.f32 %v17156_v29, %v17148_v41  ;;  %16295 = vmatprep.subr.mxu0 %v18057_v0  ;;  %v14970_v29 = vld [vmem:[#allocation10] ss:$0 sm:$0xff] }
0x28e8   :  { %16288 = vmatmul.mubr.msk.f32.vlgmr.msra.gmra.mxu0 %vm882_vm3, %v10657_v51 }
0x28e9   :  { %16296 = vmatpush3.msra.mxu0 %v10825_v52  ;;  %16297 = vmatprep.mubr.msk.f32.mxu0 %vm18058_vm0, %v18057_v0  ;;  %v14971_v52 = vld [vmem:[#allocation8] ss:$0 sm:$0xff] }
0x28ea   :  { %16305 = vmatprep.subr.mxu0 %v18057_v0 }
0x2908   :  { %v10821_v60 = vpop.xlane.xlu0 %10820 }
0x2909   :  { %17157 = vrcp.f32 %v10821_v60 }
0x290a   :  { %17159 = vrcp.f32 %v10987_v30 }
0x290c   :  { %v10991_v59 = vpop.permute.xlu0 %10990 }
0x2916   :  { %v17158_v61 = vpop.eup %17157 }
0x2917   :  { %v10823_v15 = vmul.f32 %v17158_v61, %v17152_v63  ;;  %v17160_v39 = vpop.eup %17159 }
0x2918   :  { %v10989_v33 = vmul.f32 %v17160_v39, %v17150_v5  ;;  %v14972_v39 = vld [vmem:[#allocation5] ss:$0 sm:$0xff] }
0x2919   :  { %16298 = vmatmul.mubr.msk.f32.vlgmr.msra.gmra.mxu0 %vm882_vm3, %v10823_v15 }
0x291a   :  { %16306 = vmatpush3.msra.mxu0 %v10991_v59  ;;  %16307 = vmatprep.mubr.msk.f32.mxu0 %vm18058_vm0, %v18057_v0 }
0x291b   :  { %16318 = vmatprep.subr.bf16.mxu0 %v18057_v0 }
0x291d   :  { %16308 = vmatmul.mubr.msk.f32.vlgmr.msra.gmra.mxu0 %vm882_vm3, %v10989_v33 }
0x291e   :  { %16322 = vmatprep.mubr.msk.bf16.mxu0 %vm18058_vm0, %v18057_v0  ;;  %16319 = vmatpush3.bf16.msra.mxu0 %v16929_v43 }
0x291f   :  { %16320 = vmatprep.subr.bf16.mxu0 %v18057_v0 }
0x2922   :  { %16321 = vmatpush3.bf16.msra.mxu0 %v16930_v44 }
0x2923   :  { %16334 = vmatprep.subr.mxu0 %v18057_v0 }
0x29a4   :  { %v10564_v3 = vpop.f32.mrf.mxu0 }
0x29a6   :  { %v16279_v37 = vpop.f32.mrf.mxu0 }
0x29a8   :  { %v10730_v24 = vpop.f32.mrf.mxu0 }
0x29a9   :  { %11067 = vrot.lane.b32.xlu1 %v10730_v24, %s18070_s10 }
0x29aa   :  { %v16289_v6 = vpop.f32.mrf.mxu0 }
0x29d9   :  { %v10896_v12 = vpop.f32.mrf.mxu0 }
0x29da   :  { %11071 = vrot.lane.b32.xlu0 %v10896_v12, %s18071_s19 }
0x29db   :  { %v16299_v38 = vpop.f32.mrf.mxu0 }
0x29dd   :  { %v11062_v40 = vpop.f32.mrf.mxu0 }
0x29de   :  { %11075 = vrot.lane.b32.xlu1 %v11062_v40, %s18072_s11 }
0x29df   :  { %v16309_v14 = vpop.f32.mrf.mxu0 }
0x2a1b   :  { %v11068_v18 = vpop.permute.xlu1 %11067 }
0x2a1c   :  { %v11078_v20 = vsel %vm882_vm3, %v10564_v3, %v11068_v18 }
0x2a4c   :  { %v11072_v10 = vpop.permute.xlu0 %11071 }
0x2a4d   :  { %v11079_v28 = vsel %vm736_vm1, %v11078_v20, %v11072_v10 }
0x2a50   :  { %v11076_v31 = vpop.permute.xlu1 %11075 }
0x2a51   :  { %v11080_v21 = vsel %vm1557_vm4, %v11079_v28, %v11076_v31 }
0x2a52   :  { %v11085_v53 = vpack.c.bf16 %v11080_v21, %v11080_v21 }
0x2a54   :  { %16315 = vmatmul.mubr.msk.bf16.vlgmr.msra.gmra.mxu1 %vm781_vm2, %v11085_v53 }
0x2a55   :  { %16327 = vmatpush3.bf16.msra.mxu1 %v16927_v25  ;;  %16330 = vmatprep.mubr.msk.bf16.mxu1 %vm18058_vm0, %v18057_v0 }
0x2a56   :  { %16328 = vmatprep.subr.bf16.mxu1 %v18057_v0 }
0x2a59   :  { %16329 = vmatpush3.bf16.msra.mxu1 %v16928_v22 }
0x2a5a   :  { %16344 = vmatprep.subr.mxu1 %v18057_v0 }
0x2a5c   :  { %16331 = vmatmul.mubr.msk.bf16.vlgmr.msra.gmra.mxu1 %vm781_vm2, %v19367_v46  ;;  %v14976_v46 = vld [vmem:[%s20315_s3] ss:$0 sm:$0xff] }
0x2a5d   :  { %16346 = vmatprep.mubr.msk.f32.mxu1 %vm18058_vm0, %v18057_v0 }
0x2b14   :  { %v11142_v32 = vpop.f32.mrf.mxu1 }
0x2b15   :  { %v11143_v34 = vadd.f32 %v14966_v26, %v11142_v32 }
0x2b16   :  { %v16316_v35 = vpop.f32.mrf.mxu1 }
0x2b17   :  { %v11148_v62 = vadd.f32 %v11143_v34, %v19720_v49 }
0x2b18   :  { %v11145_v36 = vpop.f32.mrf.mxu1 }
0x2b19   :  { %v11149_v56 = vsel %vm781_vm2, %v11148_v62, 0.0 }
0x2b1a   :  { %11150 = vadd.xlane.f32.xlu0 %v11149_v56  ;;  %v16317_v27 = vpop.f32.mrf.mxu1 }
0x2b1c   :  { %v11302_v41 = vpop.f32.mrf.mxu1 }
0x2b1d   :  { %v19820_v45 = vadd.f32 %v14976_v46, %v11302_v41 }
0x2b1e   :  { %v16332_v42 = vpop.f32.mrf.mxu1 }
0x2b20   :  { %v11305_v5 = vpop.f32.mrf.mxu1 }
0x2b22   :  { %v16333_v13 = vpop.f32.mrf.mxu1 }
0x2b30   :  { %11474 = vrot.lane.b32.xlu0 %v19820_v45, %s18059_s28 }
0x2b34   :  { %11640 = vrot.lane.b32.xlu0 %v19820_v45, %s18063_s13 }
0x2b38   :  { %11806 = vrot.lane.b32.xlu0 %v19820_v45, %s18065_s0 }
0x2ba3   :  { %v11151_v49 = vpop.xlane.xlu0 %11150 }
0x2ba4   :  { %v11152_v11 = vmul.f32 0.03125, %v11151_v49 }
0x2ba6   :  { %v11153_v4 = vsub.f32 %v11148_v62, %v11152_v11 }
0x2ba7   :  { %v11475_v63 = vpop.permute.xlu0 %11474 }
0x2ba8   :  { %16345 = vmatpush3.xpose.msk.msra.mxu1 %vm882_vm3, %v11475_v63  ;;  %v11154_v47 = vmul.f32 %v11153_v4, %v11153_v4 }
0x2ba9   :  { %16354 = vmatprep.subr.mxu1 %v18057_v0 }
0x2baa   :  { %v11155_v48 = vsel %vm781_vm2, %v11154_v47, 0.0 }
0x2bab   :  { %11156 = vadd.xlane.f32.xlu1 %v11155_v48  ;;  %v11641_v6 = vpop.permute.xlu0 %11640 }
0x2baf   :  { %v11807_v12 = vpop.permute.xlu0 %11806 }
0x2c34   :  { %v11157_v17 = vpop.xlane.xlu1 %11156 }
0x2c35   :  { %v11158_v50 = vmul.f32 0.03125, %v11157_v17 }
0x2c37   :  { %v11159_v2 = vadd.f32 1e-05, %v11158_v50 }
0x2c39   :  { %17161 = vrsqrt.f32 %v11159_v2 }
0x2c46   :  { %v17162_v30 = vpop.eup %17161 }
0x2c47   :  { %v11161_v51 = vmul.f32 %v17162_v30, %v11153_v4 }
0x2c49   :  { %v11169_v60 = vmul.f32 %v14970_v29, %v11161_v51 }
0x2c4b   :  { %v19835_v61 = vadd.f32 %v14971_v52, %v11169_v60 }
0x2c4d   :  { %v11182_v15 = vpack.c.bf16 %v19835_v61, %v19835_v61 }
0x2c4f   :  { %16323 = vmatmul.mubr.msk.bf16.vlgmr.msra.gmra.mxu0 %vm781_vm2, %v11182_v15 }
0x2c50   :  { %16335 = vmatpush3.xpose.msk.msra.mxu0 %vm882_vm3, %v19820_v45  ;;  %16336 = vmatprep.mubr.msk.f32.mxu0 %vm18058_vm0, %v18057_v0 }
0x2c51   :  { %16339 = vmatprep.subr.mxu0 %v18057_v0 }
0x2d0f   :  { %v11239_v59 = vpop.f32.mrf.mxu0 }
0x2d10   :  { %v11240_v33 = vadd.f32 %v14972_v39, %v11239_v59 }
0x2d11   :  { %v16324_v3 = vpop.f32.mrf.mxu0 }
0x2d12   :  { %11472 = vrot.lane.b32.xlu1 %v11240_v33, %s18059_s28  ;;  %16337 = vmatmul.mubr.msk.f32.vlgmr.msra.gmra.mxu0 %vm882_vm3, %v11240_v33  ;;  %s20317_s28 = sld [smem:[#allocation100_spill]] }
0x2d13   :  { %v11242_v37 = vpop.f32.mrf.mxu0  ;;  %16341 = vmatprep.mubr.msk.f32.mxu0 %vm18058_vm0, %v18057_v0 }
0x2d15   :  { %v16325_v24 = vpop.f32.mrf.mxu0 }
0x2d16   :  { %11638 = vrot.lane.b32.xlu1 %v11240_v33, %s18063_s13  ;;  %s18074_s13 = smov [#allocation56]  }
0x2d1a   :  { %11804 = vrot.lane.b32.xlu1 %v11240_v33, %s18065_s0 }
0x2d84   :  { %v11473_v7 = vpop.permute.xlu1 %11472 }
0x2d85   :  { %16347 = vmatmul.mubr.msk.f32.vlgmr.msra.gmra.mxu1 %vm882_vm3, %v11473_v7 }
0x2d86   :  { %16355 = vmatpush3.xpose.msk.msra.mxu1 %vm882_vm3, %v11641_v6  ;;  %16356 = vmatprep.mubr.msk.f32.mxu1 %vm18058_vm0, %v18057_v0 }
0x2d87   :  { %16364 = vmatprep.subr.mxu1 %v18057_v0 }
0x2d88   :  { %v11639_v23 = vpop.permute.xlu1 %11638 }
0x2d89   :  { %16357 = vmatmul.mubr.msk.f32.vlgmr.msra.gmra.mxu1 %vm882_vm3, %v11639_v23 }
0x2d8a   :  { %16365 = vmatpush3.xpose.msk.msra.mxu1 %vm882_vm3, %v11807_v12  ;;  %16366 = vmatprep.mubr.msk.f32.mxu1 %vm18058_vm0, %v18057_v0 }
0x2d8b   :  { %16374 = vmatprep.subr.bf16.mxu1 %v18057_v0 }
0x2d8c   :  { %v11805_v38 = vpop.permute.xlu1 %11804 }
0x2d8d   :  { %16367 = vmatmul.mubr.msk.f32.vlgmr.msra.gmra.mxu1 %vm882_vm3, %v11805_v38 }
0x2d8e   :  { %16378 = vmatprep.mubr.msk.bf16.mxu1 %vm18058_vm0, %v18057_v0 }
0x2dd2   :  { %v11380_v40 = vpop.f32.mrf.mxu0 }
0x2dd3   :  { %v11384_v14 = vmul.f32 0.35355338, %v11380_v40 }
0x2dd4   :  { %v16338_v18 = vpop.f32.mrf.mxu0 }
0x2dd5   :  { %v11385_v10 = vsel %vm882_vm3, %v11384_v14, -inf  ;;  %v16932_v18 = vld [vmem:[%s20317_s28] sm:$0xff]  }
0x2dd6   :  { %11386 = vmax.xlane.f32.xlu0 %v11385_v10 }
0x2e45   :  { %v11546_v20 = vpop.f32.mrf.mxu1 }
0x2e46   :  { %v11550_v28 = vmul.f32 0.35355338, %v11546_v20 }
0x2e47   :  { %v16348_v31 = vpop.f32.mrf.mxu1 }
0x2e48   :  { %v11551_v21 = vsel %vm882_vm3, %v11550_v28, -inf }
0x2e49   :  { %11552 = vmax.xlane.f32.xlu1 %v11551_v21  ;;  %v11712_v25 = vpop.f32.mrf.mxu1 }
0x2e4a   :  { %v11716_v53 = vmul.f32 0.35355338, %v11712_v25 }
0x2e4b   :  { %v16358_v22 = vpop.f32.mrf.mxu1 }
0x2e4c   :  { %v11717_v26 = vsel %vm882_vm3, %v11716_v53, -inf }
0x2e4d   :  { %v11878_v32 = vpop.f32.mrf.mxu1  ;;  %11718 = vmax.xlane.f32.xlu0 %v11717_v26 }
0x2e4e   :  { %v11882_v34 = vmul.f32 0.35355338, %v11878_v32 }
0x2e4f   :  { %v16368_v35 = vpop.f32.mrf.mxu1 }
0x2e50   :  { %v11883_v62 = vsel %vm882_vm3, %v11882_v34, -inf }
0x2e51   :  { %11884 = vmax.xlane.f32.xlu0 %v11883_v62 }
0x2e5a   :  { %11396 = vrot.lane.b32.xlu1 %v19820_v45, %s18060_s1  ;;  %s20318_s1 = sld [smem:[#allocation103_spill]] }
0x2e5f   :  { %v11387_v36 = vpop.xlane.xlu0 %11386 }
0x2e60   :  { %v11388_v56 = vsub.f32 %v11384_v14, %v11387_v36  ;;  %v16931_v14 = vld [vmem:[%s20317_s28 + $0x8] sm:$0xff]   ;;  %v14992_v36 = vld [vmem:[#allocation2] ss:$0 sm:$0xff] }
0x2e61   :  { %16375 = vmatpush3.bf16.msra.mxu1 %v16931_v14 }
0x2e62   :  { %v11389_v27 = vmul.f32 1.442695, %v11388_v56  ;;  %16376 = vmatprep.subr.bf16.mxu1 %v18057_v0 }
0x2e64   :  { %17163 = vpow2.f32 %v11389_v27 }
0x2e65   :  { %16377 = vmatpush3.bf16.msra.mxu1 %v16932_v18 }
0x2e71   :  { %v17164_v41 = vpop.eup %17163 }
0x2e72   :  { %v11391_v42 = vsel %vm882_vm3, %v17164_v41, 0.0 }
0x2e7e   :  { %11392 = vadd.xlane.f32.xlu1 %v11391_v42 }
0x2ed2   :  { %v11553_v5 = vpop.xlane.xlu1 %11552 }
0x2ed3   :  { %v11554_v13 = vsub.f32 %v11550_v28, %v11553_v5 }
0x2ed5   :  { %v11555_v46 = vmul.f32 1.442695, %v11554_v13 }
0x2ed6   :  { %v11397_v49 = vpop.permute.xlu1 %11396  ;;  %v11719_v11 = vpop.xlane.xlu0 %11718 }
0x2ed7   :  { %17165 = vpow2.f32 %v11555_v46  ;;  %v11720_v4 = vsub.f32 %v11716_v53, %v11719_v11  ;;  %16340 = vmatpush3.msra.mxu0 %v11397_v49 }
0x2ed8   :  { %16349 = vmatprep.subr.mxu0 %v18057_v0 }
0x2ed9   :  { %v11721_v63 = vmul.f32 1.442695, %v11720_v4 }
0x2eda   :  { %v11885_v47 = vpop.xlane.xlu0 %11884 }
0x2edb   :  { %17167 = vpow2.f32 %v11721_v63  ;;  %v11886_v48 = vsub.f32 %v11882_v34, %v11885_v47 }
0x2edd   :  { %v11887_v43 = vmul.f32 1.442695, %v11886_v48  ;;  %v12098_v48 = vld [vmem:[%s20318_s1 + $0x80] sm:$0xff] }
0x2edf   :  { %17169 = vpow2.f32 %v11887_v43  ;;  %v12106_v43 = vld [vmem:[%s20318_s1 + $0xc0] sm:$0xff] }
0x2ee4   :  { %v17166_v44 = vpop.eup %17165 }
0x2ee5   :  { %v11557_v17 = vsel %vm882_vm3, %v17166_v44, 0.0 }
0x2ee6   :  { %11558 = vadd.xlane.f32.xlu0 %v11557_v17  ;;  %v12107_v17 = vld [vmem:[%s20318_s1 + $0xc8] sm:$0xff] }
0x2ee8   :  { %v17168_v50 = vpop.eup %17167 }
0x2ee9   :  { %v11723_v2 = vsel %vm882_vm3, %v17168_v50, 0.0 }
0x2eea   :  { %11724 = vadd.xlane.f32.xlu1 %v11723_v2 }
0x2eec   :  { %v17170_v30 = vpop.eup %17169 }
0x2eed   :  { %v11889_v29 = vsel %vm882_vm3, %v17170_v30, 0.0 }
0x2eee   :  { %11890 = vadd.xlane.f32.xlu0 %v11889_v29  ;;  %v12082_v29 = vld [vmem:[%s20318_s1] sm:$0xff] }
0x2efb   :  { %11728 = vrot.lane.b32.xlu1 %v19820_v45, %s18062_s24  ;;  %s20320_s24 = sld [smem:[#allocation102_spill]] }
0x2eff   :  { %11894 = vrot.lane.b32.xlu1 %v19820_v45, %s18064_s14  ;;  %s14235_s14 = sshll.u32 %s18074_s13, 4  ;;  %s14236_s14 = int_to_ptr.vmem [resolvable:$true] %s14235_s14 }
0x2f00   :  { %p17892_p8 = scmp.lt.s32.totalorder %s14236_s14, %s14236_s14 }
0x2f04   :  { %11562 = vrot.lane.b32.xlu0 %v19820_v45, %s18061_s2  ;;  %s20319_s2 = sld [smem:[#allocation105_spill]] }
0x2f07   :  { %v11393_v51 = vpop.xlane.xlu1 %11392 }
0x2f08   :  { %17171 = vrcp.f32 %v11393_v51  ;;  %v12090_v51 = vld [vmem:[%s20318_s1 + $0x40] sm:$0xff] }
0x2f15   :  { %v17172_v52 = vpop.eup %17171 }
0x2f16   :  { %v11395_v60 = vmul.f32 %v17172_v52, %v17164_v41  ;;  %v12083_v52 = vld [vmem:[%s20318_s1 + $0x8] sm:$0xff] }
0x2f18   :  { %16342 = vmatmul.mubr.msk.f32.vlgmr.msra.gmra.mxu0 %vm882_vm3, %v11395_v60  ;;  %v14999_v60 = vcombine.high %v12082_v29, %v12090_v51 }
0x2f19   :  { %16351 = vmatprep.mubr.msk.f32.mxu0 %vm18058_vm0, %v18057_v0 }
0x2f6f   :  { %v11559_v15 = vpop.xlane.xlu0 %11558 }
0x2f70   :  { %17173 = vrcp.f32 %v11559_v15  ;;  %v12091_v15 = vld [vmem:[%s20318_s1 + $0x48] sm:$0xff] }
0x2f73   :  { %v11725_v39 = vpop.xlane.xlu1 %11724 }
0x2f74   :  { %17175 = vrcp.f32 %v11725_v39  ;;  %v14998_v39 = vcombine.low %v12082_v29, %v12090_v51 }
0x2f77   :  { %v11891_v59 = vpop.xlane.xlu0 %11890  ;;  %v11729_v37 = vpop.permute.xlu1 %11728 }
0x2f78   :  { %17177 = vrcp.f32 %v11891_v59  ;;  %v15000_v59 = vcombine.low %v12083_v52, %v12091_v15 }
0x2f7b   :  { %v11563_v33 = vpop.permute.xlu0 %11562  ;;  %v11895_v7 = vpop.permute.xlu1 %11894 }
0x2f7c   :  { %16350 = vmatpush3.msra.mxu0 %v11563_v33  ;;  %v15001_v33 = vcombine.high %v12083_v52, %v12091_v15  ;;  %v12088_v52 = vld [vmem:[%s20318_s1 + $0x30] sm:$0xff]  ;;  %v12089_v15 = vld [vmem:[%s20318_s1 + $0x38] sm:$0xff] }
0x2f7d   :  { %v17174_v3 = vpop.eup %17173  ;;  %16359 = vmatprep.subr.mxu0 %v18057_v0 }
0x2f7e   :  { %v11561_v45 = vmul.f32 %v17174_v3, %v17166_v44  ;;  %v12099_v44 = vld [vmem:[%s20318_s1 + $0x88] sm:$0xff]  ;;  %v12100_v3 = vld [vmem:[%s20318_s1 + $0x90] sm:$0xff] }
0x2f7f   :  { %v15016_v2 = vcombine.low %v12099_v44, %v12107_v17 }
0x2f80   :  { %16352 = vmatmul.mubr.msk.f32.vlgmr.msra.gmra.mxu0 %vm882_vm3, %v11561_v45  ;;  %v12108_v45 = vld [vmem:[%s20318_s1 + $0xd0] sm:$0xff] }
0x2f81   :  { %v17176_v24 = vpop.eup %17175  ;;  %16360 = vmatpush3.msra.mxu0 %v11729_v37  ;;  %16361 = vmatprep.mubr.msk.f32.mxu0 %vm18058_vm0, %v18057_v0  ;;  %v12101_v37 = vld [vmem:[%s20318_s1 + $0x98] sm:$0xff] }
0x2f82   :  { %v11727_v6 = vmul.f32 %v17176_v24, %v17168_v50  ;;  %16369 = vmatprep.subr.mxu0 %v18057_v0  ;;  %v15014_v50 = vcombine.low %v12098_v48, %v12106_v43  ;;  %v15018_v24 = vcombine.low %v12100_v3, %v12108_v45 }
0x2f84   :  { %16362 = vmatmul.mubr.msk.f32.vlgmr.msra.gmra.mxu0 %vm882_vm3, %v11727_v6  ;;  %v15019_v6 = vcombine.high %v12100_v3, %v12108_v45 }
0x2f85   :  { %v17178_v23 = vpop.eup %17177  ;;  %16370 = vmatpush3.msra.mxu0 %v11895_v7  ;;  %16371 = vmatprep.mubr.msk.f32.mxu0 %vm18058_vm0, %v18057_v0  ;;  %v12109_v7 = vld [vmem:[%s20318_s1 + $0xd8] sm:$0xff] }
0x2f86   :  { %v11893_v12 = vmul.f32 %v17178_v23, %v17170_v30  ;;  %v15017_v30 = vcombine.high %v12099_v44, %v12107_v17  ;;  %v15020_v23 = vcombine.low %v12101_v37, %v12109_v7  ;;  %v12104_v44 = vld [vmem:[%s20318_s1 + $0xb0] sm:$0xff]  ;;  %v12105_v17 = vld [vmem:[%s20318_s1 + $0xb8] sm:$0xff] }
0x2f88   :  { %16372 = vmatmul.mubr.msk.f32.vlgmr.msra.gmra.mxu0 %vm882_vm3, %v11893_v12  ;;  %12415 = vmatprep.subr.bf16.mxu1 %v15017_v30  ;;  %v15021_v12 = vcombine.high %v12101_v37, %v12109_v7  ;;  %v16934_v7 = vld [vmem:[%s20319_s2 + $0xf8] sm:$0xff]  }
0x2f89   :  { %12394 = vmatprep.mubr.bf16.mxu0 %v18073_v19 }
0x2fd8   :  { %v11468_v38 = vpop.f32.mrf.mxu0 }
0x2fda   :  { %v16343_v40 = vpop.f32.mrf.mxu0 }
0x3040   :  { %v11634_v10 = vpop.f32.mrf.mxu0 }
0x3041   :  { %11971 = vrot.lane.b32.xlu0 %v11634_v10, %s18070_s10  ;;  %v14996_v10 = vld [vmem:[#allocation13] ss:$0 sm:$0xff] }
0x3042   :  { %v16353_v20 = vpop.f32.mrf.mxu0 }
0x3044   :  { %v11800_v28 = vpop.f32.mrf.mxu0 }
0x3045   :  { %11975 = vrot.lane.b32.xlu1 %v11800_v28, %s18071_s19  ;;  %v14997_v28 = vld [vmem:[#allocation11] ss:$0 sm:$0xff] }
0x3046   :  { %v16363_v31 = vpop.f32.mrf.mxu0 }
0x3048   :  { %v11966_v21 = vpop.f32.mrf.mxu0 }
0x3049   :  { %11979 = vrot.lane.b32.xlu0 %v11966_v21, %s18072_s11  ;;  %v12084_v21 = vld [vmem:[%s20318_s1 + $0x10] sm:$0xff] }
0x304a   :  { %v16373_v25 = vpop.f32.mrf.mxu0 }
0x304b   :  { %v12092_v25 = vld [vmem:[%s20318_s1 + $0x50] sm:$0xff] }
0x30b3   :  { %v11972_v53 = vpop.permute.xlu0 %11971 }
0x30b4   :  { %v11982_v26 = vsel %vm882_vm3, %v11468_v38, %v11972_v53  ;;  %v12085_v53 = vld [vmem:[%s20318_s1 + $0x18] sm:$0xff] }
0x30b7   :  { %v11976_v22 = vpop.permute.xlu1 %11975 }
0x30b8   :  { %v11983_v32 = vsel %vm736_vm1, %v11982_v26, %v11976_v22  ;;  %v12093_v22 = vld [vmem:[%s20318_s1 + $0x58] sm:$0xff] }
0x30bb   :  { %v11980_v34 = vpop.permute.xlu0 %11979 }
0x30bc   :  { %v11984_v35 = vsel %vm1557_vm4, %v11983_v32, %v11980_v34  ;;  %v15003_v34 = vcombine.high %v12084_v21, %v12092_v25 }
0x30bd   :  { %v11989_v62 = vpack.c.bf16 %v11984_v35, %v11984_v35  ;;  %v15005_v35 = vcombine.high %v12085_v53, %v12093_v22 }
0x30bf   :  { %16379 = vmatmul.mubr.msk.bf16.vlgmr.msra.gmra.mxu1 %vm781_vm2, %v11989_v62  ;;  %v12102_v62 = vld [vmem:[%s20318_s1 + $0xa0] sm:$0xff] }
0x30c0   :  { %12435 = vmatprep.mubr.bf16.mxu1 %v18073_v19  ;;  %12416 = vmatpush1.bf16.msra.mxu1 %v15016_v2 }
0x30c1   :  { %12417 = vmatprep.subr.bf16.mxu1 %v15001_v33 }
0x30c4   :  { %12418 = vmatpush1.bf16.msra.mxu1 %v15000_v59 }
0x30c5   :  { %12497 = vmatprep.subr.bf16.mxu1 %v15021_v12  ;;  %v16936_v12 = vld [vmem:[%s20319_s2 + $0xb8] sm:$0xff]  }
0x317f   :  { %v12046_v56 = vpop.f32.mrf.mxu1 }
0x3180   :  { %v12047_v27 = vadd.f32 %v14992_v36, %v12046_v56  ;;  %v12110_v36 = vld [vmem:[%s20318_s1 + $0xe0] sm:$0xff]  ;;  %v12103_v56 = vld [vmem:[%s20318_s1 + $0xa8] sm:$0xff] }
0x3181   :  { %v16380_v41 = vpop.f32.mrf.mxu1 }
0x3182   :  { %v12052_v42 = vadd.f32 %v12047_v27, %v19835_v61  ;;  %v15015_v61 = vcombine.high %v12098_v48, %v12106_v43  ;;  %v12111_v27 = vld [vmem:[%s20318_s1 + $0xe8] sm:$0xff]  ;;  %v15002_v41 = vcombine.low %v12084_v21, %v12092_v25  ;;  %v16946_v21 = vld [vmem:[%s20319_s2 + $0xe0] sm:$0xff]  }
0x3183   :  { %v12049_v5 = vpop.f32.mrf.mxu1  ;;  %v16947_v25 = vld [vmem:[%s20319_s2 + $0x20] sm:$0xff]  }
0x3184   :  { %v12053_v13 = vsel %vm781_vm2, %v12052_v42, 0.0  ;;  %12374 = vmatprep.subr.bf16.mxu0 %v15015_v61  ;;  %v15023_v5 = vcombine.high %v12102_v62, %v12110_v36  ;;  %v12112_v61 = vld [vmem:[%s20318_s1 + $0xf0] sm:$0xff] }
0x3185   :  { %12054 = vadd.xlane.f32.xlu1 %v12053_v13  ;;  %v16381_v46 = vpop.f32.mrf.mxu1  ;;  %12375 = vmatpush1.bf16.msra.mxu0 %v15014_v50  ;;  %v15025_v13 = vcombine.high %v12103_v56, %v12111_v27  ;;  %v12113_v50 = vld [vmem:[%s20318_s1 + $0xf8] sm:$0xff]  ;;  %v15027_v29 = vcombine.high %v12104_v44, %v12112_v61  ;;  %v15026_v59 = vcombine.low %v12104_v44, %v12112_v61 }
0x3186   :  { %12376 = vmatprep.subr.bf16.mxu0 %v14999_v60  ;;  %v12086_v46 = vld [vmem:[%s20318_s1 + $0x20] sm:$0xff]  ;;  %v15029_v51 = vcombine.high %v12105_v17, %v12113_v50  ;;  %v12096_v60 = vld [vmem:[%s20318_s1 + $0x70] sm:$0xff]  ;;  %v15028_v33 = vcombine.low %v12105_v17, %v12113_v50 }
0x3187   :  { %v15011_v3 = vcombine.high %v12088_v52, %v12096_v60  ;;  %v15010_v37 = vcombine.low %v12088_v52, %v12096_v60 }
0x3189   :  { %12377 = vmatpush1.bf16.msra.mxu0 %v14998_v39  ;;  %v12097_v39 = vld [vmem:[%s20318_s1 + $0x78] sm:$0xff] }
0x318a   :  { %12456 = vmatprep.subr.bf16.mxu0 %v15019_v6  ;;  %v15013_v45 = vcombine.high %v12089_v15, %v12097_v39  ;;  %v16933_v6 = vld [vmem:[%s20319_s2 + $0x78] sm:$0xff]  }
0x320e   :  { %v12055_v49 = vpop.xlane.xlu1 %12054 }
0x320f   :  { %v12056_v11 = vmul.f32 0.03125, %v12055_v49  ;;  %v12094_v49 = vld [vmem:[%s20318_s1 + $0x60] sm:$0xff] }
0x3210   :  { %v15007_v48 = vcombine.high %v12086_v46, %v12094_v49  ;;  %v15006_v2 = vcombine.low %v12086_v46, %v12094_v49  ;;  %v16961_v46 = vld [vmem:[%s20319_s2 + $0x40] sm:$0xff]  }
0x3211   :  { %v12057_v4 = vsub.f32 %v12052_v42, %v12056_v11  ;;  %v15004_v42 = vcombine.low %v12085_v53, %v12093_v22  ;;  %v12087_v11 = vld [vmem:[%s20318_s1 + $0x28] sm:$0xff]  ;;  %v16948_v53 = vld [vmem:[%s20319_s2 + $0xa0] sm:$0xff]   ;;  %v16949_v22 = vld [vmem:[%s20319_s2 + $0x58] sm:$0xff]  }
0x3212   :  { %v16962_v49 = vld [vmem:[%s20319_s2 + $0xc0] sm:$0xff]  }
0x3213   :  { %v12058_v63 = vmul.f32 %v12057_v4, %v12057_v4 }
0x3215   :  { %v12059_v47 = vsel %vm781_vm2, %v12058_v63, 0.0  ;;  %v15022_v63 = vcombine.low %v12102_v62, %v12110_v36  ;;  %v16953_v62 = vld [vmem:[%s20319_s2 + $0x50] sm:$0xff]  }
0x3216   :  { %12060 = vadd.xlane.f32.xlu0 %v12059_v47  ;;  %v15024_v47 = vcombine.low %v12103_v56, %v12111_v27  ;;  %v16954_v36 = vld [vmem:[%s20319_s2 + $0xd0] sm:$0xff]  }
0x3217   :  { %v16955_v56 = vld [vmem:[%s20319_s2 + $0x10] sm:$0xff]  }
0x3218   :  { %v16956_v27 = vld [vmem:[%s20319_s2 + $0x90] sm:$0xff]  }
0x329f   :  { %v12061_v38 = vpop.xlane.xlu0 %12060 }
0x32a0   :  { %v12062_v40 = vmul.f32 0.03125, %v12061_v38  ;;  %v16937_v38 = vld [vmem:[%s20319_s2 + $0x70] sm:$0xff]  }
0x32a2   :  { %v12063_v14 = vadd.f32 1e-05, %v12062_v40  ;;  %v16938_v40 = vld [vmem:[%s20319_s2 + $0xf0] sm:$0xff]  }
0x32a4   :  { %17179 = vrsqrt.f32 %v12063_v14  ;;  %v16940_v14 = vld [vmem:[%s20319_s2 + $0xb0] sm:$0xff]  }
0x32b1   :  { %v17180_v18 = vpop.eup %17179 }
0x32b2   :  { %v12065_v20 = vmul.f32 %v17180_v18, %v12057_v4  ;;  %v12095_v4 = vld [vmem:[%s20318_s1 + $0x68] sm:$0xff] }
0x32b3   :  { %v15009_v43 = vcombine.high %v12087_v11, %v12095_v4  ;;  %v15008_v30 = vcombine.low %v12087_v11, %v12095_v4  ;;  %v16941_v18 = vld [vmem:[%s20319_s2 + $0x68] sm:$0xff]   ;;  %v16963_v11 = vld [vmem:[%s20319_s2] sm:$0xff]  }
0x32b4   :  { %v12073_v31 = vmul.f32 %v14996_v10, %v12065_v20  ;;  %v16942_v10 = vld [vmem:[%s20319_s2 + $0xe8] sm:$0xff]   ;;  %v16964_v4 = vld [vmem:[%s20319_s2 + $0x80] sm:$0xff]  }
0x32b5   :  { %v16943_v20 = vld [vmem:[%s20319_s2 + $0x28] sm:$0xff]  }
0x32b6   :  { %v19924_v26 = vadd.f32 %v14997_v28, %v12073_v31  ;;  %v16944_v28 = vld [vmem:[%s20319_s2 + $0xa8] sm:$0xff]   ;;  %v16945_v31 = vld [vmem:[%s20319_s2 + $0x60] sm:$0xff]  }
0x32b8   :  { %v19928_v32 = vpack.c.bf16 %v19924_v26, %v19924_v26 }
0x32ba   :  { %15030 = vmatmul.mubr.msk.bf16.vlgmr.msra.gmra.mxu0 %vm781_vm2, %v19928_v32  ;;  %15031 = vmatmul.mubr.msk.bf16.vlgmr.msra.gmra.mxu1 %vm781_vm2, %v19928_v32 }
0x32bb   :  { %12457 = vmatpush1.bf16.msra.mxu0 %v15018_v24  ;;  %12498 = vmatpush1.bf16.msra.mxu1 %v15020_v23  ;;  %v15012_v24 = vcombine.low %v12089_v15, %v12097_v39  ;;  %v16935_v23 = vld [vmem:[%s20319_s2 + $0x38] sm:$0xff]  }
0x32bc   :  { %12458 = vmatprep.subr.bf16.mxu0 %v15003_v34  ;;  %12499 = vmatprep.subr.bf16.mxu1 %v15005_v35  ;;  %v16951_v34 = vld [vmem:[%s20319_s2 + $0x18] sm:$0xff]  }
0x32bd   :  { %12476 = vmatprep.mubr.bf16.mxu0 %v18073_v19  ;;  %12517 = vmatprep.mubr.bf16.mxu1 %v18073_v19  ;;  %v16952_v35 = vld [vmem:[%s20319_s2 + $0x98] sm:$0xff]  }
0x32bf   :  { %12459 = vmatpush1.bf16.msra.mxu0 %v15002_v41  ;;  %12500 = vmatpush1.bf16.msra.mxu1 %v15004_v42  ;;  %v16957_v41 = vld [vmem:[%s20319_s2 + $0x48] sm:$0xff]  }
0x32c0   :  { %12538 = vmatprep.subr.bf16.mxu0 %v15023_v5  ;;  %12579 = vmatprep.subr.bf16.mxu1 %v15025_v13  ;;  %v16958_v42 = vld [vmem:[%s20319_s2 + $0xc8] sm:$0xff]  }
0x32c1   :  { %v16959_v5 = vld [vmem:[%s20319_s2 + $0x8] sm:$0xff]  }
0x32c2   :  { %15032 = vmatmul.mubr.msk.bf16.vlgmr.msra.gmra.mxu0 %vm781_vm2, %v19928_v32  ;;  %15033 = vmatmul.mubr.msk.bf16.vlgmr.msra.gmra.mxu1 %vm781_vm2, %v19928_v32  ;;  %v16960_v13 = vld [vmem:[%s20319_s2 + $0x88] sm:$0xff]  }
0x32c3   :  { %12539 = vmatpush1.bf16.msra.mxu0 %v15022_v63  ;;  %12580 = vmatpush1.bf16.msra.mxu1 %v15024_v47  ;;  %v16965_v63 = vld [vmem:[%s20319_s2 + $0x178] sm:$0xff]  }
0x32c4   :  { %12540 = vmatprep.subr.bf16.mxu0 %v15007_v48  ;;  %12581 = vmatprep.subr.bf16.mxu1 %v15009_v43  ;;  %v16966_v47 = vld [vmem:[%s20319_s2 + $0x1f8] sm:$0xff]   ;;  %v20003_v48 = vld [vmem:[%s20320_s24] sm:$0xff] }
0x32c5   :  { %12558 = vmatprep.mubr.bf16.mxu0 %v18073_v19  ;;  %12599 = vmatprep.mubr.bf16.mxu1 %v18073_v19  ;;  %v12122_v43 = vrot.slane %v20003_v48, %v18711_v54  ;;  %v12130_v44 = vrot.slane %v20003_v48, %v18714_v55  ;;  %v12126_v61 = vrot.slane %v20003_v48, %v18720_v57 }
0x32c6   :  { %v12134_v17 = vrot.slane %v20003_v48, %v18723_v58 }
0x32c7   :  { %12541 = vmatpush1.bf16.msra.mxu0 %v15006_v2  ;;  %12582 = vmatpush1.bf16.msra.mxu1 %v15008_v30 }
0x32c8   :  { %12620 = vmatprep.subr.bf16.mxu0 %v15027_v29  ;;  %12661 = vmatprep.subr.bf16.mxu1 %v15029_v51 }
0x32ca   :  { %15034 = vmatmul.mubr.msk.bf16.vlgmr.msra.gmra.mxu0 %vm781_vm2, %v19928_v32  ;;  %15035 = vmatmul.mubr.msk.bf16.vlgmr.msra.gmra.mxu1 %vm781_vm2, %v19928_v32 }
0x32cb   :  { %12621 = vmatpush1.bf16.msra.mxu0 %v15026_v59  ;;  %12662 = vmatpush1.bf16.msra.mxu1 %v15028_v33 }
0x32cc   :  { %12622 = vmatprep.subr.bf16.mxu0 %v15011_v3  ;;  %12663 = vmatprep.subr.bf16.mxu1 %v15013_v45 }
0x32cd   :  { %12640 = vmatprep.mubr.bf16.mxu0 %v18073_v19  ;;  %12681 = vmatprep.mubr.bf16.mxu1 %v18073_v19  ;;  %v16939_v19 = vld [vmem:[%s20319_s2 + $0x30] sm:$0xff]  }
0x32cf   :  { %12623 = vmatpush1.bf16.msra.mxu0 %v15010_v37  ;;  %12664 = vmatpush1.bf16.msra.mxu1 %v15012_v24 }
0x32d0   :  { %15845 = vmatprep.subr.bf16.mxu0 %v16933_v6  ;;  %15867 = vmatprep.subr.bf16.mxu1 %v16934_v7 }
0x32d2   :  { %15036 = vmatmul.mubr.msk.bf16.vlgmr.msra.gmra.mxu0 %vm781_vm2, %v19928_v32  ;;  %15037 = vmatmul.mubr.msk.bf16.vlgmr.msra.gmra.mxu1 %vm781_vm2, %v19928_v32  ;;  %v16950_v32 = vld [vmem:[%s20319_s2 + $0xd8] sm:$0xff]  }
0x32d3   :  { %15846 = vmatpush3.bf16.msra.mxu0 %v16935_v23  ;;  %15868 = vmatpush3.bf16.msra.mxu1 %v16936_v12  ;;  %v12142_v12 = vrot.slane %v20003_v48, %v18734_v8 }
0x32d4   :  { %15847 = vmatprep.subr.bf16.mxu0 %v16937_v38  ;;  %15869 = vmatprep.subr.bf16.mxu1 %v16938_v40  ;;  %v12150_v38 = vrot.slane %v20003_v48, %v18737_v9  ;;  %v16967_v40 = vld [vmem:[%s20319_s2 + $0x138] sm:$0xff]  }
0x32d7   :  { %15848 = vmatpush3.bf16.msra.mxu0 %v16939_v19  ;;  %15870 = vmatpush3.bf16.msra.mxu1 %v16940_v14  ;;  %v16968_v19 = vld [vmem:[%s20319_s2 + $0x1b8] sm:$0xff]  }
0x32d8   :  { %15849 = vmatprep.subr.bf16.mxu0 %v16941_v18  ;;  %15871 = vmatprep.subr.bf16.mxu1 %v16942_v10 }
0x32db   :  { %15850 = vmatpush3.bf16.msra.mxu0 %v16943_v20  ;;  %15872 = vmatpush3.bf16.msra.mxu1 %v16944_v28  ;;  %v16969_v28 = vld [vmem:[%s20319_s2 + $0x170] sm:$0xff]  }
0x32dc   :  { %15851 = vmatprep.subr.bf16.mxu0 %v16945_v31  ;;  %15873 = vmatprep.subr.bf16.mxu1 %v16946_v21  ;;  %v16970_v31 = vld [vmem:[%s20319_s2 + $0x1f0] sm:$0xff]  }
0x32df   :  { %15852 = vmatpush3.bf16.msra.mxu0 %v16947_v25  ;;  %15874 = vmatpush3.bf16.msra.mxu1 %v16948_v53 }
0x32e0   :  { %15853 = vmatprep.subr.bf16.mxu0 %v16949_v22  ;;  %15875 = vmatprep.subr.bf16.mxu1 %v16950_v32  ;;  %v16971_v32 = vld [vmem:[%s20319_s2 + $0x130] sm:$0xff]  }
0x32e3   :  { %15854 = vmatpush3.bf16.msra.mxu0 %v16951_v34  ;;  %15876 = vmatpush3.bf16.msra.mxu1 %v16952_v35  ;;  %v16972_v34 = vld [vmem:[%s20319_s2 + $0x1b0] sm:$0xff]  }
0x32e4   :  { %15855 = vmatprep.subr.bf16.mxu0 %v16953_v62  ;;  %15877 = vmatprep.subr.bf16.mxu1 %v16954_v36  ;;  %v16973_v36 = vld [vmem:[%s20319_s2 + $0x168] sm:$0xff]  }
0x32e7   :  { %15856 = vmatpush3.bf16.msra.mxu0 %v16955_v56  ;;  %15878 = vmatpush3.bf16.msra.mxu1 %v16956_v27  ;;  %v16974_v56 = vld [vmem:[%s20319_s2 + $0x1e8] sm:$0xff]  }
0x32e8   :  { %15857 = vmatprep.subr.bf16.mxu0 %v16957_v41  ;;  %15879 = vmatprep.subr.bf16.mxu1 %v16958_v42 }
0x32eb   :  { %15858 = vmatpush3.bf16.msra.mxu0 %v16959_v5  ;;  %15880 = vmatpush3.bf16.msra.mxu1 %v16960_v13 }
0x32ec   :  { %15859 = vmatprep.subr.bf16.mxu0 %v16961_v46  ;;  %15881 = vmatprep.subr.bf16.mxu1 %v16962_v49  ;;  %v16975_v49 = vld [vmem:[%s20319_s2 + $0x128] sm:$0xff]  }
0x32ef   :  { %15860 = vmatpush3.bf16.msra.mxu0 %v16963_v11  ;;  %15882 = vmatpush3.bf16.msra.mxu1 %v16964_v4  ;;  %v16976_v11 = vld [vmem:[%s20319_s2 + $0x1a8] sm:$0xff]  }
0x32f0   :  { %15889 = vmatprep.subr.bf16.mxu0 %v16965_v63  ;;  %15911 = vmatprep.subr.bf16.mxu1 %v16966_v47  ;;  %v16977_v47 = vld [vmem:[%s20319_s2 + $0x160] sm:$0xff]  }
0x337a   :  { %v12396_v50 = vpop.f32.mrf.mxu0  ;;  %v12437_v2 = vpop.f32.mrf.mxu1 }
0x337b   :  { %v12397_v30 = vadd.f32 %v12396_v50, %v12122_v43  ;;  %v12438_v29 = vadd.f32 %v12437_v2, %v12130_v44  ;;  %v16978_v43 = vld [vmem:[%s20319_s2 + $0x1e0] sm:$0xff]   ;;  %v20040_v2 = vld [vmem:[%s20320_s24 + $0x8] sm:$0xff] }
0x337c   :  { %v12398_v51 = vpop.f32.mrf.mxu0  ;;  %v12439_v52 = vpop.f32.mrf.mxu1  ;;  %v16980_v50 = vld [vmem:[%s20319_s2 + $0x1a0] sm:$0xff]  }
0x337d   :  { %v12399_v60 = vadd.f32 %v12398_v51, %v12126_v61  ;;  %v12440_v15 = vadd.f32 %v12439_v52, %v12134_v17  ;;  %v12690_v39 = vmax.f32 %v12397_v30, 0.0  ;;  %v12692_v59 = vmax.f32 %v12438_v29, 0.0  ;;  %v16979_v17 = vld [vmem:[%s20319_s2 + $0x120] sm:$0xff]   ;;  %v16981_v51 = vld [vmem:[%s20319_s2 + $0x158] sm:$0xff]  }
0x337e   :  { %v12400_v33 = vpop.f32.mrf.mxu0  ;;  %v12441_v3 = vpop.f32.mrf.mxu1  ;;  %v16982_v52 = vld [vmem:[%s20319_s2 + $0x1d8] sm:$0xff]  }
0x337f   :  { %v12691_v45 = vmax.f32 %v12399_v60, 0.0  ;;  %v12693_v37 = vmax.f32 %v12440_v15, 0.0  ;;  %v12962_v14 = vpack.c.bf16 %v12690_v39, %v12690_v39  ;;  %v12964_v18 = vpack.c.bf16 %v12692_v59, %v12692_v59  ;;  %v16983_v59 = vld [vmem:[%s20319_s2 + $0x118] sm:$0xff]  }
0x3380   :  { %v12401_v24 = vpop.f32.mrf.mxu0  ;;  %v12442_v6 = vpop.f32.mrf.mxu1  ;;  %v12178_v60 = vrot.slane %v20040_v2, %v18764_v1  ;;  %v16984_v33 = vld [vmem:[%s20319_s2 + $0x198] sm:$0xff]  }
0x3381   :  { %v12963_v7 = vpack.c.bf16 %v12691_v45, %v12691_v45  ;;  %v12965_v23 = vpack.c.bf16 %v12693_v37, %v12693_v37  ;;  %v16985_v37 = vld [vmem:[%s20319_s2 + $0x150] sm:$0xff]  }
0x3382   :  { %v20019_v10 = vpop.f32.mrf.mxu0  ;;  %v20021_v20 = vpop.f32.mrf.mxu1  ;;  %v16986_v24 = vld [vmem:[%s20319_s2 + $0x1d0] sm:$0xff]  }
0x3383   :  { %13785 = vmatprep.mubr.bf16.mxu0 %v12963_v7  ;;  %13825 = vmatprep.mubr.bf16.mxu1 %v12965_v23 }
0x3384   :  { %v12480_v21 = vpop.f32.mrf.mxu0  ;;  %v12521_v25 = vpop.f32.mrf.mxu1  ;;  %13786 = vmatmul.mubr.bf16.vlgmr.msra.gmra.mxu0 %v12962_v14  ;;  %13826 = vmatmul.mubr.bf16.vlgmr.msra.gmra.mxu1 %v12964_v18 }
0x3385   :  { %v12481_v53 = vadd.f32 %v12480_v21, %v12142_v12  ;;  %v12522_v22 = vadd.f32 %v12521_v25, %v12150_v38  ;;  %15890 = vmatpush3.bf16.msra.mxu0 %v16967_v40  ;;  %15912 = vmatpush3.bf16.msra.mxu1 %v16968_v19  ;;  %v16987_v12 = vld [vmem:[%s20319_s2 + $0x110] sm:$0xff]   ;;  %v12138_v40 = vrot.slane %v20003_v48, %v18778_v16 }
0x3386   :  { %v12482_v35 = vpop.f32.mrf.mxu0  ;;  %v12523_v62 = vpop.f32.mrf.mxu1  ;;  %15891 = vmatprep.subr.bf16.mxu0 %v16969_v28  ;;  %15913 = vmatprep.subr.bf16.mxu1 %v16970_v31  ;;  %v16988_v38 = vld [vmem:[%s20319_s2 + $0x190] sm:$0xff]   ;;  %v12146_v19 = vrot.slane %v20003_v48, %v18764_v1  ;;  %v16989_v28 = vld [vmem:[%s20319_s2 + $0x148] sm:$0xff]   ;;  %v12158_v21 = vrot.slane %v20040_v2, %v18720_v57  ;;  %v12166_v25 = vrot.slane %v20040_v2, %v18723_v58  ;;  %v16993_v57 = vld [vmem:[%s20319_s2 + $0x140] sm:$0xff]  }
0x3387   :  { %v12695_v27 = vmax.f32 %v12481_v53, 0.0  ;;  %v12697_v41 = vmax.f32 %v12522_v22, 0.0  ;;  %v16990_v31 = vld [vmem:[%s20319_s2 + $0x1c8] sm:$0xff]   ;;  %v16994_v35 = vld [vmem:[%s20319_s2 + $0x1c0] sm:$0xff]  }
0x3388   :  { %v12483_v42 = vpop.f32.mrf.mxu0  ;;  %v12524_v5 = vpop.f32.mrf.mxu1  ;;  %v16991_v1 = vld [vmem:[%s20319_s2 + $0x108] sm:$0xff]  }
0x3389   :  { %v12967_v13 = vpack.c.bf16 %v12695_v27, %v12695_v27  ;;  %v12969_v46 = vpack.c.bf16 %v12697_v41, %v12697_v41  ;;  %15892 = vmatpush3.bf16.msra.mxu0 %v16971_v32  ;;  %15914 = vmatpush3.bf16.msra.mxu1 %v16972_v34  ;;  %v16992_v48 = vld [vmem:[%s20319_s2 + $0x188] sm:$0xff]   ;;  %v12479_v32 = vadd.f32 %v20019_v10, %v12138_v40  ;;  %v16997_v10 = vld [vmem:[%s20319_s2 + $0x278] sm:$0xff]   ;;  %v17019_v40 = vld [vmem:[%s20319_s2 + $0x210] sm:$0xff]  }
0x338a   :  { %v20031_v4 = vpop.f32.mrf.mxu0  ;;  %v20033_v63 = vpop.f32.mrf.mxu1  ;;  %15893 = vmatprep.subr.bf16.mxu0 %v16973_v36  ;;  %15915 = vmatprep.subr.bf16.mxu1 %v16974_v56  ;;  %v12520_v34 = vadd.f32 %v20021_v20, %v12146_v19  ;;  %v16995_v36 = vld [vmem:[%s20319_s2 + $0x100] sm:$0xff]   ;;  %v16998_v20 = vld [vmem:[%s20319_s2 + $0x2f8] sm:$0xff]   ;;  %v12154_v19 = vrot.slane %v20040_v2, %v18711_v54  ;;  %v17023_v54 = vld [vmem:[%s20319_s2 + $0x208] sm:$0xff]  }
0x338b   :  { %13865 = vmatprep.mubr.bf16.mxu0 %v12967_v13  ;;  %13905 = vmatprep.mubr.bf16.mxu1 %v12969_v46  ;;  %v16996_v56 = vld [vmem:[%s20319_s2 + $0x180] sm:$0xff]   ;;  %v12694_v27 = vmax.f32 %v12479_v32, 0.0  ;;  %v16999_v13 = vld [vmem:[%s20319_s2 + $0x238] sm:$0xff]  }
0x338c   :  { %v12562_v44 = vpop.f32.mrf.mxu0  ;;  %v12603_v61 = vpop.f32.mrf.mxu1  ;;  %v12696_v41 = vmax.f32 %v12520_v34, 0.0  ;;  %v17027_v32 = vld [vmem:[%s20319_s2 + $0x200] sm:$0xff]  }
0x338d   :  { %15894 = vmatpush3.bf16.msra.mxu0 %v16975_v49  ;;  %15916 = vmatpush3.bf16.msra.mxu1 %v16976_v11  ;;  %v12563_v62 = vadd.f32 %v12562_v44, %v12158_v21  ;;  %v12604_v58 = vadd.f32 %v12603_v61, %v12166_v25  ;;  %v12966_v46 = vpack.c.bf16 %v12694_v27, %v12694_v27  ;;  %v17000_v11 = vld [vmem:[%s20319_s2 + $0x2b8] sm:$0xff]   ;;  %v17002_v44 = vld [vmem:[%s20319_s2 + $0x2f0] sm:$0xff]  }
0x338e   :  { %v12564_v30 = vpop.f32.mrf.mxu0  ;;  %v12605_v29 = vpop.f32.mrf.mxu1  ;;  %15895 = vmatprep.subr.bf16.mxu0 %v16977_v47  ;;  %15917 = vmatprep.subr.bf16.mxu1 %v16978_v43  ;;  %v12968_v49 = vpack.c.bf16 %v12696_v41, %v12696_v41  ;;  %v17001_v43 = vld [vmem:[%s20319_s2 + $0x270] sm:$0xff]   ;;  %v12174_v21 = vrot.slane %v20040_v2, %v18734_v8  ;;  %v12182_v25 = vrot.slane %v20040_v2, %v18737_v9 }
0x338f   :  { %v12699_v42 = vmax.f32 %v12563_v62, 0.0  ;;  %v12701_v5 = vmax.f32 %v12604_v58, 0.0  ;;  %v17005_v30 = vld [vmem:[%s20319_s2 + $0x268] sm:$0xff]   ;;  %v17033_v27 = vld [vmem:[%s20319_s2 + $0x370] sm:$0xff]  }
0x3390   :  { %v12565_v15 = vpop.f32.mrf.mxu0  ;;  %v12606_v39 = vpop.f32.mrf.mxu1  ;;  %v17006_v29 = vld [vmem:[%s20319_s2 + $0x2e8] sm:$0xff]  }
0x3391   :  { %15896 = vmatpush3.bf16.msra.mxu0 %v16979_v17  ;;  %15918 = vmatpush3.bf16.msra.mxu1 %v16980_v50  ;;  %v12971_v47 = vpack.c.bf16 %v12699_v42, %v12699_v42  ;;  %v12973_v61 = vpack.c.bf16 %v12701_v5, %v12701_v5  ;;  %v17003_v17 = vld [vmem:[%s20319_s2 + $0x230] sm:$0xff]   ;;  %v17010_v15 = vld [vmem:[%s20319_s2 + $0x2e0] sm:$0xff]  }
0x3392   :  { %v20048_v3 = vpop.f32.mrf.mxu0  ;;  %v12683_v45 = vpop.f32.mrf.mxu1  ;;  %15897 = vmatprep.subr.bf16.mxu0 %v16981_v51  ;;  %15919 = vmatprep.subr.bf16.mxu1 %v16982_v52  ;;  %v17004_v50 = vld [vmem:[%s20319_s2 + $0x2b0] sm:$0xff]   ;;  %v17007_v51 = vld [vmem:[%s20319_s2 + $0x228] sm:$0xff]   ;;  %v17011_v39 = vld [vmem:[%s20319_s2 + $0x220] sm:$0xff]  }
0x3393   :  { %v20052_v6 = vadd.f32 %v12683_v45, %v12178_v60  ;;  %v17008_v52 = vld [vmem:[%s20319_s2 + $0x2a8] sm:$0xff]   ;;  %v17009_v60 = vld [vmem:[%s20319_s2 + $0x260] sm:$0xff]   ;;  %v17014_v45 = vld [vmem:[%s20319_s2 + $0x2d8] sm:$0xff]  }
0x3394   :  { %v20054_v7 = vpop.f32.mrf.mxu0  ;;  %v20056_v23 = vpop.f32.mrf.mxu1  ;;  %v17035_v42 = vld [vmem:[%s20319_s2 + $0x330] sm:$0xff]  }
0x3395   :  { %15898 = vmatpush3.bf16.msra.mxu0 %v16983_v59  ;;  %15920 = vmatpush3.bf16.msra.mxu1 %v16984_v33  ;;  %v17012_v59 = vld [vmem:[%s20319_s2 + $0x2a0] sm:$0xff]   ;;  %v17013_v33 = vld [vmem:[%s20319_s2 + $0x258] sm:$0xff]   ;;  %v12645_v8 = vadd.f32 %v20054_v7, %v12174_v21  ;;  %v12686_v9 = vadd.f32 %v20056_v23, %v12182_v25  ;;  %v17036_v5 = vld [vmem:[%s20319_s2 + $0x3b0] sm:$0xff]  }
0x3396   :  { %v12646_v14 = vpop.f32.mrf.mxu0  ;;  %v12687_v18 = vpop.f32.mrf.mxu1  ;;  %15899 = vmatprep.subr.bf16.mxu0 %v16985_v37  ;;  %15921 = vmatprep.subr.bf16.mxu1 %v16986_v24  ;;  %v17015_v37 = vld [vmem:[%s20319_s2 + $0x218] sm:$0xff]  }
0x3397   :  { %v17016_v24 = vld [vmem:[%s20319_s2 + $0x298] sm:$0xff]   ;;  %v17020_v14 = vld [vmem:[%s20319_s2 + $0x290] sm:$0xff]   ;;  %v17021_v18 = vld [vmem:[%s20319_s2 + $0x248] sm:$0xff]   ;;  %v12703_v62 = vmax.f32 %v12645_v8, 0.0  ;;  %v12705_v58 = vmax.f32 %v12686_v9, 0.0 }
0x3398   :  { %v12647_v53 = vpop.f32.mrf.mxu0  ;;  %v12688_v22 = vpop.f32.mrf.mxu1  ;;  %v17031_v7 = vld [vmem:[%s20319_s2 + $0x338] sm:$0xff]  }
0x3399   :  { %15900 = vmatpush3.bf16.msra.mxu0 %v16987_v12  ;;  %15922 = vmatpush3.bf16.msra.mxu1 %v16988_v38  ;;  %v17017_v12 = vld [vmem:[%s20319_s2 + $0x250] sm:$0xff]   ;;  %v12561_v53 = vadd.f32 %v20031_v4, %v12154_v19  ;;  %v17024_v22 = vld [vmem:[%s20319_s2 + $0x288] sm:$0xff]   ;;  %v17028_v4 = vld [vmem:[%s20319_s2 + $0x280] sm:$0xff]   ;;  %v12975_v41 = vpack.c.bf16 %v12703_v62, %v12703_v62  ;;  %v12704_v19 = vmax.f32 %v20052_v6, 0.0 }
0x339a   :  { %15901 = vmatprep.subr.bf16.mxu0 %v16989_v28  ;;  %15923 = vmatprep.subr.bf16.mxu1 %v16990_v31  ;;  %v17018_v38 = vld [vmem:[%s20319_s2 + $0x2d0] sm:$0xff]   ;;  %v12162_v28 = vrot.slane %v20040_v2, %v18714_v55  ;;  %v17022_v31 = vld [vmem:[%s20319_s2 + $0x2c8] sm:$0xff]   ;;  %v17025_v55 = vld [vmem:[%s20319_s2 + $0x240] sm:$0xff]  }
0x339b   :  { %v12698_v34 = vmax.f32 %v12561_v53, 0.0  ;;  %v17032_v23 = vld [vmem:[%s20319_s2 + $0x3b8] sm:$0xff]  }
0x339d   :  { %15902 = vmatpush3.bf16.msra.mxu0 %v16991_v1  ;;  %15924 = vmatpush3.bf16.msra.mxu1 %v16992_v48  ;;  %v12602_v1 = vadd.f32 %v20033_v63, %v12162_v28  ;;  %v17026_v48 = vld [vmem:[%s20319_s2 + $0x2c0] sm:$0xff]   ;;  %v17030_v63 = vld [vmem:[%s20319_s2 + $0x3f8] sm:$0xff]  }
0x339e   :  { %15903 = vmatprep.subr.bf16.mxu0 %v16993_v57  ;;  %15925 = vmatprep.subr.bf16.mxu1 %v16994_v35  ;;  %v17029_v57 = vld [vmem:[%s20319_s2 + $0x378] sm:$0xff]  }
0x339f   :  { %v12700_v35 = vmax.f32 %v12602_v1, 0.0 }
0x33a1   :  { %15904 = vmatpush3.bf16.msra.mxu0 %v16995_v36  ;;  %15926 = vmatpush3.bf16.msra.mxu1 %v16996_v56  ;;  %v12970_v36 = vpack.c.bf16 %v12698_v34, %v12698_v34  ;;  %v12972_v56 = vpack.c.bf16 %v12700_v35, %v12700_v35 }
0x33a2   :  { %15933 = vmatprep.subr.bf16.mxu0 %v16997_v10  ;;  %15955 = vmatprep.subr.bf16.mxu1 %v16998_v20  ;;  %v17034_v10 = vld [vmem:[%s20319_s2 + $0x3f0] sm:$0xff]   ;;  %v12977_v20 = vpack.c.bf16 %v12705_v58, %v12705_v58 }
0x33a4   :  { %13866 = vmatmul.mubr.bf16.vlgmr.msra.gmra.mxu0 %v12966_v46  ;;  %13906 = vmatmul.mubr.bf16.vlgmr.msra.gmra.mxu1 %v12968_v49  ;;  %v17038_v46 = vld [vmem:[%s20319_s2 + $0x3e8] sm:$0xff]  }
0x33a5   :  { %15934 = vmatpush3.bf16.msra.mxu0 %v16999_v13  ;;  %13945 = vmatprep.mubr.bf16.mxu0 %v12971_v47  ;;  %v17037_v13 = vld [vmem:[%s20319_s2 + $0x368] sm:$0xff]   ;;  %v17041_v47 = vld [vmem:[%s20319_s2 + $0x360] sm:$0xff]  }
0x33a6   :  { %15956 = vmatpush3.bf16.msra.mxu1 %v17000_v11  ;;  %13985 = vmatprep.mubr.bf16.mxu1 %v12973_v61  ;;  %v17039_v49 = vld [vmem:[%s20319_s2 + $0x328] sm:$0xff]   ;;  %v17044_v61 = vld [vmem:[%s20319_s2 + $0x3a0] sm:$0xff]  }
0x33a7   :  { %15935 = vmatprep.subr.bf16.mxu0 %v17001_v43  ;;  %15957 = vmatprep.subr.bf16.mxu1 %v17002_v44  ;;  %v17040_v11 = vld [vmem:[%s20319_s2 + $0x3a8] sm:$0xff]   ;;  %v17042_v43 = vld [vmem:[%s20319_s2 + $0x3e0] sm:$0xff]  }
0x33a8   :  { %v17043_v44 = vld [vmem:[%s20319_s2 + $0x320] sm:$0xff]  }
0x33a9   :  { %15936 = vmatpush3.bf16.msra.mxu0 %v17003_v17  ;;  %v17045_v17 = vld [vmem:[%s20319_s2 + $0x358] sm:$0xff]  }
0x33aa   :  { %15958 = vmatpush3.bf16.msra.mxu1 %v17004_v50  ;;  %15937 = vmatprep.subr.bf16.mxu0 %v17005_v30  ;;  %v17046_v50 = vld [vmem:[%s20319_s2 + $0x3d8] sm:$0xff]  }
0x33ab   :  { %15959 = vmatprep.subr.bf16.mxu1 %v17006_v29  ;;  %v17047_v30 = vld [vmem:[%s20319_s2 + $0x318] sm:$0xff]  }
0x33ac   :  { %v17048_v29 = vld [vmem:[%s20319_s2 + $0x398] sm:$0xff]  }
0x33ad   :  { %15938 = vmatpush3.bf16.msra.mxu0 %v17007_v51  ;;  %v17049_v51 = vld [vmem:[%s20319_s2 + $0x350] sm:$0xff]  }
0x33ae   :  { %15960 = vmatpush3.bf16.msra.mxu1 %v17008_v52  ;;  %15939 = vmatprep.subr.bf16.mxu0 %v17009_v60  ;;  %v17050_v52 = vld [vmem:[%s20319_s2 + $0x3d0] sm:$0xff]  }
0x33af   :  { %15961 = vmatprep.subr.bf16.mxu1 %v17010_v15  ;;  %v17051_v60 = vld [vmem:[%s20319_s2 + $0x310] sm:$0xff]   ;;  %v12170_v15 = vrot.slane %v20040_v2, %v18778_v16  ;;  %v17059_v16 = vld [vmem:[%s20319_s2 + $0x300] sm:$0xff]  }
0x33b1   :  { %15940 = vmatpush3.bf16.msra.mxu0 %v17011_v39  ;;  %v17052_v39 = vld [vmem:[%s20319_s2 + $0x390] sm:$0xff]  }
0x33b2   :  { %15962 = vmatpush3.bf16.msra.mxu1 %v17012_v59  ;;  %15941 = vmatprep.subr.bf16.mxu0 %v17013_v33  ;;  %v17053_v59 = vld [vmem:[%s20319_s2 + $0x348] sm:$0xff]  }
0x33b3   :  { %15963 = vmatprep.subr.bf16.mxu1 %v17014_v45  ;;  %v17054_v33 = vld [vmem:[%s20319_s2 + $0x3c8] sm:$0xff]  }
0x33b4   :  { %v17055_v45 = vld [vmem:[%s20319_s2 + $0x308] sm:$0xff]  }
0x33b5   :  { %15942 = vmatpush3.bf16.msra.mxu0 %v17015_v37  ;;  %v12643_v37 = vadd.f32 %v20048_v3, %v12170_v15  ;;  %v12976_v3 = vpack.c.bf16 %v12704_v19, %v12704_v19 }
0x33b6   :  { %15964 = vmatpush3.bf16.msra.mxu1 %v17016_v24  ;;  %15943 = vmatprep.subr.bf16.mxu0 %v17017_v12  ;;  %v17056_v24 = vld [vmem:[%s20319_s2 + $0x388] sm:$0xff]   ;;  %v17057_v12 = vld [vmem:[%s20319_s2 + $0x340] sm:$0xff]  }
0x33b7   :  { %15965 = vmatprep.subr.bf16.mxu1 %v17018_v38  ;;  %v17058_v38 = vld [vmem:[%s20319_s2 + $0x3c0] sm:$0xff]   ;;  %v12702_v2 = vmax.f32 %v12643_v37, 0.0 }
0x33b9   :  { %15944 = vmatpush3.bf16.msra.mxu0 %v17019_v40  ;;  %v17060_v40 = vld [vmem:[%s20319_s2 + $0x380] sm:$0xff]  }
0x33ba   :  { %15966 = vmatpush3.bf16.msra.mxu1 %v17020_v14  ;;  %15945 = vmatprep.subr.bf16.mxu0 %v17021_v18  ;;  %v12974_v14 = vpack.c.bf16 %v12702_v2, %v12702_v2 }
0x33bb   :  { %15967 = vmatprep.subr.bf16.mxu1 %v17022_v31  ;;  %v15038_v31 = vld [vmem:[#allocation7] ss:$0 sm:$0xff] }
0x33bd   :  { %15946 = vmatpush3.bf16.msra.mxu0 %v17023_v54 }
0x33be   :  { %15968 = vmatpush3.bf16.msra.mxu1 %v17024_v22  ;;  %15947 = vmatprep.subr.bf16.mxu0 %v17025_v55 }
0x33bf   :  { %15969 = vmatprep.subr.bf16.mxu1 %v17026_v48 }
0x33c1   :  { %15948 = vmatpush3.bf16.msra.mxu0 %v17027_v32 }
0x33c2   :  { %15970 = vmatpush3.bf16.msra.mxu1 %v17028_v4  ;;  %15977 = vmatprep.subr.bf16.mxu0 %v17029_v57 }
0x33c3   :  { %15999 = vmatprep.subr.bf16.mxu1 %v17030_v63 }
0x33c4   :  { %13946 = vmatmul.mubr.bf16.vlgmr.msra.gmra.mxu0 %v12970_v36 }
0x33c5   :  { %13986 = vmatmul.mubr.bf16.vlgmr.msra.gmra.mxu1 %v12972_v56  ;;  %15978 = vmatpush3.bf16.msra.mxu0 %v17031_v7 }
0x33c6   :  { %14025 = vmatprep.mubr.bf16.mxu0 %v12975_v41  ;;  %16000 = vmatpush3.bf16.msra.mxu1 %v17032_v23 }
0x33c7   :  { %14065 = vmatprep.mubr.bf16.mxu1 %v12977_v20  ;;  %15979 = vmatprep.subr.bf16.mxu0 %v17033_v27 }
0x33c8   :  { %16001 = vmatprep.subr.bf16.mxu1 %v17034_v10 }
0x33c9   :  { %15980 = vmatpush3.bf16.msra.mxu0 %v17035_v42 }
0x33ca   :  { %16002 = vmatpush3.bf16.msra.mxu1 %v17036_v5  ;;  %15981 = vmatprep.subr.bf16.mxu0 %v17037_v13 }
0x33cb   :  { %16003 = vmatprep.subr.bf16.mxu1 %v17038_v46 }
0x33cd   :  { %15982 = vmatpush3.bf16.msra.mxu0 %v17039_v49 }
0x33ce   :  { %16004 = vmatpush3.bf16.msra.mxu1 %v17040_v11  ;;  %15983 = vmatprep.subr.bf16.mxu0 %v17041_v47 }
0x33cf   :  { %16005 = vmatprep.subr.bf16.mxu1 %v17042_v43 }
0x33d1   :  { %15984 = vmatpush3.bf16.msra.mxu0 %v17043_v44 }
0x33d2   :  { %16006 = vmatpush3.bf16.msra.mxu1 %v17044_v61  ;;  %15985 = vmatprep.subr.bf16.mxu0 %v17045_v17 }
0x33d3   :  { %16007 = vmatprep.subr.bf16.mxu1 %v17046_v50 }
0x33d5   :  { %15986 = vmatpush3.bf16.msra.mxu0 %v17047_v30 }
0x33d6   :  { %16008 = vmatpush3.bf16.msra.mxu1 %v17048_v29  ;;  %15987 = vmatprep.subr.bf16.mxu0 %v17049_v51 }
0x33d7   :  { %16009 = vmatprep.subr.bf16.mxu1 %v17050_v52 }
0x33d9   :  { %15988 = vmatpush3.bf16.msra.mxu0 %v17051_v60 }
0x33da   :  { %16010 = vmatpush3.bf16.msra.mxu1 %v17052_v39  ;;  %15989 = vmatprep.subr.bf16.mxu0 %v17053_v59 }
0x33db   :  { %16011 = vmatprep.subr.bf16.mxu1 %v17054_v33 }
0x33dd   :  { %15990 = vmatpush3.bf16.msra.mxu0 %v17055_v45 }
0x33de   :  { %16012 = vmatpush3.bf16.msra.mxu1 %v17056_v24  ;;  %15991 = vmatprep.subr.bf16.mxu0 %v17057_v12 }
0x33df   :  { %16013 = vmatprep.subr.bf16.mxu1 %v17058_v38 }
0x33e1   :  { %15992 = vmatpush3.bf16.msra.mxu0 %v17059_v16 }
0x33e2   :  { %16014 = vmatpush3.bf16.msra.mxu1 %v17060_v40  ;;  %16382 = vmatprep.subr.bf16.mxu0 %v18057_v0 }
0x33e4   :  { %14026 = vmatmul.mubr.bf16.vlgmr.msra.gmra.mxu0 %v12974_v14  ;;  %v15167_v14 = vld [vmem:[#allocation16] ss:$0 sm:$0xff] }
0x33e5   :  { %14066 = vmatmul.mubr.bf16.vlgmr.msra.gmra.mxu1 %v12976_v3  ;;  %16386 = vmatprep.mubr.msk.bf16.mxu0 %vm18058_vm0, %v18057_v0 }
0x3444   :  { %v15861_v18 = vpop.f32.mrf.mxu0  ;;  %v15883_v28 = vpop.f32.mrf.mxu1 }
0x3446   :  { %v15862_v21 = vpop.f32.mrf.mxu0  ;;  %v15884_v25 = vpop.f32.mrf.mxu1 }
0x3447   :  { %v15863_v54 = vadd.f32 %v15862_v21, %v15861_v18  ;;  %v15885_v53 = vadd.f32 %v15884_v25, %v15883_v28  ;;  %v15168_v18 = vld [vmem:[#allocation14] ss:$0 sm:$0xff] }
0x3448   :  { %v15864_v6 = vpop.f32.mrf.mxu0  ;;  %v15886_v22 = vpop.f32.mrf.mxu1 }
0x3449   :  { %v13788_v55 = vadd.f32 %v15863_v54, %v15038_v31 }
0x344a   :  { %v15865_v1 = vpop.f32.mrf.mxu0  ;;  %v15887_v48 = vpop.f32.mrf.mxu1 }
0x344b   :  { %v13828_v8 = vadd.f32 %v15885_v53, %v13788_v55 }
0x3464   :  { %v15905_v9 = vpop.f32.mrf.mxu0  ;;  %v15927_v32 = vpop.f32.mrf.mxu1 }
0x3466   :  { %v15906_v34 = vpop.f32.mrf.mxu0  ;;  %v15928_v4 = vpop.f32.mrf.mxu1 }
0x3467   :  { %v15907_v20 = vadd.f32 %v15906_v34, %v15905_v9  ;;  %v15929_v5 = vadd.f32 %v15928_v4, %v15927_v32  ;;  %v15170_v32 = vld [vmem:[#allocation20] ss:$0 sm:$0xff] }
0x3468   :  { %v15908_v57 = vpop.f32.mrf.mxu0  ;;  %v15930_v35 = vpop.f32.mrf.mxu1 }
0x3469   :  { %v13868_v42 = vadd.f32 %v15907_v20, %v13828_v8  ;;  %v15169_v8 = vld [vmem:[#allocation22] ss:$0 sm:$0xff]  ;;  %v15171_v20 = vld [vmem:[#allocation55] ss:$0 sm:$0xff] }
0x346a   :  { %v15909_v63 = vpop.f32.mrf.mxu0  ;;  %v15931_v62 = vpop.f32.mrf.mxu1 }
0x346b   :  { %v13908_v46 = vadd.f32 %v15929_v5, %v13868_v42  ;;  %v15172_v5 = vld [vmem:[#allocation53] ss:$0 sm:$0xff] }
0x3484   :  { %v15949_v58 = vpop.f32.mrf.mxu0 }
0x3485   :  { %v15971_v7 = vpop.f32.mrf.mxu1 }
0x3486   :  { %v15950_v36 = vpop.f32.mrf.mxu0 }
0x3487   :  { %v15972_v23 = vpop.f32.mrf.mxu1  ;;  %v15951_v13 = vadd.f32 %v15950_v36, %v15949_v58  ;;  %v17061_v36 = vld [vmem:[%s18463_s30 + $0x8] sm:$0xff]  }
0x3488   :  { %v15952_v56 = vpop.f32.mrf.mxu0  ;;  %v15973_v47 = vadd.f32 %v15972_v23, %v15971_v7  ;;  %16383 = vmatpush3.bf16.msra.mxu0 %v17061_v36  ;;  %v17062_v23 = vld [vmem:[%s18463_s30] sm:$0xff]   ;;  %s17887_s30 = scalar_lea.vmem %s14236_s14, 128 }
0x3489   :  { %v15974_v27 = vpop.f32.mrf.mxu1  ;;  %v13948_v49 = vadd.f32 %v15951_v13, %v13908_v46  ;;  %16384 = vmatprep.subr.bf16.mxu0 %v18057_v0  ;;  %p17888_p7 = scmp.ne.s32.totalorder %s14236_s14, %s17887_s30  ;;  %p17893_p9 = scmp.lt.s32.totalorder %s17887_s30, %s17887_s30 }
0x348a   :  { %v15953_v41 = vpop.f32.mrf.mxu0 }
0x348b   :  { %v15975_v10 = vpop.f32.mrf.mxu1  ;;  %v13988_v61 = vadd.f32 %v15973_v47, %v13948_v49  ;;  %p17894_p10 = por %p17893_p9, %p17892_p8 }
0x348c   :  { %16385 = vmatpush3.bf16.msra.mxu0 %v17062_v23 }
0x348d   :  { %p17895_p11 = pnand %p17894_p10, %p17888_p7 }
0x34a4   :  { %v15993_v11 = vpop.f32.mrf.mxu0 }
0x34a5   :  { %v16015_v43 = vpop.f32.mrf.mxu1 }
0x34a6   :  { %v15994_v44 = vpop.f32.mrf.mxu0 }
0x34a7   :  { %v15995_v17 = vadd.f32 %v15994_v44, %v15993_v11  ;;  %v16016_v50 = vpop.f32.mrf.mxu1  ;;  %v15173_v11 = vld [vmem:[#allocation52] ss:$0 sm:$0xff] }
0x34a8   :  { %v15996_v30 = vpop.f32.mrf.mxu0  ;;  %v16017_v51 = vadd.f32 %v16016_v50, %v16015_v43 }
0x34a9   :  { %v14028_v29 = vadd.f32 %v15995_v17, %v13988_v61  ;;  %v16018_v52 = vpop.f32.mrf.mxu1 }
0x34aa   :  { %v15997_v60 = vpop.f32.mrf.mxu0 }
0x34ab   :  { %v14068_v15 = vadd.f32 %v16017_v51, %v14028_v29  ;;  %v16019_v39 = vpop.f32.mrf.mxu1 }
0x34ad   :  { %v14073_v59 = vadd.f32 %v14068_v15, %v19924_v26 }
0x34af   :  { %v14074_v33 = vsel %vm781_vm2, %v14073_v59, 0.0 }
0x34b0   :  { %14075 = vadd.xlane.f32.xlu0 %v14074_v33 }
0x3539   :  { %v14076_v45 = vpop.xlane.xlu0 %14075 }
0x353a   :  { %v14077_v37 = vmul.f32 0.03125, %v14076_v45 }
0x353c   :  { %v14078_v24 = vsub.f32 %v14073_v59, %v14077_v37 }
0x353e   :  { %v14079_v12 = vmul.f32 %v14078_v24, %v14078_v24 }
0x3540   :  { %v14080_v38 = vsel %vm781_vm2, %v14079_v12, 0.0 }
0x3541   :  { %14081 = vadd.xlane.f32.xlu1 %v14080_v38 }
0x35ca   :  { %v14082_v16 = vpop.xlane.xlu1 %14081 }
0x35cb   :  { %v14083_v2 = vmul.f32 0.03125, %v14082_v16 }
0x35cd   :  { %v14084_v40 = vadd.f32 1e-05, %v14083_v2 }
0x35cf   :  { %17181 = vrsqrt.f32 %v14084_v40 }
0x35dc   :  { %v17182_v19 = vpop.eup %17181 }
0x35dd   :  { %v14086_v3 = vmul.f32 %v17182_v19, %v14078_v24 }
0x35df   :  { %v14094_v28 = vmul.f32 %v15167_v14, %v14086_v3 }
0x35e1   :  { %v14102_v26 = vadd.f32 %v15168_v18, %v14094_v28 }
0x35e3   :  { %v14103_v31 = vsel %vm781_vm2, %v14102_v26, 0.0 }
0x35e4   :  { %14104 = vadd.xlane.f32.xlu0 %v14103_v31 }
0x366d   :  { %v14105_v21 = vpop.xlane.xlu0 %14104 }
0x366e   :  { %v14106_v25 = vmul.f32 0.03125, %v14105_v21 }
0x3670   :  { %v14107_v54 = vsub.f32 %v14102_v26, %v14106_v25 }
0x3672   :  { %v14108_v53 = vmul.f32 %v14107_v54, %v14107_v54 }
0x3674   :  { %v14109_v6 = vsel %vm781_vm2, %v14108_v53, 0.0 }
0x3675   :  { %14110 = vadd.xlane.f32.xlu1 %v14109_v6 }
0x36fe   :  { %v14111_v22 = vpop.xlane.xlu1 %14110 }
0x36ff   :  { %v14112_v55 = vmul.f32 0.03125, %v14111_v22 }
0x3701   :  { %v14113_v1 = vadd.f32 1e-05, %v14112_v55 }
0x3703   :  { %17183 = vrsqrt.f32 %v14113_v1 }
0x3710   :  { %v17184_v48 = vpop.eup %17183 }
0x3711   :  { %v14115_v9 = vmul.f32 %v17184_v48, %v14107_v54 }
0x3713   :  { %v14123_v34 = vmul.f32 %v15169_v8, %v14115_v9 }
0x3715   :  { %v14131_v4 = vadd.f32 %v15170_v32, %v14123_v34 }
0x3717   :  { %v14132_v57 = vsel %vm781_vm2, %v14131_v4, 0.0 }
0x3718   :  { %14133 = vadd.xlane.f32.xlu0 %v14132_v57 }
0x37a1   :  { %v14134_v35 = vpop.xlane.xlu0 %14133 }
0x37a2   :  { %v14135_v63 = vmul.f32 0.03125, %v14134_v35 }
0x37a4   :  { %v14136_v62 = vsub.f32 %v14131_v4, %v14135_v63 }
0x37a6   :  { %v14137_v58 = vmul.f32 %v14136_v62, %v14136_v62 }
0x37a8   :  { %v14138_v7 = vsel %vm781_vm2, %v14137_v58, 0.0 }
0x37a9   :  { %14139 = vadd.xlane.f32.xlu1 %v14138_v7 }
0x3832   :  { %v14140_v56 = vpop.xlane.xlu1 %14139 }
0x3833   :  { %v14141_v27 = vmul.f32 0.03125, %v14140_v56 }
0x3835   :  { %v14142_v41 = vadd.f32 1e-05, %v14141_v27 }
0x3837   :  { %17185 = vrsqrt.f32 %v14142_v41 }
0x3844   :  { %v17186_v10 = vpop.eup %17185 }
0x3845   :  { %v14144_v42 = vmul.f32 %v17186_v10, %v14136_v62 }
0x3847   :  { %v14152_v13 = vmul.f32 %v15171_v20, %v14144_v42 }
0x3849   :  { %v14160_v46 = vadd.f32 %v15172_v5, %v14152_v13 }
0x384b   :  { %v14165_v49 = vpack.c.bf16 %v14160_v46, %v14160_v46 }
0x384d   :  { %16387 = vmatmul.mubr.msk.bf16.vlgmr.msra.gmra.mxu0 %vm781_vm2, %v14165_v49 }
0x390d   :  { %v14222_v47 = vpop.f32.mrf.mxu0 }
0x390e   :  { %v14223_v43 = vadd.f32 %v15173_v11, %v14222_v47 }
0x390f   :  { %v16388_v0 = vpop.f32.mrf.mxu0 }
0x3910   :  { %14228 = vst.msk [vmem:[#allocation56] sm:$0xff] %vm736_vm1, %v14223_v43 }
0x3911   :  { %v14225_v44 = vpop.f32.mrf.mxu0 }
0x3912   :  { %17898 = shalt.err (!%p17895_p11)
}
0x3913   :  { %14238 = dma.vmem_to_hbm [thread:$0]  %s14236_s14, 128, %s18468_s12, [#allocation4]   ;;  %v16389_v61 = vpop.f32.mrf.mxu0 }
0x3914   :  { %17943 = dma.done.wait [#allocation4], 128  }
0x3915   :  { %17944 = vsyncadd [#allocation4], 4294967168 }
0x3916   :  { %14242 = vsyncpa [#allocation3], 1 }
0x3917   :  { %14243 = vsyncpa [#allocation6], 1 }
0x3918   :  { %14244 = vsyncpa [#allocation9], 1 }
0x3919   :  { %14245 = vsyncpa [#allocation12], 1 }
0x391a   :  { %14246 = vsyncpa [#allocation15], 1 }
0x391b   :  { %14247 = vsyncpa [#allocation18], 1 }
0x391c   :  { %14248 = vsyncpa [#allocation21], 1 }
0x391d   :  { %14249 = vsyncpa [#allocation24], 1 }
0x391e   :  { %14250 = vsyncpa [#allocation27], 1 }
0x391f   :  { %14251 = vsyncpa [#allocation30], 1 }
0x3920   :  { %14252 = vsyncpa [#allocation33], 1 }
0x3921   :  { %14253 = vsyncpa [#allocation36], 1 }
0x3922   :  { %14254 = vsyncpa [#allocation39], 1 }
0x3923   :  { %14255 = vsyncpa [#allocation42], 1 }
0x3924   :  { %14256 = vsyncpa [#allocation45], 1 }
0x3925   :  { %14257 = vsyncpa [#allocation48], 1 }
0x3926   :  { %14258 = vsyncpa [#allocation51], 1 }
0x3927   :  { %14259 = vsyncpa [#allocation54], 1 }
0x3928   :  { %14260 = vsyncpa [#allocation4], 1 }

</bundles_post_ra>
